<compile_context>
chip_gen: v5e
topology: v5e:2x2
jax: 0.10.0
libtpu: 0.0.40
codegen_flags: <defaults>
</compile_context>

<pallas_src>
import numpy as np
import jax
import jax.numpy as jnp
from jax.experimental import pallas as pl
from jax.experimental.pallas import tpu as pltpu


# ------------------------------ Pallas kernel -------------------------------

def motif_conv_kernel(adj_ref, x_ref, deg_ref, wr_ref, b_ref, mats_ref,
                      wf_ref, bmw_ref, bc_ref, s_ref, st_ref, out_ref):
    # adj: (N,N)  x: (N,Cin)  deg: (N,1)  wr: (Cin,2C)  b: (1,C)
    # mats: (13, tm, N) row tile of every motif matrix
    # wf: (14*C, 2*dp) fused [Wa_all | Wm_all]    bmw/bc: (1, dp)
    # s: (dp, 13) block-sum selector   st: (13, dp) block-broadcast
    # out: (tm, dp) with dp = 128*ceil(13*d/128)
    C = b_ref.shape[1]
    tm = out_ref.shape[0]
    N = adj_ref.shape[0]
    nm = mats_ref.shape[0]                      # 13
    dp = out_ref.shape[1]                       # padded 13*d (256)
    n_tiles = N // tm

    # ---- GraphConv(norm='none') + mean aggregation + root + bias (all rows) ----
    xwr = jnp.dot(x_ref[...], wr_ref[...], preferred_element_type=jnp.float32)
    xw = xwr[:, :C]                             # X @ W
    xr = xwr[:, C:]                             # X @ root
    deg = deg_ref[...]
    norm = jnp.where(deg > 0.0, 1.0 / deg, 0.0)            # 1/in_deg, inf -> 0
    h = (jnp.dot(adj_ref[...], xw, preferred_element_type=jnp.float32) * norm
         + xr + b_ref[...])

    # ---- row tile of h for this grid step (value-level select; no scratch) ----
    if n_tiles == 1:
        h_tile = h
    else:
        t = pl.program_id(0)
        h_tile = h[0:tm, :]
        for tt in range(1, n_tiles):
            h_tile = jnp.where(t == tt, h[tt * tm:(tt + 1) * tm, :], h_tile)

    # ---- all 13 mats @ h as ONE stacked matmul, then lane-concat into r ------
    # (13, tm, N) -> (13*tm, N) merges leading dims contiguously (tm % 8 == 0).
    mats2d = mats_ref[...].reshape(nm * tm, N)
    m_all = jnp.dot(mats2d, h, preferred_element_type=jnp.float32)   # (13*tm, C)
    r = jnp.concatenate(
        [h_tile] + [m_all[j * tm:(j + 1) * tm, :] for j in range(nm)], axis=1)

    # ---- single fused (tm, 14*C) @ (14*C, 2*dp) matmul: big = [mw | cc] ------
    big = jnp.dot(r, wf_ref[...], preferred_element_type=jnp.float32)

    # ---- attention + output in 128-lane column chunks (bounded live ranges) --
    half = 128
    n_chunks = dp // half
    att_sum = jnp.zeros((tm, nm), jnp.float32)
    for k in range(n_chunks):
        lo, hi = k * half, (k + 1) * half
        mw_k = big[:, lo:hi] + bmw_ref[:, lo:hi]
        cc_k = big[:, dp + lo:dp + hi] + bc_ref[:, lo:hi]
        att_sum = att_sum + jnp.dot(mw_k * cc_k, s_ref[lo:hi, :],
                                    preferred_element_type=jnp.float32)
    att = jax.nn.sigmoid(att_sum)               # (tm, 13)
    # TODO(synk): F.dropout(wa) / F.dropout(att) are identity in eval mode and omitted.
    for k in range(n_chunks):
        lo, hi = k * half, (k + 1) * half
        mw_k = big[:, lo:hi] + bmw_ref[:, lo:hi]
        cc_k = big[:, dp + lo:dp + hi] + bc_ref[:, lo:hi]
        att_b = jnp.dot(att, st_ref[:, lo:hi], preferred_element_type=jnp.float32)
        out_ref[:, lo:hi] = att_b * (mw_k - cc_k)


# -------------------- one-time host-side parameter packing ------------------

def prepare_motif_conv_params(params):
    """Re-pack parameters into fused, lane-dense (128-padded) tensors. Host side, once."""
    W = np.asarray(params["weight"], np.float32)
    R = np.asarray(params["root"], np.float32)
    b = np.asarray(params["bias"], np.float32)
    wa = np.asarray(params["wa"], np.float32)
    ba = np.asarray(params["ba"], np.float32)
    bm = np.asarray(params["motif_biases"], np.float32)
    Cin, Cout = W.shape
    d = wa.shape[1]
    nm = bm.shape[0]                                         # 13
    wm = np.asarray(params["motif_weights"], np.float32).reshape(nm, nm, Cout, d)

    D13 = nm * d                                             # 208
    D13p = 128 * int(np.ceil(D13 / 128))                     # 256 (lane-dense)

    wr = np.concatenate([W, R], axis=1)                      # (Cin, 2*Cout)
    b2 = b.reshape(1, Cout)

    # Output column-block i corresponds to original motif index i+1.
    # Wa_all: mw_i = motif_rsts[i+1] @ wa  -> wa sits at source row-block i+1.
    wa_all = np.zeros(((nm + 1) * Cout, D13p), np.float32)
    # Wm_all: c_i = concat(motif_rsts except i+1) @ motif_weights[i]; re-index the 13
    # row-blocks of motif_weights[i] into the full 14-block layout (excluded -> 0).
    wm_all = np.zeros(((nm + 1) * Cout, D13p), np.float32)
    for i in range(nm):
        wa_all[(i + 1) * Cout:(i + 2) * Cout, i * d:(i + 1) * d] = wa
        for j in range(nm + 1):
            if j == i + 1:
                continue
            k = j if j <= i else j - 1
            wm_all[j * Cout:(j + 1) * Cout, i * d:(i + 1) * d] = wm[i, k]
    wfused = np.concatenate([wa_all, wm_all], axis=1)        # (14*Cout, 2*D13p)

    bmw = np.zeros((1, D13p), np.float32)
    bmw[0, :D13] = np.tile(ba, nm)
    bc = np.zeros((1, D13p), np.float32)
    bc[0, :D13] = bm.reshape(-1)

    s = np.zeros((D13p, nm), np.float32)                     # block-sum selector
    s[np.arange(D13), np.arange(D13) // d] = 1.0
    st = np.ascontiguousarray(s.T)                           # (13, D13p)

    return {
        "wr": jnp.asarray(wr), "b2": jnp.asarray(b2),
        "wfused": jnp.asarray(wfused),
        "bmw": jnp.asarray(bmw), "bc": jnp.asarray(bc),
        "s": jnp.asarray(s), "st": jnp.asarray(st),
        "mats": jnp.asarray(params["motif_mats"], dtype=jnp.float32),
    }


# --------------------------------- wrapper ----------------------------------

def _auto_num_row_tiles(N):
    """2-way 'parallel' row split only where there are 2 TensorCores (v7x)."""
    try:
        kind = (jax.devices()[0].device_kind or "").lower()
    except Exception:
        kind = ""
    two_tc = ("v7" in kind) or ("7x" in kind)
    if two_tc and N % 16 == 0:
        return 2
    # TODO(synk): on v7x with ragged N, pad rows to a multiple of 16 and mask the
    # tail with pl.when instead of falling back to a single tile.
    return 1


def motif_conv_forward(adj_w, deg, x, prep, out_dim, num_row_tiles=None):
    N, Cin = x.shape
    Cout = prep["b2"].shape[1]
    D13p = prep["bmw"].shape[1]                  # padded 13 * compress_dim
    mats = prep["mats"]
    nm = mats.shape[0]

    n_tiles = num_row_tiles if num_row_tiles is not None else _auto_num_row_tiles(N)
    if n_tiles < 1 or N % n_tiles != 0 or (N // n_tiles) % 8 != 0:
        n_tiles = 1
    tm = N // n_tiles

    deg2 = deg.astype(jnp.float32).reshape(N, 1)

    grid_spec = pltpu.PrefetchScalarGridSpec(
        num_scalar_prefetch=0,
        grid=(n_tiles,),
        in_specs=[
            pl.BlockSpec((N, N), lambda t: (0, 0)),                      # adj_w
            pl.BlockSpec((N, Cin), lambda t: (0, 0)),                    # x
            pl.BlockSpec((N, 1), lambda t: (0, 0)),                      # deg
            pl.BlockSpec((Cin, 2 * Cout), lambda t: (0, 0)),             # [W | root]
            pl.BlockSpec((1, Cout), lambda t: (0, 0)),                   # bias
            pl.BlockSpec((nm, tm, N), lambda t: (0, t, 0)),              # motif_mats tile
            pl.BlockSpec(((nm + 1) * Cout, 2 * D13p), lambda t: (0, 0)),  # [Wa_all|Wm_all]
            pl.BlockSpec((1, D13p), lambda t: (0, 0)),                   # ba tiled (padded)
            pl.BlockSpec((1, D13p), lambda t: (0, 0)),                   # motif biases
            pl.BlockSpec((D13p, nm), lambda t: (0, 0)),                  # block-sum sel
            pl.BlockSpec((nm, D13p), lambda t: (0, 0)),                  # block-broadcast
        ],
        out_specs=pl.BlockSpec((tm, D13p), lambda t: (t, 0)),
    )

    out = pl.pallas_call(
        motif_conv_kernel,
        out_shape=jax.ShapeDtypeStruct((N, D13p), jnp.float32),
        grid_spec=grid_spec,
        compiler_params=pltpu.CompilerParams(
            dimension_semantics=("parallel",)),
    )(adj_w, x, deg2, prep["wr"], prep["b2"], mats,
      prep["wfused"], prep["bmw"], prep["bc"], prep["s"], prep["st"])

    # Kernel emits a 128-lane-padded slab (all stores unmasked); trim the zero pad.
    return out[:, :out_dim]


# ---------------------------- pure-JAX reference ----------------------------

def reference_forward(adj_w, deg, x, params):
    W, R, b = params["weight"], params["root"], params["bias"]
    wa, ba = params["wa"], params["ba"]
    wm, bm = params["motif_weights"], params["motif_biases"]
    mats = params["motif_mats"]
    norm = jnp.where(deg > 0, 1.0 / deg, 0.0)[:, None]
    h = (adj_w @ (x @ W)) * norm + x @ R + b[None, :]
    motif_rsts = [h] + [mats[i] @ h for i in range(13)]
    outs = []
    for i in range(1, 14):
        compress = jnp.concatenate(motif_rsts[:i] + motif_rsts[i + 1:], axis=1)
        mw = motif_rsts[i] @ wa + ba
        c = compress @ wm[i - 1] + bm[i - 1]
        att = jax.nn.sigmoid(jnp.sum(mw * c, axis=1, keepdims=True))
        outs.append(att * (mw - c))
    return jnp.concatenate(outs, axis=1)


# ----------------------------------- main ------------------------------------

if __name__ == "__main__":
    N, Cin, Cout, d = 128, 32, 32, 16

    key = jax.random.PRNGKey(0)
    keys = jax.random.split(key, 12)

    # Graph: binary adjacency (dst, src), row 0 forced empty (exercises inf->0).
    a_bin = (jax.random.uniform(keys[0], (N, N)) < 0.1).astype(jnp.float32)
    a_bin = a_bin.at[0, :].set(0.0)
    edge_w = jax.random.uniform(keys[1], (N, N), minval=0.1, maxval=1.0)
    adj_w = a_bin * edge_w                          # edge_weight_norm adjacency
    deg = jnp.sum(a_bin, axis=1)                    # unweighted in-degrees

    # Node features.
    x = jax.random.normal(keys[2], (N, Cin), dtype=jnp.float32)

    # Deterministic parameter init (kaiming-uniform-style bounds; biases small).
    def ku(k, shape):
        bound = float(np.sqrt(6.0 / shape[0]))
        return jax.random.uniform(k, shape, minval=-bound, maxval=bound,
                                  dtype=jnp.float32)

    params = {
        "weight": ku(keys[3], (Cin, Cout)),
        "root": ku(keys[4], (Cin, Cout)),
        "bias": 0.01 * jax.random.normal(keys[5], (Cout,), dtype=jnp.float32),
        "wa": ku(keys[6], (Cout, d)),
        "ba": 0.01 * jax.random.normal(keys[7], (d,), dtype=jnp.float32),
        "motif_weights": ku(keys[8], (13, 13 * Cout, d)),
        "motif_biases": 0.01 * jax.random.normal(keys[9], (13, d), dtype=jnp.float32),
        "motif_mats": (jax.random.uniform(keys[10], (13, N, N)) < 0.05
                       ).astype(jnp.float32)
                      * jax.random.normal(keys[11], (13, N, N), dtype=jnp.float32),
    }

    # One-time parameter packing (host side), then a jit-able forward.
    prep = prepare_motif_conv_params(params)
    fwd = jax.jit(motif_conv_forward, static_argnames=("out_dim", "num_row_tiles"))

    out = fwd(adj_w, deg, x, prep, out_dim=13 * d)
    out = jax.block_until_ready(out)

    ref = reference_forward(adj_w, deg, x, params)
    ref = jax.block_until_ready(ref)

    assert out.shape == (N, 13 * d), out.shape
    assert bool(jnp.all(jnp.isfinite(out)))
    np.testing.assert_allclose(np.asarray(out), np.asarray(ref),
                               rtol=5e-3, atol=5e-3)
    print("KERNEL_OK")
</pallas_src>

<mosaic_0001>
module attributes {stable_mosaic.version = 11 : i64} {
  func.func @motif_conv_kernel(%arg0: i32, %arg1: memref<128x128xf32, #tpu.memory_space<vmem>>, %arg2: memref<128x32xf32, #tpu.memory_space<vmem>>, %arg3: memref<128x1xf32, #tpu.memory_space<vmem>>, %arg4: memref<32x64xf32, #tpu.memory_space<vmem>>, %arg5: memref<1x32xf32, #tpu.memory_space<vmem>>, %arg6: memref<13x128x128xf32, #tpu.memory_space<vmem>>, %arg7: memref<448x512xf32, #tpu.memory_space<vmem>>, %arg8: memref<1x256xf32, #tpu.memory_space<vmem>>, %arg9: memref<1x256xf32, #tpu.memory_space<vmem>>, %arg10: memref<256x13xf32, #tpu.memory_space<vmem>>, %arg11: memref<13x256xf32, #tpu.memory_space<vmem>>, %arg12: memref<128x256xf32, #tpu.memory_space<vmem>>) attributes {dimension_semantics = [#tpu.dimension_semantics<parallel>], iteration_bounds = array<i64: 1>, scalar_prefetch = 0 : i64, scratch_operands = 0 : i64, tpu.core_type = #tpu.core_type<tc>, window_params = [{pipeline_mode = #tpu.pipeline_mode<synchronous>, transform_indices = @transform_0, window_bounds = array<i64: 128, 128>}, {pipeline_mode = #tpu.pipeline_mode<synchronous>, transform_indices = @transform_1, window_bounds = array<i64: 128, 32>}, {pipeline_mode = #tpu.pipeline_mode<synchronous>, transform_indices = @transform_2, window_bounds = array<i64: 128, 1>}, {pipeline_mode = #tpu.pipeline_mode<synchronous>, transform_indices = @transform_3, window_bounds = array<i64: 32, 64>}, {pipeline_mode = #tpu.pipeline_mode<synchronous>, transform_indices = @transform_4, window_bounds = array<i64: 1, 32>}, {transform_indices = @transform_5, window_bounds = array<i64: 13, 128, 128>}, {pipeline_mode = #tpu.pipeline_mode<synchronous>, transform_indices = @transform_6, window_bounds = array<i64: 448, 512>}, {pipeline_mode = #tpu.pipeline_mode<synchronous>, transform_indices = @transform_7, window_bounds = array<i64: 1, 256>}, {pipeline_mode = #tpu.pipeline_mode<synchronous>, transform_indices = @transform_8, window_bounds = array<i64: 1, 256>}, {pipeline_mode = #tpu.pipeline_mode<synchronous>, transform_indices = @transform_9, window_bounds = array<i64: 256, 13>}, {pipeline_mode = #tpu.pipeline_mode<synchronous>, transform_indices = @transform_10, window_bounds = array<i64: 13, 256>}, {transform_indices = @transform_11, window_bounds = array<i64: 128, 256>}]} {
    %c0 = arith.constant 0 : index
    %c0_0 = arith.constant 0 : index
    %0 = vector.load %arg2[%c0, %c0_0] : memref<128x32xf32, #tpu.memory_space<vmem>>, vector<128x32xf32>
    %c0_1 = arith.constant 0 : index
    %c0_2 = arith.constant 0 : index
    %1 = vector.load %arg4[%c0_1, %c0_2] : memref<32x64xf32, #tpu.memory_space<vmem>>, vector<32x64xf32>
    %cst = arith.constant dense<0.000000e+00> : vector<128x64xf32>
    %2 = tpu.matmul %0, %1, %cst {dimension_numbers = #tpu.dot_dimension_numbers<[1], [0], [0], [1], [0, 0, 1, 1], [], []>} : vector<128x32xf32>, vector<32x64xf32>, vector<128x64xf32> -> vector<128x64xf32>
    %3 = vector.extract_strided_slice %2 {offsets = [0, 0], sizes = [128, 32], strides = [1, 1]} : vector<128x64xf32> to vector<128x32xf32>
    %4 = vector.extract_strided_slice %2 {offsets = [0, 32], sizes = [128, 32], strides = [1, 1]} : vector<128x64xf32> to vector<128x32xf32>
    %c0_3 = arith.constant 0 : index
    %c0_4 = arith.constant 0 : index
    %5 = vector.load %arg3[%c0_3, %c0_4] : memref<128x1xf32, #tpu.memory_space<vmem>>, vector<128x1xf32>
    %cst_5 = arith.constant 0.000000e+00 : f32
    %6 = vector.broadcast %cst_5 : f32 to vector<128x1xf32>
    %7 = arith.cmpf ogt, %5, %6 : vector<128x1xf32>
    %cst_6 = arith.constant 1.000000e+00 : f32
    %8 = vector.broadcast %cst_6 : f32 to vector<128x1xf32>
    %9 = arith.divf %8, %5 : vector<128x1xf32>
    %cst_7 = arith.constant 0.000000e+00 : f32
    %10 = vector.broadcast %cst_7 : f32 to vector<128x1xf32>
    %11 = arith.select %7, %9, %10 : vector<128x1xi1>, vector<128x1xf32>
    %c0_8 = arith.constant 0 : index
    %c0_9 = arith.constant 0 : index
    %12 = vector.load %arg1[%c0_8, %c0_9] : memref<128x128xf32, #tpu.memory_space<vmem>>, vector<128x128xf32>
    %cst_10 = arith.constant dense<0.000000e+00> : vector<128x32xf32>
    %13 = tpu.matmul %12, %3, %cst_10 {dimension_numbers = #tpu.dot_dimension_numbers<[1], [0], [0], [1], [0, 0, 1, 1], [], []>} : vector<128x128xf32>, vector<128x32xf32>, vector<128x32xf32> -> vector<128x32xf32>
    %14 = vector.broadcast %11 : vector<128x1xf32> to vector<128x32xf32>
    %15 = arith.mulf %13, %14 : vector<128x32xf32>
    %16 = arith.addf %15, %4 : vector<128x32xf32>
    %c0_11 = arith.constant 0 : index
    %c0_12 = arith.constant 0 : index
    %17 = vector.load %arg5[%c0_11, %c0_12] : memref<1x32xf32, #tpu.memory_space<vmem>>, vector<1x32xf32>
    %18 = vector.broadcast %17 : vector<1x32xf32> to vector<128x32xf32>
    %19 = arith.addf %16, %18 : vector<128x32xf32>
    %c0_13 = arith.constant 0 : index
    %c0_14 = arith.constant 0 : index
    %c0_15 = arith.constant 0 : index
    %20 = vector.load %arg6[%c0_13, %c0_14, %c0_15] : memref<13x128x128xf32, #tpu.memory_space<vmem>>, vector<13x128x128xf32>
    %21 = vector.shape_cast %20 : vector<13x128x128xf32> to vector<1664x128xf32>
    %cst_16 = arith.constant dense<0.000000e+00> : vector<1664x32xf32>
    %22 = tpu.matmul %21, %19, %cst_16 {dimension_numbers = #tpu.dot_dimension_numbers<[1], [0], [0], [1], [0, 0, 1, 1], [], []>} : vector<1664x128xf32>, vector<128x32xf32>, vector<1664x32xf32> -> vector<1664x32xf32>
    %23 = vector.extract_strided_slice %22 {offsets = [0, 0], sizes = [128, 32], strides = [1, 1]} : vector<1664x32xf32> to vector<128x32xf32>
    %24 = vector.extract_strided_slice %22 {offsets = [128, 0], sizes = [128, 32], strides = [1, 1]} : vector<1664x32xf32> to vector<128x32xf32>
    %25 = vector.extract_strided_slice %22 {offsets = [256, 0], sizes = [128, 32], strides = [1, 1]} : vector<1664x32xf32> to vector<128x32xf32>
    %26 = vector.extract_strided_slice %22 {offsets = [384, 0], sizes = [128, 32], strides = [1, 1]} : vector<1664x32xf32> to vector<128x32xf32>
    %27 = vector.extract_strided_slice %22 {offsets = [512, 0], sizes = [128, 32], strides = [1, 1]} : vector<1664x32xf32> to vector<128x32xf32>
    %28 = vector.extract_strided_slice %22 {offsets = [640, 0], sizes = [128, 32], strides = [1, 1]} : vector<1664x32xf32> to vector<128x32xf32>
    %29 = vector.extract_strided_slice %22 {offsets = [768, 0], sizes = [128, 32], strides = [1, 1]} : vector<1664x32xf32> to vector<128x32xf32>
    %30 = vector.extract_strided_slice %22 {offsets = [896, 0], sizes = [128, 32], strides = [1, 1]} : vector<1664x32xf32> to vector<128x32xf32>
    %31 = vector.extract_strided_slice %22 {offsets = [1024, 0], sizes = [128, 32], strides = [1, 1]} : vector<1664x32xf32> to vector<128x32xf32>
    %32 = vector.extract_strided_slice %22 {offsets = [1152, 0], sizes = [128, 32], strides = [1, 1]} : vector<1664x32xf32> to vector<128x32xf32>
    %33 = vector.extract_strided_slice %22 {offsets = [1280, 0], sizes = [128, 32], strides = [1, 1]} : vector<1664x32xf32> to vector<128x32xf32>
    %34 = vector.extract_strided_slice %22 {offsets = [1408, 0], sizes = [128, 32], strides = [1, 1]} : vector<1664x32xf32> to vector<128x32xf32>
    %35 = vector.extract_strided_slice %22 {offsets = [1536, 0], sizes = [128, 32], strides = [1, 1]} : vector<1664x32xf32> to vector<128x32xf32>
    %36 = tpu.concatenate %19, %23, %24, %25, %26, %27, %28, %29, %30, %31, %32, %33, %34, %35 in 1 : vector<128x32xf32>, vector<128x32xf32>, vector<128x32xf32>, vector<128x32xf32>, vector<128x32xf32>, vector<128x32xf32>, vector<128x32xf32>, vector<128x32xf32>, vector<128x32xf32>, vector<128x32xf32>, vector<128x32xf32>, vector<128x32xf32>, vector<128x32xf32>, vector<128x32xf32> -> vector<128x448xf32>
    %c0_17 = arith.constant 0 : index
    %c0_18 = arith.constant 0 : index
    %37 = vector.load %arg7[%c0_17, %c0_18] : memref<448x512xf32, #tpu.memory_space<vmem>>, vector<448x512xf32>
    %cst_19 = arith.constant dense<0.000000e+00> : vector<128x512xf32>
    %38 = tpu.matmul %36, %37, %cst_19 {dimension_numbers = #tpu.dot_dimension_numbers<[1], [0], [0], [1], [0, 0, 1, 1], [], []>} : vector<128x448xf32>, vector<448x512xf32>, vector<128x512xf32> -> vector<128x512xf32>
    %cst_20 = arith.constant 0.000000e+00 : f32
    %39 = vector.broadcast %cst_20 : f32 to vector<128x13xf32>
    %40 = vector.extract_strided_slice %38 {offsets = [0, 0], sizes = [128, 128], strides = [1, 1]} : vector<128x512xf32> to vector<128x128xf32>
    %c0_21 = arith.constant 0 : index
    %c0_22 = arith.constant 0 : index
    %41 = vector.load %arg8[%c0_21, %c0_22] : memref<1x256xf32, #tpu.memory_space<vmem>>, vector<1x128xf32>
    %42 = vector.broadcast %41 : vector<1x128xf32> to vector<128x128xf32>
    %43 = arith.addf %40, %42 : vector<128x128xf32>
    %44 = vector.extract_strided_slice %38 {offsets = [0, 256], sizes = [128, 128], strides = [1, 1]} : vector<128x512xf32> to vector<128x128xf32>
    %c0_23 = arith.constant 0 : index
    %c0_24 = arith.constant 0 : index
    %45 = vector.load %arg9[%c0_23, %c0_24] : memref<1x256xf32, #tpu.memory_space<vmem>>, vector<1x128xf32>
    %46 = vector.broadcast %45 : vector<1x128xf32> to vector<128x128xf32>
    %47 = arith.addf %44, %46 : vector<128x128xf32>
    %48 = arith.mulf %43, %47 : vector<128x128xf32>
    %c0_25 = arith.constant 0 : index
    %c0_26 = arith.constant 0 : index
    %49 = vector.load %arg10[%c0_25, %c0_26] : memref<256x13xf32, #tpu.memory_space<vmem>>, vector<128x13xf32>
    %cst_27 = arith.constant dense<0.000000e+00> : vector<128x13xf32>
    %50 = tpu.matmul %48, %49, %cst_27 {dimension_numbers = #tpu.dot_dimension_numbers<[1], [0], [0], [1], [0, 0, 1, 1], [], []>} : vector<128x128xf32>, vector<128x13xf32>, vector<128x13xf32> -> vector<128x13xf32>
    %51 = arith.addf %39, %50 : vector<128x13xf32>
    %52 = vector.extract_strided_slice %38 {offsets = [0, 128], sizes = [128, 128], strides = [1, 1]} : vector<128x512xf32> to vector<128x128xf32>
    %c0_28 = arith.constant 0 : index
    %c128 = arith.constant 128 : index
    %53 = vector.load %arg8[%c0_28, %c128] : memref<1x256xf32, #tpu.memory_space<vmem>>, vector<1x128xf32>
    %54 = vector.broadcast %53 : vector<1x128xf32> to vector<128x128xf32>
    %55 = arith.addf %52, %54 : vector<128x128xf32>
    %56 = vector.extract_strided_slice %38 {offsets = [0, 384], sizes = [128, 128], strides = [1, 1]} : vector<128x512xf32> to vector<128x128xf32>
    %c0_29 = arith.constant 0 : index
    %c128_30 = arith.constant 128 : index
    %57 = vector.load %arg9[%c0_29, %c128_30] : memref<1x256xf32, #tpu.memory_space<vmem>>, vector<1x128xf32>
    %58 = vector.broadcast %57 : vector<1x128xf32> to vector<128x128xf32>
    %59 = arith.addf %56, %58 : vector<128x128xf32>
    %60 = arith.mulf %55, %59 : vector<128x128xf32>
    %c128_31 = arith.constant 128 : index
    %c0_32 = arith.constant 0 : index
    %61 = vector.load %arg10[%c128_31, %c0_32] : memref<256x13xf32, #tpu.memory_space<vmem>>, vector<128x13xf32>
    %cst_33 = arith.constant dense<0.000000e+00> : vector<128x13xf32>
    %62 = tpu.matmul %60, %61, %cst_33 {dimension_numbers = #tpu.dot_dimension_numbers<[1], [0], [0], [1], [0, 0, 1, 1], [], []>} : vector<128x128xf32>, vector<128x13xf32>, vector<128x13xf32> -> vector<128x13xf32>
    %63 = arith.addf %51, %62 : vector<128x13xf32>
    %64 = arith.negf %63 : vector<128x13xf32>
    %65 = math.exp %64 : vector<128x13xf32>
    %cst_34 = arith.constant 1.000000e+00 : f32
    %66 = vector.broadcast %cst_34 : f32 to vector<128x13xf32>
    %67 = arith.addf %66, %65 : vector<128x13xf32>
    %68 = arith.divf %66, %67 : vector<128x13xf32>
    %69 = vector.extract_strided_slice %38 {offsets = [0, 0], sizes = [128, 128], strides = [1, 1]} : vector<128x512xf32> to vector<128x128xf32>
    %c0_35 = arith.constant 0 : index
    %c0_36 = arith.constant 0 : index
    %70 = vector.load %arg8[%c0_35, %c0_36] : memref<1x256xf32, #tpu.memory_space<vmem>>, vector<1x128xf32>
    %71 = vector.broadcast %70 : vector<1x128xf32> to vector<128x128xf32>
    %72 = arith.addf %69, %71 : vector<128x128xf32>
    %73 = vector.extract_strided_slice %38 {offsets = [0, 256], sizes = [128, 128], strides = [1, 1]} : vector<128x512xf32> to vector<128x128xf32>
    %c0_37 = arith.constant 0 : index
    %c0_38 = arith.constant 0 : index
    %74 = vector.load %arg9[%c0_37, %c0_38] : memref<1x256xf32, #tpu.memory_space<vmem>>, vector<1x128xf32>
    %75 = vector.broadcast %74 : vector<1x128xf32> to vector<128x128xf32>
    %76 = arith.addf %73, %75 : vector<128x128xf32>
    %c0_39 = arith.constant 0 : index
    %c0_40 = arith.constant 0 : index
    %77 = vector.load %arg11[%c0_39, %c0_40] : memref<13x256xf32, #tpu.memory_space<vmem>>, vector<13x128xf32>
    %cst_41 = arith.constant dense<0.000000e+00> : vector<128x128xf32>
    %78 = tpu.matmul %68, %77, %cst_41 {dimension_numbers = #tpu.dot_dimension_numbers<[1], [0], [0], [1], [0, 0, 1, 1], [], []>} : vector<128x13xf32>, vector<13x128xf32>, vector<128x128xf32> -> vector<128x128xf32>
    %79 = arith.subf %72, %76 : vector<128x128xf32>
    %80 = arith.mulf %78, %79 : vector<128x128xf32>
    %c0_42 = arith.constant 0 : index
    %c0_43 = arith.constant 0 : index
    %81 = vector.load %arg12[%c0_42, %c0_43] : memref<128x256xf32, #tpu.memory_space<vmem>>, vector<128x128xf32>
    tpu.vector_store %arg12[%c0_42, %c0_43], %80 {strides = array<i32>} : memref<128x256xf32, #tpu.memory_space<vmem>>, vector<128x128xf32>,
    %82 = vector.extract_strided_slice %38 {offsets = [0, 128], sizes = [128, 128], strides = [1, 1]} : vector<128x512xf32> to vector<128x128xf32>
    %c0_44 = arith.constant 0 : index
    %c128_45 = arith.constant 128 : index
    %83 = vector.load %arg8[%c0_44, %c128_45] : memref<1x256xf32, #tpu.memory_space<vmem>>, vector<1x128xf32>
    %84 = vector.broadcast %83 : vector<1x128xf32> to vector<128x128xf32>
    %85 = arith.addf %82, %84 : vector<128x128xf32>
    %86 = vector.extract_strided_slice %38 {offsets = [0, 384], sizes = [128, 128], strides = [1, 1]} : vector<128x512xf32> to vector<128x128xf32>
    %c0_46 = arith.constant 0 : index
    %c128_47 = arith.constant 128 : index
    %87 = vector.load %arg9[%c0_46, %c128_47] : memref<1x256xf32, #tpu.memory_space<vmem>>, vector<1x128xf32>
    %88 = vector.broadcast %87 : vector<1x128xf32> to vector<128x128xf32>
    %89 = arith.addf %86, %88 : vector<128x128xf32>
    %c0_48 = arith.constant 0 : index
    %c128_49 = arith.constant 128 : index
    %90 = vector.load %arg11[%c0_48, %c128_49] : memref<13x256xf32, #tpu.memory_space<vmem>>, vector<13x128xf32>
    %cst_50 = arith.constant dense<0.000000e+00> : vector<128x128xf32>
    %91 = tpu.matmul %68, %90, %cst_50 {dimension_numbers = #tpu.dot_dimension_numbers<[1], [0], [0], [1], [0, 0, 1, 1], [], []>} : vector<128x13xf32>, vector<13x128xf32>, vector<128x128xf32> -> vector<128x128xf32>
    %92 = arith.subf %85, %89 : vector<128x128xf32>
    %93 = arith.mulf %91, %92 : vector<128x128xf32>
    %c0_51 = arith.constant 0 : index
    %c128_52 = arith.constant 128 : index
    %94 = vector.load %arg12[%c0_51, %c128_52] : memref<128x256xf32, #tpu.memory_space<vmem>>, vector<128x128xf32>
    tpu.vector_store %arg12[%c0_51, %c128_52], %93 {strides = array<i32>} : memref<128x256xf32, #tpu.memory_space<vmem>>, vector<128x128xf32>,
    return
  }
  func.func @transform_0(%arg0: i32) -> (i32, i32) {
    %c0_i32 = arith.constant 0 : i32
    %c0_i32_0 = arith.constant 0 : i32
    %c0_i32_1 = arith.constant 0 : i32
    return %c0_i32, %c0_i32_0 : i32, i32
  }
  func.func @transform_1(%arg0: i32) -> (i32, i32) {
    %c0_i32 = arith.constant 0 : i32
    %c0_i32_0 = arith.constant 0 : i32
    %c0_i32_1 = arith.constant 0 : i32
    return %c0_i32, %c0_i32_0 : i32, i32
  }
  func.func @transform_2(%arg0: i32) -> (i32, i32) {
    %c0_i32 = arith.constant 0 : i32
    %c0_i32_0 = arith.constant 0 : i32
    %c0_i32_1 = arith.constant 0 : i32
    return %c0_i32, %c0_i32_0 : i32, i32
  }
  func.func @transform_3(%arg0: i32) -> (i32, i32) {
    %c0_i32 = arith.constant 0 : i32
    %c0_i32_0 = arith.constant 0 : i32
    %c0_i32_1 = arith.constant 0 : i32
    return %c0_i32, %c0_i32_0 : i32, i32
  }
  func.func @transform_4(%arg0: i32) -> (i32, i32) {
    %c0_i32 = arith.constant 0 : i32
    %c0_i32_0 = arith.constant 0 : i32
    %c0_i32_1 = arith.constant 0 : i32
    return %c0_i32, %c0_i32_0 : i32, i32
  }
  func.func @transform_5(%arg0: i32) -> (i32, i32, i32) {
    %c0_i32 = arith.constant 0 : i32
    %c0_i32_0 = arith.constant 0 : i32
    %c0_i32_1 = arith.constant 0 : i32
    return %c0_i32, %arg0, %c0_i32_0 : i32, i32, i32
  }
  func.func @transform_6(%arg0: i32) -> (i32, i32) {
    %c0_i32 = arith.constant 0 : i32
    %c0_i32_0 = arith.constant 0 : i32
    %c0_i32_1 = arith.constant 0 : i32
    return %c0_i32, %c0_i32_0 : i32, i32
  }
  func.func @transform_7(%arg0: i32) -> (i32, i32) {
    %c0_i32 = arith.constant 0 : i32
    %c0_i32_0 = arith.constant 0 : i32
    %c0_i32_1 = arith.constant 0 : i32
    return %c0_i32, %c0_i32_0 : i32, i32
  }
  func.func @transform_8(%arg0: i32) -> (i32, i32) {
    %c0_i32 = arith.constant 0 : i32
    %c0_i32_0 = arith.constant 0 : i32
    %c0_i32_1 = arith.constant 0 : i32
    return %c0_i32, %c0_i32_0 : i32, i32
  }
  func.func @transform_9(%arg0: i32) -> (i32, i32) {
    %c0_i32 = arith.constant 0 : i32
    %c0_i32_0 = arith.constant 0 : i32
    %c0_i32_1 = arith.constant 0 : i32
    return %c0_i32, %c0_i32_0 : i32, i32
  }
  func.func @transform_10(%arg0: i32) -> (i32, i32) {
    %c0_i32 = arith.constant 0 : i32
    %c0_i32_0 = arith.constant 0 : i32
    %c0_i32_1 = arith.constant 0 : i32
    return %c0_i32, %c0_i32_0 : i32, i32
  }
  func.func @transform_11(%arg0: i32) -> (i32, i32) {
    %c0_i32 = arith.constant 0 : i32
    %c0_i32_0 = arith.constant 0 : i32
    return %arg0, %c0_i32 : i32, i32
  }
}

</mosaic_0001>

<bundles_post_ra>
// kernel: motif_conv_forward.1
= control target key start
LH: loop header
LB: loop body
LE: loop exit
PB: predicated region body
PF: predicated region fallthrough
CT: control target
= control target key end

     0   :  { %16 = vsyncpa [#allocation3], 0  ;;  %s8382_s0 = inlined_call_operand.vmem [shape: f32[128,128], index: 0, kind: input, shape index: {}]   ;;  %s8383_s1 = inlined_call_operand.vmem [shape: f32[128,32], index: 1, kind: input, shape index: {}]   ;;  %s8384_s2 = inlined_call_operand.vmem [shape: f32[128,1], index: 2, kind: input, shape index: {}]   ;;  %s8385_s3 = inlined_call_operand.vmem [shape: f32[32,64], index: 3, kind: input, shape index: {}]   ;;  %s8386_s4 = inlined_call_operand.vmem [shape: f32[1,32], index: 4, kind: input, shape index: {}]   ;;  %s8387_s5 = inlined_call_operand.hbm [shape: f32[13,128,128], index: 5, kind: input, shape index: {}]   ;;  %s8388_s6 = inlined_call_operand.hbm [shape: f32[448,512], index: 6, kind: input, shape index: {}]   ;;  %s8389_s7 = inlined_call_operand.vmem [shape: f32[1,256], index: 7, kind: input, shape index: {}]   ;;  %s8390_s8 = inlined_call_operand.vmem [shape: f32[1,256], index: 8, kind: input, shape index: {}]   ;;  %s8391_s9 = inlined_call_operand.vmem [shape: f32[256,13], index: 9, kind: input, shape index: {}]   ;;  %s8392_s10 = inlined_call_operand.vmem [shape: f32[13,256], index: 10, kind: input, shape index: {}]   ;;  %s8393_s11 = inlined_call_operand.vmem [shape: f32[128,256], index: 11, kind: output, shape index: {}]  }
   0x1   :  { %s32_s19 = sshll.u32 %s8387_s5, 4  ;;  %s33_s19 = int_to_ptr.hbm [resolvable:$true] %s32_s19 }
   0x2   :  { %17 = vsyncpa [#allocation5], 0  ;;  %s5347_s20 = smov [#allocation2]   ;;  %s45_s24 = sshll.u32 %s8388_s6, 4  ;;  %s46_s24 = int_to_ptr.hbm [resolvable:$true] %s45_s24 }
   0x3   :  { %s34_s21 = sshll.u32 %s5347_s20, 4  ;;  %s5348_s25 = smov 128   ;;  %s35_s21 = int_to_ptr.vmem [resolvable:$true] %s34_s21 }
   0x4   :  { %s5349_s26 = smov 8   ;;  %s5350_s27 = smov [#allocation4]  }
   0x5   :  { %40 = dma.hbm_to_vmem [thread:$0]  %s33_s19, 26624, %s35_s21, [#allocation3], %s5348_s25, %s5348_s25, %s5349_s26  }
   0x6   :  { %s47_s28 = sshll.u32 %s5350_s27, 4  ;;  %s5351_s29 = smov 512   ;;  %s48_s28 = int_to_ptr.vmem [resolvable:$true] %s47_s28 }
   0x7   :  { %s5352_s30 = smov 32  }
   0x8   :  { %53 = dma.hbm_to_vmem [thread:$0]  %s46_s24, 28672, %s48_s28, [#allocation5], %s5351_s29, %s5351_s29, %s5352_s30  }
   0x9   :  { %5343 = dma.done.wait [#allocation3], 26624  }
   0xa   :  { %5344 = vsyncadd [#allocation3], 4294940672 }
   0xb   :  { %5345 = dma.done.wait [#allocation5], 28672  }
   0xc   :  { %5346 = vsyncadd [#allocation5], 4294938624  ;;  %v89_v0 = vld [vmem:[%s8385_s3 + $0x18] sm:$0xff]  ;;  %v88_v1 = vld [vmem:[%s8385_s3 + $0x10] sm:$0xff]  ;;  %vm90_vm0 = vcmask 261120   ;;  %v5353_v25 = vmov 0  }
   0xd   :  { %151 = vmatpush.msra.mxu0 %v89_v0  ;;  %v87_v2 = vld [vmem:[%s8385_s3 + $0x8] sm:$0xff]  ;;  %v86_v3 = vld [vmem:[%s8385_s3] sm:$0xff]  ;;  %v72_v6 = vld [vmem:[%s8383_s1 + $0x10] sm:$0xff]  ;;  %4829 = vset.pattern.permute.xlu0 %v5353_v25  ;;  %s5354_s28 = smov 96  }
   0xe   :  { %v70_v4 = vld [vmem:[%s8383_s1] sm:$0xff]  ;;  %v71_v5 = vld [vmem:[%s8383_s1 + $0x8] sm:$0xff]  ;;  %v73_v7 = vld [vmem:[%s8383_s1 + $0x18] sm:$0xff]  ;;  %4830 = vset.pattern.permute.xlu1 %v5353_v25  ;;  %4831 = vset.pattern.permute.xlu2 %v5353_v25 }
   0xf   :  { %152 = vmatpush.msra.mxu0 %v88_v1  ;;  %v74_v8 = vld [vmem:[%s8383_s1 + $0x20] sm:$0xff]  ;;  %v75_v9 = vld [vmem:[%s8383_s1 + $0x28] sm:$0xff]  ;;  %v76_v10 = vld [vmem:[%s8383_s1 + $0x30] sm:$0xff] }
  0x10   :  { %v77_v11 = vld [vmem:[%s8383_s1 + $0x38] sm:$0xff]  ;;  %v78_v12 = vld [vmem:[%s8383_s1 + $0x40] sm:$0xff]  ;;  %v79_v13 = vld [vmem:[%s8383_s1 + $0x48] sm:$0xff] }
  0x11   :  { %153 = vmatpush.msra.mxu0 %v87_v2  ;;  %v80_v14 = vld [vmem:[%s8383_s1 + $0x50] sm:$0xff]  ;;  %v81_v15 = vld [vmem:[%s8383_s1 + $0x58] sm:$0xff]  ;;  %v82_v16 = vld [vmem:[%s8383_s1 + $0x60] sm:$0xff] }
  0x12   :  { %v219_v17 = vld [vmem:[%s8384_s2 + $0x78] sm:$0xff]  ;;  %v83_v18 = vld [vmem:[%s8383_s1 + $0x68] sm:$0xff]  ;;  %v5497_v21 = vld [vmem:[%s8384_s2 + $0x70] sm:$0xff] }
  0x13   :  { %154 = vmatpush.msra.mxu0 %v86_v3  ;;  %5199 = vrcp.f32 %v219_v17  ;;  %v5502_v22 = vld [vmem:[%s8384_s2 + $0x68] sm:$0xff]  ;;  %v84_v23 = vld [vmem:[%s8383_s1 + $0x70] sm:$0xff]  ;;  %v472_v27 = vand.u32 2147483648, %v219_v17  ;;  %vm466_vm1 = vweird.f32 %v219_v17  ;;  %v470_v29 = vand.u32 2147483647, %v219_v17  ;;  %v5514_v35 = vld [vmem:[%s8384_s2 + $0x58] sm:$0xff] }
  0x14   :  { %4642 = vmatmul.msk.f32.vlgmr.msra.gmra.mxu0 %vm90_vm0, %v70_v4  ;;  %5201 = vrcp.f32 %v5497_v21  ;;  %v5519_v36 = vld [vmem:[%s8384_s2 + $0x50] sm:$0xff]  ;;  %vm235_vm5 = vcmp.gt.f32.partialorder %v219_v17, 0.0  ;;  %v85_v39 = vld [vmem:[%s8383_s1 + $0x78] sm:$0xff]  ;;  %v457_v44 = vand.u32 2147483648, %v5497_v21  ;;  %v442_v46 = vand.u32 2147483648, %v5502_v22  ;;  %v5545_v57 = vld [vmem:[%s8384_s2 + $0x60] sm:$0xff] }
  0x15   :  { %5203 = vrcp.f32 %v5502_v22  ;;  %v473_v31 = vor.u32 1.1754944e-38, %v472_v27  ;;  %vm471_vm4 = vcmp.eq.f32.partialorder %v470_v29, 8.507059e+37  ;;  %vm451_vm6 = vweird.f32 %v5497_v21  ;;  %v5554_v60 = vld [vmem:[%s8384_s2 + $0x40] sm:$0xff]  ;;  %v5565_v1 = vld [vmem:[%s8384_s2 + $0x38] sm:$0xff] }
  0x16   :  { %5205 = vrcp.f32 %v5514_v35  ;;  %v455_v48 = vand.u32 2147483647, %v5497_v21  ;;  %v458_v50 = vor.u32 1.1754944e-38, %v457_v44  ;;  %vm436_vm9 = vweird.f32 %v5502_v22 }
  0x17   :  { %5207 = vrcp.f32 %v5519_v36  ;;  %v440_v55 = vand.u32 2147483647, %v5502_v22  ;;  %v443_v56 = vor.u32 1.1754944e-38, %v442_v46  ;;  %vm234_vm13 = vcmp.gt.f32.partialorder %v5497_v21, 0.0 }
  0x18   :  { %vm456_vm11 = vcmp.eq.f32.partialorder %v455_v48, 8.507059e+37  ;;  %vm233_vm14 = vcmp.gt.f32.partialorder %v5502_v22, 0.0  ;;  %5209 = vrcp.f32 %v5545_v57  ;;  %v365_v46 = vand.u32 2147483647, %v5554_v60 }
  0x19   :  { %v5200_v19 = vpop.eup %5199  ;;  %vm441_vm15 = vcmp.eq.f32.partialorder %v440_v55, 8.507059e+37  ;;  %5211 = vrcp.f32 %v5554_v60  ;;  %v350_v55 = vand.u32 2147483647, %v5565_v1 }
  0x1a   :  { %v462_v20 = vmul.f32 %v5200_v19, %v219_v17  ;;  %vm467_vm2 = vweird.f32 %v5200_v19  ;;  %v5202_v30 = vpop.eup %5201  ;;  %5213 = vrcp.f32 %v5565_v1 }
  0x1b   :  { %vm468_vm3 = vmor %vm466_vm1, %vm467_vm2  ;;  %v5204_v32 = vpop.eup %5203  ;;  %v447_v34 = vmul.f32 %v5202_v30, %v5497_v21  ;;  %vm452_vm7 = vweird.f32 %v5202_v30  ;;  %vm406_vm1 = vweird.f32 %v5514_v35 }
  0x1c   :  { %4643 = vmatmul.msk.f32.gmra.mxu0 %vm90_vm0, %v71_v5  ;;  %v463_v24 = vsub.f32 1.0, %v462_v20  ;;  %v432_v38 = vmul.f32 %v5204_v32, %v5502_v22  ;;  %v5532_v49 = vpop.eup %5205  ;;  %vm453_vm8 = vmor %vm451_vm6, %vm452_vm7  ;;  %vm437_vm10 = vweird.f32 %v5204_v32 }
  0x1d   :  { %v448_v41 = vsub.f32 1.0, %v447_v34  ;;  %v5535_v52 = vpop.eup %5207  ;;  %vm5537_vm12 = vmor %vm436_vm9, %vm437_vm10  ;;  %v402_v63 = vmul.f32 %v5532_v49, %v5514_v35  ;;  %vm407_vm2 = vweird.f32 %v5532_v49  ;;  %vm230_vm9 = vcmp.gt.f32.partialorder %v5519_v36, 0.0 }
  0x1e   :  { %v464_v26 = vmul.f32 %v5200_v19, %v463_v24  ;;  %v433_v42 = vsub.f32 1.0, %v432_v38  ;;  %v387_v0 = vmul.f32 %v5535_v52, %v5519_v36  ;;  %v5210_v20 = vpop.eup %5209  ;;  %v367_v38 = vand.u32 2147483648, %v5554_v60 }
  0x1f   :  { %v449_v43 = vmul.f32 %v5202_v30, %v448_v41  ;;  %v403_v4 = vsub.f32 1.0, %v402_v63  ;;  %v5212_v22 = vpop.eup %5211  ;;  %v417_v25 = vmul.f32 %v5210_v20, %v5545_v57 }
  0x20   :  { %v465_v28 = vadd.f32 %v5200_v19, %v464_v26  ;;  %v434_v45 = vmul.f32 %v5204_v32, %v433_v42  ;;  %v388_v5 = vsub.f32 1.0, %v387_v0  ;;  %v5613_v26 = vpop.eup %5213  ;;  %v357_v29 = vmul.f32 %v5212_v22, %v5554_v60 }
  0x21   :  { %v450_v47 = vadd.f32 %v5202_v30, %v449_v43 }
  0x22   :  { %v469_v33 = vsel %vm468_vm3, %v5200_v19, %v465_v28  ;;  %v435_v51 = vadd.f32 %v5204_v32, %v434_v45  ;;  %vm5576_vm3 = vmor %vm406_vm1, %vm407_vm2  ;;  %v5601_v19 = vld [vmem:[%s8384_s2 + $0x28] sm:$0xff] }
  0x23   :  { %v474_v37 = vsel %vm471_vm4, %v473_v31, %v469_v33  ;;  %v454_v53 = vsel %vm453_vm8, %v5202_v30, %v450_v47  ;;  %vm391_vm4 = vweird.f32 %v5519_v36  ;;  %vm231_vm8 = vcmp.gt.f32.partialorder %v5514_v35, 0.0 }
  0x24   :  { %4644 = vmatmul.msk.f32.gmra.mxu0 %vm90_vm0, %v72_v6  ;;  %v491_v40 = vsel %vm235_vm5, %v474_v37, 0.0  ;;  %v459_v58 = vsel %vm456_vm11, %v458_v50, %v454_v53  ;;  %v439_v59 = vsel %vm5537_vm12, %v5204_v32, %v435_v51  ;;  %v412_v6 = vand.u32 2147483648, %v5514_v35 }
  0x25   :  { %650 = vperm.xlu0 %4829, %v491_v40   ;;  %v490_v62 = vsel %vm234_vm13, %v459_v58, 0.0  ;;  %v444_v2 = vsel %vm441_vm15, %v443_v56, %v439_v59  ;;  %vm392_vm5 = vweird.f32 %v5535_v52  ;;  %v418_v32 = vsub.f32 1.0, %v417_v25 }
  0x26   :  { %v489_v3 = vsel %vm233_vm14, %v444_v2, 0.0  ;;  %vm5588_vm7 = vmor %vm391_vm4, %vm392_vm5  ;;  %v342_v33 = vmul.f32 %v5613_v26, %v5565_v1  ;;  %v358_v37 = vsub.f32 1.0, %v357_v29  ;;  %vm421_vm11 = vweird.f32 %v5545_v57 }
  0x27   :  { %640 = vperm.xlu1 %4830, %v489_v3   ;;  %vm422_vm12 = vweird.f32 %v5210_v20  ;;  %v425_v40 = vand.u32 2147483647, %v5545_v57  ;;  %vm361_vm14 = vweird.f32 %v5554_v60  ;;  %vm362_vm15 = vweird.f32 %v5212_v22 }
  0x28   :  { %vm5630_vm13 = vmor %vm421_vm11, %vm422_vm12  ;;  %v359_v43 = vmul.f32 %v5212_v22, %v358_v37  ;;  %v368_v47 = vor.u32 1.1754944e-38, %v367_v38  ;;  %vm228_vm4 = vcmp.gt.f32.partialorder %v5554_v60, 0.0  ;;  %vm366_vm5 = vcmp.eq.f32.partialorder %v365_v46, 8.507059e+37 }
  0x29   :  { %vm426_vm1 = vcmp.eq.f32.partialorder %v425_v40, 8.507059e+37  ;;  %vm5635_vm2 = vmor %vm361_vm14, %vm362_vm15  ;;  %v352_v59 = vand.u32 2147483648, %v5565_v1 }
  0x2b   :  { %v353_v3 = vor.u32 1.1754944e-38, %v352_v59  ;;  %v5732_v59 = vld [vmem:[%s8384_s2 + $0x10] sm:$0xff] }
  0x2c   :  { %4645 = vmatmul.msk.f32.gmra.mxu0 %vm90_vm0, %v73_v7  ;;  %v397_v7 = vand.u32 2147483648, %v5519_v36 }
  0x2d   :  { %645 = vperm.xlu0 %4829, %v490_v62  }
  0x2e   :  { %v398_v17 = vor.u32 1.1754944e-38, %v397_v7  ;;  %v210_v7 = vld [vmem:[%s8384_s2 + $0x30] sm:$0xff] }
  0x34   :  { %4646 = vmatmul.msk.f32.gmra.mxu0 %vm90_vm0, %v74_v8  ;;  %v404_v8 = vmul.f32 %v5532_v49, %v403_v4 }
  0x3c   :  { %4647 = vmatmul.msk.f32.gmra.mxu0 %vm90_vm0, %v75_v9  ;;  %v410_v9 = vand.u32 2147483647, %v5514_v35  ;;  %v427_v35 = vand.u32 2147483648, %v5545_v57 }
  0x3e   :  { %vm5584_vm6 = vcmp.eq.f32.partialorder %v410_v9, 8.507059e+37  ;;  %v428_v42 = vor.u32 1.1754944e-38, %v427_v35 }
  0x44   :  { %4648 = vmatmul.msk.f32.gmra.mxu0 %vm90_vm0, %v76_v10 }
  0x4c   :  { %4649 = vmatmul.msk.f32.gmra.mxu0 %vm90_vm0, %v77_v11  ;;  %v413_v11 = vor.u32 1.1754944e-38, %v412_v6 }
  0x54   :  { %4650 = vmatmul.msk.f32.gmra.mxu0 %vm90_vm0, %v78_v12  ;;  %v389_v12 = vmul.f32 %v5535_v52, %v388_v5 }
  0x56   :  { %v390_v21 = vadd.f32 %v5535_v52, %v389_v12 }
  0x58   :  { %v394_v28 = vsel %vm5588_vm7, %v5535_v52, %v390_v21  ;;  %v343_v52 = vsub.f32 1.0, %v342_v33  ;;  %vm347_vm7 = vweird.f32 %v5613_v26 }
  0x5a   :  { %v344_v58 = vmul.f32 %v5613_v26, %v343_v52 }
  0x5c   :  { %4651 = vmatmul.msk.f32.gmra.mxu0 %vm90_vm0, %v79_v13  ;;  %v405_v13 = vadd.f32 %v5532_v49, %v404_v8  ;;  %v345_v2 = vadd.f32 %v5613_v26, %v344_v58 }
  0x5e   :  { %v409_v24 = vsel %vm5576_vm3, %v5532_v49, %v405_v13  ;;  %vm232_vm3 = vcmp.gt.f32.partialorder %v5545_v57, 0.0  ;;  %v360_v49 = vadd.f32 %v5212_v22, %v359_v43 }
  0x5f   :  { %v414_v27 = vsel %vm5584_vm6, %v413_v11, %v409_v24  ;;  %vm346_vm6 = vweird.f32 %v5565_v1 }
  0x60   :  { %v487_v30 = vsel %vm231_vm8, %v414_v27, 0.0  ;;  %v364_v54 = vsel %vm5635_vm2, %v5212_v22, %v360_v49  ;;  %vm227_vm8 = vcmp.gt.f32.partialorder %v5565_v1, 0.0 }
  0x61   :  { %630 = vperm.xlu1 %4830, %v487_v30   ;;  %v369_v57 = vsel %vm366_vm5, %v368_v47, %v364_v54  ;;  %vm225_vm5 = vcmp.gt.f32.partialorder %v5601_v19, 0.0  ;;  %v337_v30 = vand.u32 2147483648, %v210_v7 }
  0x62   :  { %v484_v62 = vsel %vm228_vm4, %v369_v57, 0.0 }
  0x64   :  { %4652 = vmatmul.msk.f32.gmra.mxu0 %vm90_vm0, %v80_v14  ;;  %v320_v14 = vand.u32 2147483647, %v5601_v19 }
  0x66   :  { %vm321_vm4 = vcmp.eq.f32.partialorder %v320_v14, 8.507059e+37 }
  0x69   :  { %615 = vperm.xlu1 %4830, %v484_v62  }
  0x6c   :  { %4653 = vmatmul.msk.f32.gmra.mxu0 %vm90_vm0, %v81_v15 }
  0x74   :  { %4654 = vmatmul.msk.f32.gmra.mxu0 %vm90_vm0, %v82_v16  ;;  %v395_v16 = vand.u32 2147483647, %v5519_v36 }
  0x76   :  { %vm396_vm10 = vcmp.eq.f32.partialorder %v395_v16, 8.507059e+37  ;;  %v322_v16 = vand.u32 2147483648, %v5601_v19 }
  0x77   :  { %v399_v31 = vsel %vm396_vm10, %v398_v17, %v394_v28  ;;  %vm351_vm10 = vcmp.eq.f32.partialorder %v350_v55, 8.507059e+37 }
  0x78   :  { %v486_v34 = vsel %vm230_vm9, %v399_v31, 0.0  ;;  %vm348_vm9 = vmor %vm346_vm6, %vm347_vm7  ;;  %v323_v1 = vor.u32 1.1754944e-38, %v322_v16  ;;  %vm331_vm6 = vweird.f32 %v210_v7 }
  0x79   :  { %625 = vperm.xlu0 %4829, %v486_v34   ;;  %v349_v6 = vsel %vm348_vm9, %v5613_v26, %v345_v2  ;;  %v338_v34 = vor.u32 1.1754944e-38, %v337_v30 }
  0x7a   :  { %v354_v8 = vsel %vm351_vm10, %v353_v3, %v349_v6  ;;  %vm226_vm10 = vcmp.gt.f32.partialorder %v210_v7, 0.0 }
  0x7b   :  { %v483_v12 = vsel %vm227_vm8, %v354_v8, 0.0 }
  0x7c   :  { %4655 = vmatmul.msk.f32.gmra.mxu0 %vm90_vm0, %v83_v18  ;;  %v5596_v18 = vld [vmem:[%s8384_s2 + $0x48] sm:$0xff] }
  0x7d   :  { %5215 = vrcp.f32 %v5596_v18  ;;  %v382_v0 = vand.u32 2147483648, %v5596_v18  ;;  %vm376_vm11 = vweird.f32 %v5596_v18  ;;  %v380_v5 = vand.u32 2147483647, %v5596_v18 }
  0x7e   :  { %5217 = vrcp.f32 %v5601_v19  ;;  %vm229_vm2 = vcmp.gt.f32.partialorder %v5596_v18, 0.0 }
  0x7f   :  { %v383_v10 = vor.u32 1.1754944e-38, %v382_v0  ;;  %5219 = vrcp.f32 %v210_v7 }
  0x81   :  { %610 = vperm.xlu0 %4829, %v483_v12  }
  0x83   :  { %v5216_v36 = vpop.eup %5215 }
  0x84   :  { %4656 = vmatmul.msk.f32.gmra.mxu0 %vm90_vm0, %v84_v23  ;;  %v5640_v48 = vpop.eup %5217  ;;  %v372_v63 = vmul.f32 %v5216_v36, %v5596_v18  ;;  %vm377_vm12 = vweird.f32 %v5216_v36 }
  0x85   :  { %v312_v60 = vmul.f32 %v5640_v48, %v5601_v19  ;;  %vm378_vm14 = vmor %vm376_vm11, %vm377_vm12  ;;  %vm317_vm15 = vweird.f32 %v5640_v48  ;;  %v5220_v26 = vpop.eup %5219 }
  0x86   :  { %v373_v4 = vsub.f32 1.0, %v372_v63  ;;  %v327_v29 = vmul.f32 %v5220_v26, %v210_v7  ;;  %vm332_vm7 = vweird.f32 %v5220_v26 }
  0x87   :  { %v313_v13 = vsub.f32 1.0, %v312_v60  ;;  %vm333_vm8 = vmor %vm331_vm6, %vm332_vm7 }
  0x88   :  { %v374_v9 = vmul.f32 %v5216_v36, %v373_v4  ;;  %v328_v31 = vsub.f32 1.0, %v327_v29 }
  0x89   :  { %v314_v17 = vmul.f32 %v5640_v48, %v313_v13 }
  0x8a   :  { %v375_v15 = vadd.f32 %v5216_v36, %v374_v9  ;;  %v329_v33 = vmul.f32 %v5220_v26, %v328_v31 }
  0x8b   :  { %v315_v22 = vadd.f32 %v5640_v48, %v314_v17 }
  0x8c   :  { %4657 = vmatmul.msk.f32.gmra.mxu0 %vm90_vm0, %v85_v39  ;;  %v419_v39 = vmul.f32 %v5210_v20, %v418_v32  ;;  %v335_v32 = vand.u32 2147483647, %v210_v7  ;;  %v330_v35 = vadd.f32 %v5220_v26, %v329_v33 }
  0x8e   :  { %v420_v44 = vadd.f32 %v5210_v20, %v419_v39  ;;  %vm336_vm9 = vcmp.eq.f32.partialorder %v335_v32, 8.507059e+37  ;;  %v334_v37 = vsel %vm333_vm8, %v5220_v26, %v330_v35  ;;  %v277_v32 = vand.u32 2147483648, %v5732_v59 }
  0x8f   :  { %v339_v38 = vsel %vm336_vm9, %v338_v34, %v334_v37  ;;  %v275_v34 = vand.u32 2147483647, %v5732_v59 }
  0x90   :  { %v424_v51 = vsel %vm5630_vm13, %v5210_v20, %v420_v44  ;;  %vm316_vm13 = vweird.f32 %v5601_v19  ;;  %v379_v20 = vsel %vm378_vm14, %v5216_v36, %v375_v15  ;;  %v482_v39 = vsel %vm226_vm10, %v339_v38, 0.0  ;;  %v208_v36 = vld [vmem:[%s8384_s2 + $0x20] sm:$0xff] }
  0x91   :  { %v5556_v61 = vpop.f32.mrf.mxu0  ;;  %v429_v53 = vsel %vm426_vm1, %v428_v42, %v424_v51  ;;  %vm381_vm1 = vcmp.eq.f32.partialorder %v380_v5, 8.507059e+37  ;;  %5221 = vrcp.f32 %v208_v36  ;;  %v5721_v51 = vld [vmem:[%s8384_s2 + $0x18] sm:$0xff]  ;;  %vm301_vm11 = vweird.f32 %v208_v36 }
  0x92   :  { %v488_v56 = vsel %vm232_vm3, %v429_v53, 0.0  ;;  %vm318_vm3 = vmor %vm316_vm13, %vm317_vm15  ;;  %v384_v21 = vsel %vm381_vm1, %v383_v10, %v379_v20  ;;  %v307_v54 = vand.u32 2147483648, %v208_v36  ;;  %v305_v57 = vand.u32 2147483647, %v208_v36 }
  0x93   :  { %635 = vperm.xlu2 %4831, %v488_v56   ;;  %v485_v24 = vsel %vm229_vm2, %v384_v21, 0.0  ;;  %v319_v25 = vsel %vm318_vm3, %v5640_v48, %v315_v22  ;;  %v5716_v48 = vld [vmem:[%s8384_s2 + $0x8] sm:$0xff]  ;;  %vm224_vm15 = vcmp.gt.f32.partialorder %v208_v36, 0.0  ;;  %vm286_vm3 = vweird.f32 %v5721_v51 }
  0x94   :  { %v324_v27 = vsel %vm321_vm4, %v323_v1, %v319_v25  ;;  %5223 = vrcp.f32 %v5716_v48  ;;  %v308_v62 = vor.u32 1.1754944e-38, %v307_v54  ;;  %vm306_vm14 = vcmp.eq.f32.partialorder %v305_v57, 8.507059e+37  ;;  %v498_v54 = vld [vmem:[%s8382_s0 + $0x30] sm:$0xff]  ;;  %v501_v57 = vld [vmem:[%s8382_s0 + $0x48] sm:$0xff] }
  0x95   :  { %v481_v28 = vsel %vm225_vm5, %v324_v27, 0.0  ;;  %5225 = vrcp.f32 %v5721_v51  ;;  %vm256_vm1 = vweird.f32 %v5716_v48  ;;  %v262_v13 = vand.u32 2147483648, %v5716_v48 }
  0x96   :  { %600 = vperm.xlu1 %4830, %v481_v28   ;;  %5227 = vrcp.f32 %v5732_v59  ;;  %v260_v15 = vand.u32 2147483647, %v5716_v48  ;;  %v292_v16 = vand.u32 2147483648, %v5721_v51  ;;  %v290_v1 = vand.u32 2147483647, %v5721_v51 }
  0x97   :  { %v5222_v45 = vpop.eup %5221  ;;  %vm221_vm9 = vcmp.gt.f32.partialorder %v5716_v48, 0.0  ;;  %vm223_vm10 = vcmp.gt.f32.partialorder %v5721_v51, 0.0  ;;  %v278_v38 = vor.u32 1.1754944e-38, %v277_v32 }
  0x98   :  { %v297_v47 = vmul.f32 %v5222_v45, %v208_v36  ;;  %vm302_vm12 = vweird.f32 %v5222_v45  ;;  %vm261_vm7 = vcmp.eq.f32.partialorder %v260_v15, 8.507059e+37  ;;  %v293_v26 = vor.u32 1.1754944e-38, %v292_v16 }
  0x99   :  { %v5606_v23 = vpop.f32.mrf.mxu0  ;;  %vm303_vm13 = vmor %vm301_vm11, %vm302_vm12  ;;  %vm291_vm8 = vcmp.eq.f32.partialorder %v290_v1, 8.507059e+37  ;;  %vm271_vm11 = vweird.f32 %v5732_v59 }
  0x9a   :  { %v298_v49 = vsub.f32 1.0, %v297_v47  ;;  %v5224_v55 = vpop.eup %5223 }
  0x9b   :  { %620 = vperm.xlu2 %4831, %v485_v24   ;;  %v5226_v58 = vpop.eup %5225  ;;  %v252_v63 = vmul.f32 %v5224_v55, %v5716_v48  ;;  %vm257_vm2 = vweird.f32 %v5224_v55  ;;  %v263_v24 = vor.u32 1.1754944e-38, %v262_v13 }
  0x9c   :  { %v299_v53 = vmul.f32 %v5222_v45, %v298_v49  ;;  %v282_v3 = vmul.f32 %v5226_v58, %v5721_v51  ;;  %v5228_v6 = vpop.eup %5227  ;;  %vm287_vm4 = vweird.f32 %v5226_v58  ;;  %vm5745_vm5 = vmor %vm256_vm1, %vm257_vm2  ;;  %v493_v49 = vld [vmem:[%s8382_s0 + $0x8] sm:$0xff]  ;;  %v494_v51 = vld [vmem:[%s8382_s0 + $0x10] sm:$0xff] }
  0x9d   :  { %v253_v5 = vsub.f32 1.0, %v252_v63  ;;  %v267_v12 = vmul.f32 %v5228_v6, %v5732_v59  ;;  %vm5750_vm6 = vmor %vm286_vm3, %vm287_vm4  ;;  %vm272_vm12 = vweird.f32 %v5228_v6  ;;  %v505_v63 = vld [vmem:[%s8382_s0 + $0x68] sm:$0xff] }
  0x9e   :  { %v300_v56 = vadd.f32 %v5222_v45, %v299_v53  ;;  %v283_v60 = vsub.f32 1.0, %v282_v3  ;;  %v497_v53 = vld [vmem:[%s8382_s0 + $0x28] sm:$0xff] }
  0x9f   :  { %v254_v8 = vmul.f32 %v5224_v55, %v253_v5  ;;  %v268_v22 = vsub.f32 1.0, %v267_v12 }
  0xa0   :  { %v304_v2 = vsel %vm303_vm13, %v5222_v45, %v300_v56  ;;  %v284_v10 = vmul.f32 %v5226_v58, %v283_v60  ;;  %vm273_vm13 = vmor %vm271_vm11, %vm272_vm12  ;;  %v500_v56 = vld [vmem:[%s8382_s0 + $0x40] sm:$0xff]  ;;  %vm4312_vm11 = vcmask 105472  }
  0xa1   :  { %v5644_v50 = vpop.f32.mrf.mxu0  ;;  %v309_v4 = vsel %vm306_vm14, %v308_v62, %v304_v2  ;;  %v255_v14 = vadd.f32 %v5224_v55, %v254_v8  ;;  %v269_v29 = vmul.f32 %v5228_v6, %v268_v22  ;;  %vm276_vm14 = vcmp.eq.f32.partialorder %v275_v34, 8.507059e+37  ;;  %v504_v62 = vld [vmem:[%s8382_s0 + $0x60] sm:$0xff]  ;;  %v507_v2 = vld [vmem:[%s8382_s0 + $0x78] sm:$0xff] }
  0xa2   :  { %v480_v7 = vsel %vm224_vm15, %v309_v4, 0.0  ;;  %v285_v20 = vadd.f32 %v5226_v58, %v284_v10  ;;  %vm222_vm15 = vcmp.gt.f32.partialorder %v5732_v59, 0.0  ;;  %v503_v59 = vld [vmem:[%s8382_s0 + $0x58] sm:$0xff]  ;;  %v641_v10 = vpop.permute.xlu1 %640 }
  0xa3   :  { %605 = vperm.xlu2 %4831, %v482_v39   ;;  %v259_v25 = vsel %vm5745_vm5, %v5224_v55, %v255_v14  ;;  %v270_v33 = vadd.f32 %v5228_v6, %v269_v29  ;;  %v499_v55 = vld [vmem:[%s8382_s0 + $0x38] sm:$0xff] }
  0xa4   :  { %v289_v28 = vsel %vm5750_vm6, %v5226_v58, %v285_v20  ;;  %v264_v30 = vsel %vm261_vm7, %v263_v24, %v259_v25  ;;  %v502_v58 = vld [vmem:[%s8382_s0 + $0x50] sm:$0xff]  ;;  %vm2274_vm6 = vcmask 523264   ;;  %vm2291_vm7 = vcmask 785408  }
  0xa5   :  { %v294_v31 = vsel %vm291_vm8, %v293_v26, %v289_v28  ;;  %v477_v35 = vsel %vm221_vm9, %v264_v30, 0.0  ;;  %v274_v39 = vsel %vm273_vm13, %v5228_v6, %v270_v33 }
  0xa6   :  { %v479_v37 = vsel %vm223_vm10, %v294_v31, 0.0  ;;  %v279_v36 = vsel %vm276_vm14, %v278_v38, %v274_v39 }
  0xa7   :  { %v478_v45 = vsel %vm222_vm15, %v279_v36, 0.0 }
  0xa9   :  { %v5670_v11 = vpop.f32.mrf.mxu0 }
  0xb1   :  { %v5684_v18 = vpop.f32.mrf.mxu0 }
  0xb9   :  { %v5686_v19 = vpop.f32.mrf.mxu0 }
  0xc1   :  { %v5688_v40 = vpop.f32.mrf.mxu0 }
  0xc9   :  { %v5690_v41 = vpop.f32.mrf.mxu0 }
  0xca   :  { %699 = vrot.lane.b32.xlu0 %v5690_v41, %s5354_s28 }
  0xd1   :  { %v5694_v42 = vpop.f32.mrf.mxu0 }
  0xd2   :  { %701 = vrot.lane.b32.xlu1 %v5694_v42, %s5354_s28 }
  0xd3   :  { %v631_v15 = vpop.permute.xlu1 %630 }
  0xd9   :  { %v5698_v43 = vpop.f32.mrf.mxu0 }
  0xda   :  { %703 = vrot.lane.b32.xlu2 %v5698_v43, %s5354_s28 }
  0xdb   :  { %v616_v21 = vpop.permute.xlu1 %615 }
  0xe1   :  { %v5705_v44 = vpop.f32.mrf.mxu0 }
  0xe2   :  { %705 = vrot.lane.b32.xlu0 %v5705_v44, %s5354_s28 }
  0xe9   :  { %v5709_v46 = vpop.f32.mrf.mxu0 }
  0xea   :  { %707 = vrot.lane.b32.xlu1 %v5709_v46, %s5354_s28 }
  0xed   :  { %v636_v13 = vpop.permute.xlu2 %635 }
  0xf1   :  { %v5725_v52 = vpop.f32.mrf.mxu0 }
  0xf2   :  { %709 = vrot.lane.b32.xlu2 %v5725_v52, %s5354_s28 }
  0xf5   :  { %v621_v17 = vpop.permute.xlu2 %620 }
  0xf9   :  { %v195_v0 = vpop.f32.mrf.mxu0 }
  0xfa   :  { %711 = vrot.lane.b32.xlu0 %v195_v0, %s5354_s28 }
  0xfd   :  { %v606_v22 = vpop.permute.xlu2 %605 }
 0x101   :  { %v198_v9 = vpop.f32.mrf.mxu0 }
 0x102   :  { %595 = vperm.xlu0 %4829, %v480_v7   ;;  %713 = vrot.lane.b32.xlu2 %v198_v9, %s5354_s28 }
 0x108   :  { %v601_v26 = vpop.permute.xlu1 %600 }
 0x109   :  { %v201_v27 = vpop.f32.mrf.mxu0 }
 0x10a   :  { %693 = vrot.lane.b32.xlu0 %v5684_v18, %s5354_s28  ;;  %697 = vrot.lane.b32.xlu2 %v5688_v40, %s5354_s28 }
 0x10b   :  { %715 = vrot.lane.b32.xlu1 %v201_v27, %s5354_s28  ;;  %508 = vmatpush.msra.mxu1 %v201_v27 }
 0x10d   :  { %509 = vmatpush.msra.mxu1 %v198_v9  ;;  %v651_v9 = vpop.permute.xlu0 %650 }
 0x10f   :  { %510 = vmatpush.msra.mxu1 %v195_v0  ;;  %v506_v0 = vld [vmem:[%s8382_s0 + $0x70] sm:$0xff] }
 0x111   :  { %511 = vmatpush.msra.mxu1 %v5725_v52  ;;  %v495_v52 = vld [vmem:[%s8382_s0 + $0x18] sm:$0xff] }
 0x112   :  { %580 = vperm.xlu0 %4829, %v477_v35   ;;  %590 = vperm.xlu2 %4831, %v479_v37  }
 0x113   :  { %695 = vrot.lane.b32.xlu1 %v5686_v19, %s5354_s28  ;;  %512 = vmatpush.msra.mxu1 %v5709_v46  ;;  %v204_v46 = vld [vmem:[%s8384_s2] sm:$0xff] }
 0x114   :  { %5229 = vrcp.f32 %v204_v46  ;;  %vm241_vm1 = vweird.f32 %v204_v46  ;;  %vm220_vm5 = vcmp.gt.f32.partialorder %v204_v46, 0.0 }
 0x115   :  { %513 = vmatpush.msra.mxu1 %v5705_v44  ;;  %v646_v14 = vpop.permute.xlu0 %645 }
 0x117   :  { %514 = vmatpush.msra.mxu1 %v5698_v43 }
 0x119   :  { %515 = vmatpush.msra.mxu1 %v5694_v42 }
 0x11a   :  { %687 = vrot.lane.b32.xlu0 %v5606_v23, %s5354_s28  ;;  %691 = vrot.lane.b32.xlu2 %v5670_v11, %s5354_s28  ;;  %v5230_v43 = vpop.eup %5229 }
 0x11b   :  { %585 = vperm.xlu1 %4830, %v478_v45   ;;  %516 = vmatpush.msra.mxu1 %v5690_v41  ;;  %v237_v42 = vmul.f32 %v5230_v43, %v204_v46  ;;  %vm242_vm2 = vweird.f32 %v5230_v43 }
 0x11c   :  { %vm243_vm3 = vmor %vm241_vm1, %vm242_vm2 }
 0x11d   :  { %517 = vmatpush.msra.mxu1 %v5688_v40  ;;  %v238_v44 = vsub.f32 1.0, %v237_v42  ;;  %v492_v40 = vld [vmem:[%s8382_s0] sm:$0xff]  ;;  %v626_v20 = vpop.permute.xlu0 %625 }
 0x11f   :  { %518 = vmatpush.msra.mxu1 %v5686_v19  ;;  %v239_v47 = vmul.f32 %v5230_v43, %v238_v44  ;;  %v247_v19 = vand.u32 2147483648, %v204_v46 }
 0x121   :  { %519 = vmatpush.msra.mxu1 %v5684_v18  ;;  %v240_v41 = vadd.f32 %v5230_v43, %v239_v47  ;;  %v245_v18 = vand.u32 2147483647, %v204_v46  ;;  %v248_v48 = vor.u32 1.1754944e-38, %v247_v19  ;;  %v5860_v19 = vld [vmem:[%s8386_s4] ss:$0 sm:$0xff]  ;;  %s5355_s4 = smov 64  }
 0x123   :  { %689 = vrot.lane.b32.xlu1 %v5644_v50, %s5354_s28  ;;  %520 = vmatpush.msra.mxu1 %v5670_v11  ;;  %v244_v11 = vsel %vm243_vm3, %v5230_v43, %v240_v41  ;;  %vm246_vm4 = vcmp.eq.f32.partialorder %v245_v18, 8.507059e+37 }
 0x125   :  { %521 = vmatpush.msra.mxu1 %v5644_v50  ;;  %v611_v25 = vpop.permute.xlu0 %610 }
 0x127   :  { %522 = vmatpush.msra.mxu1 %v5606_v23  ;;  %v249_v23 = vsel %vm246_vm4, %v248_v48, %v244_v11 }
 0x128   :  { %v476_v50 = vsel %vm220_vm5, %v249_v23, 0.0 }
 0x129   :  { %523 = vmatpush.msra.mxu1 %v5556_v61  ;;  %575 = vperm.xlu2 %4831, %v476_v50  }
 0x12a   :  { %524 = vmatmul.f32.vlgmr.msra.gmra.mxu1 %v492_v40 }
 0x12b   :  { %685 = vrot.lane.b32.xlu1 %v5556_v61, %s5354_s28  ;;  %v496_v61 = vld [vmem:[%s8382_s0 + $0x20] sm:$0xff] }
 0x132   :  { %527 = vmatmul.f32.gmra.mxu1 %v493_v49 }
 0x134   :  { %v704_v28 = vpop.permute.xlu2 %703 }
 0x13a   :  { %530 = vmatmul.f32.gmra.mxu1 %v494_v51 }
 0x13c   :  { %v700_v29 = vpop.permute.xlu0 %699 }
 0x142   :  { %533 = vmatmul.f32.gmra.mxu1 %v495_v52 }
 0x144   :  { %v702_v30 = vpop.permute.xlu1 %701 }
 0x14a   :  { %536 = vmatmul.f32.gmra.mxu1 %v496_v61 }
 0x14c   :  { %v710_v32 = vpop.permute.xlu2 %709 }
 0x152   :  { %539 = vmatmul.f32.gmra.mxu1 %v497_v53 }
 0x154   :  { %v706_v33 = vpop.permute.xlu0 %705 }
 0x15a   :  { %542 = vmatmul.f32.gmra.mxu1 %v498_v54 }
 0x15c   :  { %v708_v34 = vpop.permute.xlu1 %707  ;;  %v714_v37 = vpop.permute.xlu2 %713 }
 0x162   :  { %545 = vmatmul.f32.gmra.mxu1 %v499_v55 }
 0x164   :  { %v698_v45 = vpop.permute.xlu2 %697 }
 0x16a   :  { %548 = vmatmul.f32.gmra.mxu1 %v500_v56 }
 0x16c   :  { %v712_v38 = vpop.permute.xlu0 %711  ;;  %v591_v49 = vpop.permute.xlu2 %590 }
 0x172   :  { %551 = vmatmul.f32.gmra.mxu1 %v501_v57 }
 0x174   :  { %v596_v46 = vpop.permute.xlu0 %595 }
 0x17a   :  { %554 = vmatmul.f32.gmra.mxu1 %v502_v58 }
 0x17c   :  { %v694_v53 = vpop.permute.xlu0 %693 }
 0x17d   :  { %v716_v39 = vpop.permute.xlu1 %715 }
 0x182   :  { %557 = vmatmul.f32.gmra.mxu1 %v503_v59 }
 0x185   :  { %v696_v42 = vpop.permute.xlu1 %695 }
 0x18a   :  { %560 = vmatmul.f32.gmra.mxu1 %v504_v62 }
 0x18d   :  { %v586_v57 = vpop.permute.xlu1 %585 }
 0x192   :  { %563 = vmatmul.f32.gmra.mxu1 %v505_v63 }
 0x19a   :  { %566 = vmatmul.f32.gmra.mxu1 %v506_v0 }
 0x1a2   :  { %569 = vmatmul.f32.gmra.mxu1 %v507_v2 }
 0x1a7   :  { %v5843_v3 = vpop.f32.mrf.mxu1 }
 0x1af   :  { %v5845_v4 = vpop.f32.mrf.mxu1 }
 0x1b7   :  { %v5847_v5 = vpop.f32.mrf.mxu1 }
 0x1bf   :  { %v5849_v60 = vpop.f32.mrf.mxu1 }
 0x1c7   :  { %v5851_v6 = vpop.f32.mrf.mxu1 }
 0x1cf   :  { %v5853_v7 = vpop.f32.mrf.mxu1 }
 0x1d7   :  { %v5855_v8 = vpop.f32.mrf.mxu1 }
 0x1df   :  { %v546_v12 = vpop.f32.mrf.mxu1 }
 0x1e0   :  { %v660_v63 = vmul.f32 %v611_v25, %v546_v12  ;;  %v692_v12 = vpop.permute.xlu2 %691 }
 0x1e7   :  { %v549_v16 = vpop.f32.mrf.mxu1 }
 0x1e8   :  { %v661_v58 = vmul.f32 %v616_v21, %v549_v16  ;;  %v656_v21 = vmul.f32 %v591_v49, %v5849_v60  ;;  %v576_v60 = vpop.permute.xlu2 %575  ;;  %v774_v49 = vld [vmem:[#allocation2 + $0x28] sm:$0xff] }
 0x1ef   :  { %v552_v1 = vpop.f32.mrf.mxu1 }
 0x1f0   :  { %v662_v54 = vmul.f32 %v621_v17, %v552_v1  ;;  %v657_v17 = vmul.f32 %v596_v46, %v5851_v6  ;;  %v655_v6 = vmul.f32 %v586_v57, %v5847_v5  ;;  %v653_v5 = vmul.f32 %v576_v60, %v5843_v3  ;;  %v770_v46 = vld [vmem:[#allocation2 + $0x8] sm:$0xff]  ;;  %v776_v57 = vld [vmem:[#allocation2 + $0x38] sm:$0xff] }
 0x1f1   :  { %v782_v60 = vld [vmem:[#allocation2 + $0x68] sm:$0xff] }
 0x1f2   :  { %v742_v0 = vadd.f32 %v704_v28, %v662_v54  ;;  %v737_v25 = vadd.f32 %v694_v53, %v657_v17  ;;  %v736_v28 = vadd.f32 %v692_v12, %v656_v21  ;;  %v775_v53 = vld [vmem:[#allocation2 + $0x30] sm:$0xff]  ;;  %v806_v12 = vld [vmem:[#allocation2 + $0x128] sm:$0xff]  ;;  %v948_v21 = vld [vmem:[#allocation2 + $0x598] sm:$0xff] }
 0x1f3   :  { %v803_v54 = vld [vmem:[#allocation2 + $0x110] sm:$0xff] }
 0x1f4   :  { %v5898_v16 = vadd.f32 %v5860_v19, %v742_v0  ;;  %v805_v0 = vld [vmem:[#allocation2 + $0x120] sm:$0xff]  ;;  %v947_v17 = vld [vmem:[#allocation2 + $0x590] sm:$0xff] }
 0x1f7   :  { %v555_v24 = vpop.f32.mrf.mxu1 }
 0x1f8   :  { %v663_v51 = vmul.f32 %v626_v20, %v555_v24 }
 0x1fa   :  { %v743_v59 = vadd.f32 %v706_v33, %v663_v51  ;;  %v5939_v33 = vadd.f32 %v5860_v19, %v736_v28  ;;  %v802_v51 = vld [vmem:[#allocation2 + $0x108] sm:$0xff] }
 0x1fb   :  { %v950_v28 = vld [vmem:[#allocation2 + $0x5a8] sm:$0xff] }
 0x1ff   :  { %v558_v27 = vpop.f32.mrf.mxu1 }
 0x200   :  { %v664_v11 = vmul.f32 %v631_v15, %v558_v27  ;;  %v740_v15 = vadd.f32 %v700_v29, %v660_v63  ;;  %v777_v63 = vld [vmem:[#allocation2 + $0x40] sm:$0xff] }
 0x202   :  { %v744_v55 = vadd.f32 %v708_v34, %v664_v11  ;;  %v5912_v24 = vadd.f32 %v5860_v19, %v740_v15  ;;  %v801_v11 = vld [vmem:[#allocation2 + $0x100] sm:$0xff]  ;;  %v779_v15 = vld [vmem:[#allocation2 + $0x50] sm:$0xff] }
 0x204   :  { %v5884_v2 = vadd.f32 %v5860_v19, %v744_v55  ;;  %v943_v55 = vld [vmem:[#allocation2 + $0x570] sm:$0xff] }
 0x207   :  { %v561_v31 = vpop.f32.mrf.mxu1 }
 0x208   :  { %v665_v41 = vmul.f32 %v636_v13, %v561_v31  ;;  %v5891_v13 = vadd.f32 %v5860_v19, %v743_v59  ;;  %v5933_v31 = vadd.f32 %v5860_v19, %v737_v25  ;;  %v944_v59 = vld [vmem:[#allocation2 + $0x578] sm:$0xff]  ;;  %v949_v25 = vld [vmem:[#allocation2 + $0x5a0] sm:$0xff] }
 0x20a   :  { %v745_v52 = vadd.f32 %v710_v32, %v665_v41  ;;  %v800_v41 = vld [vmem:[#allocation2 + $0xf8] sm:$0xff] }
 0x20c   :  { %v5878_v62 = vadd.f32 %v5860_v19, %v745_v52  ;;  %v942_v52 = vld [vmem:[#allocation2 + $0x568] sm:$0xff] }
 0x20f   :  { %v564_v35 = vpop.f32.mrf.mxu1 }
 0x210   :  { %v666_v47 = vmul.f32 %v641_v10, %v564_v35  ;;  %v741_v10 = vadd.f32 %v702_v30, %v661_v58  ;;  %v804_v58 = vld [vmem:[#allocation2 + $0x118] sm:$0xff] }
 0x212   :  { %v746_v23 = vadd.f32 %v712_v38, %v666_v47  ;;  %v5905_v1 = vadd.f32 %v5860_v19, %v741_v10  ;;  %v799_v47 = vld [vmem:[#allocation2 + $0xf0] sm:$0xff]  ;;  %v778_v10 = vld [vmem:[#allocation2 + $0x48] sm:$0xff] }
 0x214   :  { %v5872_v56 = vadd.f32 %v5860_v19, %v746_v23  ;;  %v941_v23 = vld [vmem:[#allocation2 + $0x560] sm:$0xff] }
 0x217   :  { %v567_v36 = vpop.f32.mrf.mxu1 }
 0x218   :  { %v667_v43 = vmul.f32 %v646_v14, %v567_v36  ;;  %v658_v14 = vmul.f32 %v601_v26, %v5853_v7  ;;  %v690_v7 = vpop.permute.xlu1 %689  ;;  %v797_v36 = vld [vmem:[#allocation2 + $0xe0] sm:$0xff] }
 0x219   :  { %v735_v30 = vadd.f32 %v690_v7, %v655_v6  ;;  %v808_v7 = vld [vmem:[#allocation2 + $0x138] sm:$0xff]  ;;  %v809_v6 = vld [vmem:[#allocation2 + $0x140] sm:$0xff] }
 0x21a   :  { %v747_v18 = vadd.f32 %v714_v37, %v667_v43  ;;  %v798_v43 = vld [vmem:[#allocation2 + $0xe8] sm:$0xff] }
 0x21b   :  { %v5945_v35 = vadd.f32 %v5860_v19, %v735_v30  ;;  %v811_v30 = vld [vmem:[#allocation2 + $0x150] sm:$0xff] }
 0x21c   :  { %v5866_v61 = vadd.f32 %v5860_v19, %v747_v18  ;;  %v940_v18 = vld [vmem:[#allocation2 + $0x558] sm:$0xff] }
 0x21f   :  { %v570_v44 = vpop.f32.mrf.mxu1 }
 0x220   :  { %v668_v40 = vmul.f32 %v651_v9, %v570_v44  ;;  %v659_v9 = vmul.f32 %v606_v22, %v5855_v8  ;;  %v581_v8 = vpop.permute.xlu0 %580  ;;  %v738_v22 = vadd.f32 %v696_v42, %v658_v14  ;;  %v686_v3 = vpop.permute.xlu1 %685  ;;  %v938_v42 = vld [vmem:[#allocation2 + $0x548] sm:$0xff]  ;;  %v771_v44 = vld [vmem:[#allocation2 + $0x10] sm:$0xff] }
 0x221   :  { %v654_v27 = vmul.f32 %v581_v8, %v5845_v4  ;;  %v733_v34 = vadd.f32 %v686_v3, %v653_v5  ;;  %v946_v14 = vld [vmem:[#allocation2 + $0x588] sm:$0xff]  ;;  %v807_v8 = vld [vmem:[#allocation2 + $0x130] sm:$0xff]  ;;  %v812_v3 = vld [vmem:[#allocation2 + $0x158] sm:$0xff] }
 0x222   :  { %v748_v48 = vadd.f32 %v716_v39, %v668_v40  ;;  %v739_v20 = vadd.f32 %v698_v45, %v659_v9  ;;  %v5926_v29 = vadd.f32 %v5860_v19, %v738_v22  ;;  %v769_v39 = vld [vmem:[#allocation2] sm:$0xff]  ;;  %v939_v40 = vld [vmem:[#allocation2 + $0x550] sm:$0xff] }
 0x223   :  { %v5957_v38 = vadd.f32 %v5860_v19, %v733_v34  ;;  %v937_v45 = vld [vmem:[#allocation2 + $0x540] sm:$0xff]  ;;  %v783_v5 = vld [vmem:[#allocation2 + $0x70] sm:$0xff]  ;;  %v952_v34 = vld [vmem:[#allocation2 + $0x5b8] sm:$0xff] }
 0x224   :  { %v5863_v50 = vadd.f32 %v5860_v19, %v748_v48  ;;  %v5919_v26 = vadd.f32 %v5860_v19, %v739_v20  ;;  %v773_v48 = vld [vmem:[#allocation2 + $0x20] sm:$0xff]  ;;  %v780_v20 = vld [vmem:[#allocation2 + $0x58] sm:$0xff] }
 0x225   :  { %v945_v9 = vld [vmem:[#allocation2 + $0x580] sm:$0xff] }
 0x226   :  { %977 = vmatpush.msrb.mxu1 %v5863_v50  ;;  %4772 = vmatpush.msra.mxu2 %v5863_v50  ;;  %v781_v22 = vld [vmem:[#allocation2 + $0x60] sm:$0xff] }
 0x227   :  { %4773 = vmatpush.msra.mxu3 %v5863_v50 }
 0x228   :  { %978 = vmatpush.msrb.mxu1 %v5866_v61  ;;  %4774 = vmatpush.msra.mxu2 %v5866_v61  ;;  %v688_v4 = vpop.permute.xlu0 %687 }
 0x229   :  { %4775 = vmatpush.msra.mxu3 %v5866_v61  ;;  %v734_v32 = vadd.f32 %v688_v4, %v654_v27  ;;  %v810_v27 = vld [vmem:[#allocation2 + $0x148] sm:$0xff]  ;;  %v951_v4 = vld [vmem:[#allocation2 + $0x5b0] sm:$0xff] }
 0x22a   :  { %979 = vmatpush.msrb.mxu1 %v5872_v56  ;;  %4776 = vmatpush.msra.mxu2 %v5872_v56 }
 0x22b   :  { %4777 = vmatpush.msra.mxu3 %v5872_v56  ;;  %v5951_v37 = vadd.f32 %v5860_v19, %v734_v32  ;;  %v772_v19 = vld [vmem:[#allocation2 + $0x18] sm:$0xff] }
 0x22c   :  { %980 = vmatpush.msrb.mxu1 %v5878_v62  ;;  %4778 = vmatpush.msra.mxu2 %v5878_v62  ;;  %v784_v32 = vld [vmem:[#allocation2 + $0x78] sm:$0xff] }
 0x22d   :  { %4779 = vmatpush.msra.mxu3 %v5878_v62 }
 0x22e   :  { %981 = vmatpush.msrb.mxu1 %v5884_v2  ;;  %4780 = vmatpush.msra.mxu2 %v5884_v2 }
 0x22f   :  { %4781 = vmatpush.msra.mxu3 %v5884_v2 }
 0x230   :  { %982 = vmatpush.msrb.mxu1 %v5891_v13  ;;  %4782 = vmatpush.msra.mxu2 %v5891_v13 }
 0x231   :  { %4783 = vmatpush.msra.mxu3 %v5891_v13 }
 0x232   :  { %983 = vmatpush.msrb.mxu1 %v5898_v16  ;;  %4784 = vmatpush.msra.mxu2 %v5898_v16 }
 0x233   :  { %4785 = vmatpush.msra.mxu3 %v5898_v16 }
 0x234   :  { %984 = vmatpush.msrb.mxu1 %v5905_v1  ;;  %4786 = vmatpush.msra.mxu2 %v5905_v1 }
 0x235   :  { %4787 = vmatpush.msra.mxu3 %v5905_v1 }
 0x236   :  { %985 = vmatpush.msrb.mxu1 %v5912_v24  ;;  %4788 = vmatpush.msra.mxu2 %v5912_v24 }
 0x237   :  { %4789 = vmatpush.msra.mxu3 %v5912_v24 }
 0x238   :  { %986 = vmatpush.msrb.mxu1 %v5919_v26  ;;  %4790 = vmatpush.msra.mxu2 %v5919_v26 }
 0x239   :  { %4791 = vmatpush.msra.mxu3 %v5919_v26 }
 0x23a   :  { %987 = vmatpush.msrb.mxu1 %v5926_v29  ;;  %4792 = vmatpush.msra.mxu2 %v5926_v29 }
 0x23b   :  { %4793 = vmatpush.msra.mxu3 %v5926_v29 }
 0x23c   :  { %988 = vmatpush.msrb.mxu1 %v5933_v31  ;;  %4794 = vmatpush.msra.mxu2 %v5933_v31 }
 0x23d   :  { %4795 = vmatpush.msra.mxu3 %v5933_v31 }
 0x23e   :  { %989 = vmatpush.msrb.mxu1 %v5939_v33  ;;  %4796 = vmatpush.msra.mxu2 %v5939_v33 }
 0x23f   :  { %4797 = vmatpush.msra.mxu3 %v5939_v33 }
 0x240   :  { %990 = vmatpush.msrb.mxu1 %v5945_v35  ;;  %4798 = vmatpush.msra.mxu2 %v5945_v35 }
 0x241   :  { %4799 = vmatpush.msra.mxu3 %v5945_v35 }
 0x242   :  { %991 = vmatpush.msrb.mxu1 %v5951_v37  ;;  %4800 = vmatpush.msra.mxu2 %v5951_v37 }
 0x243   :  { %4801 = vmatpush.msra.mxu3 %v5951_v37 }
 0x244   :  { %992 = vmatpush.msrb.mxu1 %v5957_v38  ;;  %4802 = vmatpush.msra.mxu2 %v5957_v38 }
 0x245   :  { %4803 = vmatpush.msra.mxu3 %v5957_v38  ;;  %993 = vmatmul.f32.vlgmr.msrb.gmra.mxu1 %v769_v39 }
 0x246   :  { %1077 = vmatmul.f32.vlgmr.msra.gmra.mxu2 %v797_v36  ;;  %1497 = vmatmul.f32.vlgmr.msra.gmra.mxu3 %v937_v45  ;;  %v785_v36 = vld [vmem:[#allocation2 + $0x80] sm:$0xff] }
 0x247   :  { %v813_v45 = vld [vmem:[#allocation2 + $0x160] sm:$0xff] }
 0x24d   :  { %996 = vmatmul.f32.gmra.mxu1 %v770_v46  ;;  %v953_v46 = vld [vmem:[#allocation2 + $0x5c0] sm:$0xff] }
 0x24e   :  { %1080 = vmatmul.f32.gmra.mxu2 %v798_v43  ;;  %1500 = vmatmul.f32.gmra.mxu3 %v938_v42 }
 0x255   :  { %999 = vmatmul.f32.gmra.mxu1 %v771_v44 }
 0x256   :  { %1083 = vmatmul.f32.gmra.mxu2 %v799_v47  ;;  %1503 = vmatmul.f32.gmra.mxu3 %v939_v40  ;;  %v786_v47 = vld [vmem:[#allocation2 + $0x88] sm:$0xff] }
 0x257   :  { %v814_v40 = vld [vmem:[#allocation2 + $0x168] sm:$0xff] }
 0x25d   :  { %1002 = vmatmul.f32.gmra.mxu1 %v772_v19  ;;  %v954_v19 = vld [vmem:[#allocation2 + $0x5c8] sm:$0xff] }
 0x25e   :  { %1086 = vmatmul.f32.gmra.mxu2 %v800_v41  ;;  %1506 = vmatmul.f32.gmra.mxu3 %v940_v18 }
 0x265   :  { %1005 = vmatmul.f32.gmra.mxu1 %v773_v48 }
 0x266   :  { %1089 = vmatmul.f32.gmra.mxu2 %v801_v11  ;;  %1509 = vmatmul.f32.gmra.mxu3 %v941_v23  ;;  %v787_v23 = vld [vmem:[#allocation2 + $0x90] sm:$0xff] }
 0x26d   :  { %1008 = vmatmul.f32.gmra.mxu1 %v774_v49  ;;  %v815_v49 = vld [vmem:[#allocation2 + $0x170] sm:$0xff] }
 0x26e   :  { %1092 = vmatmul.f32.gmra.mxu2 %v802_v51  ;;  %1512 = vmatmul.f32.gmra.mxu3 %v942_v52  ;;  %v955_v51 = vld [vmem:[#allocation2 + $0x5d0] sm:$0xff] }
 0x275   :  { %1011 = vmatmul.f32.gmra.mxu1 %v775_v53 }
 0x276   :  { %1095 = vmatmul.f32.gmra.mxu2 %v803_v54  ;;  %1515 = vmatmul.f32.gmra.mxu3 %v943_v55 }
 0x27d   :  { %1014 = vmatmul.f32.gmra.mxu1 %v776_v57  ;;  %v788_v57 = vld [vmem:[#allocation2 + $0x98] sm:$0xff] }
 0x27e   :  { %1098 = vmatmul.f32.gmra.mxu2 %v804_v58  ;;  %1518 = vmatmul.f32.gmra.mxu3 %v944_v59  ;;  %v816_v58 = vld [vmem:[#allocation2 + $0x178] sm:$0xff] }
 0x27f   :  { %v956_v59 = vld [vmem:[#allocation2 + $0x5d8] sm:$0xff] }
 0x285   :  { %1017 = vmatmul.f32.gmra.mxu1 %v777_v63 }
 0x286   :  { %1101 = vmatmul.f32.gmra.mxu2 %v805_v0  ;;  %1521 = vmatmul.f32.gmra.mxu3 %v945_v9 }
 0x28d   :  { %1020 = vmatmul.f32.gmra.mxu1 %v778_v10 }
 0x28e   :  { %1104 = vmatmul.f32.gmra.mxu2 %v806_v12  ;;  %1524 = vmatmul.f32.gmra.mxu3 %v946_v14  ;;  %v789_v14 = vld [vmem:[#allocation2 + $0xa0] sm:$0xff] }
 0x295   :  { %1023 = vmatmul.f32.gmra.mxu1 %v779_v15  ;;  %v817_v15 = vld [vmem:[#allocation2 + $0x180] sm:$0xff] }
 0x296   :  { %1107 = vmatmul.f32.gmra.mxu2 %v807_v8  ;;  %1527 = vmatmul.f32.gmra.mxu3 %v947_v17  ;;  %v957_v8 = vld [vmem:[#allocation2 + $0x5e0] sm:$0xff] }
 0x29d   :  { %1026 = vmatmul.f32.gmra.mxu1 %v780_v20 }
 0x29e   :  { %1110 = vmatmul.f32.gmra.mxu2 %v808_v7  ;;  %1530 = vmatmul.f32.gmra.mxu3 %v948_v21  ;;  %v790_v21 = vld [vmem:[#allocation2 + $0xa8] sm:$0xff] }
 0x2a5   :  { %1029 = vmatmul.f32.gmra.mxu1 %v781_v22  ;;  %v818_v22 = vld [vmem:[#allocation2 + $0x188] sm:$0xff] }
 0x2a6   :  { %1113 = vmatmul.f32.gmra.mxu2 %v809_v6  ;;  %1533 = vmatmul.f32.gmra.mxu3 %v949_v25  ;;  %v958_v6 = vld [vmem:[#allocation2 + $0x5e8] sm:$0xff] }
 0x2ad   :  { %1032 = vmatmul.f32.gmra.mxu1 %v782_v60 }
 0x2ae   :  { %1116 = vmatmul.f32.gmra.mxu2 %v810_v27  ;;  %1536 = vmatmul.f32.gmra.mxu3 %v950_v28 }
 0x2b5   :  { %1035 = vmatmul.f32.gmra.mxu1 %v783_v5 }
 0x2b6   :  { %1119 = vmatmul.f32.gmra.mxu2 %v811_v30  ;;  %1539 = vmatmul.f32.gmra.mxu3 %v951_v4  ;;  %v791_v30 = vld [vmem:[#allocation2 + $0xb0] sm:$0xff] }
 0x2b7   :  { %v819_v4 = vld [vmem:[#allocation2 + $0x190] sm:$0xff] }
 0x2bd   :  { %1038 = vmatmul.f32.gmra.mxu1 %v784_v32  ;;  %v959_v32 = vld [vmem:[#allocation2 + $0x5f0] sm:$0xff] }
 0x2be   :  { %1122 = vmatmul.f32.gmra.mxu2 %v812_v3  ;;  %1542 = vmatmul.f32.gmra.mxu3 %v952_v34 }
 0x2c2   :  { %v994_v39 = vpop.f32.mrf.mxu1 }
 0x2c5   :  { %1041 = vmatmul.f32.gmra.mxu1 %v785_v36  ;;  %v792_v36 = vld [vmem:[#allocation2 + $0xb8] sm:$0xff] }
 0x2c6   :  { %1125 = vmatmul.f32.gmra.mxu2 %v813_v45  ;;  %1545 = vmatmul.f32.gmra.mxu3 %v953_v46  ;;  %v820_v45 = vld [vmem:[#allocation2 + $0x198] sm:$0xff] }
 0x2c7   :  { %v960_v46 = vld [vmem:[#allocation2 + $0x5f8] sm:$0xff] }
 0x2c9   :  { %v5965_v43 = vpop.f32.mrf.mxu2  ;;  %v5967_v42 = vpop.f32.mrf.mxu3 }
 0x2ca   :  { %v997_v44 = vpop.f32.mrf.mxu1 }
 0x2cb   :  { %v4832_v41 = vpack.i.bf16 %v997_v44, %v994_v39 }
 0x2cd   :  { %1044 = vmatmul.f32.gmra.mxu1 %v786_v47  ;;  %4833 = vrot.lane.b32.xlu2 %v4832_v41, %s5352_s30 }
 0x2ce   :  { %1128 = vmatmul.f32.gmra.mxu2 %v814_v40  ;;  %1548 = vmatmul.f32.gmra.mxu3 %v954_v19 }
 0x2d1   :  { %v5970_v18 = vpop.f32.mrf.mxu2  ;;  %v5972_v48 = vpop.f32.mrf.mxu3 }
 0x2d2   :  { %v1000_v11 = vpop.f32.mrf.mxu1 }
 0x2d5   :  { %1047 = vmatmul.f32.gmra.mxu1 %v787_v23  ;;  %v821_v23 = vld [vmem:[#allocation2 + $0x1a0] sm:$0xff] }
 0x2d6   :  { %1131 = vmatmul.f32.gmra.mxu2 %v815_v49  ;;  %1551 = vmatmul.f32.gmra.mxu3 %v955_v51  ;;  %v961_v49 = vld [vmem:[#allocation2 + $0x600] sm:$0xff] }
 0x2d9   :  { %v5974_v52 = vpop.f32.mrf.mxu2  ;;  %v5976_v53 = vpop.f32.mrf.mxu3 }
 0x2da   :  { %v4907_v54 = vpack.i.bf16 %v5965_v43, %v5974_v52  ;;  %v1003_v55 = vpop.f32.mrf.mxu1  ;;  %v968_v52 = vld [vmem:[#allocation2 + $0x638] sm:$0xff] }
 0x2db   :  { %v4847_v63 = vpack.i.bf16 %v1003_v55, %v1000_v11  ;;  %v793_v11 = vld [vmem:[#allocation2 + $0xc0] sm:$0xff] }
 0x2dd   :  { %1050 = vmatmul.f32.gmra.mxu1 %v788_v57  ;;  %4848 = vrot.lane.b32.xlu2 %v4847_v63, %s5352_s30 }
 0x2de   :  { %1134 = vmatmul.f32.gmra.mxu2 %v816_v58  ;;  %1554 = vmatmul.f32.gmra.mxu3 %v956_v59  ;;  %v794_v58 = vld [vmem:[#allocation2 + $0xc8] sm:$0xff] }
 0x2df   :  { %v822_v59 = vld [vmem:[#allocation2 + $0x1a8] sm:$0xff] }
 0x2e1   :  { %v5981_v0 = vpop.f32.mrf.mxu2  ;;  %v5983_v9 = vpop.f32.mrf.mxu3 }
 0x2e2   :  { %v4927_v10 = vpack.i.bf16 %v5970_v18, %v5981_v0  ;;  %v1006_v12 = vpop.f32.mrf.mxu1  ;;  %v2480_v18 = vld [vmem:[#allocation4 + $0x1e0] sm:$0xff] }
 0x2e3   :  { %2692 = vmatpush.msrb.mxu0 %v2480_v18  ;;  %4804 = vmatpush.msrb.mxu3 %v2480_v18  ;;  %v839_v18 = vld [vmem:[#allocation2 + $0x230] sm:$0xff] }
 0x2e5   :  { %1053 = vmatmul.f32.gmra.mxu1 %v789_v14 }
 0x2e6   :  { %1137 = vmatmul.f32.gmra.mxu2 %v817_v15  ;;  %1557 = vmatmul.f32.gmra.mxu3 %v957_v8 }
 0x2e9   :  { %v1090_v17 = vpop.f32.mrf.mxu2  ;;  %v5987_v20 = vpop.f32.mrf.mxu3 }
 0x2ea   :  { %v1009_v7 = vpop.f32.mrf.mxu1 }
 0x2eb   :  { %v4857_v25 = vpack.i.bf16 %v1009_v7, %v1006_v12  ;;  %v823_v7 = vld [vmem:[#allocation2 + $0x1b0] sm:$0xff] }
 0x2ed   :  { %1056 = vmatmul.f32.gmra.mxu1 %v790_v21  ;;  %4858 = vrot.lane.b32.xlu2 %v4857_v25, %s5352_s30  ;;  %v796_v25 = vld [vmem:[#allocation2 + $0xd8] sm:$0xff] }
 0x2ee   :  { %1140 = vmatmul.f32.gmra.mxu2 %v818_v22  ;;  %1560 = vmatmul.f32.gmra.mxu3 %v958_v6 }
 0x2f1   :  { %v1093_v60 = vpop.f32.mrf.mxu2  ;;  %v5990_v27 = vpop.f32.mrf.mxu3 }
 0x2f2   :  { %8501 = vst [vmem:[#allocation8_spill] sm:$0xff] %v5990_v27  ;;  %v4842_v28 = vpack.i.bf16 %v1093_v60, %v1090_v17  ;;  %v1012_v5 = vpop.f32.mrf.mxu1  ;;  %v795_v17 = vld [vmem:[#allocation2 + $0xd0] sm:$0xff]  ;;  %v824_v60 = vld [vmem:[#allocation2 + $0x1b8] sm:$0xff]  ;;  %v897_v27 = vld [vmem:[#allocation2 + $0x400] sm:$0xff] }
 0x2f4   :  { %4843 = vrot.lane.b32.xlu1 %v4842_v28, %s5354_s28 }
 0x2f5   :  { %1059 = vmatmul.f32.gmra.mxu1 %v791_v30 }
 0x2f6   :  { %1143 = vmatmul.f32.gmra.mxu2 %v819_v4  ;;  %1563 = vmatmul.f32.gmra.mxu3 %v959_v32 }
 0x2f9   :  { %v1096_v3 = vpop.f32.mrf.mxu2  ;;  %v5993_v34 = vpop.f32.mrf.mxu3 }
 0x2fa   :  { %8502 = vst [vmem:[#allocation9_spill] sm:$0xff] %v5993_v34  ;;  %v1015_v39 = vpop.f32.mrf.mxu1  ;;  %v896_v34 = vld [vmem:[#allocation2 + $0x3f8] sm:$0xff] }
 0x2fb   :  { %v4867_v44 = vpack.i.bf16 %v1015_v39, %v1012_v5 }
 0x2fd   :  { %1062 = vmatmul.f32.gmra.mxu1 %v792_v36  ;;  %4868 = vrot.lane.b32.xlu2 %v4867_v44, %s5352_s30 }
 0x2fe   :  { %1146 = vmatmul.f32.gmra.mxu2 %v820_v45  ;;  %1566 = vmatmul.f32.gmra.mxu3 %v960_v46  ;;  %v826_v46 = vld [vmem:[#allocation2 + $0x1c8] sm:$0xff] }
 0x301   :  { %v1099_v47 = vpop.f32.mrf.mxu2  ;;  %v5996_v40 = vpop.f32.mrf.mxu3 }
 0x302   :  { %8503 = vst [vmem:[#allocation10_spill] sm:$0xff] %v5996_v40  ;;  %v4852_v19 = vpack.i.bf16 %v1099_v47, %v1096_v3  ;;  %v1018_v41 = vpop.f32.mrf.mxu1  ;;  %v825_v3 = vld [vmem:[#allocation2 + $0x1c0] sm:$0xff] }
 0x303   :  { %v893_v40 = vld [vmem:[#allocation2 + $0x3e0] sm:$0xff] }
 0x304   :  { %4853 = vrot.lane.b32.xlu1 %v4852_v19, %s5354_s28 }
 0x305   :  { %1065 = vmatmul.f32.gmra.mxu1 %v793_v11  ;;  %v827_v11 = vld [vmem:[#allocation2 + $0x1d0] sm:$0xff] }
 0x306   :  { %1149 = vmatmul.f32.gmra.mxu2 %v821_v23  ;;  %1569 = vmatmul.f32.gmra.mxu3 %v961_v49 }
 0x309   :  { %v1102_v51 = vpop.f32.mrf.mxu2  ;;  %v5999_v55 = vpop.f32.mrf.mxu3 }
 0x30a   :  { %v1021_v57 = vpop.f32.mrf.mxu1 }
 0x30b   :  { %v4877_v63 = vpack.i.bf16 %v1021_v57, %v1018_v41 }
 0x30d   :  { %1068 = vmatmul.f32.gmra.mxu1 %v794_v58  ;;  %4878 = vrot.lane.b32.xlu2 %v4877_v63, %s5352_s30  ;;  %v828_v58 = vld [vmem:[#allocation2 + $0x1d8] sm:$0xff] }
 0x30e   :  { %1152 = vmatmul.f32.gmra.mxu2 %v822_v59 }
 0x311   :  { %v1105_v12 = vpop.f32.mrf.mxu2  ;;  %v6002_v14 = vpop.f32.mrf.mxu3 }
 0x312   :  { %v4862_v15 = vpack.i.bf16 %v1105_v12, %v1102_v51  ;;  %v1024_v8 = vpop.f32.mrf.mxu1 }
 0x314   :  { %4863 = vrot.lane.b32.xlu1 %v4862_v15, %s5354_s28 }
 0x315   :  { %1071 = vmatmul.f32.gmra.mxu1 %v795_v17  ;;  %v829_v17 = vld [vmem:[#allocation2 + $0x1e0] sm:$0xff] }
 0x316   :  { %1155 = vmatmul.f32.gmra.mxu2 %v823_v7  ;;  %v962_v7 = vld [vmem:[#allocation2 + $0x608] sm:$0xff] }
 0x317   :  { %1572 = vmatmul.f32.gmra.mxu3 %v962_v7 }
 0x319   :  { %v1108_v21 = vpop.f32.mrf.mxu2  ;;  %v6005_v22 = vpop.f32.mrf.mxu3 }
 0x31a   :  { %v1027_v6 = vpop.f32.mrf.mxu1 }
 0x31b   :  { %v4887_v28 = vpack.i.bf16 %v1027_v6, %v1024_v8 }
 0x31d   :  { %1074 = vmatmul.f32.gmra.mxu1 %v796_v25  ;;  %4888 = vrot.lane.b32.xlu2 %v4887_v28, %s5352_s30  ;;  %v830_v28 = vld [vmem:[#allocation2 + $0x1e8] sm:$0xff] }
 0x31e   :  { %1158 = vmatmul.f32.gmra.mxu2 %v824_v60 }
 0x321   :  { %v1111_v5 = vpop.f32.mrf.mxu2  ;;  %v6008_v30 = vpop.f32.mrf.mxu3 }
 0x322   :  { %v4872_v4 = vpack.i.bf16 %v1111_v5, %v1108_v21  ;;  %v1030_v32 = vpop.f32.mrf.mxu1  ;;  %v963_v5 = vld [vmem:[#allocation2 + $0x610] sm:$0xff] }
 0x323   :  { %1575 = vmatmul.f32.gmra.mxu3 %v963_v5 }
 0x324   :  { %4873 = vrot.lane.b32.xlu1 %v4872_v4, %s5354_s28 }
 0x326   :  { %1161 = vmatmul.f32.gmra.mxu2 %v825_v3 }
 0x329   :  { %v1114_v39 = vpop.f32.mrf.mxu2  ;;  %v6011_v36 = vpop.f32.mrf.mxu3 }
 0x32a   :  { %v1033_v45 = vpop.f32.mrf.mxu1 }
 0x32e   :  { %1164 = vmatmul.f32.gmra.mxu2 %v826_v46 }
 0x331   :  { %v1117_v44 = vpop.f32.mrf.mxu2  ;;  %v6013_v47 = vpop.f32.mrf.mxu3 }
 0x332   :  { %v4882_v19 = vpack.i.bf16 %v1117_v44, %v1114_v39  ;;  %v1036_v41 = vpop.f32.mrf.mxu1  ;;  %v964_v39 = vld [vmem:[#allocation2 + $0x618] sm:$0xff] }
 0x333   :  { %v4897_v23 = vpack.i.bf16 %v1030_v32, %v1036_v41  ;;  %1578 = vmatmul.f32.gmra.mxu3 %v964_v39 }
 0x334   :  { %4883 = vrot.lane.b32.xlu1 %v4882_v19, %s5354_s28 }
 0x335   :  { %4898 = vrot.lane.b32.xlu2 %v4897_v23, %s5352_s30  ;;  %v832_v23 = vld [vmem:[#allocation2 + $0x1f8] sm:$0xff] }
 0x336   :  { %1167 = vmatmul.f32.gmra.mxu2 %v827_v11 }
 0x339   :  { %v1120_v49 = vpop.f32.mrf.mxu2  ;;  %v6017_v51 = vpop.f32.mrf.mxu3 }
 0x33a   :  { %8504 = vst [vmem:[#allocation11_spill] sm:$0xff] %v6017_v51  ;;  %v1039_v57 = vpop.f32.mrf.mxu1  ;;  %v889_v51 = vld [vmem:[#allocation2 + $0x3c0] sm:$0xff] }
 0x33b   :  { %v4917_v59 = vpack.i.bf16 %v1033_v45, %v1039_v57  ;;  %v831_v45 = vld [vmem:[#allocation2 + $0x1f0] sm:$0xff] }
 0x33d   :  { %4918 = vrot.lane.b32.xlu2 %v4917_v59, %s5352_s30 }
 0x33e   :  { %1170 = vmatmul.f32.gmra.mxu2 %v828_v58 }
 0x341   :  { %v1123_v63 = vpop.f32.mrf.mxu2  ;;  %v6020_v12 = vpop.f32.mrf.mxu3 }
 0x342   :  { %8505 = vst [vmem:[#allocation12_spill] sm:$0xff] %v6020_v12  ;;  %v4892_v15 = vpack.i.bf16 %v1123_v63, %v1120_v49  ;;  %v1042_v8 = vpop.f32.mrf.mxu1  ;;  %v965_v49 = vld [vmem:[#allocation2 + $0x620] sm:$0xff]  ;;  %v887_v12 = vld [vmem:[#allocation2 + $0x3b0] sm:$0xff] }
 0x343   :  { %1581 = vmatmul.f32.gmra.mxu3 %v965_v49  ;;  %v837_v49 = vld [vmem:[#allocation2 + $0x220] sm:$0xff] }
 0x344   :  { %4893 = vrot.lane.b32.xlu1 %v4892_v15, %s5354_s28  ;;  %v966_v15 = vld [vmem:[#allocation2 + $0x628] sm:$0xff] }
 0x346   :  { %1173 = vmatmul.f32.gmra.mxu2 %v829_v17 }
 0x349   :  { %v1126_v21 = vpop.f32.mrf.mxu2  ;;  %v6023_v6 = vpop.f32.mrf.mxu3 }
 0x34a   :  { %8506 = vst [vmem:[#allocation13_spill] sm:$0xff] %v6023_v6  ;;  %v1045_v25 = vpop.f32.mrf.mxu1  ;;  %v885_v6 = vld [vmem:[#allocation2 + $0x3a0] sm:$0xff] }
 0x34b   :  { %v4837_v60 = vpack.i.bf16 %v1045_v25, %v1042_v8  ;;  %v833_v8 = vld [vmem:[#allocation2 + $0x200] sm:$0xff]  ;;  %1584 = vmatmul.f32.gmra.mxu3 %v966_v15 }
 0x34c   :  { %v2472_v15 = vld [vmem:[#allocation4 + $0x1a0] sm:$0xff] }
 0x34d   :  { %4838 = vrot.lane.b32.xlu0 %v4837_v60, %s5355_s4  ;;  %v834_v60 = vld [vmem:[#allocation2 + $0x208] sm:$0xff] }
 0x34e   :  { %1176 = vmatmul.f32.gmra.mxu2 %v830_v28  ;;  %v967_v28 = vld [vmem:[#allocation2 + $0x630] sm:$0xff] }
 0x351   :  { %v1129_v4 = vpop.f32.mrf.mxu2  ;;  %v6026_v32 = vpop.f32.mrf.mxu3 }
 0x352   :  { %8507 = vst [vmem:[#allocation14_spill] sm:$0xff] %v6026_v32  ;;  %v1048_v3 = vpop.f32.mrf.mxu1  ;;  %v882_v32 = vld [vmem:[#allocation2 + $0x388] sm:$0xff] }
 0x353   :  { %1587 = vmatmul.f32.gmra.mxu3 %v967_v28  ;;  %v2464_v28 = vld [vmem:[#allocation4 + $0x160] sm:$0xff] }
 0x356   :  { %1179 = vmatmul.f32.gmra.mxu2 %v831_v45 }
 0x359   :  { %v1132_v46 = vpop.f32.mrf.mxu2  ;;  %v6028_v44 = vpop.f32.mrf.mxu3 }
 0x35a   :  { %8508 = vst [vmem:[#allocation15_spill] sm:$0xff] %v6028_v44  ;;  %v4912_v19 = vpack.i.bf16 %v1126_v21, %v1132_v46  ;;  %v1051_v41 = vpop.f32.mrf.mxu1 }
 0x35b   :  { %v4902_v11 = vpack.i.bf16 %v1051_v41, %v1048_v3  ;;  %1590 = vmatmul.f32.gmra.mxu3 %v968_v52  ;;  %v969_v41 = vld [vmem:[#allocation2 + $0x640] sm:$0xff] }
 0x35c   :  { %4913 = vrot.lane.b32.xlu1 %v4912_v19, %s5354_s28  ;;  %v836_v19 = vld [vmem:[#allocation2 + $0x218] sm:$0xff]  ;;  %v2460_v52 = vld [vmem:[#allocation4 + $0x140] sm:$0xff] }
 0x35d   :  { %4903 = vrot.lane.b32.xlu0 %v4902_v11, %s5355_s4 }
 0x35e   :  { %1182 = vmatmul.f32.gmra.mxu2 %v832_v23 }
 0x361   :  { %v1135_v57 = vpop.f32.mrf.mxu2  ;;  %v6032_v58 = vpop.f32.mrf.mxu3 }
 0x362   :  { %8509 = vst [vmem:[#allocation16_spill] sm:$0xff] %v6032_v58  ;;  %v4932_v59 = vpack.i.bf16 %v1129_v4, %v1135_v57  ;;  %v1054_v63 = vpop.f32.mrf.mxu1  ;;  %v2476_v57 = vld [vmem:[#allocation4 + $0x1c0] sm:$0xff] }
 0x363   :  { %1593 = vmatmul.f32.gmra.mxu3 %v969_v41  ;;  %2693 = vmatpush.msrb.mxu0 %v2476_v57  ;;  %v972_v41 = vld [vmem:[#allocation2 + $0x658] sm:$0xff] }
 0x364   :  { %4933 = vrot.lane.b32.xlu1 %v4932_v59, %s5354_s28  ;;  %4805 = vmatpush.msrb.mxu3 %v2476_v57  ;;  %v2440_v57 = vld [vmem:[#allocation4 + $0xa0] sm:$0xff] }
 0x365   :  { %4908 = vrot.lane.b32.xlu0 %v4907_v54, %s5355_s4  ;;  %v835_v54 = vld [vmem:[#allocation2 + $0x210] sm:$0xff]  ;;  %2694 = vmatpush.msrb.mxu0 %v2472_v15 }
 0x366   :  { %1185 = vmatmul.f32.gmra.mxu2 %v833_v8  ;;  %v2468_v8 = vld [vmem:[#allocation4 + $0x180] sm:$0xff]  ;;  %4806 = vmatpush.msrb.mxu3 %v2472_v15 }
 0x367   :  { %2695 = vmatpush.msrb.mxu0 %v2468_v8 }
 0x368   :  { %4807 = vmatpush.msrb.mxu3 %v2468_v8  ;;  %v973_v8 = vld [vmem:[#allocation2 + $0x660] sm:$0xff] }
 0x369   :  { %v6039_v17 = vpop.f32.mrf.mxu2  ;;  %v6041_v7 = vpop.f32.mrf.mxu3  ;;  %2696 = vmatpush.msrb.mxu0 %v2464_v28 }
 0x36a   :  { %8510 = vst [vmem:[#allocation17_spill] sm:$0xff] %v6041_v7  ;;  %v1057_v21 = vpop.f32.mrf.mxu1  ;;  %4808 = vmatpush.msrb.mxu3 %v2464_v28  ;;  %v2428_v28 = vld [vmem:[#allocation4 + $0x40] sm:$0xff] }
 0x36b   :  { %v4922_v25 = vpack.i.bf16 %v1057_v21, %v1054_v63  ;;  %2697 = vmatpush.msrb.mxu0 %v2460_v52 }
 0x36c   :  { %4809 = vmatpush.msrb.mxu3 %v2460_v52  ;;  %v2424_v52 = vld [vmem:[#allocation4 + $0x20] sm:$0xff] }
 0x36d   :  { %4923 = vrot.lane.b32.xlu0 %v4922_v25, %s5355_s4  ;;  %v971_v25 = vld [vmem:[#allocation2 + $0x650] sm:$0xff] }
 0x36e   :  { %1188 = vmatmul.f32.gmra.mxu2 %v834_v60  ;;  %v838_v60 = vld [vmem:[#allocation2 + $0x228] sm:$0xff] }
 0x371   :  { %v6044_v5 = vpop.f32.mrf.mxu2  ;;  %v6046_v4 = vpop.f32.mrf.mxu3 }
 0x372   :  { %8511 = vst [vmem:[#allocation18_spill] sm:$0xff] %v6044_v5  ;;  %v1060_v43 = vpop.f32.mrf.mxu1  ;;  %v891_v5 = vld [vmem:[#allocation2 + $0x3d0] sm:$0xff] }
 0x373   :  { %8512 = vst [vmem:[#allocation19_spill] sm:$0xff] %v6046_v4 }
 0x375   :  { %4928 = vrot.lane.b32.xlu0 %v4927_v10, %s5355_s4  ;;  %v970_v10 = vld [vmem:[#allocation2 + $0x648] sm:$0xff] }
 0x376   :  { %1191 = vmatmul.f32.gmra.mxu2 %v835_v54  ;;  %1596 = vmatmul.f32.gmra.mxu3 %v970_v10  ;;  %v2448_v10 = vld [vmem:[#allocation4 + $0xe0] sm:$0xff] }
 0x379   :  { %v6052_v3 = vpop.f32.mrf.mxu2  ;;  %v6054_v39 = vpop.f32.mrf.mxu3 }
 0x37a   :  { %8513 = vst [vmem:[#allocation20_spill] sm:$0xff] %v6052_v3  ;;  %v1063_v45 = vpop.f32.mrf.mxu1  ;;  %v890_v3 = vld [vmem:[#allocation2 + $0x3c8] sm:$0xff] }
 0x37b   :  { %8514 = vst [vmem:[#allocation21_spill] sm:$0xff] %v6054_v39  ;;  %v4937_v46 = vpack.i.bf16 %v1063_v45, %v1060_v43  ;;  %v2456_v45 = vld [vmem:[#allocation4 + $0x120] sm:$0xff] }
 0x37c   :  { %2698 = vmatpush.msrb.mxu0 %v2456_v45  ;;  %4810 = vmatpush.msrb.mxu3 %v2456_v45  ;;  %v2420_v45 = vld [vmem:[#allocation4] sm:$0xff] }
 0x37d   :  { %4938 = vrot.lane.b32.xlu0 %v4937_v46, %s5355_s4  ;;  %v2452_v46 = vld [vmem:[#allocation4 + $0x100] sm:$0xff] }
 0x37e   :  { %1194 = vmatmul.f32.gmra.mxu2 %v836_v19  ;;  %1599 = vmatmul.f32.gmra.mxu3 %v971_v25  ;;  %v840_v25 = vld [vmem:[#allocation2 + $0x238] sm:$0xff] }
 0x37f   :  { %2699 = vmatpush.msrb.mxu0 %v2452_v46  ;;  %4811 = vmatpush.msrb.mxu3 %v2452_v46  ;;  %v4834_v46 = vpop.permute.xlu2 %4833 }
 0x381   :  { %v6057_v11 = vpop.f32.mrf.mxu2  ;;  %v6059_v23 = vpop.f32.mrf.mxu3  ;;  %2700 = vmatpush.msrb.mxu0 %v2448_v10  ;;  %4812 = vmatpush.msrb.mxu3 %v2448_v10 }
 0x382   :  { %8515 = vst [vmem:[#allocation22_spill] sm:$0xff] %v6057_v11  ;;  %v1066_v0 = vpop.f32.mrf.mxu1  ;;  %v888_v11 = vld [vmem:[#allocation2 + $0x3b8] sm:$0xff] }
 0x383   :  { %8516 = vst [vmem:[#allocation23_spill] sm:$0xff] %v6059_v23 }
 0x386   :  { %1197 = vmatmul.f32.gmra.mxu2 %v837_v49  ;;  %1602 = vmatmul.f32.gmra.mxu3 %v972_v41  ;;  %v841_v41 = vld [vmem:[#allocation2 + $0x240] sm:$0xff] }
 0x389   :  { %v6061_v59 = vpop.f32.mrf.mxu2  ;;  %v1570_v63 = vpop.f32.mrf.mxu3 }
 0x38a   :  { %8517 = vst [vmem:[#allocation24_spill] sm:$0xff] %v6061_v59  ;;  %2210 = vrot.lane.b32.xlu0 %v1570_v63, %s5352_s30  ;;  %v1069_v21 = vpop.f32.mrf.mxu1  ;;  %v2436_v63 = vld [vmem:[#allocation4 + $0x80] sm:$0xff]  ;;  %v886_v59 = vld [vmem:[#allocation2 + $0x3a8] sm:$0xff] }
 0x38b   :  { %v4942_v43 = vpack.i.bf16 %v1069_v21, %v1066_v0  ;;  %v2444_v0 = vld [vmem:[#allocation4 + $0xc0] sm:$0xff] }
 0x38c   :  { %2701 = vmatpush.msrb.mxu0 %v2444_v0  ;;  %4813 = vmatpush.msrb.mxu3 %v2444_v0  ;;  %v6074_v0 = vpop.permute.xlu2 %4848 }
 0x38e   :  { %1200 = vmatmul.f32.gmra.mxu2 %v838_v60  ;;  %2702 = vmatpush.msrb.mxu0 %v2440_v57  ;;  %v2432_v60 = vld [vmem:[#allocation4 + $0x60] sm:$0xff] }
 0x38f   :  { %1605 = vmatmul.f32.gmra.mxu3 %v973_v8  ;;  %v842_v8 = vld [vmem:[#allocation2 + $0x248] sm:$0xff] }
 0x390   :  { %2703 = vmatpush.msrb.mxu0 %v2436_v63  ;;  %4814 = vmatpush.msrb.mxu3 %v2440_v57 }
 0x391   :  { %v6064_v54 = vpop.f32.mrf.mxu2 }
 0x392   :  { %8518 = vst [vmem:[#allocation25_spill] sm:$0xff] %v6064_v54  ;;  %4943 = vrot.lane.b32.xlu0 %v4942_v43, %s5355_s4  ;;  %v1072_v19 = vpop.f32.mrf.mxu1  ;;  %2704 = vmatpush.msrb.mxu0 %v2432_v60  ;;  %v884_v54 = vld [vmem:[#allocation2 + $0x398] sm:$0xff] }
 0x393   :  { %4815 = vmatpush.msrb.mxu3 %v2436_v63 }
 0x394   :  { %2705 = vmatpush.msrb.mxu0 %v2428_v28  ;;  %v6080_v63 = vpop.permute.xlu2 %4858 }
 0x395   :  { %4816 = vmatpush.msrb.mxu3 %v2432_v60 }
 0x396   :  { %1203 = vmatmul.f32.gmra.mxu2 %v839_v18  ;;  %2706 = vmatpush.msrb.mxu0 %v2424_v52  ;;  %v4844_v18 = vpop.permute.xlu1 %4843 }
 0x397   :  { %4817 = vmatpush.msrb.mxu3 %v2428_v28  ;;  %v4846_v44 = vunpack.i.h.bf16 %v4844_v18 }
 0x398   :  { %2707 = vmatpush.msrb.mxu0 %v2420_v45 }
 0x399   :  { %v6067_v49 = vpop.f32.mrf.mxu2  ;;  %4818 = vmatpush.msrb.mxu3 %v2424_v52  ;;  %v844_v52 = vld [vmem:[#allocation2 + $0x258] sm:$0xff] }
 0x39a   :  { %8519 = vst [vmem:[#allocation26_spill] sm:$0xff] %v6067_v49  ;;  %v1075_v15 = vpop.f32.mrf.mxu1  ;;  %v883_v49 = vld [vmem:[#allocation2 + $0x390] sm:$0xff] }
 0x39b   :  { %v4947_v21 = vpack.i.bf16 %v1075_v15, %v1072_v19  ;;  %v974_v19 = vld [vmem:[#allocation2 + $0x668] sm:$0xff]  ;;  %v975_v15 = vld [vmem:[#allocation2 + $0x670] sm:$0xff]  ;;  %4819 = vmatpush.msrb.mxu3 %v2420_v45  ;;  %v4835_v45 = vunpack.i.l.bf16 %v4834_v46 }
 0x39c   :  { %1608 = vmatmul.f32.gmra.mxu3 %v974_v19  ;;  %v843_v19 = vld [vmem:[#allocation2 + $0x250] sm:$0xff] }
 0x39d   :  { %4948 = vrot.lane.b32.xlu0 %v4947_v21, %s5355_s4  ;;  %v2258_v39 = vsel %vm90_vm0, %v5957_v38, %v4835_v45 }
 0x39e   :  { %1206 = vmatmul.f32.gmra.mxu2 %v840_v25  ;;  %v6076_v57 = vpop.permute.xlu1 %4853  ;;  %v976_v25 = vld [vmem:[#allocation2 + $0x678] sm:$0xff] }
 0x3a1   :  { %v6070_v43 = vpop.f32.mrf.mxu2 }
 0x3a2   :  { %8520 = vst [vmem:[#allocation27_spill] sm:$0xff] %v6070_v43 }
 0x3a4   :  { %1611 = vmatmul.f32.gmra.mxu3 %v975_v15 }
 0x3a6   :  { %1209 = vmatmul.f32.gmra.mxu2 %v841_v41  ;;  %v6082_v60 = vpop.permute.xlu1 %4863  ;;  %v6086_v41 = vpop.permute.xlu2 %4868 }
 0x3a9   :  { %v6072_v10 = vpop.f32.mrf.mxu2 }
 0x3aa   :  { %8521 = vst [vmem:[#allocation28_spill] sm:$0xff] %v6072_v10 }
 0x3ac   :  { %1614 = vmatmul.f32.gmra.mxu3 %v976_v25  ;;  %v4845_v25 = vunpack.i.l.bf16 %v4844_v18 }
 0x3ae   :  { %1212 = vmatmul.f32.gmra.mxu2 %v842_v8  ;;  %v6088_v15 = vpop.permute.xlu1 %4873 }
 0x3b1   :  { %v6078_v21 = vpop.f32.mrf.mxu2 }
 0x3b2   :  { %8522 = vst [vmem:[#allocation29_spill] sm:$0xff] %v6078_v21  ;;  %v845_v21 = vld [vmem:[#allocation2 + $0x260] sm:$0xff] }
 0x3b6   :  { %1215 = vmatmul.f32.gmra.mxu2 %v843_v19  ;;  %v6094_v19 = vpop.permute.xlu2 %4878  ;;  %v6101_v10 = vpop.permute.xlu1 %4883 }
 0x3b9   :  { %v6084_v28 = vpop.f32.mrf.mxu2 }
 0x3ba   :  { %8523 = vst [vmem:[#allocation30_spill] sm:$0xff] %v6084_v28  ;;  %v4836_v28 = vunpack.i.h.bf16 %v4834_v46  ;;  %v4850_v46 = vunpack.i.l.bf16 %v6074_v0 }
 0x3bc   :  { %v2259_v38 = vsel %vm90_vm0, %v5951_v37, %v4836_v28 }
 0x3be   :  { %1218 = vmatmul.f32.gmra.mxu2 %v844_v52 }
 0x3bf   :  { %v4839_v8 = vpop.permute.xlu0 %4838 }
 0x3c0   :  { %v4840_v23 = vunpack.i.l.bf16 %v4839_v8  ;;  %v4841_v52 = vunpack.i.h.bf16 %v4839_v8  ;;  %v2260_v8 = vsel %vm90_vm0, %v5945_v35, %v4850_v46 }
 0x3c1   :  { %v6092_v4 = vpop.f32.mrf.mxu2 }
 0x3c2   :  { %8524 = vst [vmem:[#allocation31_spill] sm:$0xff] %v6092_v4  ;;  %v2275_v7 = vsel %vm2274_vm6, %v2258_v39, %v4840_v23  ;;  %v2276_v45 = vsel %vm2274_vm6, %v2259_v38, %v4841_v52  ;;  %v1573_v4 = vpop.f32.mrf.mxu3  ;;  %v846_v23 = vld [vmem:[#allocation2 + $0x268] sm:$0xff]  ;;  %v4851_v38 = vunpack.i.h.bf16 %v6074_v0 }
 0x3c3   :  { %v6098_v58 = vsel %vm2291_vm7, %v2275_v7, %v4845_v25  ;;  %2212 = vrot.lane.b32.xlu1 %v1573_v4, %s5352_s30  ;;  %v6109_v7 = vpop.permute.xlu2 %4888  ;;  %v6112_v39 = vsel %vm2291_vm7, %v2276_v45, %v4846_v44  ;;  %v4855_v4 = vunpack.i.l.bf16 %v6076_v57 }
 0x3c4   :  { %8525 = vst [vmem:[#allocation32_spill] sm:$0xff] %v6098_v58  ;;  %2708 = vmatmul.f32.vlgmr.msrb.gmra.mxu0 %v6098_v58 }
 0x3c5   :  { %8527 = vst [vmem:[#allocation34_spill] sm:$0xff] %v6112_v39 }
 0x3c6   :  { %1221 = vmatmul.f32.gmra.mxu2 %v845_v21  ;;  %v6116_v21 = vpop.permute.xlu1 %4893 }
 0x3c9   :  { %v6106_v43 = vpop.f32.mrf.mxu2 }
 0x3ca   :  { %8526 = vst [vmem:[#allocation33_spill] sm:$0xff] %v6106_v43  ;;  %v1576_v18 = vpop.f32.mrf.mxu3  ;;  %v4856_v43 = vunpack.i.h.bf16 %v6076_v57 }
 0x3cb   :  { %2214 = vrot.lane.b32.xlu2 %v1576_v18, %s5352_s30  ;;  %v4899_v44 = vpop.permute.xlu2 %4898 }
 0x3cc   :  { %2711 = vmatmul.f32.gmra.mxu0 %v6112_v39  ;;  %v4901_v58 = vunpack.i.h.bf16 %v4899_v44  ;;  %v4900_v35 = vunpack.i.l.bf16 %v4899_v44 }
 0x3ce   :  { %1224 = vmatmul.f32.gmra.mxu2 %v846_v23  ;;  %v847_v23 = vld [vmem:[#allocation2 + $0x270] sm:$0xff]  ;;  %v4914_v46 = vpop.permute.xlu1 %4913 }
 0x3cf   :  { %v4904_v37 = vpop.permute.xlu0 %4903  ;;  %v4916_v44 = vunpack.i.h.bf16 %v4914_v46 }
 0x3d0   :  { %v4905_v28 = vunpack.i.l.bf16 %v4904_v37  ;;  %v4906_v39 = vunpack.i.h.bf16 %v4904_v37  ;;  %v2270_v37 = vsel %vm90_vm0, %v5878_v62, %v4901_v58  ;;  %v848_v62 = vld [vmem:[#allocation2 + $0x278] sm:$0xff] }
 0x3d1   :  { %v6121_v25 = vpop.f32.mrf.mxu2 }
 0x3d2   :  { %8528 = vst [vmem:[#allocation35_spill] sm:$0xff] %v6121_v25  ;;  %v2277_v52 = vsel %vm2274_vm6, %v2260_v8, %v4905_v28  ;;  %v2261_v25 = vsel %vm90_vm0, %v5939_v33, %v4851_v38 }
 0x3d3   :  { %v6127_v45 = vsel %vm2291_vm7, %v2277_v52, %v4855_v4  ;;  %v2278_v0 = vsel %vm2274_vm6, %v2261_v25, %v4906_v39  ;;  %v1579_v4 = vpop.f32.mrf.mxu3  ;;  %v2272_v52 = vsel %vm90_vm0, %v5866_v61, %v4900_v35  ;;  %v4860_v61 = vunpack.i.l.bf16 %v6080_v63 }
 0x3d4   :  { %8529 = vst [vmem:[#allocation36_spill] sm:$0xff] %v6127_v45  ;;  %2714 = vmatmul.f32.gmra.mxu0 %v6127_v45  ;;  %v4915_v45 = vunpack.i.l.bf16 %v4914_v46  ;;  %2216 = vrot.lane.b32.xlu0 %v1579_v4, %s5352_s30  ;;  %v6144_v38 = vsel %vm2291_vm7, %v2278_v0, %v4856_v43  ;;  %v4861_v0 = vunpack.i.h.bf16 %v6080_v63 }
 0x3d5   :  { %8531 = vst [vmem:[#allocation38_spill] sm:$0xff] %v6144_v38  ;;  %v2262_v43 = vsel %vm90_vm0, %v5933_v31, %v4860_v61 }
 0x3d6   :  { %1227 = vmatmul.f32.gmra.mxu2 %v847_v23 }
 0x3d7   :  { %v4909_v18 = vpop.permute.xlu0 %4908 }
 0x3d8   :  { %v4911_v28 = vunpack.i.h.bf16 %v4909_v18  ;;  %v4910_v8 = vunpack.i.l.bf16 %v4909_v18 }
 0x3d9   :  { %v6138_v23 = vpop.f32.mrf.mxu2 }
 0x3da   :  { %8530 = vst [vmem:[#allocation37_spill] sm:$0xff] %v6138_v23  ;;  %v2289_v33 = vsel %vm2274_vm6, %v2272_v52, %v4910_v8  ;;  %v2287_v57 = vsel %vm2274_vm6, %v2270_v37, %v4911_v28  ;;  %v6161_v28 = vpop.permute.xlu2 %4918  ;;  %v849_v37 = vld [vmem:[#allocation2 + $0x280] sm:$0xff] }
 0x3db   :  { %v6147_v39 = vsel %vm2291_vm7, %v2289_v33, %v4915_v45  ;;  %v6150_v58 = vsel %vm2291_vm7, %v2287_v57, %v4916_v44  ;;  %v1582_v46 = vpop.f32.mrf.mxu3  ;;  %v4865_v45 = vunpack.i.l.bf16 %v6082_v60  ;;  %v4920_v31 = vunpack.i.l.bf16 %v6161_v28  ;;  %v6170_v44 = vpop.permute.xlu1 %4933  ;;  %v881_v23 = vld [vmem:[#allocation2 + $0x380] sm:$0xff] }
 0x3dc   :  { %8532 = vst [vmem:[#allocation39_spill] sm:$0xff] %v6147_v39  ;;  %2717 = vmatmul.f32.gmra.mxu0 %v6144_v38  ;;  %2750 = vmatmul.f32.vlgmr.msrb.gmra.mxu3 %v6147_v39  ;;  %v2263_v33 = vsel %vm90_vm0, %v5926_v29, %v4861_v0  ;;  %v850_v0 = vld [vmem:[#allocation2 + $0x288] sm:$0xff]  ;;  %v868_v39 = vld [vmem:[#allocation2 + $0x318] sm:$0xff]  ;;  %v879_v38 = vld [vmem:[#allocation2 + $0x370] sm:$0xff] }
 0x3dd   :  { %8533 = vst [vmem:[#allocation40_spill] sm:$0xff] %v6150_v58  ;;  %2218 = vrot.lane.b32.xlu1 %v1582_v46, %s5352_s30  ;;  %v4935_v46 = vunpack.i.l.bf16 %v6170_v44 }
 0x3de   :  { %1230 = vmatmul.f32.gmra.mxu2 %v848_v62 }
 0x3df   :  { %v4924_v25 = vpop.permute.xlu0 %4923 }
 0x3e0   :  { %v4925_v35 = vunpack.i.l.bf16 %v4924_v25  ;;  %v4926_v52 = vunpack.i.h.bf16 %v4924_v25  ;;  %v2273_v25 = vsel %vm90_vm0, %v5863_v50, %v4920_v31  ;;  %v4870_v50 = vunpack.i.l.bf16 %v6086_v41 }
 0x3e1   :  { %v6158_v18 = vpop.f32.mrf.mxu2  ;;  %v4875_v31 = vunpack.i.l.bf16 %v6088_v15 }
 0x3e2   :  { %8534 = vst [vmem:[#allocation41_spill] sm:$0xff] %v6158_v18  ;;  %v2279_v8 = vsel %vm2274_vm6, %v2262_v43, %v4925_v35  ;;  %v2280_v63 = vsel %vm2274_vm6, %v2263_v33, %v4926_v52  ;;  %v4866_v35 = vunpack.i.h.bf16 %v6082_v60  ;;  %v2264_v52 = vsel %vm90_vm0, %v5919_v26, %v4870_v50  ;;  %v880_v18 = vld [vmem:[#allocation2 + $0x378] sm:$0xff] }
 0x3e3   :  { %v6166_v4 = vsel %vm2291_vm7, %v2279_v8, %v4865_v45  ;;  %v1585_v61 = vpop.f32.mrf.mxu3 }
 0x3e4   :  { %8535 = vst [vmem:[#allocation42_spill] sm:$0xff] %v6166_v4  ;;  %2720 = vmatmul.f32.gmra.mxu0 %v6166_v4  ;;  %2220 = vrot.lane.b32.xlu2 %v1585_v61, %s5352_s30  ;;  %v6187_v45 = vsel %vm2291_vm7, %v2280_v63, %v4866_v35  ;;  %v4871_v63 = vunpack.i.h.bf16 %v6086_v41  ;;  %v851_v35 = vld [vmem:[#allocation2 + $0x290] sm:$0xff]  ;;  %v852_v41 = vld [vmem:[#allocation2 + $0x298] sm:$0xff]  ;;  %v878_v4 = vld [vmem:[#allocation2 + $0x368] sm:$0xff] }
 0x3e5   :  { %8536 = vst [vmem:[#allocation43_spill] sm:$0xff] %v6187_v45 }
 0x3e6   :  { %1233 = vmatmul.f32.gmra.mxu2 %v849_v37 }
 0x3e7   :  { %v6174_v57 = vpop.permute.xlu0 %4928 }
 0x3e8   :  { %v4930_v62 = vunpack.i.l.bf16 %v6174_v57 }
 0x3e9   :  { %v6182_v43 = vpop.f32.mrf.mxu2 }
 0x3ea   :  { %v2290_v29 = vsel %vm2274_vm6, %v2273_v25, %v4930_v62 }
 0x3eb   :  { %v6190_v8 = vsel %vm2291_vm7, %v2290_v29, %v4935_v46  ;;  %v2265_v46 = vsel %vm90_vm0, %v5912_v24, %v4871_v63  ;;  %v4876_v29 = vunpack.i.h.bf16 %v6088_v15  ;;  %v4880_v24 = vunpack.i.l.bf16 %v6094_v19 }
 0x3ec   :  { %8537 = vst [vmem:[#allocation44_spill] sm:$0xff] %v6190_v8  ;;  %2723 = vmatmul.f32.gmra.mxu0 %v6187_v45  ;;  %2753 = vmatmul.f32.gmra.mxu3 %v6190_v8  ;;  %v877_v45 = vld [vmem:[#allocation2 + $0x360] sm:$0xff] }
 0x3ee   :  { %1236 = vmatmul.f32.gmra.mxu2 %v850_v0 }
 0x3ef   :  { %v4939_v60 = vpop.permute.xlu0 %4938 }
 0x3f0   :  { %v4940_v37 = vunpack.i.l.bf16 %v4939_v60  ;;  %v4941_v25 = vunpack.i.h.bf16 %v4939_v60 }
 0x3f1   :  { %v6198_v33 = vpop.f32.mrf.mxu2 }
 0x3f2   :  { %v2281_v62 = vsel %vm2274_vm6, %v2264_v52, %v4940_v37  ;;  %v2282_v26 = vsel %vm2274_vm6, %v2265_v46, %v4941_v25  ;;  %v4881_v52 = vunpack.i.h.bf16 %v6094_v19  ;;  %v2266_v25 = vsel %vm90_vm0, %v5905_v1, %v4880_v24 }
 0x3f3   :  { %v6203_v61 = vsel %vm2291_vm7, %v2281_v62, %v4875_v31  ;;  %v6213_v50 = vsel %vm2291_vm7, %v2282_v26, %v4876_v29  ;;  %v853_v31 = vld [vmem:[#allocation2 + $0x2a0] sm:$0xff]  ;;  %v4886_v46 = vunpack.i.h.bf16 %v6101_v10  ;;  %v4885_v26 = vunpack.i.l.bf16 %v6101_v10 }
 0x3f4   :  { %8538 = vst [vmem:[#allocation45_spill] sm:$0xff] %v6203_v61  ;;  %2726 = vmatmul.f32.gmra.mxu0 %v6203_v61  ;;  %v4891_v1 = vunpack.i.h.bf16 %v6109_v7  ;;  %v4890_v10 = vunpack.i.l.bf16 %v6109_v7  ;;  %v876_v61 = vld [vmem:[#allocation2 + $0x358] sm:$0xff] }
 0x3f5   :  { %8539 = vst [vmem:[#allocation46_spill] sm:$0xff] %v6213_v50 }
 0x3f6   :  { %1239 = vmatmul.f32.gmra.mxu2 %v851_v35  ;;  %v2267_v35 = vsel %vm90_vm0, %v5898_v16, %v4881_v52  ;;  %v854_v16 = vld [vmem:[#allocation2 + $0x2a8] sm:$0xff] }
 0x3f9   :  { %v6210_v0 = vpop.f32.mrf.mxu2 }
 0x3fc   :  { %v6215_v37 = vpop.permute.xlu0 %2210  ;;  %2729 = vmatmul.f32.gmra.mxu0 %v6213_v50  ;;  %v875_v50 = vld [vmem:[#allocation2 + $0x350] sm:$0xff] }
 0x3fe   :  { %1242 = vmatmul.f32.gmra.mxu2 %v852_v41 }
 0x401   :  { %v6218_v60 = vpop.f32.mrf.mxu2 }
 0x404   :  { %v4944_v62 = vpop.permute.xlu0 %4943 }
 0x405   :  { %v4946_v15 = vunpack.i.h.bf16 %v4944_v62  ;;  %v4945_v63 = vunpack.i.l.bf16 %v4944_v62 }
 0x406   :  { %1245 = vmatmul.f32.gmra.mxu2 %v853_v31 }
 0x407   :  { %v2283_v29 = vsel %vm2274_vm6, %v2266_v25, %v4945_v63  ;;  %v2284_v41 = vsel %vm2274_vm6, %v2267_v35, %v4946_v15  ;;  %v2269_v15 = vsel %vm90_vm0, %v5884_v2, %v4891_v1  ;;  %v2268_v63 = vsel %vm90_vm0, %v5891_v13, %v4890_v10  ;;  %v857_v1 = vld [vmem:[#allocation2 + $0x2c0] sm:$0xff] }
 0x408   :  { %v6231_v19 = vsel %vm2291_vm7, %v2283_v29, %v4885_v26  ;;  %v6234_v62 = vsel %vm2291_vm7, %v2284_v41, %v4886_v46  ;;  %v4896_v35 = vunpack.i.h.bf16 %v6116_v21  ;;  %v4895_v25 = vunpack.i.l.bf16 %v6116_v21  ;;  %v855_v29 = vld [vmem:[#allocation2 + $0x2b0] sm:$0xff]  ;;  %v856_v21 = vld [vmem:[#allocation2 + $0x2b8] sm:$0xff] }
 0x409   :  { %8540 = vst [vmem:[#allocation47_spill] sm:$0xff] %v6231_v19  ;;  %v6236_v8 = vpop.f32.mrf.mxu2  ;;  %2732 = vmatmul.f32.gmra.mxu0 %v6231_v19  ;;  %v4921_v10 = vunpack.i.h.bf16 %v6161_v28  ;;  %v859_v28 = vld [vmem:[#allocation2 + $0x2d0] sm:$0xff]  ;;  %v874_v19 = vld [vmem:[#allocation2 + $0x348] sm:$0xff] }
 0x40a   :  { %8541 = vst [vmem:[#allocation48_spill] sm:$0xff] %v6234_v62 }
 0x40e   :  { %1248 = vmatmul.f32.gmra.mxu2 %v854_v16 }
 0x40f   :  { %v4949_v52 = vpop.permute.xlu0 %4948 }
 0x410   :  { %v4951_v24 = vunpack.i.h.bf16 %v4949_v52  ;;  %v4950_v31 = vunpack.i.l.bf16 %v4949_v52  ;;  %v4931_v52 = vunpack.i.h.bf16 %v6174_v57 }
 0x411   :  { %v6247_v46 = vpop.f32.mrf.mxu2  ;;  %2735 = vmatmul.f32.gmra.mxu0 %v6234_v62  ;;  %v873_v62 = vld [vmem:[#allocation2 + $0x340] sm:$0xff] }
 0x412   :  { %v2285_v7 = vsel %vm2274_vm6, %v2268_v63, %v4950_v31  ;;  %v2286_v26 = vsel %vm2274_vm6, %v2269_v15, %v4951_v24  ;;  %v858_v31 = vld [vmem:[#allocation2 + $0x2c8] sm:$0xff]  ;;  %v2271_v15 = vsel %vm90_vm0, %v5872_v56, %v4921_v10  ;;  %v861_v56 = vld [vmem:[#allocation2 + $0x2e0] sm:$0xff]  ;;  %v863_v10 = vld [vmem:[#allocation2 + $0x2f0] sm:$0xff] }
 0x413   :  { %v6253_v41 = vsel %vm2291_vm7, %v2285_v7, %v4895_v25  ;;  %v6256_v2 = vsel %vm2291_vm7, %v2286_v26, %v4896_v35  ;;  %v2288_v63 = vsel %vm2274_vm6, %v2271_v15, %v4931_v52  ;;  %v4936_v35 = vunpack.i.h.bf16 %v6170_v44  ;;  %v860_v26 = vld [vmem:[#allocation2 + $0x2d8] sm:$0xff]  ;;  %v862_v44 = vld [vmem:[#allocation2 + $0x2e8] sm:$0xff] }
 0x414   :  { %8542 = vst [vmem:[#allocation49_spill] sm:$0xff] %v6253_v41 }
 0x415   :  { %8543 = vst [vmem:[#allocation50_spill] sm:$0xff] %v6256_v2  ;;  %v6274_v25 = vsel %vm2291_vm7, %v2288_v63, %v4936_v35  ;;  %v865_v63 = vld [vmem:[#allocation2 + $0x300] sm:$0xff] }
 0x416   :  { %1251 = vmatmul.f32.gmra.mxu2 %v855_v29  ;;  %8544 = vst [vmem:[#allocation51_spill] sm:$0xff] %v6274_v25 }
 0x419   :  { %v6258_v13 = vpop.f32.mrf.mxu2  ;;  %2738 = vmatmul.f32.gmra.mxu0 %v6253_v41  ;;  %v872_v41 = vld [vmem:[#allocation2 + $0x338] sm:$0xff] }
 0x41e   :  { %1254 = vmatmul.f32.gmra.mxu2 %v856_v21 }
 0x421   :  { %v6261_v16 = vpop.f32.mrf.mxu2  ;;  %2741 = vmatmul.f32.gmra.mxu0 %v6256_v2  ;;  %v871_v2 = vld [vmem:[#allocation2 + $0x330] sm:$0xff] }
 0x426   :  { %1257 = vmatmul.f32.gmra.mxu2 %v857_v1 }
 0x429   :  { %v6266_v24 = vpop.f32.mrf.mxu2  ;;  %2744 = vmatmul.f32.gmra.mxu0 %v6150_v58  ;;  %v870_v58 = vld [vmem:[#allocation2 + $0x328] sm:$0xff] }
 0x42e   :  { %1260 = vmatmul.f32.gmra.mxu2 %v858_v31  ;;  %v864_v31 = vld [vmem:[#allocation2 + $0x2f8] sm:$0xff] }
 0x431   :  { %v6276_v7 = vpop.f32.mrf.mxu2  ;;  %2747 = vmatmul.f32.gmra.mxu0 %v6274_v25  ;;  %v869_v25 = vld [vmem:[#allocation2 + $0x320] sm:$0xff] }
 0x436   :  { %1263 = vmatmul.f32.gmra.mxu2 %v859_v28  ;;  %v866_v28 = vld [vmem:[#allocation2 + $0x308] sm:$0xff] }
 0x439   :  { %v6279_v57 = vpop.f32.mrf.mxu2 }
 0x43e   :  { %1266 = vmatmul.f32.gmra.mxu2 %v860_v26 }
 0x441   :  { %v6281_v29 = vpop.f32.mrf.mxu2 }
 0x446   :  { %1269 = vmatmul.f32.gmra.mxu2 %v861_v56  ;;  %v867_v56 = vld [vmem:[#allocation2 + $0x310] sm:$0xff] }
 0x449   :  { %v6283_v21 = vpop.f32.mrf.mxu2 }
 0x44e   :  { %1272 = vmatmul.f32.gmra.mxu2 %v862_v44 }
 0x451   :  { %v6285_v1 = vpop.f32.mrf.mxu2 }
 0x452   :  { %8545 = vst [vmem:[#allocation52_spill] sm:$0xff] %v6285_v1  ;;  %v899_v1 = vld [vmem:[#allocation2 + $0x410] sm:$0xff] }
 0x456   :  { %1275 = vmatmul.f32.gmra.mxu2 %v863_v10 }
 0x459   :  { %v6287_v52 = vpop.f32.mrf.mxu2 }
 0x45a   :  { %8546 = vst [vmem:[#allocation53_spill] sm:$0xff] %v6287_v52  ;;  %v898_v52 = vld [vmem:[#allocation2 + $0x408] sm:$0xff] }
 0x45e   :  { %1278 = vmatmul.f32.gmra.mxu2 %v864_v31 }
 0x461   :  { %v6289_v15 = vpop.f32.mrf.mxu2 }
 0x462   :  { %8547 = vst [vmem:[#allocation54_spill] sm:$0xff] %v6289_v15  ;;  %v895_v15 = vld [vmem:[#allocation2 + $0x3f0] sm:$0xff] }
 0x466   :  { %1281 = vmatmul.f32.gmra.mxu2 %v865_v63 }
 0x469   :  { %v6291_v35 = vpop.f32.mrf.mxu2 }
 0x46e   :  { %1284 = vmatmul.f32.gmra.mxu2 %v866_v28 }
 0x471   :  { %v6293_v26 = vpop.f32.mrf.mxu2 }
 0x476   :  { %1287 = vmatmul.f32.gmra.mxu2 %v867_v56 }
 0x479   :  { %v6295_v44 = vpop.f32.mrf.mxu2 }
 0x47e   :  { %1290 = vmatmul.f32.gmra.mxu2 %v868_v39 }
 0x481   :  { %v6297_v10 = vpop.f32.mrf.mxu2 }
 0x486   :  { %1293 = vmatmul.f32.gmra.mxu2 %v869_v25 }
 0x489   :  { %v6299_v31 = vpop.f32.mrf.mxu2 }
 0x48e   :  { %1296 = vmatmul.f32.gmra.mxu2 %v870_v58 }
 0x491   :  { %v6301_v63 = vpop.f32.mrf.mxu2 }
 0x496   :  { %1299 = vmatmul.f32.gmra.mxu2 %v871_v2 }
 0x499   :  { %v6303_v28 = vpop.f32.mrf.mxu2 }
 0x49e   :  { %1302 = vmatmul.f32.gmra.mxu2 %v872_v41 }
 0x4a1   :  { %v6305_v56 = vpop.f32.mrf.mxu2 }
 0x4a6   :  { %1305 = vmatmul.f32.gmra.mxu2 %v873_v62 }
 0x4a9   :  { %v6307_v39 = vpop.f32.mrf.mxu2 }
 0x4ae   :  { %1308 = vmatmul.f32.gmra.mxu2 %v874_v19 }
 0x4b1   :  { %v6309_v25 = vpop.f32.mrf.mxu2 }
 0x4b6   :  { %1311 = vmatmul.f32.gmra.mxu2 %v875_v50 }
 0x4b9   :  { %v6311_v58 = vpop.f32.mrf.mxu2 }
 0x4be   :  { %1314 = vmatmul.f32.gmra.mxu2 %v876_v61 }
 0x4c1   :  { %v6313_v2 = vpop.f32.mrf.mxu2 }
 0x4c6   :  { %1317 = vmatmul.f32.gmra.mxu2 %v877_v45 }
 0x4c9   :  { %v6315_v41 = vpop.f32.mrf.mxu2 }
 0x4ce   :  { %1320 = vmatmul.f32.gmra.mxu2 %v878_v4 }
 0x4d1   :  { %v6317_v62 = vpop.f32.mrf.mxu2 }
 0x4d2   :  { %8548 = vst [vmem:[#allocation55_spill] sm:$0xff] %v6317_v62  ;;  %v903_v62 = vld [vmem:[#allocation2 + $0x430] sm:$0xff] }
 0x4d6   :  { %1323 = vmatmul.f32.gmra.mxu2 %v879_v38 }
 0x4d9   :  { %v6319_v19 = vpop.f32.mrf.mxu2 }
 0x4da   :  { %8549 = vst [vmem:[#allocation56_spill] sm:$0xff] %v6319_v19  ;;  %v894_v19 = vld [vmem:[#allocation2 + $0x3e8] sm:$0xff] }
 0x4de   :  { %1326 = vmatmul.f32.gmra.mxu2 %v880_v18 }
 0x4e1   :  { %v6321_v50 = vpop.f32.mrf.mxu2 }
 0x4e2   :  { %8550 = vst [vmem:[#allocation57_spill] sm:$0xff] %v6321_v50  ;;  %v892_v50 = vld [vmem:[#allocation2 + $0x3d8] sm:$0xff] }
 0x4e6   :  { %1329 = vmatmul.f32.gmra.mxu2 %v881_v23 }
 0x4e9   :  { %v6323_v61 = vpop.f32.mrf.mxu2 }
 0x4ee   :  { %1332 = vmatmul.f32.gmra.mxu2 %v882_v32 }
 0x4f1   :  { %v6325_v45 = vpop.f32.mrf.mxu2 }
 0x4f6   :  { %1335 = vmatmul.f32.gmra.mxu2 %v883_v49 }
 0x4f9   :  { %v6327_v4 = vpop.f32.mrf.mxu2 }
 0x4fe   :  { %1338 = vmatmul.f32.gmra.mxu2 %v884_v54 }
 0x501   :  { %v6329_v38 = vpop.f32.mrf.mxu2 }
 0x506   :  { %1341 = vmatmul.f32.gmra.mxu2 %v885_v6 }
 0x509   :  { %v6331_v18 = vpop.f32.mrf.mxu2 }
 0x50e   :  { %1344 = vmatmul.f32.gmra.mxu2 %v886_v59 }
 0x511   :  { %v6333_v23 = vpop.f32.mrf.mxu2 }
 0x516   :  { %1347 = vmatmul.f32.gmra.mxu2 %v887_v12 }
 0x519   :  { %v6335_v32 = vpop.f32.mrf.mxu2 }
 0x51e   :  { %1350 = vmatmul.f32.gmra.mxu2 %v888_v11 }
 0x521   :  { %v6337_v49 = vpop.f32.mrf.mxu2 }
 0x526   :  { %1353 = vmatmul.f32.gmra.mxu2 %v889_v51 }
 0x529   :  { %v6339_v54 = vpop.f32.mrf.mxu2 }
 0x52e   :  { %1356 = vmatmul.f32.gmra.mxu2 %v890_v3 }
 0x531   :  { %v6341_v6 = vpop.f32.mrf.mxu2 }
 0x536   :  { %1359 = vmatmul.f32.gmra.mxu2 %v891_v5 }
 0x539   :  { %v6343_v59 = vpop.f32.mrf.mxu2 }
 0x53e   :  { %1362 = vmatmul.f32.gmra.mxu2 %v892_v50 }
 0x541   :  { %v6345_v12 = vpop.f32.mrf.mxu2 }
 0x546   :  { %1365 = vmatmul.f32.gmra.mxu2 %v893_v40 }
 0x549   :  { %v6347_v11 = vpop.f32.mrf.mxu2 }
 0x54e   :  { %1368 = vmatmul.f32.gmra.mxu2 %v894_v19 }
 0x551   :  { %v6349_v51 = vpop.f32.mrf.mxu2 }
 0x552   :  { %8551 = vst [vmem:[#allocation58_spill] sm:$0xff] %v6349_v51  ;;  %v900_v51 = vld [vmem:[#allocation2 + $0x418] sm:$0xff] }
 0x556   :  { %1371 = vmatmul.f32.gmra.mxu2 %v895_v15 }
 0x559   :  { %v6351_v3 = vpop.f32.mrf.mxu2 }
 0x55a   :  { %8552 = vst [vmem:[#allocation59_spill] sm:$0xff] %v6351_v3  ;;  %v901_v3 = vld [vmem:[#allocation2 + $0x420] sm:$0xff] }
 0x55e   :  { %1374 = vmatmul.f32.gmra.mxu2 %v896_v34 }
 0x561   :  { %v6353_v5 = vpop.f32.mrf.mxu2 }
 0x562   :  { %8553 = vst [vmem:[#allocation60_spill] sm:$0xff] %v6353_v5  ;;  %v902_v5 = vld [vmem:[#allocation2 + $0x428] sm:$0xff] }
 0x566   :  { %1377 = vmatmul.f32.gmra.mxu2 %v897_v27 }
 0x569   :  { %v6355_v50 = vpop.f32.mrf.mxu2 }
 0x56e   :  { %1380 = vmatmul.f32.gmra.mxu2 %v898_v52 }
 0x571   :  { %v6357_v40 = vpop.f32.mrf.mxu2 }
 0x572   :  { %8554 = vst [vmem:[#allocation61_spill] sm:$0xff] %v6357_v40  ;;  %v904_v40 = vld [vmem:[#allocation2 + $0x438] sm:$0xff] }
 0x576   :  { %1383 = vmatmul.f32.gmra.mxu2 %v899_v1 }
 0x579   :  { %v6359_v19 = vpop.f32.mrf.mxu2 }
 0x57a   :  { %8555 = vst [vmem:[#allocation62_spill] sm:$0xff] %v6359_v19  ;;  %v905_v19 = vld [vmem:[#allocation2 + $0x440] sm:$0xff] }
 0x57e   :  { %1386 = vmatmul.f32.gmra.mxu2 %v900_v51 }
 0x581   :  { %v6361_v15 = vpop.f32.mrf.mxu2 }
 0x582   :  { %8556 = vst [vmem:[#allocation63_spill] sm:$0xff] %v6361_v15  ;;  %v906_v15 = vld [vmem:[#allocation2 + $0x448] sm:$0xff] }
 0x586   :  { %1389 = vmatmul.f32.gmra.mxu2 %v901_v3 }
 0x589   :  { %v6363_v34 = vpop.f32.mrf.mxu2 }
 0x58a   :  { %8557 = vst [vmem:[#allocation64_spill] sm:$0xff] %v6363_v34  ;;  %v907_v34 = vld [vmem:[#allocation2 + $0x450] sm:$0xff] }
 0x58e   :  { %1392 = vmatmul.f32.gmra.mxu2 %v902_v5 }
 0x591   :  { %v6365_v27 = vpop.f32.mrf.mxu2 }
 0x592   :  { %8558 = vst [vmem:[#allocation65_spill] sm:$0xff] %v6365_v27  ;;  %v908_v27 = vld [vmem:[#allocation2 + $0x458] sm:$0xff] }
 0x596   :  { %1395 = vmatmul.f32.gmra.mxu2 %v903_v62 }
 0x599   :  { %v6367_v52 = vpop.f32.mrf.mxu2 }
 0x59a   :  { %8559 = vst [vmem:[#allocation66_spill] sm:$0xff] %v6367_v52  ;;  %v909_v52 = vld [vmem:[#allocation2 + $0x460] sm:$0xff] }
 0x59e   :  { %1398 = vmatmul.f32.gmra.mxu2 %v904_v40 }
 0x5a1   :  { %v6369_v1 = vpop.f32.mrf.mxu2 }
 0x5a2   :  { %8560 = vst [vmem:[#allocation67_spill] sm:$0xff] %v6369_v1  ;;  %v910_v1 = vld [vmem:[#allocation2 + $0x468] sm:$0xff] }
 0x5a6   :  { %1401 = vmatmul.f32.gmra.mxu2 %v905_v19 }
 0x5a9   :  { %v6371_v51 = vpop.f32.mrf.mxu2 }
 0x5aa   :  { %8561 = vst [vmem:[#allocation68_spill] sm:$0xff] %v6371_v51  ;;  %v911_v51 = vld [vmem:[#allocation2 + $0x470] sm:$0xff] }
 0x5ae   :  { %1404 = vmatmul.f32.gmra.mxu2 %v906_v15 }
 0x5b1   :  { %v6373_v3 = vpop.f32.mrf.mxu2 }
 0x5b2   :  { %8562 = vst [vmem:[#allocation69_spill] sm:$0xff] %v6373_v3  ;;  %v912_v3 = vld [vmem:[#allocation2 + $0x478] sm:$0xff] }
 0x5b6   :  { %1407 = vmatmul.f32.gmra.mxu2 %v907_v34 }
 0x5b9   :  { %v6375_v5 = vpop.f32.mrf.mxu2 }
 0x5ba   :  { %8563 = vst [vmem:[#allocation70_spill] sm:$0xff] %v6375_v5  ;;  %v913_v5 = vld [vmem:[#allocation2 + $0x480] sm:$0xff] }
 0x5be   :  { %1410 = vmatmul.f32.gmra.mxu2 %v908_v27 }
 0x5c1   :  { %v6377_v62 = vpop.f32.mrf.mxu2 }
 0x5c2   :  { %8564 = vst [vmem:[#allocation71_spill] sm:$0xff] %v6377_v62 }
 0x5c6   :  { %1413 = vmatmul.f32.gmra.mxu2 %v909_v52  ;;  %v914_v52 = vld [vmem:[#allocation2 + $0x488] sm:$0xff] }
 0x5c9   :  { %v6379_v40 = vpop.f32.mrf.mxu2 }
 0x5ca   :  { %8565 = vst [vmem:[#allocation72_spill] sm:$0xff] %v6379_v40  ;;  %v915_v40 = vld [vmem:[#allocation2 + $0x490] sm:$0xff] }
 0x5ce   :  { %1416 = vmatmul.f32.gmra.mxu2 %v910_v1 }
 0x5d1   :  { %v6381_v19 = vpop.f32.mrf.mxu2 }
 0x5d2   :  { %8566 = vst [vmem:[#allocation73_spill] sm:$0xff] %v6381_v19 }
 0x5d6   :  { %1419 = vmatmul.f32.gmra.mxu2 %v911_v51 }
 0x5d9   :  { %v6383_v15 = vpop.f32.mrf.mxu2 }
 0x5de   :  { %1422 = vmatmul.f32.gmra.mxu2 %v912_v3 }
 0x5e1   :  { %v6385_v34 = vpop.f32.mrf.mxu2 }
 0x5e2   :  { %8567 = vst [vmem:[#allocation74_spill] sm:$0xff] %v6385_v34  ;;  %v916_v34 = vld [vmem:[#allocation2 + $0x498] sm:$0xff] }
 0x5e6   :  { %1425 = vmatmul.f32.gmra.mxu2 %v913_v5  ;;  %v2640_v5 = vld [vmem:[#allocation4 + $0x6e0] sm:$0xff] }
 0x5e7   :  { %2895 = vmatpush.msra.mxu3 %v2640_v5  ;;  %v918_v5 = vld [vmem:[#allocation2 + $0x4a8] sm:$0xff] }
 0x5e9   :  { %v1378_v27 = vpop.f32.mrf.mxu2 }
 0x5ea   :  { %v4952_v62 = vpack.i.bf16 %v1378_v27, %v6182_v43  ;;  %v2636_v43 = vld [vmem:[#allocation4 + $0x6c0] sm:$0xff] }
 0x5eb   :  { %2896 = vmatpush.msra.mxu3 %v2636_v43  ;;  %v2632_v27 = vld [vmem:[#allocation4 + $0x6a0] sm:$0xff] }
 0x5ec   :  { %4953 = vrot.lane.b32.xlu2 %v4952_v62, %s5352_s30 }
 0x5ed   :  { %2897 = vmatpush.msra.mxu3 %v2632_v27 }
 0x5ee   :  { %1428 = vmatmul.f32.gmra.mxu2 %v914_v52  ;;  %v2628_v52 = vld [vmem:[#allocation4 + $0x680] sm:$0xff] }
 0x5ef   :  { %2898 = vmatpush.msra.mxu3 %v2628_v52 }
 0x5f1   :  { %v1381_v1 = vpop.f32.mrf.mxu2 }
 0x5f2   :  { %v4957_v19 = vpack.i.bf16 %v1381_v1, %v6198_v33  ;;  %v917_v1 = vld [vmem:[#allocation2 + $0x4a0] sm:$0xff] }
 0x5f4   :  { %4958 = vrot.lane.b32.xlu0 %v4957_v19, %s5352_s30 }
 0x5f6   :  { %1431 = vmatmul.f32.gmra.mxu2 %v915_v40  ;;  %v2624_v40 = vld [vmem:[#allocation4 + $0x660] sm:$0xff] }
 0x5f7   :  { %2899 = vmatpush.msra.mxu3 %v2624_v40 }
 0x5f9   :  { %v1384_v51 = vpop.f32.mrf.mxu2 }
 0x5fa   :  { %v4962_v3 = vpack.i.bf16 %v1384_v51, %v6210_v0  ;;  %v2620_v0 = vld [vmem:[#allocation4 + $0x640] sm:$0xff] }
 0x5fb   :  { %2900 = vmatpush.msra.mxu3 %v2620_v0  ;;  %v2612_v51 = vld [vmem:[#allocation4 + $0x600] sm:$0xff] }
 0x5fc   :  { %4963 = vrot.lane.b32.xlu1 %v4962_v3, %s5352_s30  ;;  %v6398_v3 = vsel %vm90_vm0, %v5999_v55, %v6215_v37  ;;  %v919_v55 = vld [vmem:[#allocation2 + $0x4b0] sm:$0xff]  ;;  %v2215_v37 = vpop.permute.xlu2 %2214  ;;  %v921_v0 = vld [vmem:[#allocation2 + $0x4c0] sm:$0xff] }
 0x5fe   :  { %1434 = vmatmul.f32.gmra.mxu2 %v916_v34  ;;  %v2616_v34 = vld [vmem:[#allocation4 + $0x620] sm:$0xff] }
 0x5ff   :  { %2901 = vmatpush.msra.mxu3 %v2616_v34 }
 0x601   :  { %v1387_v62 = vpop.f32.mrf.mxu2  ;;  %2902 = vmatpush.msra.mxu3 %v2612_v51  ;;  %v922_v51 = vld [vmem:[#allocation2 + $0x4c8] sm:$0xff] }
 0x602   :  { %v4967_v33 = vpack.i.bf16 %v1387_v62, %v6218_v60  ;;  %4658 = vmatmul.msk.f32.vlgmr.msra.gmra.mxu3 %vm2274_vm6, %v6398_v3  ;;  %v2213_v62 = vpop.permute.xlu1 %2212 }
 0x603   :  { %v6407_v52 = vsel %vm90_vm0, %v6002_v14, %v2213_v62 }
 0x604   :  { %4968 = vrot.lane.b32.xlu2 %v4967_v33, %s5352_s30  ;;  %8568 = vst [vmem:[#allocation75_spill] sm:$0xff] %v6407_v52  ;;  %v6416_v33 = vsel %vm90_vm0, %v6005_v22, %v2215_v37 }
 0x605   :  { %8569 = vst [vmem:[#allocation76_spill] sm:$0xff] %v6416_v33 }
 0x606   :  { %1437 = vmatmul.f32.gmra.mxu2 %v917_v1  ;;  %v920_v1 = vld [vmem:[#allocation2 + $0x4b8] sm:$0xff] }
 0x609   :  { %v1390_v19 = vpop.f32.mrf.mxu2 }
 0x60a   :  { %v4972_v60 = vpack.i.bf16 %v1390_v19, %v6236_v8  ;;  %4659 = vmatmul.msk.f32.gmra.mxu3 %vm2274_vm6, %v6407_v52  ;;  %v2219_v22 = vpop.permute.xlu1 %2218  ;;  %v2568_v52 = vld [vmem:[#allocation4 + $0x4a0] sm:$0xff] }
 0x60b   :  { %v6432_v34 = vsel %vm90_vm0, %v6011_v36, %v2219_v22  ;;  %v924_v36 = vld [vmem:[#allocation2 + $0x4d8] sm:$0xff] }
 0x60c   :  { %4973 = vrot.lane.b32.xlu0 %v4972_v60, %s5352_s30  ;;  %8571 = vst [vmem:[#allocation78_spill] sm:$0xff] %v6432_v34  ;;  %v928_v22 = vld [vmem:[#allocation2 + $0x4f8] sm:$0xff] }
 0x60e   :  { %1440 = vmatmul.f32.gmra.mxu2 %v918_v5 }
 0x611   :  { %v1393_v43 = vpop.f32.mrf.mxu2 }
 0x612   :  { %v4977_v27 = vpack.i.bf16 %v1393_v43, %v6247_v46  ;;  %4660 = vmatmul.msk.f32.gmra.mxu3 %vm2274_vm6, %v6416_v33  ;;  %v2217_v46 = vpop.permute.xlu0 %2216  ;;  %v923_v43 = vld [vmem:[#allocation2 + $0x4d0] sm:$0xff] }
 0x613   :  { %v6424_v40 = vsel %vm90_vm0, %v6008_v30, %v2217_v46  ;;  %v2221_v30 = vpop.permute.xlu2 %2220 }
 0x614   :  { %4978 = vrot.lane.b32.xlu1 %v4977_v27, %s5352_s30  ;;  %8570 = vst [vmem:[#allocation77_spill] sm:$0xff] %v6424_v40  ;;  %v6440_v5 = vsel %vm90_vm0, %v6013_v47, %v2221_v30  ;;  %v927_v47 = vld [vmem:[#allocation2 + $0x4f0] sm:$0xff]  ;;  %v929_v30 = vld [vmem:[#allocation2 + $0x500] sm:$0xff] }
 0x615   :  { %8572 = vst [vmem:[#allocation79_spill] sm:$0xff] %v6440_v5 }
 0x616   :  { %1443 = vmatmul.f32.gmra.mxu2 %v919_v55  ;;  %v925_v55 = vld [vmem:[#allocation2 + $0x4e0] sm:$0xff] }
 0x619   :  { %v6412_v8 = vpop.f32.mrf.mxu2 }
 0x61a   :  { %4661 = vmatmul.msk.f32.gmra.mxu3 %vm2274_vm6, %v6424_v40  ;;  %v931_v40 = vld [vmem:[#allocation2 + $0x510] sm:$0xff] }
 0x61e   :  { %1446 = vmatmul.f32.gmra.mxu2 %v920_v1  ;;  %v926_v1 = vld [vmem:[#allocation2 + $0x4e8] sm:$0xff] }
 0x621   :  { %v6420_v14 = vpop.f32.mrf.mxu2 }
 0x622   :  { %4662 = vmatmul.msk.f32.gmra.mxu3 %vm2274_vm6, %v6432_v34  ;;  %v2604_v34 = vld [vmem:[#allocation4 + $0x5c0] sm:$0xff] }
 0x626   :  { %1449 = vmatmul.f32.gmra.mxu2 %v921_v0 }
 0x629   :  { %v6428_v19 = vpop.f32.mrf.mxu2 }
 0x62a   :  { %4663 = vmatmul.msk.f32.gmra.mxu3 %vm2274_vm6, %v6440_v5  ;;  %v930_v5 = vld [vmem:[#allocation2 + $0x508] sm:$0xff] }
 0x62e   :  { %1452 = vmatmul.f32.gmra.mxu2 %v922_v51 }
 0x631   :  { %v6436_v60 = vpop.f32.mrf.mxu2 }
 0x636   :  { %1455 = vmatmul.f32.gmra.mxu2 %v923_v43  ;;  %v2608_v43 = vld [vmem:[#allocation4 + $0x5e0] sm:$0xff] }
 0x637   :  { %2822 = vmatpush.msra.mxu1 %v2608_v43 }
 0x639   :  { %v6444_v62 = vpop.f32.mrf.mxu2  ;;  %2823 = vmatpush.msra.mxu1 %v2604_v34 }
 0x63e   :  { %1458 = vmatmul.f32.gmra.mxu2 %v924_v36 }
 0x641   :  { %v6446_v27 = vpop.f32.mrf.mxu2 }
 0x646   :  { %1461 = vmatmul.f32.gmra.mxu2 %v925_v55 }
 0x649   :  { %v6448_v37 = vpop.f32.mrf.mxu2 }
 0x64e   :  { %1464 = vmatmul.f32.gmra.mxu2 %v926_v1 }
 0x651   :  { %v6450_v46 = vpop.f32.mrf.mxu2 }
 0x656   :  { %1467 = vmatmul.f32.gmra.mxu2 %v927_v47 }
 0x659   :  { %v6452_v0 = vpop.f32.mrf.mxu2 }
 0x65e   :  { %1470 = vmatmul.f32.gmra.mxu2 %v928_v22 }
 0x661   :  { %v6454_v51 = vpop.f32.mrf.mxu2 }
 0x666   :  { %1473 = vmatmul.f32.gmra.mxu2 %v929_v30  ;;  %v932_v30 = vld [vmem:[#allocation2 + $0x518] sm:$0xff] }
 0x669   :  { %v1426_v36 = vpop.f32.mrf.mxu2 }
 0x66a   :  { %v4982_v55 = vpack.i.bf16 %v1426_v36, %v6291_v35 }
 0x66c   :  { %4983 = vrot.lane.b32.xlu1 %v4982_v55, %s5355_s4  ;;  %v933_v55 = vld [vmem:[#allocation2 + $0x520] sm:$0xff] }
 0x66e   :  { %1476 = vmatmul.f32.gmra.mxu2 %v930_v5  ;;  %v2600_v5 = vld [vmem:[#allocation4 + $0x5a0] sm:$0xff] }
 0x66f   :  { %2824 = vmatpush.msra.mxu1 %v2600_v5  ;;  %v2588_v5 = vld [vmem:[#allocation4 + $0x540] sm:$0xff] }
 0x671   :  { %v1429_v1 = vpop.f32.mrf.mxu2 }
 0x672   :  { %v4987_v47 = vpack.i.bf16 %v1429_v1, %v6293_v26  ;;  %v934_v1 = vld [vmem:[#allocation2 + $0x528] sm:$0xff] }
 0x674   :  { %4988 = vrot.lane.b32.xlu2 %v4987_v47, %s5355_s4 }
 0x676   :  { %1479 = vmatmul.f32.gmra.mxu2 %v931_v40  ;;  %v2596_v40 = vld [vmem:[#allocation4 + $0x580] sm:$0xff] }
 0x677   :  { %2825 = vmatpush.msra.mxu1 %v2596_v40 }
 0x679   :  { %v1432_v22 = vpop.f32.mrf.mxu2 }
 0x67a   :  { %v4992_v43 = vpack.i.bf16 %v1432_v22, %v6295_v44  ;;  %v935_v22 = vld [vmem:[#allocation2 + $0x530] sm:$0xff] }
 0x67c   :  { %4993 = vrot.lane.b32.xlu0 %v4992_v43, %s5355_s4 }
 0x67e   :  { %1482 = vmatmul.f32.gmra.mxu2 %v932_v30  ;;  %v2592_v30 = vld [vmem:[#allocation4 + $0x560] sm:$0xff] }
 0x67f   :  { %2826 = vmatpush.msra.mxu1 %v2592_v30  ;;  %v2536_v30 = vld [vmem:[#allocation4 + $0x3a0] sm:$0xff] }
 0x681   :  { %v1435_v35 = vpop.f32.mrf.mxu2  ;;  %2827 = vmatpush.msra.mxu1 %v2588_v5  ;;  %v2532_v5 = vld [vmem:[#allocation4 + $0x380] sm:$0xff] }
 0x682   :  { %v4997_v36 = vpack.i.bf16 %v1435_v35, %v6297_v10  ;;  %v936_v35 = vld [vmem:[#allocation2 + $0x538] sm:$0xff] }
 0x684   :  { %4998 = vrot.lane.b32.xlu1 %v4997_v36, %s5355_s4 }
 0x686   :  { %1485 = vmatmul.f32.gmra.mxu2 %v933_v55 }
 0x689   :  { %v1438_v26 = vpop.f32.mrf.mxu2 }
 0x68a   :  { %v5002_v34 = vpack.i.bf16 %v1438_v26, %v6299_v31  ;;  %v2584_v26 = vld [vmem:[#allocation4 + $0x520] sm:$0xff] }
 0x68b   :  { %2828 = vmatpush.msra.mxu1 %v2584_v26 }
 0x68c   :  { %5003 = vrot.lane.b32.xlu2 %v5002_v34, %s5355_s4 }
 0x68e   :  { %1488 = vmatmul.f32.gmra.mxu2 %v934_v1 }
 0x691   :  { %v1441_v44 = vpop.f32.mrf.mxu2 }
 0x692   :  { %v5007_v47 = vpack.i.bf16 %v1441_v44, %v6301_v63  ;;  %v2544_v44 = vld [vmem:[#allocation4 + $0x3e0] sm:$0xff] }
 0x693   :  { %2757 = vmatpush.msra.mxu0 %v2544_v44  ;;  %v2528_v44 = vld [vmem:[#allocation4 + $0x360] sm:$0xff] }
 0x694   :  { %5008 = vrot.lane.b32.xlu0 %v5007_v47, %s5355_s4  ;;  %v2576_v47 = vld [vmem:[#allocation4 + $0x4e0] sm:$0xff] }
 0x696   :  { %1491 = vmatmul.f32.gmra.mxu2 %v935_v22 }
 0x699   :  { %v1444_v10 = vpop.f32.mrf.mxu2 }
 0x69a   :  { %v5027_v43 = vpack.i.bf16 %v1444_v10, %v6303_v28  ;;  %v2580_v28 = vld [vmem:[#allocation4 + $0x500] sm:$0xff] }
 0x69b   :  { %2829 = vmatpush.msra.mxu1 %v2580_v28  ;;  %v2540_v10 = vld [vmem:[#allocation4 + $0x3c0] sm:$0xff] }
 0x69c   :  { %5028 = vrot.lane.b32.xlu1 %v5027_v43, %s5355_s4  ;;  %2758 = vmatpush.msra.mxu0 %v2540_v10  ;;  %v5017_v10 = vpack.i.bf16 %v6412_v8, %v6258_v13  ;;  %v2520_v13 = vld [vmem:[#allocation4 + $0x320] sm:$0xff] }
 0x69d   :  { %2830 = vmatpush.msra.mxu1 %v2576_v47 }
 0x69e   :  { %1494 = vmatmul.f32.gmra.mxu2 %v936_v35  ;;  %v2572_v35 = vld [vmem:[#allocation4 + $0x4c0] sm:$0xff]  ;;  %2759 = vmatpush.msra.mxu0 %v2536_v30 }
 0x69f   :  { %2831 = vmatpush.msra.mxu1 %v2572_v35  ;;  %v2524_v30 = vld [vmem:[#allocation4 + $0x340] sm:$0xff]  ;;  %v1588_v35 = vpop.f32.mrf.mxu3 }
 0x6a0   :  { %2760 = vmatpush.msra.mxu0 %v2532_v5 }
 0x6a1   :  { %v1447_v31 = vpop.f32.mrf.mxu2  ;;  %2832 = vmatpush.msra.mxu1 %v2568_v52 }
 0x6a2   :  { %2761 = vmatpush.msra.mxu0 %v2528_v44  ;;  %v5042_v5 = vpack.i.bf16 %v1447_v31, %v6305_v56  ;;  %v5032_v56 = vpack.i.bf16 %v6420_v14, %v6261_v16  ;;  %v2560_v16 = vld [vmem:[#allocation4 + $0x460] sm:$0xff] }
 0x6a3   :  { %v2508_v14 = vld [vmem:[#allocation4 + $0x2c0] sm:$0xff] }
 0x6a4   :  { %2762 = vmatpush.msra.mxu0 %v2524_v30 }
 0x6a6   :  { %2763 = vmatpush.msra.mxu0 %v2520_v13  ;;  %v4954_v13 = vpop.permute.xlu2 %4953 }
 0x6a7   :  { %v1591_v52 = vpop.f32.mrf.mxu3 }
 0x6a9   :  { %v6470_v36 = vpop.f32.mrf.mxu2 }
 0x6b1   :  { %v6472_v55 = vpop.f32.mrf.mxu2 }
 0x6b9   :  { %v6474_v63 = vpop.f32.mrf.mxu2 }
 0x6c1   :  { %v6476_v34 = vpop.f32.mrf.mxu2 }
 0x6c9   :  { %v6478_v40 = vpop.f32.mrf.mxu2 }
 0x6d1   :  { %v6480_v1 = vpop.f32.mrf.mxu2 }
 0x6d9   :  { %v6482_v22 = vpop.f32.mrf.mxu2 }
 0x6e1   :  { %v6484_v43 = vpop.f32.mrf.mxu2 }
 0x6e9   :  { %v1474_v26 = vpop.f32.mrf.mxu2 }
 0x6ea   :  { %v5012_v28 = vpack.i.bf16 %v1474_v26, %v6323_v61 }
 0x6ec   :  { %5013 = vrot.lane.b32.xlu2 %v5012_v28, %s5354_s28  ;;  %v2516_v28 = vld [vmem:[#allocation4 + $0x300] sm:$0xff] }
 0x6ed   :  { %2764 = vmatpush.msra.mxu0 %v2516_v28  ;;  %v5117_v28 = vpack.i.bf16 %v6446_v27, %v6281_v29  ;;  %v5132_v29 = vpack.i.bf16 %v6448_v37, %v6283_v21  ;;  %v5122_v27 = vpack.i.bf16 %v6476_v34, %v6313_v2  ;;  %v5142_v21 = vpack.i.bf16 %v5987_v20, %v6347_v11 }
 0x6ee   :  { %v5137_v2 = vpack.i.bf16 %v6478_v40, %v6315_v41  ;;  %v4955_v37 = vunpack.i.l.bf16 %v4954_v13 }
 0x6f0   :  { %v2308_v41 = vsel %vm90_vm0, %v6039_v17, %v4955_v37  ;;  %v2477_v17 = vld [vmem:[#allocation4 + $0x1c8] sm:$0xff] }
 0x6f1   :  { %v1477_v47 = vpop.f32.mrf.mxu2 }
 0x6f2   :  { %v5022_v33 = vpack.i.bf16 %v1477_v47, %v6325_v45  ;;  %v2564_v45 = vld [vmem:[#allocation4 + $0x480] sm:$0xff]  ;;  %v5047_v47 = vpack.i.bf16 %v6428_v19, %v6266_v24  ;;  %v5062_v24 = vpack.i.bf16 %v6470_v36, %v6307_v39 }
 0x6f3   :  { %2833 = vmatpush.msra.mxu1 %v2564_v45  ;;  %v2504_v19 = vld [vmem:[#allocation4 + $0x2a0] sm:$0xff] }
 0x6f4   :  { %5018 = vrot.lane.b32.xlu2 %v5017_v10, %s5352_s30  ;;  %5023 = vrot.lane.b32.xlu0 %v5022_v33, %s5354_s28  ;;  %v2500_v39 = vld [vmem:[#allocation4 + $0x280] sm:$0xff] }
 0x6f5   :  { %2834 = vmatpush.msra.mxu1 %v2560_v16  ;;  %v2488_v45 = vld [vmem:[#allocation4 + $0x220] sm:$0xff] }
 0x6f9   :  { %v1480_v61 = vpop.f32.mrf.mxu2 }
 0x6fa   :  { %v5037_v26 = vpack.i.bf16 %v1480_v61, %v6327_v4  ;;  %v2512_v4 = vld [vmem:[#allocation4 + $0x2e0] sm:$0xff] }
 0x6fb   :  { %2765 = vmatpush.msra.mxu0 %v2512_v4  ;;  %v2609_v4 = vld [vmem:[#allocation4 + $0x5e8] sm:$0xff] }
 0x6fc   :  { %5038 = vrot.lane.b32.xlu1 %v5037_v26, %s5354_s28  ;;  %5043 = vrot.lane.b32.xlu2 %v5042_v5, %s5355_s4  ;;  %v5092_v26 = vpack.i.bf16 %v5972_v48, %v6341_v6  ;;  %v2548_v48 = vld [vmem:[#allocation4 + $0x400] sm:$0xff] }
 0x6fd   :  { %2222 = vrot.lane.b32.xlu0 %v1588_v35, %s5352_s30  ;;  %2766 = vmatpush.msra.mxu0 %v2508_v14  ;;  %v2556_v35 = vld [vmem:[#allocation4 + $0x440] sm:$0xff]  ;;  %v2605_v14 = vld [vmem:[#allocation4 + $0x5c8] sm:$0xff] }
 0x6fe   :  { %2835 = vmatpush.msra.mxu1 %v2556_v35  ;;  %3082 = vmatpush.msrb.mxu3 %v2609_v4  ;;  %v8573_v35 = vld [vmem:[#allocation55_spill] sm:$0xff] }
 0x6ff   :  { %2767 = vmatpush.msra.mxu0 %v2504_v19 }
 0x700   :  { %3083 = vmatpush.msrb.mxu3 %v2605_v14  ;;  %v8588_v14 = vld [vmem:[#allocation18_spill] sm:$0xff] }
 0x701   :  { %v1483_v8 = vpop.f32.mrf.mxu2  ;;  %2768 = vmatpush.msra.mxu0 %v2500_v39  ;;  %v2601_v39 = vld [vmem:[#allocation4 + $0x5a8] sm:$0xff] }
 0x702   :  { %v5052_v33 = vpack.i.bf16 %v1483_v8, %v6329_v38  ;;  %v1594_v38 = vpop.f32.mrf.mxu3  ;;  %v2484_v8 = vld [vmem:[#allocation4 + $0x200] sm:$0xff]  ;;  %3084 = vmatpush.msrb.mxu3 %v2601_v39 }
 0x704   :  { %2224 = vrot.lane.b32.xlu1 %v1591_v52, %s5352_s30  ;;  %5053 = vrot.lane.b32.xlu2 %v5052_v33, %s5354_s28  ;;  %v2552_v52 = vld [vmem:[#allocation4 + $0x420] sm:$0xff]  ;;  %v6541_v33 = vpop.permute.xlu1 %4963 }
 0x705   :  { %5033 = vrot.lane.b32.xlu0 %v5032_v56, %s5352_s30  ;;  %2836 = vmatpush.msra.mxu1 %v2552_v52  ;;  %v4966_v39 = vunpack.i.h.bf16 %v6541_v33 }
 0x707   :  { %2837 = vmatpush.msra.mxu1 %v2548_v48  ;;  %v8580_v48 = vld [vmem:[#allocation9_spill] sm:$0xff] }
 0x709   :  { %v1486_v31 = vpop.f32.mrf.mxu2 }
 0x70a   :  { %v5057_v44 = vpack.i.bf16 %v1486_v31, %v6331_v18  ;;  %v5077_v18 = vpack.i.bf16 %v6436_v60, %v6276_v7  ;;  %v1597_v7 = vpop.f32.mrf.mxu3  ;;  %v2496_v60 = vld [vmem:[#allocation4 + $0x260] sm:$0xff]  ;;  %v2481_v31 = vld [vmem:[#allocation4 + $0x1e8] sm:$0xff] }
 0x70b   :  { %2769 = vmatpush.msra.mxu0 %v2496_v60  ;;  %v8575_v60 = vld [vmem:[#allocation53_spill] sm:$0xff] }
 0x70c   :  { %5048 = vrot.lane.b32.xlu1 %v5047_v47, %s5352_s30  ;;  %2226 = vrot.lane.b32.xlu2 %v1594_v38, %s5352_s30  ;;  %v2545_v47 = vld [vmem:[#allocation4 + $0x3e8] sm:$0xff]  ;;  %v6572_v38 = vpop.permute.xlu0 %4958 }
 0x70d   :  { %5058 = vrot.lane.b32.xlu0 %v5057_v44, %s5354_s28  ;;  %3017 = vmatpush.msrb.mxu1 %v2545_v47  ;;  %v4961_v37 = vunpack.i.h.bf16 %v6572_v38  ;;  %v2529_v47 = vld [vmem:[#allocation4 + $0x368] sm:$0xff] }
 0x711   :  { %v1489_v10 = vpop.f32.mrf.mxu2 }
 0x712   :  { %v5067_v30 = vpack.i.bf16 %v1489_v10, %v6333_v23  ;;  %v5072_v23 = vpack.i.bf16 %v5967_v42, %v6339_v54  ;;  %v5082_v42 = vpack.i.bf16 %v6472_v55, %v6309_v25  ;;  %v2492_v54 = vld [vmem:[#allocation4 + $0x240] sm:$0xff]  ;;  %v1600_v6 = vpop.f32.mrf.mxu3  ;;  %v5107_v25 = vpack.i.bf16 %v6474_v63, %v6311_v58  ;;  %v6539_v55 = vpop.permute.xlu2 %4968 }
 0x713   :  { %2770 = vmatpush.msra.mxu0 %v2492_v54  ;;  %v5112_v58 = vpack.i.bf16 %v5976_v53, %v6343_v59  ;;  %v5127_v63 = vpack.i.bf16 %v5983_v9, %v6345_v12  ;;  %v4956_v12 = vunpack.i.h.bf16 %v4954_v13  ;;  %v8577_v54 = vld [vmem:[#allocation8_spill] sm:$0xff] }
 0x714   :  { %5068 = vrot.lane.b32.xlu1 %v5067_v30, %s5354_s28  ;;  %5078 = vrot.lane.b32.xlu2 %v5077_v18, %s5352_s30 }
 0x715   :  { %5063 = vrot.lane.b32.xlu0 %v5062_v24, %s5355_s4  ;;  %2771 = vmatpush.msra.mxu0 %v2488_v45  ;;  %v2356_v20 = vsel %vm90_vm0, %v6355_v50, %v4956_v12  ;;  %v5152_v50 = vpack.i.bf16 %v6480_v1, %v8573_v35 }
 0x717   :  { %2772 = vmatpush.msra.mxu0 %v2484_v8  ;;  %v8579_v8 = vld [vmem:[#allocation59_spill] sm:$0xff] }
 0x719   :  { %v1492_v61 = vpop.f32.mrf.mxu2  ;;  %2952 = vmatpush.msrb.mxu0 %v2481_v31  ;;  %v2593_v31 = vld [vmem:[#allocation4 + $0x568] sm:$0xff] }
 0x71a   :  { %v5087_v5 = vpack.i.bf16 %v1492_v61, %v6335_v32  ;;  %v1603_v56 = vpop.f32.mrf.mxu3  ;;  %v2541_v61 = vld [vmem:[#allocation4 + $0x3c8] sm:$0xff] }
 0x71b   :  { %2953 = vmatpush.msrb.mxu0 %v2477_v17  ;;  %3018 = vmatpush.msrb.mxu1 %v2541_v61  ;;  %v2589_v17 = vld [vmem:[#allocation4 + $0x548] sm:$0xff] }
 0x71c   :  { %5073 = vrot.lane.b32.xlu1 %v5072_v23, %s5354_s28  ;;  %5088 = vrot.lane.b32.xlu2 %v5087_v5, %s5354_s28  ;;  %v8574_v23 = vld [vmem:[#allocation52_spill] sm:$0xff] }
 0x71d   :  { %2228 = vrot.lane.b32.xlu0 %v1597_v7, %s5352_s30  ;;  %v5147_v5 = vpack.i.bf16 %v6450_v46, %v8574_v23  ;;  %v6595_v7 = vpop.permute.xlu0 %4973 }
 0x721   :  { %v1495_v36 = vpop.f32.mrf.mxu2 }
 0x722   :  { %v5097_v32 = vpack.i.bf16 %v1495_v36, %v6337_v49  ;;  %v5102_v49 = vpack.i.bf16 %v6444_v62, %v6279_v57  ;;  %v6550_v57 = vpop.permute.xlu2 %4988  ;;  %v6552_v62 = vpop.permute.xlu1 %4978  ;;  %v5162_v36 = vpack.i.bf16 %v6452_v0, %v8575_v60  ;;  %v4965_v60 = vunpack.i.l.bf16 %v6541_v33 }
 0x723   :  { %v1606_v59 = vpop.f32.mrf.mxu3  ;;  %v6610_v0 = vpop.f32.mrf.mxu0 }
 0x724   :  { %5083 = vrot.lane.b32.xlu1 %v5082_v42, %s5355_s4  ;;  %5093 = vrot.lane.b32.xlu2 %v5092_v26, %s5354_s28  ;;  %v2473_v26 = vld [vmem:[#allocation4 + $0x1a8] sm:$0xff]  ;;  %8578 = vst [vmem:[#allocation55_spill] sm:$0xff] %v6610_v0 }
 0x725   :  { %5098 = vrot.lane.b32.xlu0 %v5097_v32, %s5354_s28  ;;  %v2537_v42 = vld [vmem:[#allocation4 + $0x3a8] sm:$0xff]  ;;  %v8576_v32 = vld [vmem:[#allocation58_spill] sm:$0xff]  ;;  %2954 = vmatpush.msrb.mxu0 %v2473_v26  ;;  %v6606_v45 = vpop.permute.xlu0 %4993 }
 0x726   :  { %v5157_v13 = vpack.i.bf16 %v8577_v54, %v8576_v32  ;;  %3019 = vmatpush.msrb.mxu1 %v2537_v42  ;;  %v2525_v26 = vld [vmem:[#allocation4 + $0x348] sm:$0xff]  ;;  %v4996_v42 = vunpack.i.h.bf16 %v6606_v45  ;;  %v8590_v54 = vld [vmem:[#allocation62_spill] sm:$0xff] }
 0x72a   :  { %v6563_v53 = vpop.permute.xlu2 %5003  ;;  %v4984_v9 = vpop.permute.xlu1 %4983 }
 0x72b   :  { %v4986_v34 = vunpack.i.h.bf16 %v4984_v9  ;;  %v4985_v44 = vunpack.i.l.bf16 %v4984_v9  ;;  %v1609_v18 = vpop.f32.mrf.mxu3  ;;  %v6627_v4 = vpop.f32.mrf.mxu0  ;;  %v8584_v9 = vld [vmem:[#allocation60_spill] sm:$0xff] }
 0x72c   :  { %2230 = vrot.lane.b32.xlu1 %v1600_v6, %s5352_s30  ;;  %5108 = vrot.lane.b32.xlu2 %v5107_v25, %s5355_s4  ;;  %v5172_v6 = vpack.i.bf16 %v8580_v48, %v8579_v8  ;;  %v8581_v25 = vld [vmem:[#allocation54_spill] sm:$0xff]  ;;  %8583 = vst [vmem:[#allocation52_spill] sm:$0xff] %v6627_v4  ;;  %v8591_v8 = vld [vmem:[#allocation20_spill] sm:$0xff] }
 0x72d   :  { %5103 = vrot.lane.b32.xlu0 %v5102_v49, %s5352_s30  ;;  %v2324_v10 = vsel %vm2274_vm6, %v2308_v41, %v4985_v44  ;;  %v2372_v30 = vsel %vm2274_vm6, %v2356_v20, %v4986_v34  ;;  %v5177_v49 = vpack.i.bf16 %v6454_v51, %v8581_v25  ;;  %v4960_v34 = vunpack.i.l.bf16 %v6572_v38  ;;  %v2465_v44 = vld [vmem:[#allocation4 + $0x168] sm:$0xff] }
 0x72e   :  { %v4991_v20 = vunpack.i.h.bf16 %v6550_v57  ;;  %v4990_v41 = vunpack.i.l.bf16 %v6550_v57  ;;  %v2310_v48 = vsel %vm90_vm0, %v8591_v8, %v4965_v60  ;;  %v4975_v60 = vunpack.i.l.bf16 %v6595_v7  ;;  %v8599_v8 = vld [vmem:[#allocation24_spill] sm:$0xff] }
 0x733   :  { %v1612_v46 = vpop.f32.mrf.mxu3 }
 0x734   :  { %5118 = vrot.lane.b32.xlu1 %v5117_v28, %s5352_s30  ;;  %2232 = vrot.lane.b32.xlu2 %v1603_v56, %s5352_s30  ;;  %v2597_v28 = vld [vmem:[#allocation4 + $0x588] sm:$0xff] }
 0x735   :  { %5113 = vrot.lane.b32.xlu0 %v5112_v58, %s5354_s28  ;;  %v2469_v56 = vld [vmem:[#allocation4 + $0x188] sm:$0xff]  ;;  %3085 = vmatpush.msrb.mxu3 %v2597_v28  ;;  %v8592_v28 = vld [vmem:[#allocation11_spill] sm:$0xff] }
 0x736   :  { %v2533_v58 = vld [vmem:[#allocation4 + $0x388] sm:$0xff]  ;;  %2955 = vmatpush.msrb.mxu0 %v2469_v56 }
 0x737   :  { %3020 = vmatpush.msrb.mxu1 %v2533_v58  ;;  %3086 = vmatpush.msrb.mxu3 %v2593_v31  ;;  %v2585_v31 = vld [vmem:[#allocation4 + $0x528] sm:$0xff] }
 0x738   :  { %2956 = vmatpush.msrb.mxu0 %v2465_v44 }
 0x739   :  { %3021 = vmatpush.msrb.mxu1 %v2529_v47  ;;  %3087 = vmatpush.msrb.mxu3 %v2589_v17  ;;  %v2453_v17 = vld [vmem:[#allocation4 + $0x108] sm:$0xff] }
 0x73b   :  { %3022 = vmatpush.msrb.mxu1 %v2525_v26  ;;  %3088 = vmatpush.msrb.mxu3 %v2585_v31  ;;  %v5005_v26 = vunpack.i.l.bf16 %v6563_v53  ;;  %v2577_v31 = vld [vmem:[#allocation4 + $0x4e8] sm:$0xff] }
 0x73c   :  { %5128 = vrot.lane.b32.xlu1 %v5127_v63, %s5354_s28  ;;  %5133 = vrot.lane.b32.xlu2 %v5132_v29, %s5352_s30  ;;  %v8582_v63 = vld [vmem:[#allocation56_spill] sm:$0xff] }
 0x73d   :  { %5123 = vrot.lane.b32.xlu0 %v5122_v27, %s5355_s4  ;;  %v5167_v29 = vpack.i.bf16 %v6482_v22, %v8582_v63  ;;  %v6620_v27 = vpop.permute.xlu1 %4998  ;;  %v8585_v22 = vld [vmem:[#allocation10_spill] sm:$0xff] }
 0x744   :  { %5138 = vrot.lane.b32.xlu1 %v5137_v2, %s5355_s4  ;;  %5143 = vrot.lane.b32.xlu2 %v5142_v21, %s5354_s28  ;;  %v5187_v21 = vpack.i.bf16 %v8585_v22, %v8584_v9  ;;  %v8586_v2 = vld [vmem:[#allocation57_spill] sm:$0xff]  ;;  %v4971_v9 = vunpack.i.h.bf16 %v6539_v55  ;;  %v4970_v22 = vunpack.i.l.bf16 %v6539_v55  ;;  %v8595_v55 = vld [vmem:[#allocation22_spill] sm:$0xff] }
 0x745   :  { %2234 = vrot.lane.b32.xlu0 %v1606_v59, %s5352_s30  ;;  %v6623_v59 = vpop.permute.xlu0 %5008  ;;  %v5182_v12 = vpack.i.bf16 %v6484_v43, %v8586_v2  ;;  %v6640_v43 = vpop.permute.xlu1 %5028  ;;  %v2521_v2 = vld [vmem:[#allocation4 + $0x328] sm:$0xff] }
 0x746   :  { %v5014_v16 = vpop.permute.xlu2 %5013  ;;  %3023 = vmatpush.msrb.mxu1 %v2521_v2  ;;  %v5011_v2 = vunpack.i.h.bf16 %v6623_v59 }
 0x747   :  { %v5016_v11 = vunpack.i.h.bf16 %v5014_v16  ;;  %v5015_v40 = vunpack.i.l.bf16 %v5014_v16  ;;  %v1615_v16 = vpop.f32.mrf.mxu3 }
 0x749   :  { %v6581_v24 = vsel %vm2291_vm7, %v2324_v10, %v5015_v40  ;;  %v6584_v19 = vsel %vm2291_vm7, %v2372_v30, %v5016_v11  ;;  %v8587_v40 = vld [vmem:[#allocation61_spill] sm:$0xff]  ;;  %v2309_v10 = vsel %vm90_vm0, %v8588_v14, %v4960_v34 }
 0x74a   :  { %2773 = vmatmul.f32.vlgmr.msra.gmra.mxu0 %v6581_v24  ;;  %2838 = vmatmul.f32.vlgmr.msra.gmra.mxu1 %v6584_v19  ;;  %v2357_v38 = vsel %vm90_vm0, %v8587_v40, %v4961_v37  ;;  %v2325_v35 = vsel %vm2274_vm6, %v2309_v10, %v4990_v41  ;;  %v5000_v37 = vunpack.i.l.bf16 %v6620_v27  ;;  %v8596_v40 = vld [vmem:[#allocation12_spill] sm:$0xff] }
 0x74c   :  { %2236 = vrot.lane.b32.xlu1 %v1609_v18, %s5352_s30  ;;  %5153 = vrot.lane.b32.xlu2 %v5152_v50, %s5355_s4  ;;  %v2373_v50 = vsel %vm2274_vm6, %v2357_v38, %v4991_v20  ;;  %v8594_v20 = vld [vmem:[#allocation63_spill] sm:$0xff] }
 0x74d   :  { %5148 = vrot.lane.b32.xlu0 %v5147_v5, %s5352_s30  ;;  %v6658_v5 = vpop.f32.mrf.mxu0  ;;  %v2359_v41 = vsel %vm90_vm0, %v8594_v20, %v4971_v9  ;;  %v4981_v9 = vunpack.i.h.bf16 %v6552_v62 }
 0x74e   :  { %v6597_v1 = vpop.permute.xlu2 %5018  ;;  %8589 = vst [vmem:[#allocation53_spill] sm:$0xff] %v6658_v5  ;;  %v8653_v5 = vld [vmem:[#allocation23_spill] sm:$0xff] }
 0x754   :  { %5163 = vrot.lane.b32.xlu1 %v5162_v36, %s5352_s30  ;;  %2238 = vrot.lane.b32.xlu2 %v1612_v46, %s5352_s30  ;;  %v2461_v36 = vld [vmem:[#allocation4 + $0x148] sm:$0xff]  ;;  %v4995_v46 = vunpack.i.l.bf16 %v6606_v45 }
 0x755   :  { %5158 = vrot.lane.b32.xlu0 %v5157_v13, %s5354_s28  ;;  %2957 = vmatpush.msrb.mxu0 %v2461_v36  ;;  %v2358_v13 = vsel %vm90_vm0, %v8590_v54, %v4966_v39  ;;  %v6690_v34 = vpop.f32.mrf.mxu0  ;;  %v2517_v39 = vld [vmem:[#allocation4 + $0x308] sm:$0xff]  ;;  %v5006_v36 = vunpack.i.h.bf16 %v6563_v53 }
 0x756   :  { %v6608_v52 = vpop.permute.xlu2 %5043  ;;  %v2326_v56 = vsel %vm2274_vm6, %v2310_v48, %v4995_v46  ;;  %v2374_v45 = vsel %vm2274_vm6, %v2358_v13, %v4996_v42  ;;  %8593 = vst [vmem:[#allocation58_spill] sm:$0xff] %v6690_v34  ;;  %3024 = vmatpush.msrb.mxu1 %v2517_v39  ;;  %v2312_v48 = vsel %vm90_vm0, %v8599_v8, %v4975_v60  ;;  %v5020_v39 = vunpack.i.l.bf16 %v6597_v1  ;;  %v2445_v60 = vld [vmem:[#allocation4 + $0xc8] sm:$0xff] }
 0x757   :  { %v2328_v53 = vsel %vm2274_vm6, %v2312_v48, %v5005_v26  ;;  %v8604_v26 = vld [vmem:[#allocation66_spill] sm:$0xff] }
 0x75c   :  { %5173 = vrot.lane.b32.xlu1 %v5172_v6, %s5354_s28  ;;  %5178 = vrot.lane.b32.xlu2 %v5177_v49, %s5352_s30 }
 0x75d   :  { %5168 = vrot.lane.b32.xlu0 %v5167_v29, %s5355_s4  ;;  %v6724_v46 = vpop.f32.mrf.mxu0 }
 0x75e   :  { %v6625_v51 = vpop.permute.xlu2 %5053  ;;  %8597 = vst [vmem:[#allocation8_spill] sm:$0xff] %v6724_v46 }
 0x75f   :  { %v5056_v44 = vunpack.i.h.bf16 %v6625_v51  ;;  %v5055_v47 = vunpack.i.l.bf16 %v6625_v51 }
 0x764   :  { %5183 = vrot.lane.b32.xlu1 %v5182_v12, %s5355_s4  ;;  %5188 = vrot.lane.b32.xlu2 %v5187_v21, %s5354_s28  ;;  %v2457_v21 = vld [vmem:[#allocation4 + $0x128] sm:$0xff]  ;;  %v5001_v12 = vunpack.i.h.bf16 %v6620_v27 }
 0x765   :  { %2240 = vrot.lane.b32.xlu0 %v1615_v16, %s5352_s30  ;;  %2958 = vmatpush.msrb.mxu0 %v2457_v21  ;;  %v2513_v21 = vld [vmem:[#allocation4 + $0x2e8] sm:$0xff] }
 0x766   :  { %v5024_v11 = vpop.permute.xlu0 %5023  ;;  %v6646_v30 = vpop.permute.xlu2 %2226  ;;  %v2375_v10 = vsel %vm2274_vm6, %v2359_v41, %v5001_v12  ;;  %v5010_v12 = vunpack.i.l.bf16 %v6623_v59  ;;  %3025 = vmatpush.msrb.mxu1 %v2513_v21 }
 0x767   :  { %v5026_v57 = vunpack.i.h.bf16 %v5024_v11  ;;  %v5025_v18 = vunpack.i.l.bf16 %v5024_v11  ;;  %v2311_v11 = vsel %vm90_vm0, %v8595_v55, %v4970_v22  ;;  %2959 = vmatpush.msrb.mxu0 %v2453_v17  ;;  %v2449_v22 = vld [vmem:[#allocation4 + $0xe8] sm:$0xff]  ;;  %v5021_v17 = vunpack.i.h.bf16 %v6597_v1 }
 0x768   :  { %v2327_v14 = vsel %vm2274_vm6, %v2311_v11, %v5000_v37 }
 0x769   :  { %v6651_v61 = vsel %vm2291_vm7, %v2325_v35, %v5025_v18  ;;  %v6654_v23 = vsel %vm2291_vm7, %v2373_v50, %v5026_v57  ;;  %v6709_v51 = vsel %vm2291_vm7, %v2327_v14, %v5055_v47  ;;  %v6712_v57 = vsel %vm2291_vm7, %v2375_v10, %v5056_v44  ;;  %v2581_v18 = vld [vmem:[#allocation4 + $0x508] sm:$0xff]  ;;  %2960 = vmatpush.msrb.mxu0 %v2449_v22  ;;  %v6761_v14 = vpop.f32.mrf.mxu0 }
 0x76a   :  { %2776 = vmatmul.f32.gmra.mxu0 %v6651_v61  ;;  %2841 = vmatmul.f32.gmra.mxu1 %v6654_v23  ;;  %v4976_v35 = vunpack.i.h.bf16 %v6595_v7  ;;  %v8601_v47 = vld [vmem:[#allocation65_spill] sm:$0xff]  ;;  %8603 = vst [vmem:[#allocation59_spill] sm:$0xff] %v6761_v14 }
 0x76b   :  { %3089 = vmatpush.msrb.mxu3 %v2581_v18  ;;  %2961 = vmatpush.msrb.mxu0 %v2445_v60 }
 0x76d   :  { %3090 = vmatpush.msrb.mxu3 %v2577_v31 }
 0x76e   :  { %v5039_v32 = vpop.permute.xlu1 %5038  ;;  %v6674_v58 = vpop.permute.xlu2 %5078 }
 0x76f   :  { %v5041_v6 = vunpack.i.h.bf16 %v5039_v32  ;;  %v5040_v25 = vunpack.i.l.bf16 %v5039_v32  ;;  %v2223_v49 = vpop.permute.xlu0 %2222  ;;  %v8598_v32 = vld [vmem:[#allocation64_spill] sm:$0xff] }
 0x770   :  { %v6670_v33 = vsel %vm90_vm0, %v8592_v28, %v2223_v49  ;;  %v2360_v54 = vsel %vm90_vm0, %v8598_v32, %v4976_v35  ;;  %v2573_v35 = vld [vmem:[#allocation4 + $0x4c8] sm:$0xff]  ;;  %v2362_v32 = vsel %vm90_vm0, %v8604_v26, %v5021_v17 }
 0x771   :  { %4664 = vmatmul.msk.f32.gmra.mxu3 %vm2274_vm6, %v6670_v33  ;;  %v6679_v63 = vsel %vm2291_vm7, %v2326_v56, %v5040_v25  ;;  %v6682_v29 = vsel %vm2291_vm7, %v2374_v45, %v5041_v6  ;;  %v8600_v6 = vld [vmem:[#allocation13_spill] sm:$0xff]  ;;  %v2376_v28 = vsel %vm2274_vm6, %v2360_v54, %v5006_v36  ;;  %v8605_v54 = vld [vmem:[#allocation26_spill] sm:$0xff] }
 0x772   :  { %2779 = vmatmul.f32.gmra.mxu0 %v6679_v63  ;;  %2844 = vmatmul.f32.gmra.mxu1 %v6682_v29  ;;  %v6733_v7 = vsel %vm90_vm0, %v8600_v6, %v6646_v30  ;;  %v4980_v30 = vunpack.i.l.bf16 %v6552_v62  ;;  %v8602_v62 = vld [vmem:[#allocation25_spill] sm:$0xff]  ;;  %v5031_v6 = vunpack.i.h.bf16 %v6640_v43 }
 0x773   :  { %3091 = vmatpush.msrb.mxu3 %v2573_v35  ;;  %v2509_v36 = vld [vmem:[#allocation4 + $0x2c8] sm:$0xff] }
 0x774   :  { %v2313_v20 = vsel %vm90_vm0, %v8602_v62, %v4980_v30  ;;  %3026 = vmatpush.msrb.mxu1 %v2509_v36  ;;  %v8610_v62 = vld [vmem:[#allocation27_spill] sm:$0xff]  ;;  %v2565_v26 = vld [vmem:[#allocation4 + $0x488] sm:$0xff] }
 0x776   :  { %v2225_v16 = vpop.permute.xlu1 %2224  ;;  %v6717_v50 = vpop.permute.xlu2 %5088 }
 0x777   :  { %v6700_v38 = vsel %vm90_vm0, %v8596_v40, %v2225_v16  ;;  %v6702_v27 = vpop.permute.xlu0 %5033  ;;  %v2361_v16 = vsel %vm90_vm0, %v8601_v47, %v4981_v9  ;;  %v2329_v40 = vsel %vm2274_vm6, %v2313_v20, %v5010_v12  ;;  %v5091_v8 = vunpack.i.h.bf16 %v6717_v50  ;;  %v2569_v9 = vld [vmem:[#allocation4 + $0x4a8] sm:$0xff]  ;;  %v6801_v12 = vpop.f32.mrf.mxu0 }
 0x778   :  { %v2377_v59 = vsel %vm2274_vm6, %v2361_v16, %v5011_v2  ;;  %v5090_v48 = vunpack.i.l.bf16 %v6717_v50  ;;  %v2378_v50 = vsel %vm2274_vm6, %v2362_v32, %v5031_v6  ;;  %v5036_v22 = vunpack.i.h.bf16 %v6702_v27  ;;  %3092 = vmatpush.msrb.mxu3 %v2569_v9  ;;  %8608 = vst [vmem:[#allocation54_spill] sm:$0xff] %v6801_v12  ;;  %v2505_v47 = vld [vmem:[#allocation4 + $0x2a8] sm:$0xff]  ;;  %v8609_v16 = vld [vmem:[#allocation67_spill] sm:$0xff] }
 0x779   :  { %4665 = vmatmul.msk.f32.gmra.mxu3 %vm2274_vm6, %v6700_v38  ;;  %v5035_v21 = vunpack.i.l.bf16 %v6702_v27  ;;  %v6799_v2 = vsel %vm2291_vm7, %v2378_v50, %v5091_v8  ;;  %3027 = vmatpush.msrb.mxu1 %v2505_v47  ;;  %v8613_v50 = vld [vmem:[#allocation15_spill] sm:$0xff]  ;;  %v8615_v47 = vld [vmem:[#allocation28_spill] sm:$0xff] }
 0x77a   :  { %2782 = vmatmul.f32.gmra.mxu0 %v6709_v51  ;;  %2847 = vmatmul.f32.gmra.mxu1 %v6712_v57  ;;  %8607 = vst [vmem:[#allocation9_spill] sm:$0xff] %v6799_v2  ;;  %v2363_v27 = vsel %vm90_vm0, %v8609_v16, %v5036_v22 }
 0x77b   :  { %v2315_v20 = vsel %vm90_vm0, %v8610_v62, %v5035_v21  ;;  %3093 = vmatpush.msrb.mxu3 %v2565_v26  ;;  %v5080_v62 = vunpack.i.l.bf16 %v6674_v58  ;;  %v8618_v26 = vld [vmem:[#allocation69_spill] sm:$0xff] }
 0x77e   :  { %v6722_v42 = vpop.permute.xlu1 %5048  ;;  %v6751_v37 = vpop.permute.xlu2 %5093 }
 0x77f   :  { %v5059_v13 = vpop.permute.xlu0 %5058  ;;  %v5051_v8 = vunpack.i.h.bf16 %v6722_v42  ;;  %v6823_v6 = vpop.f32.mrf.mxu0 }
 0x780   :  { %v5061_v25 = vunpack.i.h.bf16 %v5059_v13  ;;  %v5060_v49 = vunpack.i.l.bf16 %v5059_v13  ;;  %v2314_v13 = vsel %vm90_vm0, %v8605_v54, %v5020_v39  ;;  %8612 = vst [vmem:[#allocation60_spill] sm:$0xff] %v6823_v6  ;;  %v8646_v6 = vld [vmem:[#allocation37_spill] sm:$0xff] }
 0x781   :  { %4666 = vmatmul.msk.f32.gmra.mxu3 %vm2274_vm6, %v6733_v7 }
 0x782   :  { %v6740_v56 = vsel %vm2291_vm7, %v2328_v53, %v5060_v49  ;;  %v6743_v45 = vsel %vm2291_vm7, %v2376_v28, %v5061_v25  ;;  %v5030_v25 = vunpack.i.l.bf16 %v6640_v43  ;;  %v8606_v28 = vld [vmem:[#allocation14_spill] sm:$0xff] }
 0x783   :  { %2785 = vmatmul.f32.gmra.mxu0 %v6740_v56  ;;  %2850 = vmatmul.f32.gmra.mxu1 %v6743_v45 }
 0x784   :  { %v2330_v30 = vsel %vm2274_vm6, %v2314_v13, %v5030_v25  ;;  %v2501_v13 = vld [vmem:[#allocation4 + $0x288] sm:$0xff] }
 0x785   :  { %v6796_v43 = vsel %vm2291_vm7, %v2330_v30, %v5090_v48  ;;  %v5050_v48 = vunpack.i.l.bf16 %v6722_v42  ;;  %3028 = vmatpush.msrb.mxu1 %v2501_v13  ;;  %v8619_v13 = vld [vmem:[#allocation29_spill] sm:$0xff] }
 0x786   :  { %v5069_v44 = vpop.permute.xlu1 %5068  ;;  %v6783_v49 = vpop.permute.xlu2 %5108 }
 0x787   :  { %v5071_v41 = vunpack.i.h.bf16 %v5069_v44  ;;  %v5070_v55 = vunpack.i.l.bf16 %v5069_v44  ;;  %v6757_v11 = vpop.permute.xlu0 %5063  ;;  %v2441_v44 = vld [vmem:[#allocation4 + $0xa8] sm:$0xff]  ;;  %v2316_v16 = vsel %vm90_vm0, %v8615_v47, %v5050_v48  ;;  %v8620_v48 = vld [vmem:[#allocation16_spill] sm:$0xff] }
 0x788   :  { %2962 = vmatpush.msrb.mxu0 %v2441_v44  ;;  %v5066_v25 = vunpack.i.h.bf16 %v6757_v11  ;;  %v8614_v44 = vld [vmem:[#allocation68_spill] sm:$0xff] }
 0x789   :  { %v6764_v10 = vsel %vm2291_vm7, %v2329_v40, %v5070_v55  ;;  %v6767_v18 = vsel %vm2291_vm7, %v2377_v59, %v5071_v41  ;;  %v5046_v55 = vunpack.i.h.bf16 %v6608_v52  ;;  %v5045_v40 = vunpack.i.l.bf16 %v6608_v52  ;;  %v2437_v52 = vld [vmem:[#allocation4 + $0x88] sm:$0xff] }
 0x78a   :  { %2963 = vmatpush.msrb.mxu0 %v2437_v52  ;;  %v2364_v42 = vsel %vm90_vm0, %v8614_v44, %v5051_v8  ;;  %v2317_v8 = vsel %vm90_vm0, %v8619_v13, %v5080_v62 }
 0x78b   :  { %2788 = vmatmul.f32.gmra.mxu0 %v6764_v10  ;;  %2853 = vmatmul.f32.gmra.mxu1 %v6767_v18  ;;  %v2331_v60 = vsel %vm2274_vm6, %v2315_v20, %v5045_v40  ;;  %v2379_v36 = vsel %vm2274_vm6, %v2363_v27, %v5046_v55  ;;  %v2380_v27 = vsel %vm2274_vm6, %v2364_v42, %v5066_v25  ;;  %v2561_v40 = vld [vmem:[#allocation4 + $0x468] sm:$0xff] }
 0x78c   :  { %3094 = vmatpush.msrb.mxu3 %v2561_v40 }
 0x78e   :  { %v6779_v1 = vpop.permute.xlu1 %5073  ;;  %v2233_v39 = vpop.permute.xlu2 %2232 }
 0x78f   :  { %v2229_v53 = vpop.permute.xlu0 %2228  ;;  %v5075_v9 = vunpack.i.l.bf16 %v6779_v1  ;;  %v6861_v25 = vsel %vm90_vm0, %v8620_v48, %v2233_v39 }
 0x790   :  { %v6787_v31 = vsel %vm90_vm0, %v8606_v28, %v2229_v53  ;;  %v5065_v53 = vunpack.i.l.bf16 %v6757_v11  ;;  %v5076_v28 = vunpack.i.h.bf16 %v6779_v1  ;;  %v5081_v1 = vunpack.i.h.bf16 %v6674_v58  ;;  %v6853_v58 = vpop.f32.mrf.mxu0 }
 0x791   :  { %4667 = vmatmul.msk.f32.gmra.mxu3 %vm2274_vm6, %v6787_v31  ;;  %8617 = vst [vmem:[#allocation57_spill] sm:$0xff] %v6853_v58 }
 0x792   :  { %v2332_v11 = vsel %vm2274_vm6, %v2316_v16, %v5065_v53  ;;  %v6847_v55 = vsel %vm2291_vm7, %v2380_v27, %v5076_v28  ;;  %v2365_v52 = vsel %vm90_vm0, %v8618_v26, %v5081_v1  ;;  %v8623_v27 = vld [vmem:[#allocation30_spill] sm:$0xff]  ;;  %v5111_v26 = vunpack.i.h.bf16 %v6783_v49 }
 0x793   :  { %2791 = vmatmul.f32.gmra.mxu0 %v6796_v43  ;;  %2856 = vmatmul.f32.gmra.mxu1 %v6799_v2  ;;  %v6844_v20 = vsel %vm2291_vm7, %v2332_v11, %v5075_v9  ;;  %8616 = vst [vmem:[#allocation10_spill] sm:$0xff] %v6847_v55  ;;  %v8622_v11 = vld [vmem:[#allocation70_spill] sm:$0xff] }
 0x796   :  { %v5084_v41 = vpop.permute.xlu1 %5083 }
 0x797   :  { %v5099_v59 = vpop.permute.xlu0 %5098 }
 0x798   :  { %v5101_v35 = vunpack.i.h.bf16 %v5099_v59  ;;  %v5100_v17 = vunpack.i.l.bf16 %v5099_v59  ;;  %v5086_v59 = vunpack.i.h.bf16 %v5084_v41 }
 0x79a   :  { %v6814_v32 = vsel %vm2291_vm7, %v2331_v60, %v5100_v17  ;;  %v6817_v54 = vsel %vm2291_vm7, %v2379_v36, %v5101_v35  ;;  %v5085_v35 = vunpack.i.l.bf16 %v5084_v41  ;;  %v6849_v17 = vpop.permute.xlu2 %5133  ;;  %v2433_v60 = vld [vmem:[#allocation4 + $0x68] sm:$0xff]  ;;  %v2381_v9 = vsel %vm2274_vm6, %v2365_v52, %v5086_v59 }
 0x79b   :  { %8611 = vst [vmem:[#allocation56_spill] sm:$0xff] %v6817_v54  ;;  %2794 = vmatmul.f32.gmra.mxu0 %v6814_v32  ;;  %2859 = vmatmul.f32.gmra.mxu1 %v6817_v54  ;;  %v2497_v36 = vld [vmem:[#allocation4 + $0x268] sm:$0xff]  ;;  %v5110_v52 = vunpack.i.l.bf16 %v6783_v49 }
 0x79c   :  { %2964 = vmatpush.msrb.mxu0 %v2433_v60  ;;  %3029 = vmatpush.msrb.mxu1 %v2497_v36  ;;  %v2333_v28 = vsel %vm2274_vm6, %v2317_v8, %v5085_v35  ;;  %v2557_v59 = vld [vmem:[#allocation4 + $0x448] sm:$0xff]  ;;  %v6883_v36 = vpop.f32.mrf.mxu0 }
 0x79d   :  { %v2429_v35 = vld [vmem:[#allocation4 + $0x48] sm:$0xff]  ;;  %8624 = vst [vmem:[#allocation18_spill] sm:$0xff] %v6883_v36  ;;  %3095 = vmatpush.msrb.mxu3 %v2557_v59 }
 0x79e   :  { %v2231_v30 = vpop.permute.xlu1 %2230  ;;  %v2493_v60 = vld [vmem:[#allocation4 + $0x248] sm:$0xff]  ;;  %2965 = vmatpush.msrb.mxu0 %v2429_v35 }
 0x79f   :  { %v6831_v22 = vsel %vm90_vm0, %v8613_v50, %v2231_v30  ;;  %v5104_v21 = vpop.permute.xlu0 %5103  ;;  %v5096_v30 = vunpack.i.h.bf16 %v6751_v37  ;;  %v5095_v50 = vunpack.i.l.bf16 %v6751_v37  ;;  %3030 = vmatpush.msrb.mxu1 %v2493_v60  ;;  %v2553_v8 = vld [vmem:[#allocation4 + $0x428] sm:$0xff] }
 0x7a0   :  { %4668 = vmatmul.msk.f32.gmra.mxu3 %vm2274_vm6, %v6831_v22  ;;  %v5106_v44 = vunpack.i.h.bf16 %v5104_v21  ;;  %v5105_v42 = vunpack.i.l.bf16 %v5104_v21 }
 0x7a1   :  { %v6870_v47 = vsel %vm2291_vm7, %v2333_v28, %v5095_v50  ;;  %v6873_v39 = vsel %vm2291_vm7, %v2381_v9, %v5096_v30  ;;  %3096 = vmatpush.msrb.mxu3 %v2553_v8 }
 0x7a2   :  { %8621 = vst [vmem:[#allocation61_spill] sm:$0xff] %v6873_v39  ;;  %v6877_v16 = vpop.permute.xlu2 %5143  ;;  %v2366_v37 = vsel %vm90_vm0, %v8622_v11, %v5106_v44  ;;  %v2318_v1 = vsel %vm90_vm0, %v8623_v27, %v5105_v42  ;;  %v2425_v42 = vld [vmem:[#allocation4 + $0x28] sm:$0xff] }
 0x7a3   :  { %2797 = vmatmul.f32.gmra.mxu0 %v6844_v20  ;;  %2862 = vmatmul.f32.gmra.mxu1 %v6847_v55  ;;  %v2334_v48 = vsel %vm2274_vm6, %v2318_v1, %v5110_v52  ;;  %v2382_v28 = vsel %vm2274_vm6, %v2366_v37, %v5111_v26  ;;  %v2489_v11 = vld [vmem:[#allocation4 + $0x228] sm:$0xff]  ;;  %v8626_v37 = vld [vmem:[#allocation71_spill] sm:$0xff] }
 0x7a4   :  { %2966 = vmatpush.msrb.mxu0 %v2425_v42  ;;  %3031 = vmatpush.msrb.mxu1 %v2489_v11  ;;  %v2421_v11 = vld [vmem:[#allocation4 + $0x8] sm:$0xff] }
 0x7a6   :  { %v5119_v41 = vpop.permute.xlu1 %5118  ;;  %2967 = vmatpush.msrb.mxu0 %v2421_v11  ;;  %v5145_v11 = vunpack.i.l.bf16 %v6877_v16 }
 0x7a7   :  { %v5114_v53 = vpop.permute.xlu0 %5113  ;;  %v5120_v9 = vunpack.i.l.bf16 %v5119_v41 }
 0x7a8   :  { %4669 = vmatmul.msk.f32.gmra.mxu3 %vm2274_vm6, %v6861_v25  ;;  %v5116_v62 = vunpack.i.h.bf16 %v5114_v53  ;;  %v5115_v21 = vunpack.i.l.bf16 %v5114_v53  ;;  %v5121_v53 = vunpack.i.h.bf16 %v5119_v41  ;;  %v8627_v41 = vld [vmem:[#allocation31_spill] sm:$0xff] }
 0x7a9   :  { %v2319_v1 = vsel %vm90_vm0, %v8627_v41, %v5120_v9 }
 0x7aa   :  { %v6890_v30 = vsel %vm2291_vm7, %v2334_v48, %v5115_v21  ;;  %v6893_v50 = vsel %vm2291_vm7, %v2382_v28, %v5116_v62  ;;  %v2367_v27 = vsel %vm90_vm0, %v8626_v37, %v5121_v53  ;;  %v5154_v35 = vpop.permute.xlu2 %5153  ;;  %v6907_v48 = vpop.f32.mrf.mxu0  ;;  %v2549_v28 = vld [vmem:[#allocation4 + $0x408] sm:$0xff]  ;;  %v5136_v53 = vunpack.i.h.bf16 %v6849_v17 }
 0x7ab   :  { %2800 = vmatmul.f32.gmra.mxu0 %v6870_v47  ;;  %2865 = vmatmul.f32.gmra.mxu1 %v6873_v39  ;;  %8625 = vst [vmem:[#allocation62_spill] sm:$0xff] %v6893_v50  ;;  %v2485_v37 = vld [vmem:[#allocation4 + $0x208] sm:$0xff] }
 0x7ac   :  { %8629 = vst [vmem:[#allocation20_spill] sm:$0xff] %v6907_v48  ;;  %3097 = vmatpush.msrb.mxu3 %v2549_v28  ;;  %3032 = vmatpush.msrb.mxu1 %v2485_v37  ;;  %v5146_v28 = vunpack.i.h.bf16 %v6877_v16  ;;  %v2641_v16 = vld [vmem:[#allocation4 + $0x6e8] sm:$0xff] }
 0x7ad   :  { %3155 = vmatpush.msra.mxu0 %v2641_v16 }
 0x7ae   :  { %v5129_v40 = vpop.permute.xlu1 %5128 }
 0x7af   :  { %v5124_v13 = vpop.permute.xlu0 %5123  ;;  %v5131_v21 = vunpack.i.h.bf16 %v5129_v40  ;;  %v5130_v59 = vunpack.i.l.bf16 %v5129_v40  ;;  %v5135_v40 = vunpack.i.l.bf16 %v6849_v17  ;;  %v8632_v17 = vld [vmem:[#allocation72_spill] sm:$0xff] }
 0x7b0   :  { %v5126_v44 = vunpack.i.h.bf16 %v5124_v13  ;;  %v5125_v49 = vunpack.i.l.bf16 %v5124_v13  ;;  %v8628_v13 = vld [vmem:[#allocation17_spill] sm:$0xff]  ;;  %v2368_v41 = vsel %vm90_vm0, %v8632_v17, %v5136_v53  ;;  %v2546_v53 = vld [vmem:[#allocation4 + $0x3f0] sm:$0xff] }
 0x7b1   :  { %3277 = vmatpush.msra.mxu3 %v2546_v53 }
 0x7b2   :  { %v2335_v26 = vsel %vm2274_vm6, %v2319_v1, %v5125_v49  ;;  %v2383_v52 = vsel %vm2274_vm6, %v2367_v27, %v5126_v44  ;;  %v6921_v27 = vpop.f32.mrf.mxu3  ;;  %v8633_v1 = vld [vmem:[#allocation33_spill] sm:$0xff]  ;;  %v2239_v37 = vpop.permute.xlu2 %2238 }
 0x7b3   :  { %2803 = vmatmul.f32.gmra.mxu0 %v6890_v30  ;;  %2868 = vmatmul.f32.gmra.mxu1 %v6893_v50  ;;  %v6914_v9 = vsel %vm2291_vm7, %v2335_v26, %v5130_v59  ;;  %v6917_v49 = vsel %vm2291_vm7, %v2383_v52, %v5131_v21  ;;  %v2320_v21 = vsel %vm90_vm0, %v8633_v1, %v5135_v40 }
 0x7b4   :  { %8630 = vst [vmem:[#allocation11_spill] sm:$0xff] %v6914_v9 }
 0x7b5   :  { %8631 = vst [vmem:[#allocation63_spill] sm:$0xff] %v6917_v49 }
 0x7b6   :  { %v5139_v62 = vpop.permute.xlu1 %5138 }
 0x7b7   :  { %v2235_v60 = vpop.permute.xlu0 %2234  ;;  %v5141_v44 = vunpack.i.h.bf16 %v5139_v62  ;;  %v5140_v42 = vunpack.i.l.bf16 %v5139_v62 }
 0x7b8   :  { %v6905_v8 = vsel %vm90_vm0, %v8628_v13, %v2235_v60  ;;  %v8634_v60 = vld [vmem:[#allocation19_spill] sm:$0xff] }
 0x7b9   :  { %4670 = vmatmul.msk.f32.gmra.mxu3 %vm2274_vm6, %v6905_v8  ;;  %v2336_v52 = vsel %vm2274_vm6, %v2320_v21, %v5140_v42  ;;  %v2384_v13 = vsel %vm2274_vm6, %v2368_v41, %v5141_v44  ;;  %v6943_v42 = vpop.f32.mrf.mxu0  ;;  %v2482_v44 = vld [vmem:[#allocation4 + $0x1f0] sm:$0xff]  ;;  %v8638_v21 = vld [vmem:[#allocation73_spill] sm:$0xff] }
 0x7ba   :  { %v6938_v1 = vsel %vm2291_vm7, %v2336_v52, %v5145_v11  ;;  %8637 = vst [vmem:[#allocation64_spill] sm:$0xff] %v6943_v42  ;;  %3212 = vmatpush.msra.mxu1 %v2482_v44  ;;  %v6947_v41 = vpop.f32.mrf.mxu3  ;;  %v5155_v11 = vunpack.i.l.bf16 %v5154_v35  ;;  %v8640_v42 = vld [vmem:[#allocation21_spill] sm:$0xff] }
 0x7bb   :  { %2806 = vmatmul.f32.gmra.mxu0 %v6914_v9  ;;  %2871 = vmatmul.f32.gmra.mxu1 %v6917_v49  ;;  %8635 = vst [vmem:[#allocation22_spill] sm:$0xff] %v6938_v1  ;;  %v6955_v48 = vsel %vm90_vm0, %v8640_v42, %v2239_v37 }
 0x7bc   :  { %8641 = vst [vmem:[#allocation24_spill] sm:$0xff] %v6955_v48 }
 0x7be   :  { %v2237_v59 = vpop.permute.xlu1 %2236 }
 0x7bf   :  { %v6929_v62 = vsel %vm90_vm0, %v8634_v60, %v2237_v59  ;;  %v5149_v26 = vpop.permute.xlu0 %5148  ;;  %v6941_v59 = vsel %vm2291_vm7, %v2384_v13, %v5146_v28  ;;  %v5156_v28 = vunpack.i.h.bf16 %v5154_v35  ;;  %v5179_v35 = vpop.permute.xlu2 %5178 }
 0x7c0   :  { %v5151_v40 = vunpack.i.h.bf16 %v5149_v26  ;;  %v5150_v17 = vunpack.i.l.bf16 %v5149_v26  ;;  %8636 = vst [vmem:[#allocation12_spill] sm:$0xff] %v6941_v59  ;;  %v8639_v26 = vld [vmem:[#allocation35_spill] sm:$0xff]  ;;  %v5181_v14 = vunpack.i.h.bf16 %v5179_v35 }
 0x7c1   :  { %4671 = vmatmul.msk.f32.gmra.mxu3 %vm2274_vm6, %v6929_v62  ;;  %v6969_v37 = vpop.f32.mrf.mxu0 }
 0x7c2   :  { %v2369_v60 = vsel %vm90_vm0, %v8638_v21, %v5151_v40  ;;  %v2321_v52 = vsel %vm90_vm0, %v8639_v26, %v5150_v17  ;;  %8644 = vst [vmem:[#allocation25_spill] sm:$0xff] %v6969_v37  ;;  %v6971_v26 = vpop.f32.mrf.mxu3 }
 0x7c3   :  { %2809 = vmatmul.f32.gmra.mxu0 %v6938_v1  ;;  %2874 = vmatmul.f32.gmra.mxu1 %v6941_v59  ;;  %v2337_v16 = vsel %vm2274_vm6, %v2321_v52, %v5155_v11  ;;  %v2385_v40 = vsel %vm2274_vm6, %v2369_v60, %v5156_v28  ;;  %8645 = vst [vmem:[#allocation66_spill] sm:$0xff] %v6971_v26  ;;  %v2542_v11 = vld [vmem:[#allocation4 + $0x3d0] sm:$0xff] }
 0x7c4   :  { %v2478_v60 = vld [vmem:[#allocation4 + $0x1d0] sm:$0xff]  ;;  %3278 = vmatpush.msra.mxu3 %v2542_v11  ;;  %v5180_v11 = vunpack.i.l.bf16 %v5179_v35  ;;  %v8652_v35 = vld [vmem:[#allocation41_spill] sm:$0xff] }
 0x7c5   :  { %3213 = vmatpush.msra.mxu1 %v2478_v60  ;;  %v2538_v60 = vld [vmem:[#allocation4 + $0x3b0] sm:$0xff] }
 0x7c6   :  { %v5164_v13 = vpop.permute.xlu1 %5163  ;;  %3279 = vmatpush.msra.mxu3 %v2538_v60 }
 0x7c7   :  { %v5159_v53 = vpop.permute.xlu0 %5158  ;;  %v5166_v42 = vunpack.i.h.bf16 %v5164_v13  ;;  %v5165_v21 = vunpack.i.l.bf16 %v5164_v13 }
 0x7c8   :  { %v5161_v36 = vunpack.i.h.bf16 %v5159_v53  ;;  %v5160_v58 = vunpack.i.l.bf16 %v5159_v53 }
 0x7c9   :  { %4672 = vmatmul.msk.f32.gmra.mxu3 %vm2274_vm6, %v6955_v48  ;;  %v2322_v37 = vsel %vm90_vm0, %v8646_v6, %v5165_v21  ;;  %v2637_v6 = vld [vmem:[#allocation4 + $0x6c8] sm:$0xff]  ;;  %v2474_v21 = vld [vmem:[#allocation4 + $0x1b0] sm:$0xff] }
 0x7ca   :  { %v6962_v44 = vsel %vm2291_vm7, %v2337_v16, %v5160_v58  ;;  %v6965_v17 = vsel %vm2291_vm7, %v2385_v40, %v5161_v36  ;;  %v2370_v40 = vsel %vm90_vm0, %v6383_v15, %v5166_v42  ;;  %v5189_v15 = vpop.permute.xlu2 %5188  ;;  %3156 = vmatpush.msra.mxu0 %v2637_v6  ;;  %3214 = vmatpush.msra.mxu1 %v2474_v21  ;;  %v7013_v6 = vpop.f32.mrf.mxu1 }
 0x7cb   :  { %8642 = vst [vmem:[#allocation13_spill] sm:$0xff] %v6962_v44  ;;  %2812 = vmatmul.f32.gmra.mxu0 %v6962_v44  ;;  %2877 = vmatmul.f32.gmra.mxu1 %v6965_v17  ;;  %v5190_v34 = vunpack.i.l.bf16 %v5189_v15 }
 0x7cc   :  { %8643 = vst [vmem:[#allocation65_spill] sm:$0xff] %v6965_v17 }
 0x7cd   :  { %8658 = vst [vmem:[#allocation29_spill] sm:$0xff] %v7013_v6 }
 0x7ce   :  { %v5174_v52 = vpop.permute.xlu1 %5173 }
 0x7cf   :  { %v5176_v28 = vunpack.i.h.bf16 %v5174_v52  ;;  %v5175_v58 = vunpack.i.l.bf16 %v5174_v52  ;;  %v5169_v53 = vpop.permute.xlu0 %5168 }
 0x7d0   :  { %v5171_v36 = vunpack.i.h.bf16 %v5169_v53  ;;  %v5170_v16 = vunpack.i.l.bf16 %v5169_v53  ;;  %v8650_v53 = vld [vmem:[#allocation74_spill] sm:$0xff] }
 0x7d2   :  { %v2338_v13 = vsel %vm2274_vm6, %v2322_v37, %v5170_v16  ;;  %v2386_v12 = vsel %vm2274_vm6, %v2370_v40, %v5171_v36  ;;  %v6987_v37 = vpop.f32.mrf.mxu0  ;;  %v2371_v36 = vsel %vm90_vm0, %v8650_v53, %v5181_v14 }
 0x7d3   :  { %v6980_v46 = vsel %vm2291_vm7, %v2338_v13, %v5175_v58  ;;  %v6983_v52 = vsel %vm2291_vm7, %v2386_v12, %v5176_v28  ;;  %8649 = vst [vmem:[#allocation67_spill] sm:$0xff] %v6987_v37  ;;  %v6991_v12 = vpop.f32.mrf.mxu3  ;;  %v2323_v28 = vsel %vm90_vm0, %v8652_v35, %v5180_v11  ;;  %v5191_v13 = vunpack.i.h.bf16 %v5189_v15  ;;  %v2470_v11 = vld [vmem:[#allocation4 + $0x190] sm:$0xff] }
 0x7d4   :  { %8647 = vst [vmem:[#allocation26_spill] sm:$0xff] %v6980_v46  ;;  %2815 = vmatmul.f32.gmra.mxu0 %v6980_v46  ;;  %2880 = vmatmul.f32.gmra.mxu1 %v6983_v52  ;;  %v8664_v35 = vld [vmem:[#allocation34_spill] sm:$0xff] }
 0x7d5   :  { %8648 = vst [vmem:[#allocation14_spill] sm:$0xff] %v6983_v52  ;;  %3215 = vmatpush.msra.mxu1 %v2470_v11  ;;  %v8667_v11 = vld [vmem:[#allocation36_spill] sm:$0xff] }
 0x7d6   :  { %v5184_v42 = vpop.permute.xlu1 %5183  ;;  %8651 = vst [vmem:[#allocation27_spill] sm:$0xff] %v6991_v12 }
 0x7d7   :  { %v5186_v58 = vunpack.i.h.bf16 %v5184_v42  ;;  %v5185_v16 = vunpack.i.l.bf16 %v5184_v42  ;;  %v2241_v40 = vpop.permute.xlu0 %2240 }
 0x7d8   :  { %v6997_v4 = vsel %vm90_vm0, %v8653_v5, %v2241_v40  ;;  %v2534_v5 = vld [vmem:[#allocation4 + $0x390] sm:$0xff]  ;;  %vm4361_vm0 = vcmask 1044480  }
 0x7d9   :  { %8654 = vst [vmem:[#allocation15_spill] sm:$0xff] %v6997_v4  ;;  %v2339_v37 = vsel %vm2274_vm6, %v2323_v28, %v5185_v16  ;;  %v2387_v14 = vsel %vm2274_vm6, %v2371_v36, %v5186_v58  ;;  %4673 = vmatmul.msk.f32.gmra.mxu3 %vm2274_vm6, %v6997_v4  ;;  %v2530_v36 = vld [vmem:[#allocation4 + $0x370] sm:$0xff]  ;;  %v2633_v58 = vld [vmem:[#allocation4 + $0x6a8] sm:$0xff] }
 0x7da   :  { %v7004_v42 = vsel %vm2291_vm7, %v2339_v37, %v5190_v34  ;;  %v7007_v60 = vsel %vm2291_vm7, %v2387_v14, %v5191_v13  ;;  %v7011_v15 = vpop.f32.mrf.mxu0  ;;  %3280 = vmatpush.msra.mxu3 %v2534_v5  ;;  %v8660_v34 = vld [vmem:[#allocation32_spill] sm:$0xff]  ;;  %v2466_v16 = vld [vmem:[#allocation4 + $0x170] sm:$0xff]  ;;  %3157 = vmatpush.msra.mxu0 %v2633_v58 }
 0x7db   :  { %8655 = vst [vmem:[#allocation68_spill] sm:$0xff] %v7004_v42  ;;  %v7016_v21 = vpop.f32.mrf.mxu3  ;;  %3216 = vmatpush.msra.mxu1 %v2466_v16  ;;  %v2526_v14 = vld [vmem:[#allocation4 + $0x350] sm:$0xff] }
 0x7dc   :  { %8656 = vst [vmem:[#allocation28_spill] sm:$0xff] %v7007_v60  ;;  %2818 = vmatmul.f32.gmra.mxu0 %v7004_v42  ;;  %2883 = vmatmul.f32.gmra.mxu1 %v7007_v60  ;;  %v2462_v5 = vld [vmem:[#allocation4 + $0x150] sm:$0xff] }
 0x7dd   :  { %8657 = vst [vmem:[#allocation69_spill] sm:$0xff] %v7011_v15  ;;  %3281 = vmatpush.msra.mxu3 %v2530_v36  ;;  %3217 = vmatpush.msra.mxu1 %v2462_v5  ;;  %v2518_v5 = vld [vmem:[#allocation4 + $0x310] sm:$0xff] }
 0x7de   :  { %8659 = vst [vmem:[#allocation16_spill] sm:$0xff] %v7016_v21  ;;  %v2629_v21 = vld [vmem:[#allocation4 + $0x688] sm:$0xff] }
 0x7df   :  { %3282 = vmatpush.msra.mxu3 %v2526_v14  ;;  %3158 = vmatpush.msra.mxu0 %v2629_v21  ;;  %v8671_v14 = vld [vmem:[#allocation38_spill] sm:$0xff] }
 0x7e0   :  { %v8675_v21 = vld [vmem:[#allocation42_spill] sm:$0xff] }
 0x7e1   :  { %3098 = vmatmul.f32.vlgmr.msrb.gmra.mxu3 %v6584_v19 }
 0x7e3   :  { %v7025_v40 = vpop.f32.mrf.mxu3 }
 0x7e4   :  { %2968 = vmatmul.f32.vlgmr.msrb.gmra.mxu0 %v8660_v34  ;;  %3033 = vmatmul.f32.vlgmr.msrb.gmra.mxu1 %v6581_v24  ;;  %8663 = vst [vmem:[#allocation71_spill] sm:$0xff] %v7025_v40  ;;  %v2522_v40 = vld [vmem:[#allocation4 + $0x330] sm:$0xff] }
 0x7e5   :  { %3283 = vmatpush.msra.mxu3 %v2522_v40  ;;  %v2514_v40 = vld [vmem:[#allocation4 + $0x2f0] sm:$0xff] }
 0x7e7   :  { %v7020_v37 = vpop.f32.mrf.mxu0  ;;  %v7022_v53 = vpop.f32.mrf.mxu1  ;;  %3284 = vmatpush.msra.mxu3 %v2518_v5  ;;  %v2510_v5 = vld [vmem:[#allocation4 + $0x2d0] sm:$0xff] }
 0x7e8   :  { %8661 = vst [vmem:[#allocation70_spill] sm:$0xff] %v7020_v37 }
 0x7e9   :  { %8662 = vst [vmem:[#allocation30_spill] sm:$0xff] %v7022_v53  ;;  %3101 = vmatmul.f32.gmra.mxu3 %v6654_v23 }
 0x7ea   :  { %3285 = vmatpush.msra.mxu3 %v2514_v40 }
 0x7eb   :  { %v7036_v36 = vpop.f32.mrf.mxu3 }
 0x7ec   :  { %2971 = vmatmul.f32.gmra.mxu0 %v8664_v35  ;;  %3036 = vmatmul.f32.gmra.mxu1 %v6651_v61  ;;  %8668 = vst [vmem:[#allocation72_spill] sm:$0xff] %v7036_v36 }
 0x7ed   :  { %3286 = vmatpush.msra.mxu3 %v2510_v5 }
 0x7ef   :  { %v7029_v28 = vpop.f32.mrf.mxu0  ;;  %v7031_v13 = vpop.f32.mrf.mxu1 }
 0x7f0   :  { %8665 = vst [vmem:[#allocation31_spill] sm:$0xff] %v7029_v28  ;;  %v2458_v28 = vld [vmem:[#allocation4 + $0x130] sm:$0xff] }
 0x7f1   :  { %8666 = vst [vmem:[#allocation17_spill] sm:$0xff] %v7031_v13  ;;  %3104 = vmatmul.f32.gmra.mxu3 %v6682_v29  ;;  %3218 = vmatpush.msra.mxu1 %v2458_v28  ;;  %v2454_v13 = vld [vmem:[#allocation4 + $0x110] sm:$0xff]  ;;  %v2625_v28 = vld [vmem:[#allocation4 + $0x668] sm:$0xff] }
 0x7f2   :  { %3159 = vmatpush.msra.mxu0 %v2625_v28  ;;  %v8683_v28 = vld [vmem:[#allocation45_spill] sm:$0xff] }
 0x7f3   :  { %3219 = vmatpush.msra.mxu1 %v2454_v13  ;;  %v8679_v13 = vld [vmem:[#allocation43_spill] sm:$0xff] }
 0x7f4   :  { %2974 = vmatmul.f32.gmra.mxu0 %v8667_v11  ;;  %3039 = vmatmul.f32.gmra.mxu1 %v6679_v63 }
 0x7f7   :  { %v7038_v58 = vpop.f32.mrf.mxu0  ;;  %v7040_v16 = vpop.f32.mrf.mxu1 }
 0x7f8   :  { %8669 = vst [vmem:[#allocation33_spill] sm:$0xff] %v7038_v58  ;;  %v2450_v58 = vld [vmem:[#allocation4 + $0xf0] sm:$0xff] }
 0x7f9   :  { %8670 = vst [vmem:[#allocation19_spill] sm:$0xff] %v7040_v16  ;;  %3107 = vmatmul.f32.gmra.mxu3 %v6712_v57  ;;  %v7049_v16 = vpop.f32.mrf.mxu3  ;;  %3220 = vmatpush.msra.mxu1 %v2450_v58  ;;  %v2506_v58 = vld [vmem:[#allocation4 + $0x2b0] sm:$0xff] }
 0x7fa   :  { %8674 = vst [vmem:[#allocation21_spill] sm:$0xff] %v7049_v16  ;;  %v2446_v16 = vld [vmem:[#allocation4 + $0xd0] sm:$0xff]  ;;  %3287 = vmatpush.msra.mxu3 %v2506_v58 }
 0x7fb   :  { %3221 = vmatpush.msra.mxu1 %v2446_v16  ;;  %v8686_v16 = vld [vmem:[#allocation46_spill] sm:$0xff] }
 0x7fc   :  { %2977 = vmatmul.f32.gmra.mxu0 %v8671_v14  ;;  %3042 = vmatmul.f32.gmra.mxu1 %v6709_v51  ;;  %v2498_v58 = vld [vmem:[#allocation4 + $0x270] sm:$0xff] }
 0x800   :  { %v7045_v12 = vpop.f32.mrf.mxu0  ;;  %v7047_v36 = vpop.f32.mrf.mxu1 }
 0x801   :  { %8672 = vst [vmem:[#allocation73_spill] sm:$0xff] %v7045_v12  ;;  %3110 = vmatmul.f32.gmra.mxu3 %v6743_v45 }
 0x802   :  { %8673 = vst [vmem:[#allocation35_spill] sm:$0xff] %v7047_v36  ;;  %v7058_v36 = vpop.f32.mrf.mxu3 }
 0x803   :  { %8678 = vst [vmem:[#allocation41_spill] sm:$0xff] %v7058_v36  ;;  %v2621_v36 = vld [vmem:[#allocation4 + $0x648] sm:$0xff] }
 0x804   :  { %2980 = vmatmul.f32.gmra.mxu0 %v8675_v21  ;;  %3045 = vmatmul.f32.gmra.mxu1 %v6740_v56 }
 0x805   :  { %3160 = vmatpush.msra.mxu0 %v2621_v36  ;;  %v8690_v36 = vld [vmem:[#allocation47_spill] sm:$0xff] }
 0x808   :  { %v7054_v53 = vpop.f32.mrf.mxu0  ;;  %v7056_v37 = vpop.f32.mrf.mxu1 }
 0x809   :  { %8676 = vst [vmem:[#allocation37_spill] sm:$0xff] %v7054_v53  ;;  %3113 = vmatmul.f32.gmra.mxu3 %v6767_v18 }
 0x80a   :  { %8677 = vst [vmem:[#allocation74_spill] sm:$0xff] %v7056_v37  ;;  %v7068_v40 = vpop.f32.mrf.mxu3  ;;  %v2442_v37 = vld [vmem:[#allocation4 + $0xb0] sm:$0xff] }
 0x80b   :  { %8682 = vst [vmem:[#allocation34_spill] sm:$0xff] %v7068_v40  ;;  %3222 = vmatpush.msra.mxu1 %v2442_v37  ;;  %v2502_v40 = vld [vmem:[#allocation4 + $0x290] sm:$0xff] }
 0x80c   :  { %2983 = vmatmul.f32.gmra.mxu0 %v8679_v13  ;;  %3048 = vmatmul.f32.gmra.mxu1 %v6764_v10 }
 0x80d   :  { %3288 = vmatpush.msra.mxu3 %v2502_v40 }
 0x80f   :  { %3289 = vmatpush.msra.mxu3 %v2498_v58 }
 0x810   :  { %v7063_v12 = vpop.f32.mrf.mxu0  ;;  %v7065_v26 = vpop.f32.mrf.mxu1 }
 0x811   :  { %8680 = vst [vmem:[#allocation23_spill] sm:$0xff] %v7063_v12  ;;  %3116 = vmatmul.f32.gmra.mxu3 %v6799_v2 }
 0x812   :  { %8681 = vst [vmem:[#allocation32_spill] sm:$0xff] %v7065_v26  ;;  %v7079_v5 = vpop.f32.mrf.mxu3  ;;  %v2438_v26 = vld [vmem:[#allocation4 + $0x90] sm:$0xff] }
 0x813   :  { %8687 = vst [vmem:[#allocation42_spill] sm:$0xff] %v7079_v5  ;;  %3223 = vmatpush.msra.mxu1 %v2438_v26  ;;  %v8694_v26 = vld [vmem:[#allocation48_spill] sm:$0xff] }
 0x814   :  { %2986 = vmatmul.f32.gmra.mxu0 %v8683_v28  ;;  %3051 = vmatmul.f32.gmra.mxu1 %v6796_v43 }
 0x818   :  { %v7072_v53 = vpop.f32.mrf.mxu0  ;;  %v7074_v6 = vpop.f32.mrf.mxu1 }
 0x819   :  { %8684 = vst [vmem:[#allocation36_spill] sm:$0xff] %v7072_v53  ;;  %3119 = vmatmul.f32.gmra.mxu3 %v6817_v54  ;;  %v2434_v53 = vld [vmem:[#allocation4 + $0x70] sm:$0xff] }
 0x81a   :  { %8685 = vst [vmem:[#allocation38_spill] sm:$0xff] %v7074_v6  ;;  %v7088_v37 = vpop.f32.mrf.mxu3  ;;  %v2617_v6 = vld [vmem:[#allocation4 + $0x628] sm:$0xff]  ;;  %3224 = vmatpush.msra.mxu1 %v2434_v53 }
 0x81b   :  { %8691 = vst [vmem:[#allocation46_spill] sm:$0xff] %v7088_v37  ;;  %3161 = vmatpush.msra.mxu0 %v2617_v6  ;;  %v2430_v37 = vld [vmem:[#allocation4 + $0x50] sm:$0xff]  ;;  %v8698_v6 = vld [vmem:[#allocation49_spill] sm:$0xff] }
 0x81c   :  { %2989 = vmatmul.f32.gmra.mxu0 %v8686_v16  ;;  %3054 = vmatmul.f32.gmra.mxu1 %v6814_v32 }
 0x81d   :  { %3225 = vmatpush.msra.mxu1 %v2430_v37  ;;  %v2486_v37 = vld [vmem:[#allocation4 + $0x210] sm:$0xff] }
 0x820   :  { %v7081_v12 = vpop.f32.mrf.mxu0  ;;  %v7083_v15 = vpop.f32.mrf.mxu1 }
 0x821   :  { %8688 = vst [vmem:[#allocation43_spill] sm:$0xff] %v7081_v12  ;;  %3122 = vmatmul.f32.gmra.mxu3 %v6847_v55 }
 0x822   :  { %8689 = vst [vmem:[#allocation45_spill] sm:$0xff] %v7083_v15  ;;  %v2494_v15 = vld [vmem:[#allocation4 + $0x250] sm:$0xff] }
 0x823   :  { %v7097_v40 = vpop.f32.mrf.mxu3  ;;  %3290 = vmatpush.msra.mxu3 %v2494_v15  ;;  %v8702_v15 = vld [vmem:[#allocation50_spill] sm:$0xff] }
 0x824   :  { %2992 = vmatmul.f32.gmra.mxu0 %v8690_v36  ;;  %3057 = vmatmul.f32.gmra.mxu1 %v6844_v20  ;;  %8695 = vst [vmem:[#allocation48_spill] sm:$0xff] %v7097_v40  ;;  %v2490_v40 = vld [vmem:[#allocation4 + $0x230] sm:$0xff] }
 0x825   :  { %3291 = vmatpush.msra.mxu3 %v2490_v40  ;;  %v2642_v40 = vld [vmem:[#allocation4 + $0x6f0] sm:$0xff] }
 0x827   :  { %3292 = vmatpush.msra.mxu3 %v2486_v37 }
 0x828   :  { %v7090_v5 = vpop.f32.mrf.mxu0  ;;  %v7092_v0 = vpop.f32.mrf.mxu1 }
 0x829   :  { %8692 = vst [vmem:[#allocation47_spill] sm:$0xff] %v7090_v5  ;;  %3125 = vmatmul.f32.gmra.mxu3 %v6873_v39  ;;  %v2613_v5 = vld [vmem:[#allocation4 + $0x608] sm:$0xff]  ;;  %v2426_v39 = vld [vmem:[#allocation4 + $0x30] sm:$0xff] }
 0x82a   :  { %8693 = vst [vmem:[#allocation80_spill] sm:$0xff] %v7092_v0  ;;  %3162 = vmatpush.msra.mxu0 %v2613_v5  ;;  %3226 = vmatpush.msra.mxu1 %v2426_v39  ;;  %v8706_v5 = vld [vmem:[#allocation40_spill] sm:$0xff]  ;;  %v2610_v39 = vld [vmem:[#allocation4 + $0x5f0] sm:$0xff] }
 0x82b   :  { %v7106_v53 = vpop.f32.mrf.mxu3 }
 0x82c   :  { %2995 = vmatmul.f32.gmra.mxu0 %v8694_v26  ;;  %3060 = vmatmul.f32.gmra.mxu1 %v6870_v47  ;;  %8699 = vst [vmem:[#allocation49_spill] sm:$0xff] %v7106_v53 }
 0x82d   :  { %3342 = vmatpush.msrb.mxu0 %v2610_v39 }
 0x830   :  { %v7099_v12 = vpop.f32.mrf.mxu0  ;;  %v7101_v55 = vpop.f32.mrf.mxu1 }
 0x831   :  { %8696 = vst [vmem:[#allocation81_spill] sm:$0xff] %v7099_v12  ;;  %3128 = vmatmul.f32.gmra.mxu3 %v6893_v50  ;;  %v2483_v12 = vld [vmem:[#allocation4 + $0x1f8] sm:$0xff] }
 0x832   :  { %8697 = vst [vmem:[#allocation82_spill] sm:$0xff] %v7101_v55  ;;  %3472 = vmatpush.msrb.mxu3 %v2483_v12  ;;  %v2606_v12 = vld [vmem:[#allocation4 + $0x5d0] sm:$0xff] }
 0x833   :  { %3343 = vmatpush.msrb.mxu0 %v2606_v12 }
 0x834   :  { %2998 = vmatmul.f32.gmra.mxu0 %v8698_v6  ;;  %3063 = vmatmul.f32.gmra.mxu1 %v6890_v30 }
 0x838   :  { %v7108_v58 = vpop.f32.mrf.mxu0  ;;  %v7110_v0 = vpop.f32.mrf.mxu1 }
 0x839   :  { %8700 = vst [vmem:[#allocation83_spill] sm:$0xff] %v7108_v58  ;;  %3131 = vmatmul.f32.gmra.mxu3 %v6917_v49 }
 0x83a   :  { %8701 = vst [vmem:[#allocation84_spill] sm:$0xff] %v7110_v0  ;;  %v2422_v0 = vld [vmem:[#allocation4 + $0x10] sm:$0xff] }
 0x83b   :  { %3227 = vmatpush.msra.mxu1 %v2422_v0  ;;  %v8710_v0 = vld [vmem:[#allocation51_spill] sm:$0xff] }
 0x83c   :  { %3001 = vmatmul.f32.gmra.mxu0 %v8702_v15  ;;  %3066 = vmatmul.f32.gmra.mxu1 %v6914_v9  ;;  %v7115_v55 = vpop.f32.mrf.mxu3 }
 0x83d   :  { %8703 = vst [vmem:[#allocation50_spill] sm:$0xff] %v7115_v55  ;;  %3415 = vmatpush.msrb.mxu1 %v2642_v40  ;;  %v2475_v40 = vld [vmem:[#allocation4 + $0x1b8] sm:$0xff] }
 0x840   :  { %v7117_v53 = vpop.f32.mrf.mxu0  ;;  %v7119_v58 = vpop.f32.mrf.mxu1 }
 0x841   :  { %8704 = vst [vmem:[#allocation85_spill] sm:$0xff] %v7117_v53  ;;  %3134 = vmatmul.f32.gmra.mxu3 %v6941_v59  ;;  %v2479_v53 = vld [vmem:[#allocation4 + $0x1d8] sm:$0xff] }
 0x842   :  { %8705 = vst [vmem:[#allocation86_spill] sm:$0xff] %v7119_v58  ;;  %3473 = vmatpush.msrb.mxu3 %v2479_v53  ;;  %v2602_v53 = vld [vmem:[#allocation4 + $0x5b0] sm:$0xff] }
 0x843   :  { %3344 = vmatpush.msrb.mxu0 %v2602_v53  ;;  %v2634_v53 = vld [vmem:[#allocation4 + $0x6b0] sm:$0xff] }
 0x844   :  { %3004 = vmatmul.f32.gmra.mxu0 %v8706_v5  ;;  %3069 = vmatmul.f32.gmra.mxu1 %v6938_v1  ;;  %v7129_v58 = vpop.f32.mrf.mxu3 }
 0x845   :  { %8709 = vst [vmem:[#allocation88_spill] sm:$0xff] %v7129_v58  ;;  %3474 = vmatpush.msrb.mxu3 %v2475_v40  ;;  %v2638_v58 = vld [vmem:[#allocation4 + $0x6d0] sm:$0xff] }
 0x846   :  { %3416 = vmatpush.msrb.mxu1 %v2638_v58 }
 0x848   :  { %v7124_v37 = vpop.f32.mrf.mxu0  ;;  %v7126_v55 = vpop.f32.mrf.mxu1  ;;  %3417 = vmatpush.msrb.mxu1 %v2634_v53  ;;  %v2459_v53 = vld [vmem:[#allocation4 + $0x138] sm:$0xff] }
 0x849   :  { %8707 = vst [vmem:[#allocation40_spill] sm:$0xff] %v7124_v37  ;;  %3137 = vmatmul.f32.gmra.mxu3 %v6965_v17  ;;  %v8711_v17 = vld [vmem:[#allocation39_spill] sm:$0xff] }
 0x84a   :  { %8708 = vst [vmem:[#allocation87_spill] sm:$0xff] %v7126_v55 }
 0x84c   :  { %3007 = vmatmul.f32.gmra.mxu0 %v8710_v0  ;;  %3072 = vmatmul.f32.gmra.mxu1 %v6962_v44  ;;  %v2946_v55 = vpop.f32.mrf.mxu3 }
 0x851   :  { %v2816_v59 = vpop.f32.mrf.mxu0  ;;  %v2881_v49 = vpop.f32.mrf.mxu1  ;;  %3140 = vmatmul.f32.gmra.mxu3 %v6983_v52  ;;  %v2598_v52 = vld [vmem:[#allocation4 + $0x590] sm:$0xff] }
 0x852   :  { %v2817_v39 = vadd.f32 %v2816_v59, %v6921_v27  ;;  %v2471_v59 = vld [vmem:[#allocation4 + $0x198] sm:$0xff]  ;;  %3345 = vmatpush.msrb.mxu0 %v2598_v52 }
 0x853   :  { %3475 = vmatpush.msrb.mxu3 %v2471_v59 }
 0x854   :  { %v2882_v37 = vadd.f32 %v2881_v49, %v2817_v39  ;;  %3010 = vmatmul.f32.gmra.mxu0 %v8711_v17  ;;  %3075 = vmatmul.f32.gmra.mxu1 %v6980_v46  ;;  %v8713_v39 = vld [vmem:[#allocation44_spill] sm:$0xff] }
 0x856   :  { %v7137_v50 = vadd.f32 %v2946_v55, %v2882_v37  ;;  %v2467_v37 = vld [vmem:[#allocation4 + $0x178] sm:$0xff] }
 0x857   :  { %3476 = vmatpush.msrb.mxu3 %v2467_v37 }
 0x858   :  { %8712 = vst [vmem:[#allocation51_spill] sm:$0xff] %v7137_v50 }
 0x859   :  { %v2819_v12 = vpop.f32.mrf.mxu0  ;;  %v2884_v54 = vpop.f32.mrf.mxu1  ;;  %3143 = vmatmul.f32.gmra.mxu3 %v7007_v60 }
 0x85a   :  { %v2820_v27 = vadd.f32 %v2819_v12, %v6947_v41 }
 0x85c   :  { %v2885_v40 = vadd.f32 %v2884_v54, %v2820_v27  ;;  %v2949_v49 = vpop.f32.mrf.mxu3  ;;  %3013 = vmatmul.f32.gmra.mxu0 %v8713_v39  ;;  %3078 = vmatmul.f32.gmra.mxu1 %v7004_v42  ;;  %v2594_v54 = vld [vmem:[#allocation4 + $0x570] sm:$0xff]  ;;  %v2463_v27 = vld [vmem:[#allocation4 + $0x158] sm:$0xff] }
 0x85d   :  { %3346 = vmatpush.msrb.mxu0 %v2594_v54  ;;  %3477 = vmatpush.msrb.mxu3 %v2463_v27  ;;  %v8725_v27 = vld [vmem:[#allocation76_spill] sm:$0xff] }
 0x85e   :  { %v7143_v2 = vadd.f32 %v2949_v49, %v2885_v40  ;;  %v8721_v40 = vld [vmem:[#allocation75_spill] sm:$0xff]  ;;  %v2590_v49 = vld [vmem:[#allocation4 + $0x550] sm:$0xff] }
 0x85f   :  { %3347 = vmatpush.msrb.mxu0 %v2590_v49  ;;  %3478 = vmatpush.msrb.mxu3 %v2459_v53 }
 0x860   :  { %8714 = vst [vmem:[#allocation39_spill] sm:$0xff] %v7143_v2 }
 0x861   :  { %v7145_v55 = vpop.f32.mrf.mxu0  ;;  %v7147_v58 = vpop.f32.mrf.mxu1  ;;  %3293 = vmatmul.f32.vlgmr.msra.gmra.mxu3 %v6581_v24 }
 0x862   :  { %8715 = vst [vmem:[#allocation44_spill] sm:$0xff] %v7145_v55 }
 0x863   :  { %8716 = vst [vmem:[#allocation89_spill] sm:$0xff] %v7147_v58  ;;  %v2574_v58 = vld [vmem:[#allocation4 + $0x4d0] sm:$0xff] }
 0x864   :  { %v7150_v41 = vpop.f32.mrf.mxu3  ;;  %4674 = vmatmul.msk.f32.vlgmr.msra.gmra.mxu0 %vm2274_vm6, %v6398_v3  ;;  %3228 = vmatmul.f32.vlgmr.msra.gmra.mxu1 %v8660_v34 }
 0x865   :  { %8717 = vst [vmem:[#allocation90_spill] sm:$0xff] %v7150_v41  ;;  %v2582_v41 = vld [vmem:[#allocation4 + $0x510] sm:$0xff] }
 0x869   :  { %v7155_v52 = vpop.f32.mrf.mxu0  ;;  %v7157_v12 = vpop.f32.mrf.mxu1  ;;  %3296 = vmatmul.f32.gmra.mxu3 %v6651_v61 }
 0x86a   :  { %8718 = vst [vmem:[#allocation91_spill] sm:$0xff] %v7155_v52  ;;  %v2630_v52 = vld [vmem:[#allocation4 + $0x690] sm:$0xff] }
 0x86b   :  { %8719 = vst [vmem:[#allocation92_spill] sm:$0xff] %v7157_v12  ;;  %3418 = vmatpush.msrb.mxu1 %v2630_v52 }
 0x86c   :  { %v7160_v59 = vpop.f32.mrf.mxu3  ;;  %4675 = vmatmul.msk.f32.gmra.mxu0 %vm2274_vm6, %v8721_v40  ;;  %3231 = vmatmul.f32.gmra.mxu1 %v8664_v35 }
 0x86d   :  { %8720 = vst [vmem:[#allocation93_spill] sm:$0xff] %v7160_v59  ;;  %v2586_v59 = vld [vmem:[#allocation4 + $0x530] sm:$0xff] }
 0x86e   :  { %3348 = vmatpush.msrb.mxu0 %v2586_v59  ;;  %v2451_v59 = vld [vmem:[#allocation4 + $0xf8] sm:$0xff] }
 0x870   :  { %3349 = vmatpush.msrb.mxu0 %v2582_v41 }
 0x871   :  { %v7165_v37 = vpop.f32.mrf.mxu0  ;;  %v7167_v54 = vpop.f32.mrf.mxu1  ;;  %3299 = vmatmul.f32.gmra.mxu3 %v6679_v63 }
 0x872   :  { %8722 = vst [vmem:[#allocation75_spill] sm:$0xff] %v7165_v37 }
 0x873   :  { %8723 = vst [vmem:[#allocation94_spill] sm:$0xff] %v7167_v54  ;;  %v2455_v54 = vld [vmem:[#allocation4 + $0x118] sm:$0xff] }
 0x874   :  { %v7170_v12 = vpop.f32.mrf.mxu3  ;;  %4676 = vmatmul.msk.f32.gmra.mxu0 %vm2274_vm6, %v8725_v27  ;;  %3234 = vmatmul.f32.gmra.mxu1 %v8667_v11 }
 0x875   :  { %8724 = vst [vmem:[#allocation95_spill] sm:$0xff] %v7170_v12  ;;  %3479 = vmatpush.msrb.mxu3 %v2455_v54  ;;  %v8729_v12 = vld [vmem:[#allocation77_spill] sm:$0xff]  ;;  %v8733_v54 = vld [vmem:[#allocation78_spill] sm:$0xff] }
 0x877   :  { %3480 = vmatpush.msrb.mxu3 %v2451_v59 }
 0x879   :  { %v7175_v49 = vpop.f32.mrf.mxu0  ;;  %v7177_v37 = vpop.f32.mrf.mxu1  ;;  %3302 = vmatmul.f32.gmra.mxu3 %v6709_v51 }
 0x87a   :  { %8726 = vst [vmem:[#allocation76_spill] sm:$0xff] %v7175_v49  ;;  %v2626_v49 = vld [vmem:[#allocation4 + $0x670] sm:$0xff] }
 0x87b   :  { %8727 = vst [vmem:[#allocation96_spill] sm:$0xff] %v7177_v37  ;;  %3419 = vmatpush.msrb.mxu1 %v2626_v49 }
 0x87c   :  { %v7180_v53 = vpop.f32.mrf.mxu3  ;;  %4677 = vmatmul.msk.f32.gmra.mxu0 %vm2274_vm6, %v8729_v12  ;;  %3237 = vmatmul.f32.gmra.mxu1 %v8671_v14 }
 0x87d   :  { %8728 = vst [vmem:[#allocation97_spill] sm:$0xff] %v7180_v53  ;;  %v2578_v53 = vld [vmem:[#allocation4 + $0x4f0] sm:$0xff] }
 0x87e   :  { %3350 = vmatpush.msrb.mxu0 %v2578_v53  ;;  %v2443_v53 = vld [vmem:[#allocation4 + $0xb8] sm:$0xff] }
 0x880   :  { %3351 = vmatpush.msrb.mxu0 %v2574_v58 }
 0x881   :  { %v7185_v2 = vpop.f32.mrf.mxu0  ;;  %v7187_v52 = vpop.f32.mrf.mxu1  ;;  %3305 = vmatmul.f32.gmra.mxu3 %v6740_v56 }
 0x882   :  { %8730 = vst [vmem:[#allocation77_spill] sm:$0xff] %v7185_v2 }
 0x883   :  { %8731 = vst [vmem:[#allocation98_spill] sm:$0xff] %v7187_v52  ;;  %v2447_v52 = vld [vmem:[#allocation4 + $0xd8] sm:$0xff] }
 0x884   :  { %v7190_v37 = vpop.f32.mrf.mxu3  ;;  %4678 = vmatmul.msk.f32.gmra.mxu0 %vm2274_vm6, %v8733_v54  ;;  %3240 = vmatmul.f32.gmra.mxu1 %v8675_v21 }
 0x885   :  { %8732 = vst [vmem:[#allocation99_spill] sm:$0xff] %v7190_v37  ;;  %3481 = vmatpush.msrb.mxu3 %v2447_v52  ;;  %v8737_v37 = vld [vmem:[#allocation79_spill] sm:$0xff]  ;;  %v2570_v52 = vld [vmem:[#allocation4 + $0x4b0] sm:$0xff] }
 0x886   :  { %3352 = vmatpush.msrb.mxu0 %v2570_v52  ;;  %v2435_v52 = vld [vmem:[#allocation4 + $0x78] sm:$0xff] }
 0x887   :  { %3482 = vmatpush.msrb.mxu3 %v2443_v53 }
 0x889   :  { %v7195_v41 = vpop.f32.mrf.mxu0  ;;  %v7197_v2 = vpop.f32.mrf.mxu1  ;;  %3308 = vmatmul.f32.gmra.mxu3 %v6764_v10 }
 0x88a   :  { %8734 = vst [vmem:[#allocation78_spill] sm:$0xff] %v7195_v41 }
 0x88b   :  { %8735 = vst [vmem:[#allocation100_spill] sm:$0xff] %v7197_v2 }
 0x88c   :  { %v7200_v59 = vpop.f32.mrf.mxu3  ;;  %4679 = vmatmul.msk.f32.gmra.mxu0 %vm2274_vm6, %v8737_v37  ;;  %3243 = vmatmul.f32.gmra.mxu1 %v8679_v13 }
 0x88d   :  { %8736 = vst [vmem:[#allocation101_spill] sm:$0xff] %v7200_v59  ;;  %v2622_v59 = vld [vmem:[#allocation4 + $0x650] sm:$0xff] }
 0x88e   :  { %3420 = vmatpush.msrb.mxu1 %v2622_v59 }
 0x891   :  { %v7205_v55 = vpop.f32.mrf.mxu0  ;;  %v7207_v49 = vpop.f32.mrf.mxu1  ;;  %3311 = vmatmul.f32.gmra.mxu3 %v6796_v43 }
 0x892   :  { %8738 = vst [vmem:[#allocation79_spill] sm:$0xff] %v7205_v55 }
 0x893   :  { %8739 = vst [vmem:[#allocation102_spill] sm:$0xff] %v7207_v49  ;;  %v2439_v49 = vld [vmem:[#allocation4 + $0x98] sm:$0xff] }
 0x894   :  { %v7210_v2 = vpop.f32.mrf.mxu3  ;;  %4680 = vmatmul.msk.f32.gmra.mxu0 %vm2274_vm6, %v6670_v33  ;;  %3246 = vmatmul.f32.gmra.mxu1 %v8683_v28 }
 0x895   :  { %8740 = vst [vmem:[#allocation103_spill] sm:$0xff] %v7210_v2  ;;  %3483 = vmatpush.msrb.mxu3 %v2439_v49  ;;  %v2566_v2 = vld [vmem:[#allocation4 + $0x490] sm:$0xff] }
 0x896   :  { %3353 = vmatpush.msrb.mxu0 %v2566_v2  ;;  %v2562_v49 = vld [vmem:[#allocation4 + $0x470] sm:$0xff] }
 0x897   :  { %3484 = vmatpush.msrb.mxu3 %v2435_v52 }
 0x898   :  { %3354 = vmatpush.msrb.mxu0 %v2562_v49  ;;  %v2427_v49 = vld [vmem:[#allocation4 + $0x38] sm:$0xff] }
 0x899   :  { %v7215_v58 = vpop.f32.mrf.mxu0  ;;  %v7217_v55 = vpop.f32.mrf.mxu1  ;;  %3314 = vmatmul.f32.gmra.mxu3 %v6814_v32 }
 0x89a   :  { %8741 = vst [vmem:[#allocation104_spill] sm:$0xff] %v7215_v58 }
 0x89b   :  { %8742 = vst [vmem:[#allocation105_spill] sm:$0xff] %v7217_v55 }
 0x89c   :  { %v7220_v53 = vpop.f32.mrf.mxu3  ;;  %4681 = vmatmul.msk.f32.gmra.mxu0 %vm2274_vm6, %v6700_v38  ;;  %3249 = vmatmul.f32.gmra.mxu1 %v8686_v16 }
 0x89d   :  { %8743 = vst [vmem:[#allocation106_spill] sm:$0xff] %v7220_v53  ;;  %v2618_v53 = vld [vmem:[#allocation4 + $0x630] sm:$0xff] }
 0x89e   :  { %3421 = vmatpush.msrb.mxu1 %v2618_v53 }
 0x8a1   :  { %v7225_v41 = vpop.f32.mrf.mxu0  ;;  %v7227_v59 = vpop.f32.mrf.mxu1  ;;  %3317 = vmatmul.f32.gmra.mxu3 %v6844_v20 }
 0x8a2   :  { %8744 = vst [vmem:[#allocation107_spill] sm:$0xff] %v7225_v41 }
 0x8a3   :  { %8745 = vst [vmem:[#allocation108_spill] sm:$0xff] %v7227_v59  ;;  %v2431_v59 = vld [vmem:[#allocation4 + $0x58] sm:$0xff] }
 0x8a4   :  { %v7230_v55 = vpop.f32.mrf.mxu3  ;;  %4682 = vmatmul.msk.f32.gmra.mxu0 %vm2274_vm6, %v6733_v7  ;;  %3252 = vmatmul.f32.gmra.mxu1 %v8690_v36 }
 0x8a5   :  { %8746 = vst [vmem:[#allocation109_spill] sm:$0xff] %v7230_v55  ;;  %3485 = vmatpush.msrb.mxu3 %v2431_v59  ;;  %v2558_v55 = vld [vmem:[#allocation4 + $0x450] sm:$0xff] }
 0x8a6   :  { %3355 = vmatpush.msrb.mxu0 %v2558_v55  ;;  %v2554_v59 = vld [vmem:[#allocation4 + $0x430] sm:$0xff] }
 0x8a7   :  { %3486 = vmatpush.msrb.mxu3 %v2427_v49 }
 0x8a8   :  { %3356 = vmatpush.msrb.mxu0 %v2554_v59 }
 0x8a9   :  { %v7235_v2 = vpop.f32.mrf.mxu0  ;;  %v7237_v41 = vpop.f32.mrf.mxu1  ;;  %3320 = vmatmul.f32.gmra.mxu3 %v6870_v47 }
 0x8aa   :  { %8747 = vst [vmem:[#allocation110_spill] sm:$0xff] %v7235_v2 }
 0x8ab   :  { %8748 = vst [vmem:[#allocation111_spill] sm:$0xff] %v7237_v41 }
 0x8ac   :  { %v7240_v52 = vpop.f32.mrf.mxu3  ;;  %4683 = vmatmul.msk.f32.gmra.mxu0 %vm2274_vm6, %v6787_v31  ;;  %3255 = vmatmul.f32.gmra.mxu1 %v8694_v26 }
 0x8ad   :  { %8749 = vst [vmem:[#allocation112_spill] sm:$0xff] %v7240_v52  ;;  %v2614_v52 = vld [vmem:[#allocation4 + $0x610] sm:$0xff] }
 0x8ae   :  { %3422 = vmatpush.msrb.mxu1 %v2614_v52 }
 0x8b1   :  { %v7245_v58 = vpop.f32.mrf.mxu0  ;;  %v7247_v53 = vpop.f32.mrf.mxu1  ;;  %3323 = vmatmul.f32.gmra.mxu3 %v6890_v30 }
 0x8b2   :  { %8750 = vst [vmem:[#allocation113_spill] sm:$0xff] %v7245_v58 }
 0x8b3   :  { %8751 = vst [vmem:[#allocation114_spill] sm:$0xff] %v7247_v53  ;;  %v2423_v53 = vld [vmem:[#allocation4 + $0x18] sm:$0xff] }
 0x8b4   :  { %v7250_v41 = vpop.f32.mrf.mxu3  ;;  %4684 = vmatmul.msk.f32.gmra.mxu0 %vm2274_vm6, %v6831_v22  ;;  %3258 = vmatmul.f32.gmra.mxu1 %v8698_v6 }
 0x8b5   :  { %8752 = vst [vmem:[#allocation115_spill] sm:$0xff] %v7250_v41  ;;  %3487 = vmatpush.msrb.mxu3 %v2423_v53  ;;  %v2550_v41 = vld [vmem:[#allocation4 + $0x410] sm:$0xff]  ;;  %v2643_v53 = vld [vmem:[#allocation4 + $0x6f8] sm:$0xff] }
 0x8b6   :  { %3357 = vmatpush.msrb.mxu0 %v2550_v41 }
 0x8b7   :  { %3675 = vmatpush.msra.mxu3 %v2643_v53 }
 0x8b9   :  { %v7255_v55 = vpop.f32.mrf.mxu0  ;;  %v7257_v58 = vpop.f32.mrf.mxu1  ;;  %3326 = vmatmul.f32.gmra.mxu3 %v6914_v9 }
 0x8ba   :  { %8753 = vst [vmem:[#allocation116_spill] sm:$0xff] %v7255_v55  ;;  %v2607_v55 = vld [vmem:[#allocation4 + $0x5d8] sm:$0xff] }
 0x8bb   :  { %8754 = vst [vmem:[#allocation117_spill] sm:$0xff] %v7257_v58  ;;  %v2611_v58 = vld [vmem:[#allocation4 + $0x5f8] sm:$0xff] }
 0x8bc   :  { %v7260_v49 = vpop.f32.mrf.mxu3  ;;  %4685 = vmatmul.msk.f32.gmra.mxu0 %vm2274_vm6, %v6861_v25  ;;  %3261 = vmatmul.f32.gmra.mxu1 %v8702_v15 }
 0x8bd   :  { %8755 = vst [vmem:[#allocation118_spill] sm:$0xff] %v7260_v49  ;;  %v2547_v49 = vld [vmem:[#allocation4 + $0x3f8] sm:$0xff]  ;;  %3602 = vmatpush.msra.mxu1 %v2611_v58 }
 0x8be   :  { %3537 = vmatpush.msra.mxu0 %v2547_v49 }
 0x8bf   :  { %3603 = vmatpush.msra.mxu1 %v2607_v55 }
 0x8c1   :  { %v7265_v2 = vpop.f32.mrf.mxu0  ;;  %v7267_v52 = vpop.f32.mrf.mxu1  ;;  %3329 = vmatmul.f32.gmra.mxu3 %v6938_v1 }
 0x8c2   :  { %8756 = vst [vmem:[#allocation119_spill] sm:$0xff] %v7265_v2 }
 0x8c3   :  { %8757 = vst [vmem:[#allocation120_spill] sm:$0xff] %v7267_v52 }
 0x8c4   :  { %v7270_v59 = vpop.f32.mrf.mxu3  ;;  %4686 = vmatmul.msk.f32.gmra.mxu0 %vm2274_vm6, %v6905_v8  ;;  %3264 = vmatmul.f32.gmra.mxu1 %v8706_v5 }
 0x8c5   :  { %8758 = vst [vmem:[#allocation121_spill] sm:$0xff] %v7270_v59  ;;  %v2543_v59 = vld [vmem:[#allocation4 + $0x3d8] sm:$0xff] }
 0x8c6   :  { %3538 = vmatpush.msra.mxu0 %v2543_v59 }
 0x8c9   :  { %v7275_v41 = vpop.f32.mrf.mxu0  ;;  %v7277_v2 = vpop.f32.mrf.mxu1  ;;  %3332 = vmatmul.f32.gmra.mxu3 %v6962_v44 }
 0x8ca   :  { %8759 = vst [vmem:[#allocation122_spill] sm:$0xff] %v7275_v41  ;;  %v2603_v41 = vld [vmem:[#allocation4 + $0x5b8] sm:$0xff] }
 0x8cb   :  { %8760 = vst [vmem:[#allocation123_spill] sm:$0xff] %v7277_v2  ;;  %v2539_v2 = vld [vmem:[#allocation4 + $0x3b8] sm:$0xff]  ;;  %3604 = vmatpush.msra.mxu1 %v2603_v41 }
 0x8cc   :  { %v7280_v52 = vpop.f32.mrf.mxu3  ;;  %4687 = vmatmul.msk.f32.gmra.mxu0 %vm2274_vm6, %v6929_v62  ;;  %3267 = vmatmul.f32.gmra.mxu1 %v8710_v0 }
 0x8cd   :  { %8761 = vst [vmem:[#allocation124_spill] sm:$0xff] %v7280_v52  ;;  %v2639_v52 = vld [vmem:[#allocation4 + $0x6d8] sm:$0xff]  ;;  %3539 = vmatpush.msra.mxu0 %v2539_v2 }
 0x8ce   :  { %3676 = vmatpush.msra.mxu3 %v2639_v52 }
 0x8d1   :  { %v7285_v53 = vpop.f32.mrf.mxu0  ;;  %v7287_v58 = vpop.f32.mrf.mxu1  ;;  %3335 = vmatmul.f32.gmra.mxu3 %v6980_v46 }
 0x8d2   :  { %8762 = vst [vmem:[#allocation125_spill] sm:$0xff] %v7285_v53  ;;  %v2599_v53 = vld [vmem:[#allocation4 + $0x598] sm:$0xff] }
 0x8d3   :  { %8763 = vst [vmem:[#allocation126_spill] sm:$0xff] %v7287_v58  ;;  %3605 = vmatpush.msra.mxu1 %v2599_v53 }
 0x8d4   :  { %v7290_v49 = vpop.f32.mrf.mxu3  ;;  %4688 = vmatmul.msk.f32.gmra.mxu0 %vm2274_vm6, %v6955_v48  ;;  %3270 = vmatmul.f32.gmra.mxu1 %v8711_v17 }
 0x8d5   :  { %8764 = vst [vmem:[#allocation127_spill] sm:$0xff] %v7290_v49  ;;  %v2535_v49 = vld [vmem:[#allocation4 + $0x398] sm:$0xff] }
 0x8d6   :  { %3540 = vmatpush.msra.mxu0 %v2535_v49 }
 0x8d9   :  { %v7295_v55 = vpop.f32.mrf.mxu0  ;;  %v7297_v59 = vpop.f32.mrf.mxu1  ;;  %3338 = vmatmul.f32.gmra.mxu3 %v7004_v42  ;;  %v2595_v42 = vld [vmem:[#allocation4 + $0x578] sm:$0xff] }
 0x8da   :  { %8765 = vst [vmem:[#allocation128_spill] sm:$0xff] %v7295_v55  ;;  %v2531_v55 = vld [vmem:[#allocation4 + $0x378] sm:$0xff]  ;;  %3606 = vmatpush.msra.mxu1 %v2595_v42 }
 0x8db   :  { %8766 = vst [vmem:[#allocation129_spill] sm:$0xff] %v7297_v59  ;;  %3541 = vmatpush.msra.mxu0 %v2531_v55 }
 0x8dc   :  { %v7300_v58 = vpop.f32.mrf.mxu3  ;;  %4689 = vmatmul.msk.f32.gmra.mxu0 %vm2274_vm6, %v6997_v4  ;;  %3273 = vmatmul.f32.gmra.mxu1 %v8713_v39 }
 0x8dd   :  { %8767 = vst [vmem:[#allocation130_spill] sm:$0xff] %v7300_v58  ;;  %v2635_v58 = vld [vmem:[#allocation4 + $0x6b8] sm:$0xff] }
 0x8de   :  { %3677 = vmatpush.msra.mxu3 %v2635_v58 }
 0x8e1   :  { %v7305_v52 = vpop.f32.mrf.mxu0  ;;  %v3229_v2 = vpop.f32.mrf.mxu1  ;;  %3488 = vmatmul.f32.vlgmr.msrb.gmra.mxu3 %v8660_v34 }
 0x8e2   :  { %8768 = vst [vmem:[#allocation131_spill] sm:$0xff] %v7305_v52 }
 0x8e4   :  { %v3294_v41 = vpop.f32.mrf.mxu3  ;;  %3358 = vmatmul.f32.vlgmr.msrb.gmra.mxu0 %v6584_v19  ;;  %4690 = vmatmul.msk.f32.vlgmr.msrb.gmra.mxu1 %vm2274_vm6, %v6398_v3 }
 0x8e5   :  { %v7311_v59 = vadd.f32 %v3294_v41, %v3229_v2  ;;  %v2527_v2 = vld [vmem:[#allocation4 + $0x358] sm:$0xff] }
 0x8e6   :  { %v2591_v41 = vld [vmem:[#allocation4 + $0x558] sm:$0xff]  ;;  %3542 = vmatpush.msra.mxu0 %v2527_v2 }
 0x8e7   :  { %3607 = vmatpush.msra.mxu1 %v2591_v41 }
 0x8e9   :  { %v7313_v53 = vpop.f32.mrf.mxu0  ;;  %v3232_v49 = vpop.f32.mrf.mxu1  ;;  %3491 = vmatmul.f32.gmra.mxu3 %v8664_v35  ;;  %v2631_v35 = vld [vmem:[#allocation4 + $0x698] sm:$0xff] }
 0x8ea   :  { %8769 = vst [vmem:[#allocation132_spill] sm:$0xff] %v7313_v53  ;;  %3678 = vmatpush.msra.mxu3 %v2631_v35 }
 0x8ec   :  { %v3297_v34 = vpop.f32.mrf.mxu3  ;;  %3361 = vmatmul.f32.gmra.mxu0 %v6654_v23  ;;  %4691 = vmatmul.msk.f32.gmra.mxu1 %vm2274_vm6, %v8721_v40 }
 0x8ed   :  { %v7319_v52 = vadd.f32 %v3297_v34, %v3232_v49  ;;  %v2523_v49 = vld [vmem:[#allocation4 + $0x338] sm:$0xff] }
 0x8ee   :  { %v2587_v34 = vld [vmem:[#allocation4 + $0x538] sm:$0xff]  ;;  %3543 = vmatpush.msra.mxu0 %v2523_v49 }
 0x8ef   :  { %3608 = vmatpush.msra.mxu1 %v2587_v34 }
 0x8f1   :  { %v7321_v58 = vpop.f32.mrf.mxu0  ;;  %v3235_v42 = vpop.f32.mrf.mxu1  ;;  %3494 = vmatmul.f32.gmra.mxu3 %v8667_v11 }
 0x8f2   :  { %8770 = vst [vmem:[#allocation133_spill] sm:$0xff] %v7321_v58 }
 0x8f4   :  { %v3300_v55 = vpop.f32.mrf.mxu3  ;;  %3364 = vmatmul.f32.gmra.mxu0 %v6682_v29  ;;  %4692 = vmatmul.msk.f32.gmra.mxu1 %vm2274_vm6, %v8725_v27 }
 0x8f5   :  { %v7327_v53 = vadd.f32 %v3300_v55, %v3235_v42  ;;  %v2519_v42 = vld [vmem:[#allocation4 + $0x318] sm:$0xff] }
 0x8f6   :  { %v2583_v55 = vld [vmem:[#allocation4 + $0x518] sm:$0xff]  ;;  %3544 = vmatpush.msra.mxu0 %v2519_v42 }
 0x8f7   :  { %3609 = vmatpush.msra.mxu1 %v2583_v55 }
 0x8f9   :  { %v7329_v2 = vpop.f32.mrf.mxu0  ;;  %v3238_v41 = vpop.f32.mrf.mxu1  ;;  %3497 = vmatmul.f32.gmra.mxu3 %v8671_v14  ;;  %v2627_v14 = vld [vmem:[#allocation4 + $0x678] sm:$0xff] }
 0x8fa   :  { %8771 = vst [vmem:[#allocation134_spill] sm:$0xff] %v7329_v2  ;;  %3679 = vmatpush.msra.mxu3 %v2627_v14 }
 0x8fc   :  { %v3303_v11 = vpop.f32.mrf.mxu3  ;;  %3367 = vmatmul.f32.gmra.mxu0 %v6712_v57  ;;  %4693 = vmatmul.msk.f32.gmra.mxu1 %vm2274_vm6, %v8729_v12 }
 0x8fd   :  { %v7335_v58 = vadd.f32 %v3303_v11, %v3238_v41  ;;  %v2515_v41 = vld [vmem:[#allocation4 + $0x2f8] sm:$0xff] }
 0x8fe   :  { %v2579_v11 = vld [vmem:[#allocation4 + $0x4f8] sm:$0xff]  ;;  %3545 = vmatpush.msra.mxu0 %v2515_v41 }
 0x8ff   :  { %3610 = vmatpush.msra.mxu1 %v2579_v11 }
 0x901   :  { %v7337_v35 = vpop.f32.mrf.mxu0  ;;  %v3241_v49 = vpop.f32.mrf.mxu1  ;;  %3500 = vmatmul.f32.gmra.mxu3 %v8675_v21 }
 0x902   :  { %8772 = vst [vmem:[#allocation135_spill] sm:$0xff] %v7337_v35 }
 0x904   :  { %v3306_v34 = vpop.f32.mrf.mxu3  ;;  %3370 = vmatmul.f32.gmra.mxu0 %v6743_v45  ;;  %4694 = vmatmul.msk.f32.gmra.mxu1 %vm2274_vm6, %v8733_v54 }
 0x905   :  { %v7343_v2 = vadd.f32 %v3306_v34, %v3241_v49  ;;  %v2511_v49 = vld [vmem:[#allocation4 + $0x2d8] sm:$0xff] }
 0x906   :  { %v2575_v34 = vld [vmem:[#allocation4 + $0x4d8] sm:$0xff]  ;;  %3546 = vmatpush.msra.mxu0 %v2511_v49 }
 0x907   :  { %3611 = vmatpush.msra.mxu1 %v2575_v34 }
 0x909   :  { %v7345_v42 = vpop.f32.mrf.mxu0  ;;  %v3244_v55 = vpop.f32.mrf.mxu1  ;;  %3503 = vmatmul.f32.gmra.mxu3 %v8679_v13  ;;  %v2623_v13 = vld [vmem:[#allocation4 + $0x658] sm:$0xff] }
 0x90a   :  { %8773 = vst [vmem:[#allocation136_spill] sm:$0xff] %v7345_v42  ;;  %v8775_v42 = vld [vmem:[#allocation9_spill] sm:$0xff]  ;;  %3680 = vmatpush.msra.mxu3 %v2623_v13 }
 0x90c   :  { %v3309_v21 = vpop.f32.mrf.mxu3  ;;  %3373 = vmatmul.f32.gmra.mxu0 %v6767_v18  ;;  %4695 = vmatmul.msk.f32.gmra.mxu1 %vm2274_vm6, %v8737_v37 }
 0x90d   :  { %v7351_v35 = vadd.f32 %v3309_v21, %v3244_v55  ;;  %v2507_v55 = vld [vmem:[#allocation4 + $0x2b8] sm:$0xff] }
 0x90e   :  { %v2571_v21 = vld [vmem:[#allocation4 + $0x4b8] sm:$0xff]  ;;  %3547 = vmatpush.msra.mxu0 %v2507_v55 }
 0x90f   :  { %3612 = vmatpush.msra.mxu1 %v2571_v21 }
 0x911   :  { %v7353_v14 = vpop.f32.mrf.mxu0  ;;  %v3247_v41 = vpop.f32.mrf.mxu1  ;;  %3506 = vmatmul.f32.gmra.mxu3 %v8683_v28 }
 0x912   :  { %8774 = vst [vmem:[#allocation137_spill] sm:$0xff] %v7353_v14  ;;  %v8777_v14 = vld [vmem:[#allocation56_spill] sm:$0xff] }
 0x914   :  { %v3312_v11 = vpop.f32.mrf.mxu3  ;;  %3376 = vmatmul.f32.gmra.mxu0 %v8775_v42  ;;  %4696 = vmatmul.msk.f32.gmra.mxu1 %vm2274_vm6, %v6670_v33 }
 0x915   :  { %v7359_v50 = vadd.f32 %v3312_v11, %v3247_v41  ;;  %v2503_v41 = vld [vmem:[#allocation4 + $0x298] sm:$0xff] }
 0x916   :  { %v2567_v11 = vld [vmem:[#allocation4 + $0x498] sm:$0xff]  ;;  %3548 = vmatpush.msra.mxu0 %v2503_v41 }
 0x917   :  { %3613 = vmatpush.msra.mxu1 %v2567_v11 }
 0x919   :  { %v7361_v49 = vpop.f32.mrf.mxu0  ;;  %v3250_v34 = vpop.f32.mrf.mxu1  ;;  %3509 = vmatmul.f32.gmra.mxu3 %v8686_v16  ;;  %v2619_v16 = vld [vmem:[#allocation4 + $0x638] sm:$0xff] }
 0x91a   :  { %8776 = vst [vmem:[#allocation9_spill] sm:$0xff] %v7361_v49  ;;  %v8779_v49 = vld [vmem:[#allocation10_spill] sm:$0xff]  ;;  %3681 = vmatpush.msra.mxu3 %v2619_v16 }
 0x91c   :  { %v3315_v28 = vpop.f32.mrf.mxu3  ;;  %3379 = vmatmul.f32.gmra.mxu0 %v8777_v14  ;;  %4697 = vmatmul.msk.f32.gmra.mxu1 %vm2274_vm6, %v6700_v38 }
 0x91d   :  { %v7367_v46 = vadd.f32 %v3315_v28, %v3250_v34  ;;  %v2499_v34 = vld [vmem:[#allocation4 + $0x278] sm:$0xff] }
 0x91e   :  { %v2563_v28 = vld [vmem:[#allocation4 + $0x478] sm:$0xff]  ;;  %3549 = vmatpush.msra.mxu0 %v2499_v34 }
 0x91f   :  { %3614 = vmatpush.msra.mxu1 %v2563_v28 }
 0x921   :  { %v7369_v13 = vpop.f32.mrf.mxu0  ;;  %v3253_v55 = vpop.f32.mrf.mxu1  ;;  %3512 = vmatmul.f32.gmra.mxu3 %v8690_v36 }
 0x922   :  { %8778 = vst [vmem:[#allocation56_spill] sm:$0xff] %v7369_v13  ;;  %v8781_v13 = vld [vmem:[#allocation61_spill] sm:$0xff] }
 0x924   :  { %v3318_v21 = vpop.f32.mrf.mxu3  ;;  %3382 = vmatmul.f32.gmra.mxu0 %v8779_v49  ;;  %4698 = vmatmul.msk.f32.gmra.mxu1 %vm2274_vm6, %v6733_v7 }
 0x925   :  { %v7375_v44 = vadd.f32 %v3318_v21, %v3253_v55  ;;  %v2495_v55 = vld [vmem:[#allocation4 + $0x258] sm:$0xff] }
 0x926   :  { %v2559_v21 = vld [vmem:[#allocation4 + $0x458] sm:$0xff]  ;;  %3550 = vmatpush.msra.mxu0 %v2495_v55 }
 0x927   :  { %3615 = vmatpush.msra.mxu1 %v2559_v21 }
 0x929   :  { %v7377_v41 = vpop.f32.mrf.mxu0  ;;  %v3256_v11 = vpop.f32.mrf.mxu1  ;;  %3515 = vmatmul.f32.gmra.mxu3 %v8694_v26  ;;  %v2615_v26 = vld [vmem:[#allocation4 + $0x618] sm:$0xff] }
 0x92a   :  { %8780 = vst [vmem:[#allocation10_spill] sm:$0xff] %v7377_v41  ;;  %v8783_v41 = vld [vmem:[#allocation62_spill] sm:$0xff]  ;;  %3682 = vmatpush.msra.mxu3 %v2615_v26 }
 0x92c   :  { %v3321_v36 = vpop.f32.mrf.mxu3  ;;  %3385 = vmatmul.f32.gmra.mxu0 %v8781_v13  ;;  %4699 = vmatmul.msk.f32.gmra.mxu1 %vm2274_vm6, %v6787_v31 }
 0x92d   :  { %v7383_v1 = vadd.f32 %v3321_v36, %v3256_v11  ;;  %v2491_v11 = vld [vmem:[#allocation4 + $0x238] sm:$0xff] }
 0x92e   :  { %v2555_v36 = vld [vmem:[#allocation4 + $0x438] sm:$0xff]  ;;  %3551 = vmatpush.msra.mxu0 %v2491_v11 }
 0x92f   :  { %3616 = vmatpush.msra.mxu1 %v2555_v36 }
 0x931   :  { %v7385_v16 = vpop.f32.mrf.mxu0  ;;  %v3259_v34 = vpop.f32.mrf.mxu1  ;;  %3518 = vmatmul.f32.gmra.mxu3 %v8698_v6 }
 0x932   :  { %8782 = vst [vmem:[#allocation61_spill] sm:$0xff] %v7385_v16  ;;  %v8785_v16 = vld [vmem:[#allocation63_spill] sm:$0xff] }
 0x934   :  { %v3324_v28 = vpop.f32.mrf.mxu3  ;;  %3388 = vmatmul.f32.gmra.mxu0 %v8783_v41  ;;  %4700 = vmatmul.msk.f32.gmra.mxu1 %vm2274_vm6, %v6831_v22 }
 0x935   :  { %v7391_v9 = vadd.f32 %v3324_v28, %v3259_v34  ;;  %v2487_v34 = vld [vmem:[#allocation4 + $0x218] sm:$0xff] }
 0x936   :  { %v2551_v28 = vld [vmem:[#allocation4 + $0x418] sm:$0xff]  ;;  %3552 = vmatpush.msra.mxu0 %v2487_v34  ;;  %v8789_v34 = vld [vmem:[#allocation65_spill] sm:$0xff] }
 0x937   :  { %3617 = vmatpush.msra.mxu1 %v2551_v28  ;;  %v3875_v28 = vld [vmem:[%s8391_s9 + $0xf8] sm:$0xff] }
 0x938   :  { %3876 = vmatpush.msrb.mxu0 %v3875_v28  ;;  %v3802_v28 = vld [vmem:[%s8391_s9 + $0x70] sm:$0xff] }
 0x939   :  { %v7393_v55 = vpop.f32.mrf.mxu0  ;;  %v3262_v21 = vpop.f32.mrf.mxu1  ;;  %3521 = vmatmul.f32.gmra.mxu3 %v8702_v15 }
 0x93a   :  { %8784 = vst [vmem:[#allocation138_spill] sm:$0xff] %v7393_v55  ;;  %v8787_v55 = vld [vmem:[#allocation12_spill] sm:$0xff] }
 0x93c   :  { %v3327_v6 = vpop.f32.mrf.mxu3  ;;  %3391 = vmatmul.f32.gmra.mxu0 %v8785_v16  ;;  %4701 = vmatmul.msk.f32.gmra.mxu1 %vm2274_vm6, %v6861_v25 }
 0x93d   :  { %v7399_v41 = vadd.f32 %v3327_v6, %v3262_v21 }
 0x941   :  { %v7401_v26 = vpop.f32.mrf.mxu0  ;;  %v3265_v11 = vpop.f32.mrf.mxu1  ;;  %3524 = vmatmul.f32.gmra.mxu3 %v8706_v5 }
 0x942   :  { %8786 = vst [vmem:[#allocation139_spill] sm:$0xff] %v7401_v26  ;;  %v8791_v26 = vld [vmem:[#allocation14_spill] sm:$0xff] }
 0x944   :  { %v3330_v36 = vpop.f32.mrf.mxu3  ;;  %3394 = vmatmul.f32.gmra.mxu0 %v8787_v55  ;;  %4702 = vmatmul.msk.f32.gmra.mxu1 %vm2274_vm6, %v6905_v8 }
 0x945   :  { %v7407_v15 = vadd.f32 %v3330_v36, %v3265_v11  ;;  %v3803_v11 = vld [vmem:[%s8391_s9 + $0x78] sm:$0xff] }
 0x946   :  { %3941 = vmatpush.msrb.mxu1 %v3803_v11 }
 0x948   :  { %3942 = vmatpush.msrb.mxu1 %v3802_v28  ;;  %v8798_v28 = vld [vmem:[#allocation66_spill] sm:$0xff] }
 0x949   :  { %v7409_v16 = vpop.f32.mrf.mxu0  ;;  %v3268_v21 = vpop.f32.mrf.mxu1  ;;  %3527 = vmatmul.f32.gmra.mxu3 %v8710_v0 }
 0x94a   :  { %8788 = vst [vmem:[#allocation12_spill] sm:$0xff] %v7409_v16 }
 0x94c   :  { %v3333_v6 = vpop.f32.mrf.mxu3  ;;  %3397 = vmatmul.f32.gmra.mxu0 %v8789_v34  ;;  %4703 = vmatmul.msk.f32.gmra.mxu1 %vm2274_vm6, %v6929_v62 }
 0x94d   :  { %v7415_v5 = vadd.f32 %v3333_v6, %v3268_v21  ;;  %v3874_v6 = vld [vmem:[%s8391_s9 + $0xf0] sm:$0xff] }
 0x94e   :  { %3877 = vmatpush.msrb.mxu0 %v3874_v6  ;;  %v3873_v6 = vld [vmem:[%s8391_s9 + $0xe8] sm:$0xff] }
 0x950   :  { %3878 = vmatpush.msrb.mxu0 %v3873_v6  ;;  %v7468_v6 = vld [vmem:[%s8390_s8] ss:$0 sm:$0xff] }
 0x951   :  { %v7423_v36 = vpop.f32.mrf.mxu0  ;;  %v3271_v0 = vpop.f32.mrf.mxu1  ;;  %3530 = vmatmul.f32.gmra.mxu3 %v8711_v17 }
 0x952   :  { %8790 = vst [vmem:[#allocation140_spill] sm:$0xff] %v7423_v36  ;;  %v8794_v36 = vld [vmem:[#allocation55_spill] sm:$0xff] }
 0x954   :  { %v3336_v16 = vpop.f32.mrf.mxu3  ;;  %3400 = vmatmul.f32.gmra.mxu0 %v8791_v26  ;;  %4704 = vmatmul.msk.f32.gmra.mxu1 %vm2274_vm6, %v6955_v48  ;;  %v8795_v26 = vld [vmem:[#allocation69_spill] sm:$0xff] }
 0x955   :  { %v7429_v21 = vadd.f32 %v3336_v16, %v3271_v0  ;;  %v2775_v48 = vadd.f32 %v8795_v26, %v8794_v36 }
 0x957   :  { %8792 = vst [vmem:[#allocation141_spill] sm:$0xff] %v7429_v21  ;;  %v8797_v21 = vld [vmem:[#allocation29_spill] sm:$0xff] }
 0x958   :  { %v2840_v34 = vadd.f32 %v8797_v21, %v2775_v48  ;;  %v7460_v48 = vld [vmem:[%s8389_s7] ss:$0 sm:$0xff] }
 0x959   :  { %v7437_v11 = vpop.f32.mrf.mxu0  ;;  %v3274_v17 = vpop.f32.mrf.mxu1  ;;  %3533 = vmatmul.f32.gmra.mxu3 %v8713_v39  ;;  %v3801_v39 = vld [vmem:[%s8391_s9 + $0x68] sm:$0xff]  ;;  %v8799_v21 = vld [vmem:[#allocation52_spill] sm:$0xff] }
 0x95a   :  { %8793 = vst [vmem:[#allocation142_spill] sm:$0xff] %v7437_v11  ;;  %3943 = vmatpush.msrb.mxu1 %v3801_v39 }
 0x95c   :  { %v3339_v16 = vpop.f32.mrf.mxu3  ;;  %3403 = vmatmul.f32.gmra.mxu0 %v7007_v60  ;;  %4705 = vmatmul.msk.f32.gmra.mxu1 %vm2274_vm6, %v6997_v4 }
 0x95d   :  { %v7445_v0 = vadd.f32 %v3339_v16, %v3274_v17  ;;  %v2905_v17 = vadd.f32 %v8798_v28, %v2840_v34  ;;  %v8800_v16 = vld [vmem:[#allocation70_spill] sm:$0xff] }
 0x95e   :  { %v2778_v11 = vadd.f32 %v8800_v16, %v8799_v21  ;;  %v8803_v34 = vld [vmem:[#allocation30_spill] sm:$0xff]  ;;  %v8807_v16 = vld [vmem:[#allocation31_spill] sm:$0xff] }
 0x95f   :  { %8796 = vst [vmem:[#allocation55_spill] sm:$0xff] %v7445_v0 }
 0x960   :  { %v2843_v28 = vadd.f32 %v8803_v34, %v2778_v11  ;;  %v8805_v11 = vld [vmem:[#allocation27_spill] sm:$0xff] }
 0x961   :  { %v3359_v26 = vpop.f32.mrf.mxu0  ;;  %v3424_v36 = vpop.f32.mrf.mxu1  ;;  %4706 = vmatmul.msk.f32.vlgmr.msra.gmra.mxu3 %vm2274_vm6, %v6398_v3  ;;  %v7475_v3 = vadd.f32 %v7460_v48, %v2905_v17  ;;  %v8806_v17 = vld [vmem:[#allocation53_spill] sm:$0xff] }
 0x962   :  { %v3360_v60 = vadd.f32 %v3359_v26, %v7311_v59  ;;  %v3872_v59 = vld [vmem:[%s8391_s9 + $0xe0] sm:$0xff] }
 0x963   :  { %8802 = vst [vmem:[#allocation29_spill] sm:$0xff] %v7475_v3  ;;  %3879 = vmatpush.msrb.mxu0 %v3872_v59 }
 0x964   :  { %v3425_v39 = vadd.f32 %v3424_v36, %v3360_v60  ;;  %v7470_v0 = vpop.f32.mrf.mxu3  ;;  %3553 = vmatmul.f32.vlgmr.msra.gmra.mxu0 %v6581_v24  ;;  %3618 = vmatmul.f32.vlgmr.msra.gmra.mxu1 %v6584_v19  ;;  %v3800_v60 = vld [vmem:[%s8391_s9 + $0x60] sm:$0xff]  ;;  %v2908_v36 = vadd.f32 %v8805_v11, %v2843_v28  ;;  %v3871_v28 = vld [vmem:[%s8391_s9 + $0xd8] sm:$0xff]  ;;  %v8811_v11 = vld [vmem:[#allocation58_spill] sm:$0xff] }
 0x965   :  { %8801 = vst [vmem:[#allocation69_spill] sm:$0xff] %v7470_v0  ;;  %3944 = vmatpush.msrb.mxu1 %v3800_v60  ;;  %v8808_v60 = vld [vmem:[#allocation17_spill] sm:$0xff]  ;;  %3880 = vmatpush.msrb.mxu0 %v3871_v28  ;;  %v8813_v28 = vld [vmem:[#allocation19_spill] sm:$0xff] }
 0x966   :  { %v7479_v21 = vadd.f32 %v7468_v6, %v3425_v39  ;;  %v2781_v39 = vadd.f32 %v8807_v16, %v8806_v17  ;;  %v7500_v59 = vadd.f32 %v7460_v48, %v2908_v36  ;;  %v8812_v36 = vld [vmem:[#allocation33_spill] sm:$0xff] }
 0x967   :  { %v2784_v17 = vadd.f32 %v8812_v36, %v8811_v11  ;;  %v8817_v11 = vld [vmem:[#allocation73_spill] sm:$0xff] }
 0x968   :  { %8804 = vst [vmem:[#allocation66_spill] sm:$0xff] %v7479_v21  ;;  %v2846_v24 = vadd.f32 %v8808_v60, %v2781_v39 }
 0x969   :  { %v3362_v19 = vpop.f32.mrf.mxu0  ;;  %v3427_v26 = vpop.f32.mrf.mxu1  ;;  %4707 = vmatmul.msk.f32.gmra.mxu3 %vm2274_vm6, %v8721_v40 }
 0x96a   :  { %v3363_v34 = vadd.f32 %v3362_v19, %v7319_v52  ;;  %v3799_v52 = vld [vmem:[%s8391_s9 + $0x58] sm:$0xff] }
 0x96b   :  { %3945 = vmatpush.msrb.mxu1 %v3799_v52  ;;  %v2849_v52 = vadd.f32 %v8813_v28, %v2784_v17 }
 0x96c   :  { %v3428_v0 = vadd.f32 %v3427_v26, %v3363_v34  ;;  %v7495_v4 = vpop.f32.mrf.mxu3  ;;  %3556 = vmatmul.f32.gmra.mxu0 %v6651_v61  ;;  %3621 = vmatmul.f32.gmra.mxu1 %v6654_v23  ;;  %v8890_v61 = vld [vmem:[#allocation39_spill] sm:$0xff] }
 0x96e   :  { %v7504_v40 = vadd.f32 %v7468_v6, %v3428_v0  ;;  %v8810_v0 = vld [vmem:[#allocation16_spill] sm:$0xff] }
 0x96f   :  { %v2911_v26 = vadd.f32 %v8810_v0, %v2846_v24  ;;  %v3870_v24 = vld [vmem:[%s8391_s9 + $0xd0] sm:$0xff] }
 0x970   :  { %8809 = vst [vmem:[#allocation52_spill] sm:$0xff] %v7504_v40  ;;  %3881 = vmatpush.msrb.mxu0 %v3870_v24  ;;  %v8818_v24 = vld [vmem:[#allocation35_spill] sm:$0xff] }
 0x971   :  { %v3365_v23 = vpop.f32.mrf.mxu0  ;;  %v3430_v19 = vpop.f32.mrf.mxu1  ;;  %4708 = vmatmul.msk.f32.gmra.mxu3 %vm2274_vm6, %v8725_v27  ;;  %v7525_v60 = vadd.f32 %v7460_v48, %v2911_v26  ;;  %v8816_v26 = vld [vmem:[#allocation8_spill] sm:$0xff] }
 0x972   :  { %v3366_v16 = vadd.f32 %v3365_v23, %v7327_v53  ;;  %v3798_v53 = vld [vmem:[%s8391_s9 + $0x50] sm:$0xff]  ;;  %v2787_v36 = vadd.f32 %v8817_v11, %v8816_v26  ;;  %v8822_v26 = vld [vmem:[#allocation37_spill] sm:$0xff] }
 0x973   :  { %3946 = vmatpush.msrb.mxu1 %v3798_v53 }
 0x974   :  { %v3431_v39 = vadd.f32 %v3430_v19, %v3366_v16  ;;  %v7520_v34 = vpop.f32.mrf.mxu3  ;;  %3559 = vmatmul.f32.gmra.mxu0 %v6679_v63  ;;  %3624 = vmatmul.f32.gmra.mxu1 %v6682_v29  ;;  %v8815_v19 = vld [vmem:[#allocation71_spill] sm:$0xff]  ;;  %v2852_v53 = vadd.f32 %v8818_v24, %v2787_v36 }
 0x975   :  { %v2914_v0 = vadd.f32 %v8815_v19, %v2849_v52  ;;  %v3869_v52 = vld [vmem:[%s8391_s9 + $0xc8] sm:$0xff] }
 0x976   :  { %v7529_v27 = vadd.f32 %v7468_v6, %v3431_v39  ;;  %3882 = vmatpush.msrb.mxu0 %v3869_v52  ;;  %v8823_v52 = vld [vmem:[#allocation74_spill] sm:$0xff] }
 0x977   :  { %v7550_v28 = vadd.f32 %v7460_v48, %v2914_v0  ;;  %v8821_v0 = vld [vmem:[#allocation59_spill] sm:$0xff] }
 0x978   :  { %8814 = vst [vmem:[#allocation70_spill] sm:$0xff] %v7529_v27  ;;  %v2790_v11 = vadd.f32 %v8822_v26, %v8821_v0  ;;  %v8827_v0 = vld [vmem:[#allocation23_spill] sm:$0xff] }
 0x979   :  { %v3368_v29 = vpop.f32.mrf.mxu0  ;;  %v3433_v23 = vpop.f32.mrf.mxu1  ;;  %4709 = vmatmul.msk.f32.gmra.mxu3 %vm2274_vm6, %v8729_v12 }
 0x97a   :  { %v3369_v17 = vadd.f32 %v3368_v29, %v7335_v58  ;;  %v3797_v58 = vld [vmem:[%s8391_s9 + $0x48] sm:$0xff] }
 0x97b   :  { %3947 = vmatpush.msrb.mxu1 %v3797_v58  ;;  %v2855_v58 = vadd.f32 %v8823_v52, %v2790_v11 }
 0x97c   :  { %v3434_v16 = vadd.f32 %v3433_v23, %v3369_v17  ;;  %v7545_v39 = vpop.f32.mrf.mxu3  ;;  %3562 = vmatmul.f32.gmra.mxu0 %v6709_v51  ;;  %3627 = vmatmul.f32.gmra.mxu1 %v6712_v57  ;;  %v8820_v23 = vld [vmem:[#allocation72_spill] sm:$0xff]  ;;  %v8889_v51 = vld [vmem:[#allocation89_spill] sm:$0xff] }
 0x97d   :  { %v2917_v19 = vadd.f32 %v8820_v23, %v2852_v53  ;;  %v3868_v53 = vld [vmem:[%s8391_s9 + $0xc0] sm:$0xff] }
 0x97e   :  { %v7554_v12 = vadd.f32 %v7468_v6, %v3434_v16  ;;  %3883 = vmatpush.msrb.mxu0 %v3868_v53  ;;  %v8828_v53 = vld [vmem:[#allocation32_spill] sm:$0xff] }
 0x97f   :  { %v7575_v24 = vadd.f32 %v7460_v48, %v2917_v19  ;;  %v8826_v19 = vld [vmem:[#allocation54_spill] sm:$0xff] }
 0x980   :  { %8819 = vst [vmem:[#allocation30_spill] sm:$0xff] %v7554_v12  ;;  %v2793_v26 = vadd.f32 %v8827_v0, %v8826_v19  ;;  %v8832_v19 = vld [vmem:[#allocation36_spill] sm:$0xff] }
 0x981   :  { %v3371_v57 = vpop.f32.mrf.mxu0  ;;  %v3436_v29 = vpop.f32.mrf.mxu1  ;;  %4710 = vmatmul.msk.f32.gmra.mxu3 %vm2274_vm6, %v8733_v54 }
 0x982   :  { %v3372_v36 = vadd.f32 %v3371_v57, %v7343_v2  ;;  %v3796_v2 = vld [vmem:[%s8391_s9 + $0x40] sm:$0xff] }
 0x983   :  { %3948 = vmatpush.msrb.mxu1 %v3796_v2  ;;  %v2858_v2 = vadd.f32 %v8828_v53, %v2793_v26 }
 0x984   :  { %v3437_v17 = vadd.f32 %v3436_v29, %v3372_v36  ;;  %v7570_v16 = vpop.f32.mrf.mxu3  ;;  %3565 = vmatmul.f32.gmra.mxu0 %v6740_v56  ;;  %3630 = vmatmul.f32.gmra.mxu1 %v6743_v45  ;;  %v8825_v29 = vld [vmem:[#allocation21_spill] sm:$0xff]  ;;  %v8888_v56 = vld [vmem:[#allocation44_spill] sm:$0xff] }
 0x985   :  { %v2920_v23 = vadd.f32 %v8825_v29, %v2855_v58  ;;  %v3867_v58 = vld [vmem:[%s8391_s9 + $0xb8] sm:$0xff]  ;;  %v3035_v63 = vadd.f32 %v8889_v51, %v8888_v56  ;;  %v3772_v51 = vmul.f32 %v7479_v21, %v7475_v3  ;;  %v8894_v56 = vld [vmem:[#allocation69_spill] sm:$0xff] }
 0x986   :  { %v7579_v54 = vadd.f32 %v7468_v6, %v3437_v17  ;;  %3884 = vmatpush.msrb.mxu0 %v3867_v58  ;;  %v8833_v58 = vld [vmem:[#allocation38_spill] sm:$0xff] }
 0x987   :  { %v7600_v52 = vadd.f32 %v7460_v48, %v2920_v23  ;;  %v8831_v23 = vld [vmem:[#allocation60_spill] sm:$0xff] }
 0x988   :  { %8824 = vst [vmem:[#allocation27_spill] sm:$0xff] %v7579_v54  ;;  %v2796_v0 = vadd.f32 %v8832_v19, %v8831_v23  ;;  %v8837_v23 = vld [vmem:[#allocation43_spill] sm:$0xff] }
 0x989   :  { %v3374_v45 = vpop.f32.mrf.mxu0  ;;  %v3439_v57 = vpop.f32.mrf.mxu1  ;;  %4711 = vmatmul.msk.f32.gmra.mxu3 %vm2274_vm6, %v8737_v37 }
 0x98a   :  { %v3375_v11 = vadd.f32 %v3374_v45, %v7351_v35  ;;  %v3795_v35 = vld [vmem:[%s8391_s9 + $0x38] sm:$0xff] }
 0x98b   :  { %3949 = vmatpush.msrb.mxu1 %v3795_v35  ;;  %v2861_v35 = vadd.f32 %v8833_v58, %v2796_v0 }
 0x98c   :  { %v3440_v36 = vadd.f32 %v3439_v57, %v3375_v11  ;;  %v7595_v17 = vpop.f32.mrf.mxu3  ;;  %3568 = vmatmul.f32.gmra.mxu0 %v6764_v10  ;;  %3633 = vmatmul.f32.gmra.mxu1 %v6767_v18  ;;  %v8830_v57 = vld [vmem:[#allocation41_spill] sm:$0xff]  ;;  %v8886_v10 = vld [vmem:[#allocation68_spill] sm:$0xff] }
 0x98d   :  { %v2923_v29 = vadd.f32 %v8830_v57, %v2858_v2  ;;  %v3866_v2 = vld [vmem:[%s8391_s9 + $0xb0] sm:$0xff] }
 0x98e   :  { %v7604_v37 = vadd.f32 %v7468_v6, %v3440_v36  ;;  %3885 = vmatpush.msrb.mxu0 %v3866_v2  ;;  %v8838_v2 = vld [vmem:[#allocation45_spill] sm:$0xff] }
 0x98f   :  { %v7625_v53 = vadd.f32 %v7460_v48, %v2923_v29  ;;  %v8836_v29 = vld [vmem:[#allocation57_spill] sm:$0xff] }
 0x990   :  { %8829 = vst [vmem:[#allocation53_spill] sm:$0xff] %v7604_v37  ;;  %v2799_v19 = vadd.f32 %v8837_v23, %v8836_v29  ;;  %v8842_v29 = vld [vmem:[#allocation47_spill] sm:$0xff] }
 0x991   :  { %v3377_v18 = vpop.f32.mrf.mxu0  ;;  %v3442_v45 = vpop.f32.mrf.mxu1  ;;  %4712 = vmatmul.msk.f32.gmra.mxu3 %vm2274_vm6, %v6670_v33 }
 0x992   :  { %v3378_v26 = vadd.f32 %v3377_v18, %v7359_v50  ;;  %v3794_v50 = vld [vmem:[%s8391_s9 + $0x30] sm:$0xff] }
 0x993   :  { %3950 = vmatpush.msrb.mxu1 %v3794_v50  ;;  %v2864_v50 = vadd.f32 %v8838_v2, %v2799_v19 }
 0x994   :  { %v3443_v11 = vadd.f32 %v3442_v45, %v3378_v26  ;;  %v7620_v36 = vpop.f32.mrf.mxu3  ;;  %3571 = vmatmul.f32.gmra.mxu0 %v6796_v43  ;;  %3636 = vmatmul.f32.gmra.mxu1 %v8775_v42  ;;  %v8835_v45 = vld [vmem:[#allocation34_spill] sm:$0xff] }
 0x995   :  { %v2926_v57 = vadd.f32 %v8835_v45, %v2861_v35  ;;  %v3865_v35 = vld [vmem:[%s8391_s9 + $0xa8] sm:$0xff] }
 0x996   :  { %v7629_v33 = vadd.f32 %v7468_v6, %v3443_v11  ;;  %3886 = vmatpush.msrb.mxu0 %v3865_v35  ;;  %v8843_v35 = vld [vmem:[#allocation80_spill] sm:$0xff] }
 0x997   :  { %v7650_v58 = vadd.f32 %v7460_v48, %v2926_v57  ;;  %v8841_v57 = vld [vmem:[#allocation18_spill] sm:$0xff] }
 0x998   :  { %8834 = vst [vmem:[#allocation31_spill] sm:$0xff] %v7629_v33  ;;  %v2802_v23 = vadd.f32 %v8842_v29, %v8841_v57  ;;  %v8847_v57 = vld [vmem:[#allocation81_spill] sm:$0xff] }
 0x999   :  { %v3380_v42 = vpop.f32.mrf.mxu0  ;;  %v3445_v18 = vpop.f32.mrf.mxu1  ;;  %4713 = vmatmul.msk.f32.gmra.mxu3 %vm2274_vm6, %v6700_v38 }
 0x99a   :  { %v3381_v0 = vadd.f32 %v3380_v42, %v7367_v46  ;;  %v3793_v46 = vld [vmem:[%s8391_s9 + $0x28] sm:$0xff] }
 0x99b   :  { %3951 = vmatpush.msrb.mxu1 %v3793_v46  ;;  %v2867_v46 = vadd.f32 %v8843_v35, %v2802_v23 }
 0x99c   :  { %v3446_v26 = vadd.f32 %v3445_v18, %v3381_v0  ;;  %v7645_v11 = vpop.f32.mrf.mxu3  ;;  %3574 = vmatmul.f32.gmra.mxu0 %v6814_v32  ;;  %3639 = vmatmul.f32.gmra.mxu1 %v8777_v14  ;;  %v8840_v18 = vld [vmem:[#allocation42_spill] sm:$0xff] }
 0x99d   :  { %v2929_v45 = vadd.f32 %v8840_v18, %v2864_v50  ;;  %v3864_v50 = vld [vmem:[%s8391_s9 + $0xa0] sm:$0xff] }
 0x99e   :  { %v7654_v38 = vadd.f32 %v7468_v6, %v3446_v26  ;;  %3887 = vmatpush.msrb.mxu0 %v3864_v50  ;;  %v8848_v50 = vld [vmem:[#allocation82_spill] sm:$0xff] }
 0x99f   :  { %v7675_v2 = vadd.f32 %v7460_v48, %v2929_v45  ;;  %v8846_v45 = vld [vmem:[#allocation20_spill] sm:$0xff] }
 0x9a0   :  { %8839 = vst [vmem:[#allocation17_spill] sm:$0xff] %v7654_v38  ;;  %v2805_v29 = vadd.f32 %v8847_v57, %v8846_v45  ;;  %v8852_v45 = vld [vmem:[#allocation83_spill] sm:$0xff] }
 0x9a1   :  { %v3383_v14 = vpop.f32.mrf.mxu0  ;;  %v3448_v42 = vpop.f32.mrf.mxu1  ;;  %4714 = vmatmul.msk.f32.gmra.mxu3 %vm2274_vm6, %v6733_v7 }
 0x9a2   :  { %v3384_v19 = vadd.f32 %v3383_v14, %v7375_v44  ;;  %v3792_v44 = vld [vmem:[%s8391_s9 + $0x20] sm:$0xff] }
 0x9a3   :  { %3952 = vmatpush.msrb.mxu1 %v3792_v44  ;;  %v2870_v44 = vadd.f32 %v8848_v50, %v2805_v29  ;;  %v8853_v50 = vld [vmem:[#allocation62_spill] sm:$0xff] }
 0x9a4   :  { %v3449_v0 = vadd.f32 %v3448_v42, %v3384_v19  ;;  %v7670_v26 = vpop.f32.mrf.mxu3  ;;  %3577 = vmatmul.f32.gmra.mxu0 %v6844_v20  ;;  %3642 = vmatmul.f32.gmra.mxu1 %v8779_v49  ;;  %v8845_v42 = vld [vmem:[#allocation46_spill] sm:$0xff] }
 0x9a5   :  { %v2932_v18 = vadd.f32 %v8845_v42, %v2867_v46  ;;  %v3863_v46 = vld [vmem:[%s8391_s9 + $0x98] sm:$0xff] }
 0x9a6   :  { %v7679_v7 = vadd.f32 %v7468_v6, %v3449_v0  ;;  %3888 = vmatpush.msrb.mxu0 %v3863_v46 }
 0x9a7   :  { %v7700_v35 = vadd.f32 %v7460_v48, %v2932_v18  ;;  %v8851_v18 = vld [vmem:[#allocation64_spill] sm:$0xff] }
 0x9a8   :  { %8844 = vst [vmem:[#allocation16_spill] sm:$0xff] %v7679_v7  ;;  %v2808_v57 = vadd.f32 %v8852_v45, %v8851_v18  ;;  %v8858_v18 = vld [vmem:[#allocation25_spill] sm:$0xff] }
 0x9a9   :  { %v3386_v49 = vpop.f32.mrf.mxu0  ;;  %v3451_v14 = vpop.f32.mrf.mxu1  ;;  %4715 = vmatmul.msk.f32.gmra.mxu3 %vm2274_vm6, %v6787_v31  ;;  %v8859_v45 = vld [vmem:[#allocation85_spill] sm:$0xff] }
 0x9aa   :  { %v3387_v23 = vadd.f32 %v3386_v49, %v7383_v1  ;;  %v3791_v1 = vld [vmem:[%s8391_s9 + $0x18] sm:$0xff] }
 0x9ab   :  { %3953 = vmatpush.msrb.mxu1 %v3791_v1  ;;  %v8855_v1 = vld [vmem:[#allocation84_spill] sm:$0xff] }
 0x9ac   :  { %v3452_v19 = vadd.f32 %v3451_v14, %v3387_v23  ;;  %v7695_v0 = vpop.f32.mrf.mxu3  ;;  %3580 = vmatmul.f32.gmra.mxu0 %v6870_v47  ;;  %3645 = vmatmul.f32.gmra.mxu1 %v8781_v13  ;;  %v8850_v14 = vld [vmem:[#allocation48_spill] sm:$0xff]  ;;  %v2873_v47 = vadd.f32 %v8855_v1, %v2808_v57  ;;  %v2811_v57 = vadd.f32 %v8859_v45, %v8858_v18  ;;  %v8860_v1 = vld [vmem:[#allocation11_spill] sm:$0xff] }
 0x9ad   :  { %v2935_v42 = vadd.f32 %v8850_v14, %v2870_v44  ;;  %v3862_v44 = vld [vmem:[%s8391_s9 + $0x90] sm:$0xff]  ;;  %v8857_v14 = vld [vmem:[#allocation49_spill] sm:$0xff]  ;;  %v8866_v45 = vld [vmem:[#allocation67_spill] sm:$0xff] }
 0x9ae   :  { %v7704_v31 = vadd.f32 %v7468_v6, %v3452_v19  ;;  %3889 = vmatpush.msrb.mxu0 %v3862_v44  ;;  %v8861_v44 = vld [vmem:[#allocation63_spill] sm:$0xff] }
 0x9af   :  { %v7725_v46 = vadd.f32 %v7460_v48, %v2935_v42  ;;  %v2938_v42 = vadd.f32 %v8857_v14, %v2873_v47  ;;  %v3861_v47 = vld [vmem:[%s8391_s9 + $0x88] sm:$0xff] }
 0x9b0   :  { %8849 = vst [vmem:[#allocation58_spill] sm:$0xff] %v7704_v31  ;;  %3890 = vmatpush.msrb.mxu0 %v3861_v47 }
 0x9b1   :  { %v3389_v13 = vpop.f32.mrf.mxu0  ;;  %v3454_v49 = vpop.f32.mrf.mxu1  ;;  %4716 = vmatmul.msk.f32.gmra.mxu3 %vm2274_vm6, %v6831_v22  ;;  %8854 = vst [vmem:[#allocation33_spill] sm:$0xff] %v7725_v46 }
 0x9b2   :  { %v3390_v29 = vadd.f32 %v3389_v13, %v7391_v9  ;;  %v3790_v9 = vld [vmem:[%s8391_s9 + $0x10] sm:$0xff] }
 0x9b3   :  { %3954 = vmatpush.msrb.mxu1 %v3790_v9  ;;  %v7750_v9 = vadd.f32 %v7460_v48, %v2938_v42  ;;  %v8865_v42 = vld [vmem:[#allocation50_spill] sm:$0xff] }
 0x9b4   :  { %v3455_v23 = vadd.f32 %v3454_v49, %v3390_v29  ;;  %v7720_v19 = vpop.f32.mrf.mxu3  ;;  %3583 = vmatmul.f32.gmra.mxu0 %v6890_v30  ;;  %3648 = vmatmul.f32.gmra.mxu1 %v8853_v50  ;;  %v8863_v30 = vld [vmem:[#allocation86_spill] sm:$0xff] }
 0x9b5   :  { %8862 = vst [vmem:[#allocation71_spill] sm:$0xff] %v7750_v9  ;;  %v2876_v20 = vadd.f32 %v8863_v30, %v2811_v57  ;;  %v8867_v57 = vld [vmem:[#allocation40_spill] sm:$0xff]  ;;  %v8881_v30 = vld [vmem:[#allocation51_spill] sm:$0xff] }
 0x9b6   :  { %v7729_v22 = vadd.f32 %v7468_v6, %v3455_v23  ;;  %v7826_v32 = vadd.f32 %v7460_v48, %v8881_v30 }
 0x9b7   :  { %v2941_v18 = vadd.f32 %v8865_v42, %v2876_v20  ;;  %v8870_v20 = vld [vmem:[#allocation87_spill] sm:$0xff] }
 0x9b8   :  { %8856 = vst [vmem:[#allocation19_spill] sm:$0xff] %v7729_v22 }
 0x9b9   :  { %v3392_v13 = vpop.f32.mrf.mxu0  ;;  %v3457_v49 = vpop.f32.mrf.mxu1  ;;  %4717 = vmatmul.msk.f32.gmra.mxu3 %vm2274_vm6, %v6861_v25  ;;  %8882 = vst [vmem:[#allocation37_spill] sm:$0xff] %v7826_v32 }
 0x9ba   :  { %v3393_v29 = vadd.f32 %v3392_v13, %v7399_v41  ;;  %v3789_v41 = vld [vmem:[%s8391_s9 + $0x8] sm:$0xff] }
 0x9bb   :  { %3955 = vmatpush.msrb.mxu1 %v3789_v41  ;;  %v8868_v41 = vld [vmem:[#allocation22_spill] sm:$0xff] }
 0x9bc   :  { %v3458_v23 = vadd.f32 %v3457_v49, %v3393_v29  ;;  %v7745_v50 = vpop.f32.mrf.mxu3  ;;  %3586 = vmatmul.f32.gmra.mxu0 %v8860_v1  ;;  %3651 = vmatmul.f32.gmra.mxu1 %v8861_v44  ;;  %v2814_v29 = vadd.f32 %v8867_v57, %v8866_v45  ;;  %v3788_v1 = vld [vmem:[%s8391_s9] sm:$0xff] }
 0x9bd   :  { %3956 = vmatpush.msrb.mxu1 %v3788_v1 }
 0x9be   :  { %v7754_v25 = vadd.f32 %v7468_v6, %v3458_v23  ;;  %v2879_v42 = vadd.f32 %v8870_v20, %v2814_v29  ;;  %v3860_v29 = vld [vmem:[%s8391_s9 + $0x80] sm:$0xff]  ;;  %v8874_v20 = vld [vmem:[#allocation65_spill] sm:$0xff] }
 0x9bf   :  { %3891 = vmatpush.msrb.mxu0 %v3860_v29 }
 0x9c0   :  { %8864 = vst [vmem:[#allocation8_spill] sm:$0xff] %v7754_v25  ;;  %v7764_v13 = vmul.f32 %v7754_v25, %v7750_v9 }
 0x9c1   :  { %v3395_v49 = vpop.f32.mrf.mxu0  ;;  %v3460_v14 = vpop.f32.mrf.mxu1  ;;  %4718 = vmatmul.msk.f32.gmra.mxu3 %vm2274_vm6, %v6905_v8  ;;  %v7782_v8 = vadd.f32 %v7460_v48, %v2941_v18 }
 0x9c2   :  { %v3396_v23 = vadd.f32 %v3395_v49, %v7407_v15 }
 0x9c3   :  { %8869 = vst [vmem:[#allocation73_spill] sm:$0xff] %v7782_v8 }
 0x9c4   :  { %v3461_v44 = vadd.f32 %v3460_v14, %v3396_v23  ;;  %v7777_v47 = vpop.f32.mrf.mxu3  ;;  %3589 = vmatmul.f32.gmra.mxu0 %v8868_v41  ;;  %3654 = vmatmul.f32.gmra.mxu1 %v8787_v55  ;;  %v8872_v55 = vld [vmem:[#allocation88_spill] sm:$0xff]  ;;  %v8873_v41 = vld [vmem:[#allocation13_spill] sm:$0xff] }
 0x9c5   :  { %v2944_v18 = vadd.f32 %v8872_v55, %v2879_v42  ;;  %v8877_v55 = vld [vmem:[#allocation24_spill] sm:$0xff] }
 0x9c6   :  { %v7786_v45 = vadd.f32 %v7468_v6, %v3461_v44 }
 0x9c7   :  { %v7806_v49 = vadd.f32 %v7460_v48, %v2944_v18 }
 0x9c8   :  { %8871 = vst [vmem:[#allocation35_spill] sm:$0xff] %v7786_v45  ;;  %v7790_v15 = vmul.f32 %v7786_v45, %v7782_v8 }
 0x9c9   :  { %v3398_v14 = vpop.f32.mrf.mxu0  ;;  %v3463_v57 = vpop.f32.mrf.mxu1  ;;  %4719 = vmatmul.msk.f32.gmra.mxu3 %vm2274_vm6, %v6929_v62  ;;  %8875 = vst [vmem:[#allocation72_spill] sm:$0xff] %v7806_v49 }
 0x9ca   :  { %v3399_v23 = vadd.f32 %v3398_v14, %v7415_v5 }
 0x9cc   :  { %v3464_v1 = vadd.f32 %v3463_v57, %v3399_v23  ;;  %v7801_v44 = vpop.f32.mrf.mxu3  ;;  %3592 = vmatmul.f32.gmra.mxu0 %v8873_v41  ;;  %3657 = vmatmul.f32.gmra.mxu1 %v8874_v20  ;;  %v8878_v23 = vld [vmem:[#allocation141_spill] sm:$0xff]  ;;  %v8879_v20 = vld [vmem:[#allocation26_spill] sm:$0xff] }
 0x9ce   :  { %v7809_v62 = vadd.f32 %v7468_v6, %v3464_v1  ;;  %v8880_v1 = vld [vmem:[#allocation14_spill] sm:$0xff] }
 0x9d0   :  { %8876 = vst [vmem:[#allocation59_spill] sm:$0xff] %v7809_v62  ;;  %v7813_v5 = vmul.f32 %v7809_v62, %v7806_v49  ;;  %v4311_v62 = vld [vmem:[%s8392_s10 + $0x10] sm:$0x1f] }
 0x9d1   :  { %v3401_v14 = vpop.f32.mrf.mxu0  ;;  %v3466_v57 = vpop.f32.mrf.mxu1  ;;  %4720 = vmatmul.msk.f32.gmra.mxu3 %vm2274_vm6, %v8877_v55 }
 0x9d2   :  { %v3402_v29 = vadd.f32 %v3401_v14, %v8878_v23  ;;  %v8884_v23 = vld [vmem:[#allocation15_spill] sm:$0xff]  ;;  %v7848_v14 = vadd.f32 %v7460_v48, %v8890_v61  ;;  %4738 = vmatpush.msk.msrb.mxu3 %vm4361_vm0, %v4311_v62 }
 0x9d3   :  { %v8895_v61 = vld [vmem:[#allocation131_spill] sm:$0xff] }
 0x9d4   :  { %v3467_v41 = vadd.f32 %v3466_v57, %v3402_v29  ;;  %v7820_v18 = vpop.f32.mrf.mxu3  ;;  %3595 = vmatmul.f32.gmra.mxu0 %v8879_v20  ;;  %3660 = vmatmul.f32.gmra.mxu1 %v8880_v1  ;;  %v8885_v29 = vld [vmem:[#allocation55_spill] sm:$0xff]  ;;  %8891 = vst [vmem:[#allocation21_spill] sm:$0xff] %v7848_v14 }
 0x9d6   :  { %v7829_v42 = vadd.f32 %v7468_v6, %v3467_v41  ;;  %v8887_v41 = vld [vmem:[#allocation28_spill] sm:$0xff] }
 0x9d8   :  { %8883 = vst [vmem:[#allocation74_spill] sm:$0xff] %v7829_v42  ;;  %v7833_v43 = vmul.f32 %v7829_v42, %v7826_v32 }
 0x9d9   :  { %v3404_v57 = vpop.f32.mrf.mxu0  ;;  %v3469_v55 = vpop.f32.mrf.mxu1  ;;  %4721 = vmatmul.msk.f32.gmra.mxu3 %vm2274_vm6, %v8884_v23 }
 0x9da   :  { %v3405_v20 = vadd.f32 %v3404_v57, %v8885_v29 }
 0x9dc   :  { %v3470_v1 = vadd.f32 %v3469_v55, %v3405_v20  ;;  %v7840_v30 = vpop.f32.mrf.mxu3  ;;  %3598 = vmatmul.f32.gmra.mxu0 %v8886_v10  ;;  %3663 = vmatmul.f32.gmra.mxu1 %v8887_v41  ;;  %v8893_v10 = vld [vmem:[#allocation90_spill] sm:$0xff]  ;;  %v7877_v55 = vld [vmem:[%s8390_s8 + $0x1] ss:$0 sm:$0xff] }
 0x9dd   :  { %v3100_v23 = vadd.f32 %v8893_v10, %v3035_v63 }
 0x9de   :  { %v7851_v42 = vadd.f32 %v7468_v6, %v3470_v1  ;;  %v7867_v6 = vld [vmem:[%s8389_s7 + $0x1] ss:$0 sm:$0xff] }
 0x9df   :  { %v3165_v41 = vadd.f32 %v8895_v61, %v3100_v23  ;;  %v7872_v1 = vld [vmem:[%s8389_s7 + $0x1] ss:$0 sm:$0xff] }
 0x9e0   :  { %8892 = vst [vmem:[#allocation54_spill] sm:$0xff] %v7851_v42  ;;  %v7855_v57 = vmul.f32 %v7851_v42, %v7848_v14  ;;  %v7882_v23 = vld [vmem:[%s8390_s8 + $0x1] ss:$0 sm:$0xff] }
 0x9e1   :  { %v3554_v29 = vpop.f32.mrf.mxu0  ;;  %v3619_v20 = vpop.f32.mrf.mxu1  ;;  %v3808_v14 = vadd.f32 %v7867_v6, %v3165_v41 }
 0x9e2   :  { %v3555_v48 = vadd.f32 %v3554_v29, %v8894_v56  ;;  %v8896_v29 = vld [vmem:[#allocation91_spill] sm:$0xff]  ;;  %v8897_v56 = vld [vmem:[#allocation92_spill] sm:$0xff] }
 0x9e3   :  { %v3038_v61 = vadd.f32 %v8897_v56, %v8896_v29  ;;  %v8899_v56 = vld [vmem:[#allocation132_spill] sm:$0xff] }
 0x9e4   :  { %v3620_v63 = vadd.f32 %v3619_v20, %v3555_v48  ;;  %v3684_v10 = vpop.f32.mrf.mxu3  ;;  %3957 = vmatmul.f32.vlgmr.msrb.gmra.mxu1 %v3772_v51  ;;  %v7888_v20 = vadd.f32 %v7872_v1, %v3165_v41  ;;  %v8898_v51 = vld [vmem:[#allocation93_spill] sm:$0xff] }
 0x9e5   :  { %v3103_v49 = vadd.f32 %v8898_v51, %v3038_v61  ;;  %v8900_v61 = vld [vmem:[#allocation75_spill] sm:$0xff]  ;;  %v8901_v51 = vld [vmem:[#allocation94_spill] sm:$0xff] }
 0x9e6   :  { %v3685_v42 = vadd.f32 %v3684_v10, %v3620_v63  ;;  %v3773_v10 = vmul.f32 %v7504_v40, %v7500_v59  ;;  %v3041_v21 = vadd.f32 %v8901_v51, %v8900_v61 }
 0x9e7   :  { %v3168_v8 = vadd.f32 %v8899_v56, %v3103_v49  ;;  %v4519_v49 = vld [vmem:[%s8392_s10 + $0x18] sm:$0x1f] }
 0x9e8   :  { %v3828_v48 = vadd.f32 %v7877_v55, %v3685_v42  ;;  %v7892_v32 = vadd.f32 %v7882_v23, %v3685_v42  ;;  %4755 = vmatpush.msk.msra.mxu0 %vm4361_vm0, %v4519_v49 }
 0x9e9   :  { %v3557_v45 = vpop.f32.mrf.mxu0  ;;  %v3622_v29 = vpop.f32.mrf.mxu1  ;;  %v3809_v62 = vadd.f32 %v7867_v6, %v3168_v8 }
 0x9ea   :  { %v3844_v63 = vmul.f32 %v3828_v48, %v3808_v14  ;;  %v3558_v41 = vadd.f32 %v3557_v45, %v7495_v4  ;;  %v7909_v4 = vadd.f32 %v7872_v1, %v3168_v8  ;;  %v8902_v48 = vld [vmem:[#allocation95_spill] sm:$0xff]  ;;  %v3774_v8 = vmul.f32 %v7529_v27, %v7525_v60 }
 0x9ec   :  { %v3623_v25 = vadd.f32 %v3622_v29, %v3558_v41  ;;  %v3687_v9 = vpop.f32.mrf.mxu3  ;;  %3892 = vmatmul.f32.vlgmr.msrb.gmra.mxu0 %v3844_v63  ;;  %3960 = vmatmul.f32.gmra.mxu1 %v3773_v10  ;;  %v3106_v29 = vadd.f32 %v8902_v48, %v3041_v21  ;;  %v8903_v10 = vld [vmem:[#allocation133_spill] sm:$0xff]  ;;  %v8904_v21 = vld [vmem:[#allocation76_spill] sm:$0xff] }
 0x9ed   :  { %v8905_v48 = vld [vmem:[#allocation96_spill] sm:$0xff] }
 0x9ee   :  { %v3688_v3 = vadd.f32 %v3687_v9, %v3623_v25  ;;  %v3171_v56 = vadd.f32 %v8903_v10, %v3106_v29  ;;  %v3044_v42 = vadd.f32 %v8905_v48, %v8904_v21  ;;  %v3775_v10 = vmul.f32 %v7554_v12, %v7550_v28 }
 0x9f0   :  { %v3829_v45 = vadd.f32 %v7877_v55, %v3688_v3  ;;  %v7913_v14 = vadd.f32 %v7882_v23, %v3688_v3  ;;  %v3810_v49 = vadd.f32 %v7867_v6, %v3171_v56  ;;  %v8909_v3 = vld [vmem:[#allocation98_spill] sm:$0xff] }
 0x9f1   :  { %v3560_v63 = vpop.f32.mrf.mxu0  ;;  %v3625_v41 = vpop.f32.mrf.mxu1 }
 0x9f2   :  { %v3561_v9 = vadd.f32 %v3560_v63, %v7520_v34  ;;  %v3845_v25 = vmul.f32 %v3829_v45, %v3809_v62  ;;  %v7930_v34 = vadd.f32 %v7872_v1, %v3171_v56  ;;  %v8906_v63 = vld [vmem:[#allocation97_spill] sm:$0xff]  ;;  %v8907_v56 = vld [vmem:[#allocation134_spill] sm:$0xff] }
 0x9f3   :  { %v3109_v29 = vadd.f32 %v8906_v63, %v3044_v42 }
 0x9f4   :  { %v3626_v61 = vadd.f32 %v3625_v41, %v3561_v9  ;;  %v3690_v51 = vpop.f32.mrf.mxu3  ;;  %3895 = vmatmul.f32.gmra.mxu0 %v3845_v25  ;;  %3963 = vmatmul.f32.gmra.mxu1 %v3774_v8 }
 0x9f6   :  { %v3691_v40 = vadd.f32 %v3690_v51, %v3626_v61  ;;  %v3174_v51 = vadd.f32 %v8907_v56, %v3109_v29  ;;  %v8913_v61 = vld [vmem:[#allocation100_spill] sm:$0xff]  ;;  %v8917_v56 = vld [vmem:[#allocation102_spill] sm:$0xff] }
 0x9f8   :  { %v3830_v62 = vadd.f32 %v7877_v55, %v3691_v40  ;;  %v7934_v45 = vadd.f32 %v7882_v23, %v3691_v40  ;;  %v8908_v40 = vld [vmem:[#allocation77_spill] sm:$0xff]  ;;  %v3811_v27 = vadd.f32 %v7867_v6, %v3174_v51 }
 0x9f9   :  { %v3563_v41 = vpop.f32.mrf.mxu0  ;;  %v3628_v9 = vpop.f32.mrf.mxu1  ;;  %v3047_v42 = vadd.f32 %v8909_v3, %v8908_v40  ;;  %v3776_v3 = vmul.f32 %v7579_v54, %v7575_v24 }
 0x9fa   :  { %v3564_v25 = vadd.f32 %v3563_v41, %v7545_v39  ;;  %v3846_v8 = vmul.f32 %v3830_v62, %v3810_v49  ;;  %v7947_v39 = vadd.f32 %v7872_v1, %v3174_v51  ;;  %v8910_v41 = vld [vmem:[#allocation99_spill] sm:$0xff] }
 0x9fb   :  { %v3112_v29 = vadd.f32 %v8910_v41, %v3047_v42  ;;  %v8911_v51 = vld [vmem:[#allocation135_spill] sm:$0xff] }
 0x9fc   :  { %v3629_v21 = vadd.f32 %v3628_v9, %v3564_v25  ;;  %v3693_v48 = vpop.f32.mrf.mxu3  ;;  %3898 = vmatmul.f32.gmra.mxu0 %v3846_v8  ;;  %3966 = vmatmul.f32.gmra.mxu1 %v3775_v10 }
 0x9fe   :  { %v3694_v63 = vadd.f32 %v3693_v48, %v3629_v21  ;;  %v3177_v21 = vadd.f32 %v8911_v51, %v3112_v29  ;;  %v8921_v51 = vld [vmem:[#allocation105_spill] sm:$0xff] }
 0xa00   :  { %v3831_v49 = vadd.f32 %v7877_v55, %v3694_v63  ;;  %v7951_v62 = vadd.f32 %v7882_v23, %v3694_v63  ;;  %v8912_v63 = vld [vmem:[#allocation78_spill] sm:$0xff]  ;;  %v3812_v12 = vadd.f32 %v7867_v6, %v3177_v21 }
 0xa01   :  { %v3566_v9 = vpop.f32.mrf.mxu0  ;;  %v3631_v25 = vpop.f32.mrf.mxu1  ;;  %v3050_v42 = vadd.f32 %v8913_v61, %v8912_v63  ;;  %v3777_v61 = vmul.f32 %v7604_v37, %v7600_v52 }
 0xa02   :  { %v3567_v8 = vadd.f32 %v3566_v9, %v7570_v16  ;;  %v3847_v10 = vmul.f32 %v3831_v49, %v3811_v27  ;;  %v7964_v27 = vadd.f32 %v7872_v1, %v3177_v21  ;;  %v8914_v9 = vld [vmem:[#allocation101_spill] sm:$0xff]  ;;  %v8915_v21 = vld [vmem:[#allocation136_spill] sm:$0xff] }
 0xa03   :  { %v3115_v29 = vadd.f32 %v8914_v9, %v3050_v42 }
 0xa04   :  { %v3632_v48 = vadd.f32 %v3631_v25, %v3567_v8  ;;  %v3696_v40 = vpop.f32.mrf.mxu3  ;;  %3901 = vmatmul.f32.gmra.mxu0 %v3847_v10  ;;  %3969 = vmatmul.f32.gmra.mxu1 %v3776_v3 }
 0xa06   :  { %v3697_v41 = vadd.f32 %v3696_v40, %v3632_v48  ;;  %v3180_v48 = vadd.f32 %v8915_v21, %v3115_v29  ;;  %v8925_v21 = vld [vmem:[#allocation108_spill] sm:$0xff] }
 0xa08   :  { %v3832_v16 = vadd.f32 %v7877_v55, %v3697_v41  ;;  %v7968_v49 = vadd.f32 %v7882_v23, %v3697_v41  ;;  %v8916_v41 = vld [vmem:[#allocation79_spill] sm:$0xff]  ;;  %v3813_v54 = vadd.f32 %v7867_v6, %v3180_v48 }
 0xa09   :  { %v3569_v25 = vpop.f32.mrf.mxu0  ;;  %v3634_v8 = vpop.f32.mrf.mxu1  ;;  %v3053_v42 = vadd.f32 %v8917_v56, %v8916_v41  ;;  %v3778_v56 = vmul.f32 %v7629_v33, %v7625_v53 }
 0xa0a   :  { %v3570_v10 = vadd.f32 %v3569_v25, %v7595_v17  ;;  %v3848_v3 = vmul.f32 %v3832_v16, %v3812_v12  ;;  %v7981_v12 = vadd.f32 %v7872_v1, %v3180_v48  ;;  %v8918_v25 = vld [vmem:[#allocation103_spill] sm:$0xff]  ;;  %v8919_v48 = vld [vmem:[#allocation137_spill] sm:$0xff] }
 0xa0b   :  { %v3118_v29 = vadd.f32 %v8918_v25, %v3053_v42 }
 0xa0c   :  { %v3635_v40 = vadd.f32 %v3634_v8, %v3570_v10  ;;  %v3699_v63 = vpop.f32.mrf.mxu3  ;;  %3904 = vmatmul.f32.gmra.mxu0 %v3848_v3  ;;  %3972 = vmatmul.f32.gmra.mxu1 %v3777_v61 }
 0xa0e   :  { %v3700_v9 = vadd.f32 %v3699_v63, %v3635_v40  ;;  %v3183_v40 = vadd.f32 %v8919_v48, %v3118_v29  ;;  %v8929_v48 = vld [vmem:[#allocation111_spill] sm:$0xff] }
 0xa10   :  { %v3833_v17 = vadd.f32 %v7877_v55, %v3700_v9  ;;  %v7985_v16 = vadd.f32 %v7882_v23, %v3700_v9  ;;  %v8920_v9 = vld [vmem:[#allocation104_spill] sm:$0xff]  ;;  %v3814_v37 = vadd.f32 %v7867_v6, %v3183_v40 }
 0xa11   :  { %v3572_v8 = vpop.f32.mrf.mxu0  ;;  %v3637_v10 = vpop.f32.mrf.mxu1  ;;  %v3056_v42 = vadd.f32 %v8921_v51, %v8920_v9  ;;  %v3779_v51 = vmul.f32 %v7654_v38, %v7650_v58 }
 0xa12   :  { %v3573_v3 = vadd.f32 %v3572_v8, %v7620_v36  ;;  %v3849_v61 = vmul.f32 %v3833_v17, %v3813_v54  ;;  %v7998_v54 = vadd.f32 %v7872_v1, %v3183_v40  ;;  %v8922_v8 = vld [vmem:[#allocation106_spill] sm:$0xff]  ;;  %v8923_v40 = vld [vmem:[#allocation9_spill] sm:$0xff] }
 0xa13   :  { %v3121_v29 = vadd.f32 %v8922_v8, %v3056_v42 }
 0xa14   :  { %v3638_v63 = vadd.f32 %v3637_v10, %v3573_v3  ;;  %v3702_v41 = vpop.f32.mrf.mxu3  ;;  %3907 = vmatmul.f32.gmra.mxu0 %v3849_v61  ;;  %3975 = vmatmul.f32.gmra.mxu1 %v3778_v56 }
 0xa16   :  { %v3703_v25 = vadd.f32 %v3702_v41, %v3638_v63  ;;  %v3186_v63 = vadd.f32 %v8923_v40, %v3121_v29  ;;  %v8932_v40 = vld [vmem:[#allocation113_spill] sm:$0xff] }
 0xa18   :  { %v3834_v36 = vadd.f32 %v7877_v55, %v3703_v25  ;;  %v8002_v17 = vadd.f32 %v7882_v23, %v3703_v25  ;;  %v8924_v25 = vld [vmem:[#allocation107_spill] sm:$0xff]  ;;  %v3815_v33 = vadd.f32 %v7867_v6, %v3186_v63 }
 0xa19   :  { %v3575_v10 = vpop.f32.mrf.mxu0  ;;  %v3640_v3 = vpop.f32.mrf.mxu1  ;;  %v3059_v42 = vadd.f32 %v8925_v21, %v8924_v25  ;;  %v3780_v21 = vmul.f32 %v7679_v7, %v7675_v2 }
 0xa1a   :  { %v3576_v61 = vadd.f32 %v3575_v10, %v7645_v11  ;;  %v3850_v56 = vmul.f32 %v3834_v36, %v3814_v37  ;;  %v8015_v37 = vadd.f32 %v7872_v1, %v3186_v63  ;;  %v8926_v10 = vld [vmem:[#allocation109_spill] sm:$0xff]  ;;  %v8927_v63 = vld [vmem:[#allocation56_spill] sm:$0xff] }
 0xa1b   :  { %v3124_v29 = vadd.f32 %v8926_v10, %v3059_v42 }
 0xa1c   :  { %v3641_v41 = vadd.f32 %v3640_v3, %v3576_v61  ;;  %v3705_v9 = vpop.f32.mrf.mxu3  ;;  %3910 = vmatmul.f32.gmra.mxu0 %v3850_v56  ;;  %3978 = vmatmul.f32.gmra.mxu1 %v3779_v51 }
 0xa1e   :  { %v3706_v8 = vadd.f32 %v3705_v9, %v3641_v41  ;;  %v3189_v41 = vadd.f32 %v8927_v63, %v3124_v29  ;;  %v4310_v29 = vld [vmem:[%s8392_s10] sm:$0xff]  ;;  %v3781_v63 = vmul.f32 %v7704_v31, %v7700_v35 }
 0xa1f   :  { %4380 = vmatpush.msrb.mxu3 %v4310_v29 }
 0xa20   :  { %v3835_v11 = vadd.f32 %v7877_v55, %v3706_v8  ;;  %v8019_v36 = vadd.f32 %v7882_v23, %v3706_v8  ;;  %v8928_v8 = vld [vmem:[#allocation110_spill] sm:$0xff]  ;;  %v3816_v38 = vadd.f32 %v7867_v6, %v3189_v41 }
 0xa21   :  { %v3578_v3 = vpop.f32.mrf.mxu0  ;;  %v3643_v61 = vpop.f32.mrf.mxu1  ;;  %v3062_v42 = vadd.f32 %v8929_v48, %v8928_v8 }
 0xa22   :  { %v3579_v56 = vadd.f32 %v3578_v3, %v7670_v26  ;;  %v3851_v51 = vmul.f32 %v3835_v11, %v3815_v33  ;;  %v8032_v33 = vadd.f32 %v7872_v1, %v3189_v41  ;;  %v8930_v3 = vld [vmem:[#allocation112_spill] sm:$0xff] }
 0xa23   :  { %v8936_v41 = vld [vmem:[#allocation116_spill] sm:$0xff] }
 0xa24   :  { %v3644_v9 = vadd.f32 %v3643_v61, %v3579_v56  ;;  %v3708_v25 = vpop.f32.mrf.mxu3  ;;  %3913 = vmatmul.f32.gmra.mxu0 %v3851_v51  ;;  %3981 = vmatmul.f32.gmra.mxu1 %v3780_v21  ;;  %v3127_v61 = vadd.f32 %v8930_v3, %v3062_v42  ;;  %v8933_v42 = vld [vmem:[#allocation114_spill] sm:$0xff] }
 0xa25   :  { %v3065_v3 = vadd.f32 %v8933_v42, %v8932_v40 }
 0xa26   :  { %v3709_v10 = vadd.f32 %v3708_v25, %v3644_v9  ;;  %v8931_v9 = vld [vmem:[#allocation10_spill] sm:$0xff] }
 0xa27   :  { %v3192_v25 = vadd.f32 %v8931_v9, %v3127_v61  ;;  %v4518_v61 = vld [vmem:[%s8392_s10 + $0x8] sm:$0xff]  ;;  %v3782_v9 = vmul.f32 %v7729_v22, %v7725_v46 }
 0xa28   :  { %v3836_v26 = vadd.f32 %v7877_v55, %v3709_v10  ;;  %v8036_v11 = vadd.f32 %v7882_v23, %v3709_v10  ;;  %4538 = vmatpush.msra.mxu0 %v4518_v61 }
 0xa29   :  { %v3581_v56 = vpop.f32.mrf.mxu0  ;;  %v3646_v51 = vpop.f32.mrf.mxu1  ;;  %v3817_v29 = vadd.f32 %v7867_v6, %v3192_v25 }
 0xa2a   :  { %v3582_v48 = vadd.f32 %v3581_v56, %v7695_v0  ;;  %v3852_v21 = vmul.f32 %v3836_v26, %v3816_v38  ;;  %v8052_v38 = vadd.f32 %v7872_v1, %v3192_v25  ;;  %v8934_v56 = vld [vmem:[#allocation115_spill] sm:$0xff] }
 0xa2c   :  { %v3647_v8 = vadd.f32 %v3646_v51, %v3582_v48  ;;  %v3711_v10 = vpop.f32.mrf.mxu3  ;;  %3916 = vmatmul.f32.gmra.mxu0 %v3852_v21  ;;  %3984 = vmatmul.f32.gmra.mxu1 %v3781_v63  ;;  %v3130_v51 = vadd.f32 %v8934_v56, %v3065_v3  ;;  %v8937_v3 = vld [vmem:[#allocation117_spill] sm:$0xff] }
 0xa2d   :  { %v3068_v56 = vadd.f32 %v8937_v3, %v8936_v41  ;;  %v8940_v3 = vld [vmem:[#allocation119_spill] sm:$0xff] }
 0xa2e   :  { %v3712_v7 = vadd.f32 %v3711_v10, %v3647_v8 }
 0xa30   :  { %v3837_v0 = vadd.f32 %v7877_v55, %v3712_v7  ;;  %v8056_v26 = vadd.f32 %v7882_v23, %v3712_v7  ;;  %v8935_v7 = vld [vmem:[#allocation61_spill] sm:$0xff] }
 0xa31   :  { %v3584_v48 = vpop.f32.mrf.mxu0  ;;  %v3649_v21 = vpop.f32.mrf.mxu1  ;;  %v3195_v8 = vadd.f32 %v8935_v7, %v3130_v51  ;;  %v8939_v7 = vld [vmem:[#allocation138_spill] sm:$0xff] }
 0xa32   :  { %v3585_v40 = vadd.f32 %v3584_v48, %v7720_v19  ;;  %v3853_v63 = vmul.f32 %v3837_v0, %v3817_v29 }
 0xa33   :  { %v3818_v61 = vadd.f32 %v7867_v6, %v3195_v8  ;;  %v8072_v19 = vadd.f32 %v7872_v1, %v3195_v8 }
 0xa34   :  { %v3650_v10 = vadd.f32 %v3649_v21, %v3585_v40  ;;  %v3714_v42 = vpop.f32.mrf.mxu3  ;;  %3919 = vmatmul.f32.gmra.mxu0 %v3853_v63  ;;  %3987 = vmatmul.f32.gmra.mxu1 %v3782_v9  ;;  %v8938_v21 = vld [vmem:[#allocation118_spill] sm:$0xff] }
 0xa35   :  { %v3133_v40 = vadd.f32 %v8938_v21, %v3068_v56 }
 0xa36   :  { %v3715_v31 = vadd.f32 %v3714_v42, %v3650_v10 }
 0xa37   :  { %v3198_v10 = vadd.f32 %v8939_v7, %v3133_v40 }
 0xa38   :  { %v3838_v29 = vadd.f32 %v7877_v55, %v3715_v31  ;;  %v8076_v0 = vadd.f32 %v7882_v23, %v3715_v31  ;;  %v8941_v31 = vld [vmem:[#allocation120_spill] sm:$0xff] }
 0xa39   :  { %v3587_v48 = vpop.f32.mrf.mxu0  ;;  %v3652_v51 = vpop.f32.mrf.mxu1  ;;  %v3071_v25 = vadd.f32 %v8941_v31, %v8940_v3  ;;  %v3819_v46 = vadd.f32 %v7867_v6, %v3198_v10  ;;  %v8088_v56 = vadd.f32 %v7872_v1, %v3198_v10 }
 0xa3a   :  { %v3588_v63 = vadd.f32 %v3587_v48, %v7745_v50  ;;  %v3854_v9 = vmul.f32 %v3838_v29, %v3818_v61 }
 0xa3c   :  { %v3653_v42 = vadd.f32 %v3652_v51, %v3588_v63  ;;  %v3717_v8 = vpop.f32.mrf.mxu3  ;;  %3922 = vmatmul.f32.gmra.mxu0 %v3854_v9  ;;  %3990 = vmatmul.f32.gmra.mxu1 %v7764_v13  ;;  %v8942_v51 = vld [vmem:[#allocation121_spill] sm:$0xff]  ;;  %v8943_v9 = vld [vmem:[#allocation139_spill] sm:$0xff] }
 0xa3d   :  { %v3136_v21 = vadd.f32 %v8942_v51, %v3071_v25 }
 0xa3e   :  { %v3718_v22 = vadd.f32 %v3717_v8, %v3653_v42  ;;  %v8944_v8 = vld [vmem:[#allocation122_spill] sm:$0xff] }
 0xa3f   :  { %v3201_v7 = vadd.f32 %v8943_v9, %v3136_v21 }
 0xa40   :  { %v3839_v50 = vadd.f32 %v7877_v55, %v3718_v22  ;;  %v8092_v61 = vadd.f32 %v7882_v23, %v3718_v22  ;;  %v8945_v22 = vld [vmem:[#allocation123_spill] sm:$0xff] }
 0xa41   :  { %v3590_v29 = vpop.f32.mrf.mxu0  ;;  %v3655_v48 = vpop.f32.mrf.mxu1  ;;  %v3074_v3 = vadd.f32 %v8945_v22, %v8944_v8  ;;  %v3820_v41 = vadd.f32 %v7867_v6, %v3201_v7  ;;  %v8104_v25 = vadd.f32 %v7872_v1, %v3201_v7  ;;  %v8949_v8 = vld [vmem:[#allocation126_spill] sm:$0xff] }
 0xa42   :  { %v3591_v13 = vadd.f32 %v3590_v29, %v7777_v47  ;;  %v3855_v40 = vmul.f32 %v3839_v50, %v3819_v46 }
 0xa44   :  { %v3656_v42 = vadd.f32 %v3655_v48, %v3591_v13  ;;  %v3720_v10 = vpop.f32.mrf.mxu3  ;;  %3925 = vmatmul.f32.gmra.mxu0 %v3855_v40  ;;  %3993 = vmatmul.f32.gmra.mxu1 %v7790_v15  ;;  %v8946_v48 = vld [vmem:[#allocation124_spill] sm:$0xff] }
 0xa45   :  { %v3139_v51 = vadd.f32 %v8946_v48, %v3074_v3  ;;  %v8947_v40 = vld [vmem:[#allocation12_spill] sm:$0xff] }
 0xa46   :  { %v3721_v31 = vadd.f32 %v3720_v10, %v3656_v42  ;;  %v8948_v10 = vld [vmem:[#allocation125_spill] sm:$0xff] }
 0xa47   :  { %v3204_v9 = vadd.f32 %v8947_v40, %v3139_v51  ;;  %v3077_v22 = vadd.f32 %v8949_v8, %v8948_v10  ;;  %v8953_v10 = vld [vmem:[#allocation129_spill] sm:$0xff] }
 0xa48   :  { %v3840_v46 = vadd.f32 %v7877_v55, %v3721_v31  ;;  %v8108_v47 = vadd.f32 %v7882_v23, %v3721_v31 }
 0xa49   :  { %v3593_v50 = vpop.f32.mrf.mxu0  ;;  %v3658_v29 = vpop.f32.mrf.mxu1  ;;  %v3821_v63 = vadd.f32 %v7867_v6, %v3204_v9  ;;  %v8120_v3 = vadd.f32 %v7872_v1, %v3204_v9 }
 0xa4a   :  { %v3594_v15 = vadd.f32 %v3593_v50, %v7801_v44  ;;  %v3856_v21 = vmul.f32 %v3840_v46, %v3820_v41 }
 0xa4c   :  { %v3659_v42 = vadd.f32 %v3658_v29, %v3594_v15  ;;  %v3723_v7 = vpop.f32.mrf.mxu3  ;;  %3928 = vmatmul.f32.gmra.mxu0 %v3856_v21  ;;  %3996 = vmatmul.f32.gmra.mxu1 %v7813_v5  ;;  %v8950_v29 = vld [vmem:[#allocation127_spill] sm:$0xff]  ;;  %v8951_v21 = vld [vmem:[#allocation140_spill] sm:$0xff] }
 0xa4d   :  { %v3142_v48 = vadd.f32 %v8950_v29, %v3077_v22 }
 0xa4e   :  { %v3724_v31 = vadd.f32 %v3723_v7, %v3659_v42  ;;  %v8952_v7 = vld [vmem:[#allocation128_spill] sm:$0xff] }
 0xa4f   :  { %v3207_v40 = vadd.f32 %v8951_v21, %v3142_v48  ;;  %v3080_v8 = vadd.f32 %v8953_v10, %v8952_v7 }
 0xa50   :  { %v3841_v44 = vadd.f32 %v7877_v55, %v3724_v31  ;;  %v8124_v41 = vadd.f32 %v7882_v23, %v3724_v31 }
 0xa51   :  { %v3596_v46 = vpop.f32.mrf.mxu0  ;;  %v3661_v50 = vpop.f32.mrf.mxu1  ;;  %v3822_v13 = vadd.f32 %v7867_v6, %v3207_v40  ;;  %v8136_v22 = vadd.f32 %v7872_v1, %v3207_v40 }
 0xa52   :  { %v3597_v5 = vadd.f32 %v3596_v46, %v7820_v18  ;;  %v3857_v51 = vmul.f32 %v3841_v44, %v3821_v63  ;;  %v4601_v15 = vsub.f32 %v8120_v3, %v8124_v41  ;;  %v9002_v41 = vld [vmem:[#allocation37_spill] sm:$0xff] }
 0xa54   :  { %v3662_v42 = vadd.f32 %v3661_v50, %v3597_v5  ;;  %v3726_v9 = vpop.f32.mrf.mxu3  ;;  %3931 = vmatmul.f32.gmra.mxu0 %v3857_v51  ;;  %3999 = vmatmul.f32.gmra.mxu1 %v7833_v43  ;;  %v8954_v50 = vld [vmem:[#allocation130_spill] sm:$0xff] }
 0xa55   :  { %v3145_v29 = vadd.f32 %v8954_v50, %v3080_v8  ;;  %v8955_v51 = vld [vmem:[#allocation142_spill] sm:$0xff] }
 0xa56   :  { %v3727_v31 = vadd.f32 %v3726_v9, %v3662_v42 }
 0xa57   :  { %v3210_v21 = vadd.f32 %v8955_v51, %v3145_v29 }
 0xa58   :  { %v3842_v18 = vadd.f32 %v7877_v55, %v3727_v31  ;;  %v8140_v63 = vadd.f32 %v7882_v23, %v3727_v31 }
 0xa59   :  { %v3599_v44 = vpop.f32.mrf.mxu0  ;;  %v3664_v46 = vpop.f32.mrf.mxu1  ;;  %v3823_v7 = vadd.f32 %v7867_v6, %v3210_v21  ;;  %v8150_v10 = vadd.f32 %v7872_v1, %v3210_v21 }
 0xa5a   :  { %v3600_v43 = vadd.f32 %v3599_v44, %v7840_v30  ;;  %v3858_v48 = vmul.f32 %v3842_v18, %v3822_v13  ;;  %v4602_v5 = vsub.f32 %v8136_v22, %v8140_v63  ;;  %v9006_v63 = vld [vmem:[#allocation21_spill] sm:$0xff] }
 0xa5c   :  { %v3665_v42 = vadd.f32 %v3664_v46, %v3600_v43  ;;  %v3729_v40 = vpop.f32.mrf.mxu3  ;;  %3934 = vmatmul.f32.gmra.mxu0 %v3858_v48  ;;  %4002 = vmatmul.f32.gmra.mxu1 %v7855_v57 }
 0xa5e   :  { %v3730_v9 = vadd.f32 %v3729_v40, %v3665_v42 }
 0xa60   :  { %v3843_v8 = vadd.f32 %v7877_v55, %v3730_v9  ;;  %v8154_v30 = vadd.f32 %v7882_v23, %v3730_v9 }
 0xa61   :  { %v3958_v13 = vpop.f32.mrf.mxu1 }
 0xa62   :  { %v3859_v31 = vmul.f32 %v3843_v8, %v3823_v7 }
 0xa64   :  { %3937 = vmatmul.f32.gmra.mxu0 %v3859_v31 }
 0xa69   :  { %v3893_v44 = vpop.f32.mrf.mxu0  ;;  %v3961_v46 = vpop.f32.mrf.mxu1 }
 0xa6a   :  { %v3959_v57 = vadd.f32 %v3958_v13, %v3893_v44 }
 0xa6c   :  { %v4722_v50 = vmul.f32 -1.442695, %v3959_v57 }
 0xa6e   :  { %5231 = vpow2.f32 %v4722_v50 }
 0xa71   :  { %v3896_v6 = vpop.f32.mrf.mxu0  ;;  %v3964_v29 = vpop.f32.mrf.mxu1 }
 0xa72   :  { %v3962_v1 = vadd.f32 %v3961_v46, %v3896_v6 }
 0xa74   :  { %v5232_v43 = vpop.eup %5231  ;;  %v4723_v48 = vmul.f32 -1.442695, %v3962_v1 }
 0xa75   :  { %v4054_v55 = vadd.f32 1.0, %v5232_v43 }
 0xa76   :  { %5233 = vpow2.f32 %v4723_v48 }
 0xa77   :  { %5235 = vrcp.f32 %v4054_v55  ;;  %v4081_v57 = vand.u32 2147483648, %v4054_v55  ;;  %v4079_v6 = vand.u32 2147483647, %v4054_v55  ;;  %vm4075_vm9 = vweird.f32 %v4054_v55 }
 0xa79   :  { %v3899_v23 = vpop.f32.mrf.mxu0  ;;  %v3967_v51 = vpop.f32.mrf.mxu1  ;;  %vm4080_vm12 = vcmp.eq.f32.partialorder %v4079_v6, 8.507059e+37 }
 0xa7a   :  { %v3965_v21 = vadd.f32 %v3964_v29, %v3899_v23 }
 0xa7c   :  { %v5234_v42 = vpop.eup %5233  ;;  %v4724_v40 = vmul.f32 -1.442695, %v3965_v21  ;;  %v4082_v21 = vor.u32 1.1754944e-38, %v4081_v57 }
 0xa7d   :  { %v5236_v9 = vpop.eup %5235  ;;  %v4055_v7 = vadd.f32 1.0, %v5234_v42 }
 0xa7e   :  { %v4071_v8 = vmul.f32 %v5236_v9, %v4054_v55  ;;  %5237 = vpow2.f32 %v4724_v40  ;;  %vm4076_vm8 = vweird.f32 %v5236_v9 }
 0xa7f   :  { %5239 = vrcp.f32 %v4055_v7  ;;  %vm4077_vm10 = vmor %vm4075_vm9, %vm4076_vm8  ;;  %vm4090_vm14 = vweird.f32 %v4055_v7 }
 0xa80   :  { %v4072_v13 = vsub.f32 1.0, %v4071_v8 }
 0xa81   :  { %v3902_v31 = vpop.f32.mrf.mxu0  ;;  %v3970_v44 = vpop.f32.mrf.mxu1 }
 0xa82   :  { %v3968_v46 = vadd.f32 %v3967_v51, %v3902_v31  ;;  %v4073_v50 = vmul.f32 %v5236_v9, %v4072_v13 }
 0xa84   :  { %v5238_v1 = vpop.eup %5237  ;;  %v4725_v43 = vmul.f32 -1.442695, %v3968_v46  ;;  %v4074_v48 = vadd.f32 %v5236_v9, %v4073_v50  ;;  %v4096_v46 = vand.u32 2147483648, %v4055_v7 }
 0xa85   :  { %v5240_v29 = vpop.eup %5239  ;;  %v4056_v23 = vadd.f32 1.0, %v5238_v1  ;;  %v4094_v1 = vand.u32 2147483647, %v4055_v7 }
 0xa86   :  { %5241 = vpow2.f32 %v4725_v43  ;;  %v4078_v42 = vsel %vm4077_vm10, %v5236_v9, %v4074_v48  ;;  %v4086_v40 = vmul.f32 %v5240_v29, %v4055_v7  ;;  %vm4091_vm13 = vweird.f32 %v5240_v29 }
 0xa87   :  { %5243 = vrcp.f32 %v4056_v23  ;;  %v4083_v8 = vsel %vm4080_vm12, %v4082_v21, %v4078_v42  ;;  %vm4092_vm15 = vmor %vm4090_vm14, %vm4091_vm13  ;;  %v4097_v48 = vor.u32 1.1754944e-38, %v4096_v46  ;;  %vm4095_vm1 = vcmp.eq.f32.partialorder %v4094_v1, 8.507059e+37 }
 0xa88   :  { %4739 = vmatmul.msk.f32.vlgmr.msrb.gmra.mxu3 %vm4312_vm11, %v4083_v8  ;;  %4756 = vmatmul.msk.f32.vlgmr.msra.gmra.mxu0 %vm4312_vm11, %v4083_v8  ;;  %v4087_v51 = vsub.f32 1.0, %v4086_v40  ;;  %vm4105_vm3 = vweird.f32 %v4056_v23 }
 0xa89   :  { %v3905_v13 = vpop.f32.mrf.mxu0  ;;  %v3973_v31 = vpop.f32.mrf.mxu1 }
 0xa8a   :  { %v3971_v55 = vadd.f32 %v3970_v44, %v3905_v13  ;;  %v4088_v50 = vmul.f32 %v5240_v29, %v4087_v51  ;;  %v4111_v13 = vand.u32 2147483648, %v4056_v23 }
 0xa8c   :  { %v5242_v57 = vpop.eup %5241  ;;  %v4726_v18 = vmul.f32 -1.442695, %v3971_v55  ;;  %v4089_v43 = vadd.f32 %v5240_v29, %v4088_v50  ;;  %v4109_v50 = vand.u32 2147483647, %v4056_v23 }
 0xa8d   :  { %v5244_v9 = vpop.eup %5243  ;;  %v4057_v6 = vadd.f32 1.0, %v5242_v57 }
 0xa8e   :  { %5245 = vpow2.f32 %v4726_v18  ;;  %v4093_v21 = vsel %vm4092_vm15, %v5240_v29, %v4089_v43  ;;  %v4101_v42 = vmul.f32 %v5244_v9, %v4056_v23  ;;  %vm4106_vm2 = vweird.f32 %v5244_v9 }
 0xa8f   :  { %5247 = vrcp.f32 %v4057_v6  ;;  %v4098_v40 = vsel %vm4095_vm1, %v4097_v48, %v4093_v21  ;;  %vm4107_vm4 = vmor %vm4105_vm3, %vm4106_vm2  ;;  %v4112_v43 = vor.u32 1.1754944e-38, %v4111_v13  ;;  %vm4110_vm5 = vcmp.eq.f32.partialorder %v4109_v50, 8.507059e+37 }
 0xa90   :  { %4740 = vmatmul.msk.f32.gmra.mxu3 %vm4312_vm11, %v4098_v40  ;;  %4757 = vmatmul.msk.f32.gmra.mxu0 %vm4312_vm11, %v4098_v40  ;;  %v4102_v44 = vsub.f32 1.0, %v4101_v42  ;;  %vm4120_vm7 = vweird.f32 %v4057_v6 }
 0xa91   :  { %v3908_v8 = vpop.f32.mrf.mxu0  ;;  %v3976_v51 = vpop.f32.mrf.mxu1 }
 0xa92   :  { %v3974_v55 = vadd.f32 %v3973_v31, %v3908_v8  ;;  %v4103_v7 = vmul.f32 %v5244_v9, %v4102_v44  ;;  %v4126_v8 = vand.u32 2147483648, %v4057_v6 }
 0xa94   :  { %v5246_v57 = vpop.eup %5245  ;;  %v4727_v46 = vmul.f32 -1.442695, %v3974_v55  ;;  %v4104_v18 = vadd.f32 %v5244_v9, %v4103_v7  ;;  %v4124_v7 = vand.u32 2147483647, %v4057_v6 }
 0xa95   :  { %v5248_v29 = vpop.eup %5247  ;;  %v4058_v1 = vadd.f32 1.0, %v5246_v57 }
 0xa96   :  { %5249 = vpow2.f32 %v4727_v46  ;;  %v4108_v48 = vsel %vm4107_vm4, %v5244_v9, %v4104_v18  ;;  %v4116_v21 = vmul.f32 %v5248_v29, %v4057_v6  ;;  %vm4121_vm6 = vweird.f32 %v5248_v29 }
 0xa97   :  { %5251 = vrcp.f32 %v4058_v1  ;;  %v4113_v42 = vsel %vm4110_vm5, %v4112_v43, %v4108_v48  ;;  %vm4122_vm0 = vmor %vm4120_vm7, %vm4121_vm6  ;;  %v4127_v18 = vor.u32 1.1754944e-38, %v4126_v8  ;;  %vm4125_vm8 = vcmp.eq.f32.partialorder %v4124_v7, 8.507059e+37 }
 0xa98   :  { %4741 = vmatmul.msk.f32.gmra.mxu3 %vm4312_vm11, %v4113_v42  ;;  %4758 = vmatmul.msk.f32.gmra.mxu0 %vm4312_vm11, %v4113_v42  ;;  %v4117_v31 = vsub.f32 1.0, %v4116_v21  ;;  %vm4135_vm10 = vweird.f32 %v4058_v1 }
 0xa99   :  { %v3911_v40 = vpop.f32.mrf.mxu0  ;;  %v3979_v44 = vpop.f32.mrf.mxu1 }
 0xa9a   :  { %v3977_v55 = vadd.f32 %v3976_v51, %v3911_v40  ;;  %v4118_v23 = vmul.f32 %v5248_v29, %v4117_v31  ;;  %v4141_v40 = vand.u32 2147483648, %v4058_v1 }
 0xa9c   :  { %v5250_v57 = vpop.eup %5249  ;;  %v4728_v13 = vmul.f32 -1.442695, %v3977_v55  ;;  %v4119_v46 = vadd.f32 %v5248_v29, %v4118_v23  ;;  %v4139_v23 = vand.u32 2147483647, %v4058_v1 }
 0xa9d   :  { %v5252_v9 = vpop.eup %5251  ;;  %v4059_v50 = vadd.f32 1.0, %v5250_v57 }
 0xa9e   :  { %5253 = vpow2.f32 %v4728_v13  ;;  %v4123_v43 = vsel %vm4122_vm0, %v5248_v29, %v4119_v46  ;;  %v4131_v48 = vmul.f32 %v5252_v9, %v4058_v1  ;;  %vm4136_vm9 = vweird.f32 %v5252_v9 }
 0xa9f   :  { %5255 = vrcp.f32 %v4059_v50  ;;  %v4128_v21 = vsel %vm4125_vm8, %v4127_v18, %v4123_v43  ;;  %vm4137_vm12 = vmor %vm4135_vm10, %vm4136_vm9  ;;  %v4142_v46 = vor.u32 1.1754944e-38, %v4141_v40  ;;  %vm4140_vm13 = vcmp.eq.f32.partialorder %v4139_v23, 8.507059e+37 }
 0xaa0   :  { %4742 = vmatmul.msk.f32.gmra.mxu3 %vm4312_vm11, %v4128_v21  ;;  %4759 = vmatmul.msk.f32.gmra.mxu0 %vm4312_vm11, %v4128_v21  ;;  %v4132_v51 = vsub.f32 1.0, %v4131_v48  ;;  %vm4150_vm15 = vweird.f32 %v4059_v50 }
 0xaa1   :  { %v3914_v42 = vpop.f32.mrf.mxu0  ;;  %v3982_v31 = vpop.f32.mrf.mxu1 }
 0xaa2   :  { %v3980_v55 = vadd.f32 %v3979_v44, %v3914_v42  ;;  %v4133_v6 = vmul.f32 %v5252_v9, %v4132_v51  ;;  %v4156_v42 = vand.u32 2147483648, %v4059_v50 }
 0xaa4   :  { %v5254_v57 = vpop.eup %5253  ;;  %v4729_v8 = vmul.f32 -1.442695, %v3980_v55  ;;  %v4134_v13 = vadd.f32 %v5252_v9, %v4133_v6  ;;  %v4154_v6 = vand.u32 2147483647, %v4059_v50 }
 0xaa5   :  { %v5256_v29 = vpop.eup %5255  ;;  %v4060_v7 = vadd.f32 1.0, %v5254_v57 }
 0xaa6   :  { %5257 = vpow2.f32 %v4729_v8  ;;  %v4138_v18 = vsel %vm4137_vm12, %v5252_v9, %v4134_v13  ;;  %v4146_v43 = vmul.f32 %v5256_v29, %v4059_v50  ;;  %vm4151_vm14 = vweird.f32 %v5256_v29 }
 0xaa7   :  { %5259 = vrcp.f32 %v4060_v7  ;;  %v4143_v48 = vsel %vm4140_vm13, %v4142_v46, %v4138_v18  ;;  %vm4152_vm1 = vmor %vm4150_vm15, %vm4151_vm14  ;;  %v4157_v13 = vor.u32 1.1754944e-38, %v4156_v42  ;;  %vm4155_vm2 = vcmp.eq.f32.partialorder %v4154_v6, 8.507059e+37 }
 0xaa8   :  { %4743 = vmatmul.msk.f32.gmra.mxu3 %vm4312_vm11, %v4143_v48  ;;  %4760 = vmatmul.msk.f32.gmra.mxu0 %vm4312_vm11, %v4143_v48  ;;  %v4147_v44 = vsub.f32 1.0, %v4146_v43  ;;  %vm4165_vm4 = vweird.f32 %v4060_v7 }
 0xaa9   :  { %v3917_v21 = vpop.f32.mrf.mxu0  ;;  %v3985_v51 = vpop.f32.mrf.mxu1 }
 0xaaa   :  { %v3983_v55 = vadd.f32 %v3982_v31, %v3917_v21  ;;  %v4148_v1 = vmul.f32 %v5256_v29, %v4147_v44  ;;  %v4171_v21 = vand.u32 2147483648, %v4060_v7 }
 0xaac   :  { %v5258_v57 = vpop.eup %5257  ;;  %v4730_v40 = vmul.f32 -1.442695, %v3983_v55  ;;  %v4149_v8 = vadd.f32 %v5256_v29, %v4148_v1  ;;  %v4169_v1 = vand.u32 2147483647, %v4060_v7 }
 0xaad   :  { %v5260_v9 = vpop.eup %5259  ;;  %v4061_v23 = vadd.f32 1.0, %v5258_v57 }
 0xaae   :  { %5261 = vpow2.f32 %v4730_v40  ;;  %v4153_v46 = vsel %vm4152_vm1, %v5256_v29, %v4149_v8  ;;  %v4161_v18 = vmul.f32 %v5260_v9, %v4060_v7  ;;  %vm4166_vm3 = vweird.f32 %v5260_v9 }
 0xaaf   :  { %5263 = vrcp.f32 %v4061_v23  ;;  %v4158_v43 = vsel %vm4155_vm2, %v4157_v13, %v4153_v46  ;;  %vm4167_vm5 = vmor %vm4165_vm4, %vm4166_vm3  ;;  %v4172_v8 = vor.u32 1.1754944e-38, %v4171_v21  ;;  %vm4170_vm6 = vcmp.eq.f32.partialorder %v4169_v1, 8.507059e+37 }
 0xab0   :  { %4744 = vmatmul.msk.f32.gmra.mxu3 %vm4312_vm11, %v4158_v43  ;;  %4761 = vmatmul.msk.f32.gmra.mxu0 %vm4312_vm11, %v4158_v43  ;;  %v4162_v31 = vsub.f32 1.0, %v4161_v18  ;;  %vm4180_vm0 = vweird.f32 %v4061_v23 }
 0xab1   :  { %v3920_v48 = vpop.f32.mrf.mxu0  ;;  %v3988_v44 = vpop.f32.mrf.mxu1 }
 0xab2   :  { %v3986_v55 = vadd.f32 %v3985_v51, %v3920_v48  ;;  %v4163_v50 = vmul.f32 %v5260_v9, %v4162_v31  ;;  %v4186_v48 = vand.u32 2147483648, %v4061_v23 }
 0xab4   :  { %v5262_v57 = vpop.eup %5261  ;;  %v4731_v42 = vmul.f32 -1.442695, %v3986_v55  ;;  %v4164_v40 = vadd.f32 %v5260_v9, %v4163_v50  ;;  %v4184_v50 = vand.u32 2147483647, %v4061_v23 }
 0xab5   :  { %v5264_v29 = vpop.eup %5263  ;;  %v4062_v6 = vadd.f32 1.0, %v5262_v57 }
 0xab6   :  { %5265 = vpow2.f32 %v4731_v42  ;;  %v4168_v13 = vsel %vm4167_vm5, %v5260_v9, %v4164_v40  ;;  %v4176_v46 = vmul.f32 %v5264_v29, %v4061_v23  ;;  %vm4181_vm7 = vweird.f32 %v5264_v29 }
 0xab7   :  { %5267 = vrcp.f32 %v4062_v6  ;;  %v4173_v18 = vsel %vm4170_vm6, %v4172_v8, %v4168_v13  ;;  %vm4182_vm8 = vmor %vm4180_vm0, %vm4181_vm7  ;;  %v4187_v40 = vor.u32 1.1754944e-38, %v4186_v48  ;;  %vm4185_vm9 = vcmp.eq.f32.partialorder %v4184_v50, 8.507059e+37 }
 0xab8   :  { %4745 = vmatmul.msk.f32.gmra.mxu3 %vm4312_vm11, %v4173_v18  ;;  %4762 = vmatmul.msk.f32.gmra.mxu0 %vm4312_vm11, %v4173_v18  ;;  %v4177_v51 = vsub.f32 1.0, %v4176_v46  ;;  %v4199_v23 = vand.u32 2147483647, %v4062_v6  ;;  %vm4195_vm12 = vweird.f32 %v4062_v6 }
 0xab9   :  { %v3923_v43 = vpop.f32.mrf.mxu0  ;;  %v3991_v31 = vpop.f32.mrf.mxu1 }
 0xaba   :  { %v3989_v55 = vadd.f32 %v3988_v44, %v3923_v43  ;;  %v4178_v7 = vmul.f32 %v5264_v29, %v4177_v51  ;;  %v4201_v51 = vand.u32 2147483648, %v4062_v6  ;;  %vm4200_vm14 = vcmp.eq.f32.partialorder %v4199_v23, 8.507059e+37 }
 0xabc   :  { %v5266_v57 = vpop.eup %5265  ;;  %v4732_v21 = vmul.f32 -1.442695, %v3989_v55  ;;  %v4179_v42 = vadd.f32 %v5264_v29, %v4178_v7 }
 0xabd   :  { %v5268_v9 = vpop.eup %5267  ;;  %v4063_v1 = vadd.f32 1.0, %v5266_v57 }
 0xabe   :  { %5269 = vpow2.f32 %v4732_v21  ;;  %v4183_v8 = vsel %vm4182_vm8, %v5264_v29, %v4179_v42  ;;  %v4191_v13 = vmul.f32 %v5268_v9, %v4062_v6  ;;  %vm4196_vm10 = vweird.f32 %v5268_v9 }
 0xabf   :  { %5271 = vrcp.f32 %v4063_v1  ;;  %v4188_v46 = vsel %vm4185_vm9, %v4187_v40, %v4183_v8  ;;  %vm4197_vm13 = vmor %vm4195_vm12, %vm4196_vm10  ;;  %v4202_v42 = vor.u32 1.1754944e-38, %v4201_v51  ;;  %v4214_v6 = vand.u32 2147483647, %v4063_v1 }
 0xac0   :  { %4746 = vmatmul.msk.f32.gmra.mxu3 %vm4312_vm11, %v4188_v46  ;;  %4763 = vmatmul.msk.f32.gmra.mxu0 %vm4312_vm11, %v4188_v46  ;;  %v4192_v44 = vsub.f32 1.0, %v4191_v13  ;;  %vm4210_vm1 = vweird.f32 %v4063_v1 }
 0xac1   :  { %v3926_v18 = vpop.f32.mrf.mxu0  ;;  %v3994_v7 = vpop.f32.mrf.mxu1  ;;  %vm4215_vm3 = vcmp.eq.f32.partialorder %v4214_v6, 8.507059e+37 }
 0xac2   :  { %v3992_v43 = vadd.f32 %v3991_v31, %v3926_v18  ;;  %v4193_v55 = vmul.f32 %v5268_v9, %v4192_v44  ;;  %v4216_v44 = vand.u32 2147483648, %v4063_v1 }
 0xac4   :  { %v5270_v57 = vpop.eup %5269  ;;  %v4733_v48 = vmul.f32 -1.442695, %v3992_v43  ;;  %v4194_v21 = vadd.f32 %v5268_v9, %v4193_v55 }
 0xac5   :  { %v5272_v29 = vpop.eup %5271  ;;  %v4064_v50 = vadd.f32 1.0, %v5270_v57 }
 0xac6   :  { %5273 = vpow2.f32 %v4733_v48  ;;  %v4198_v40 = vsel %vm4197_vm13, %v5268_v9, %v4194_v21  ;;  %v4206_v8 = vmul.f32 %v5272_v29, %v4063_v1  ;;  %vm4211_vm15 = vweird.f32 %v5272_v29 }
 0xac7   :  { %5275 = vrcp.f32 %v4064_v50  ;;  %v4203_v13 = vsel %vm4200_vm14, %v4202_v42, %v4198_v40  ;;  %vm4212_vm2 = vmor %vm4210_vm1, %vm4211_vm15  ;;  %v4217_v21 = vor.u32 1.1754944e-38, %v4216_v44  ;;  %vm4225_vm5 = vweird.f32 %v4064_v50 }
 0xac8   :  { %4747 = vmatmul.msk.f32.gmra.mxu3 %vm4312_vm11, %v4203_v13  ;;  %4764 = vmatmul.msk.f32.gmra.mxu0 %vm4312_vm11, %v4203_v13  ;;  %v4207_v31 = vsub.f32 1.0, %v4206_v8 }
 0xac9   :  { %v3929_v46 = vpop.f32.mrf.mxu0  ;;  %v3997_v48 = vpop.f32.mrf.mxu1 }
 0xaca   :  { %v3995_v18 = vadd.f32 %v3994_v7, %v3929_v46  ;;  %v4208_v43 = vmul.f32 %v5272_v29, %v4207_v31  ;;  %v4231_v31 = vand.u32 2147483648, %v4064_v50 }
 0xacc   :  { %v5274_v55 = vpop.eup %5273  ;;  %v4734_v57 = vmul.f32 -1.442695, %v3995_v18  ;;  %v4209_v51 = vadd.f32 %v5272_v29, %v4208_v43  ;;  %v4229_v18 = vand.u32 2147483647, %v4064_v50 }
 0xacd   :  { %v5276_v9 = vpop.eup %5275  ;;  %v4065_v23 = vadd.f32 1.0, %v5274_v55 }
 0xace   :  { %5277 = vpow2.f32 %v4734_v57  ;;  %v4213_v42 = vsel %vm4212_vm2, %v5272_v29, %v4209_v51  ;;  %v4221_v40 = vmul.f32 %v5276_v9, %v4064_v50  ;;  %vm4226_vm4 = vweird.f32 %v5276_v9 }
 0xacf   :  { %5279 = vrcp.f32 %v4065_v23  ;;  %v4218_v8 = vsel %vm4215_vm3, %v4217_v21, %v4213_v42  ;;  %vm4227_vm6 = vmor %vm4225_vm5, %vm4226_vm4  ;;  %v4232_v57 = vor.u32 1.1754944e-38, %v4231_v31  ;;  %vm4230_vm7 = vcmp.eq.f32.partialorder %v4229_v18, 8.507059e+37 }
 0xad0   :  { %4748 = vmatmul.msk.f32.gmra.mxu3 %vm4312_vm11, %v4218_v8  ;;  %4765 = vmatmul.msk.f32.gmra.mxu0 %vm4312_vm11, %v4218_v8  ;;  %v4222_v7 = vsub.f32 1.0, %v4221_v40  ;;  %vm4240_vm8 = vweird.f32 %v4065_v23 }
 0xad1   :  { %v3932_v13 = vpop.f32.mrf.mxu0  ;;  %v4000_v42 = vpop.f32.mrf.mxu1 }
 0xad2   :  { %v3998_v46 = vadd.f32 %v3997_v48, %v3932_v13  ;;  %v4223_v1 = vmul.f32 %v5276_v9, %v4222_v7  ;;  %v4246_v7 = vand.u32 2147483648, %v4065_v23 }
 0xad4   :  { %v5278_v43 = vpop.eup %5277  ;;  %v4735_v55 = vmul.f32 -1.442695, %v3998_v46  ;;  %v4224_v44 = vadd.f32 %v5276_v9, %v4223_v1  ;;  %v4244_v46 = vand.u32 2147483647, %v4065_v23 }
 0xad5   :  { %v5280_v29 = vpop.eup %5279  ;;  %v4066_v6 = vadd.f32 1.0, %v5278_v43 }
 0xad6   :  { %5281 = vpow2.f32 %v4735_v55  ;;  %v4228_v51 = vsel %vm4227_vm6, %v5276_v9, %v4224_v44  ;;  %v4236_v21 = vmul.f32 %v5280_v29, %v4065_v23  ;;  %vm4241_vm0 = vweird.f32 %v5280_v29 }
 0xad7   :  { %5283 = vrcp.f32 %v4066_v6  ;;  %v4233_v40 = vsel %vm4230_vm7, %v4232_v57, %v4228_v51  ;;  %vm4242_vm9 = vmor %vm4240_vm8, %vm4241_vm0  ;;  %v4247_v55 = vor.u32 1.1754944e-38, %v4246_v7  ;;  %vm4245_vm10 = vcmp.eq.f32.partialorder %v4244_v46, 8.507059e+37 }
 0xad8   :  { %4749 = vmatmul.msk.f32.gmra.mxu3 %vm4312_vm11, %v4233_v40  ;;  %4766 = vmatmul.msk.f32.gmra.mxu0 %vm4312_vm11, %v4233_v40  ;;  %v4237_v48 = vsub.f32 1.0, %v4236_v21  ;;  %vm4255_vm13 = vweird.f32 %v4066_v6 }
 0xad9   :  { %v3935_v8 = vpop.f32.mrf.mxu0 }
 0xada   :  { %v4001_v13 = vadd.f32 %v4000_v42, %v3935_v8  ;;  %v4238_v50 = vmul.f32 %v5280_v29, %v4237_v48  ;;  %v4003_v42 = vpop.f32.mrf.mxu1  ;;  %v4261_v48 = vand.u32 2147483648, %v4066_v6 }
 0xadc   :  { %v5282_v1 = vpop.eup %5281  ;;  %v4736_v31 = vmul.f32 -1.442695, %v4001_v13  ;;  %v4239_v43 = vadd.f32 %v5280_v29, %v4238_v50  ;;  %v4259_v13 = vand.u32 2147483647, %v4066_v6 }
 0xadd   :  { %v5284_v9 = vpop.eup %5283  ;;  %v4067_v18 = vadd.f32 1.0, %v5282_v1 }
 0xade   :  { %5285 = vpow2.f32 %v4736_v31  ;;  %v4243_v44 = vsel %vm4242_vm9, %v5280_v29, %v4239_v43  ;;  %v4251_v57 = vmul.f32 %v5284_v9, %v4066_v6  ;;  %vm4256_vm12 = vweird.f32 %v5284_v9 }
 0xadf   :  { %5287 = vrcp.f32 %v4067_v18  ;;  %v4248_v51 = vsel %vm4245_vm10, %v4247_v55, %v4243_v44  ;;  %vm4257_vm14 = vmor %vm4255_vm13, %vm4256_vm12  ;;  %v4262_v31 = vor.u32 1.1754944e-38, %v4261_v48  ;;  %vm4260_vm15 = vcmp.eq.f32.partialorder %v4259_v13, 8.507059e+37 }
 0xae0   :  { %4750 = vmatmul.msk.f32.gmra.mxu3 %vm4312_vm11, %v4248_v51  ;;  %4767 = vmatmul.msk.f32.gmra.mxu0 %vm4312_vm11, %v4248_v51  ;;  %v4252_v21 = vsub.f32 1.0, %v4251_v57  ;;  %v4276_v51 = vand.u32 2147483648, %v4067_v18  ;;  %vm4270_vm2 = vweird.f32 %v4067_v18 }
 0xae1   :  { %v3938_v40 = vpop.f32.mrf.mxu0 }
 0xae2   :  { %v4004_v8 = vadd.f32 %v4003_v42, %v3938_v40  ;;  %v4253_v23 = vmul.f32 %v5284_v9, %v4252_v21  ;;  %v4274_v42 = vand.u32 2147483647, %v4067_v18 }
 0xae4   :  { %v5286_v50 = vpop.eup %5285  ;;  %v4737_v7 = vmul.f32 -1.442695, %v4004_v8  ;;  %v4254_v1 = vadd.f32 %v5284_v9, %v4253_v23  ;;  %vm4275_vm4 = vcmp.eq.f32.partialorder %v4274_v42, 8.507059e+37 }
 0xae5   :  { %v5288_v29 = vpop.eup %5287  ;;  %v4068_v46 = vadd.f32 1.0, %v5286_v50 }
 0xae6   :  { %5289 = vpow2.f32 %v4737_v7  ;;  %v4258_v43 = vsel %vm4257_vm14, %v5284_v9, %v4254_v1  ;;  %v4266_v55 = vmul.f32 %v5288_v29, %v4067_v18  ;;  %vm4271_vm1 = vweird.f32 %v5288_v29 }
 0xae7   :  { %5291 = vrcp.f32 %v4068_v46  ;;  %v4263_v44 = vsel %vm4260_vm15, %v4262_v31, %v4258_v43  ;;  %vm4272_vm3 = vmor %vm4270_vm2, %vm4271_vm1  ;;  %v4277_v9 = vor.u32 1.1754944e-38, %v4276_v51  ;;  %v4291_v1 = vand.u32 2147483648, %v4068_v46 }
 0xae8   :  { %4751 = vmatmul.msk.f32.gmra.mxu3 %vm4312_vm11, %v4263_v44  ;;  %4768 = vmatmul.msk.f32.gmra.mxu0 %vm4312_vm11, %v4263_v44  ;;  %v4267_v57 = vsub.f32 1.0, %v4266_v55  ;;  %v4289_v43 = vand.u32 2147483647, %v4068_v46  ;;  %vm4285_vm6 = vweird.f32 %v4068_v46 }
 0xae9   :  { %v4292_v44 = vor.u32 1.1754944e-38, %v4291_v1 }
 0xaea   :  { %v4268_v21 = vmul.f32 %v5288_v29, %v4267_v57  ;;  %vm4290_vm0 = vcmp.eq.f32.partialorder %v4289_v43, 8.507059e+37 }
 0xaec   :  { %v5290_v6 = vpop.eup %5289  ;;  %v4269_v40 = vadd.f32 %v5288_v29, %v4268_v21 }
 0xaed   :  { %v5292_v8 = vpop.eup %5291  ;;  %v4069_v48 = vadd.f32 1.0, %v5290_v6 }
 0xaee   :  { %v4273_v23 = vsel %vm4272_vm3, %v5288_v29, %v4269_v40  ;;  %v4281_v13 = vmul.f32 %v5292_v8, %v4068_v46  ;;  %vm4286_vm5 = vweird.f32 %v5292_v8 }
 0xaef   :  { %5293 = vrcp.f32 %v4069_v48  ;;  %v4278_v50 = vsel %vm4275_vm4, %v4277_v9, %v4273_v23  ;;  %vm4287_vm7 = vmor %vm4285_vm6, %vm4286_vm5  ;;  %v4306_v42 = vand.u32 2147483648, %v4069_v48  ;;  %v4304_v40 = vand.u32 2147483647, %v4069_v48 }
 0xaf0   :  { %4752 = vmatmul.msk.f32.gmra.mxu3 %vm4312_vm11, %v4278_v50  ;;  %4769 = vmatmul.msk.f32.gmra.mxu0 %vm4312_vm11, %v4278_v50  ;;  %v4282_v7 = vsub.f32 1.0, %v4281_v13  ;;  %vm4300_vm9 = vweird.f32 %v4069_v48  ;;  %v8956_v50 = vsub.f32 %v7888_v20, %v7892_v32  ;;  %v8961_v20 = vld [vmem:[#allocation52_spill] sm:$0xff] }
 0xaf1   :  { %v4307_v46 = vor.u32 1.1754944e-38, %v4306_v42  ;;  %vm4305_vm12 = vcmp.eq.f32.partialorder %v4304_v40, 8.507059e+37  ;;  %v8963_v42 = vsub.f32 %v7930_v34, %v7934_v45  ;;  %v8967_v45 = vld [vmem:[#allocation30_spill] sm:$0xff] }
 0xaf2   :  { %v4283_v31 = vmul.f32 %v5292_v8, %v4282_v7 }
 0xaf4   :  { %v4284_v55 = vadd.f32 %v5292_v8, %v4283_v31  ;;  %v8958_v31 = vld [vmem:[#allocation66_spill] sm:$0xff] }
 0xaf5   :  { %v5294_v18 = vpop.eup %5293 }
 0xaf6   :  { %v4288_v57 = vsel %vm4287_vm7, %v5292_v8, %v4284_v55  ;;  %v4296_v29 = vmul.f32 %v5294_v18, %v4069_v48  ;;  %vm4301_vm8 = vweird.f32 %v5294_v18  ;;  %v8957_v48 = vld [vmem:[#allocation29_spill] sm:$0xff] }
 0xaf7   :  { %v4293_v51 = vsel %vm4290_vm0, %v4292_v44, %v4288_v57  ;;  %vm4302_vm10 = vmor %vm4300_vm9, %vm4301_vm8  ;;  %v8959_v43 = vsub.f32 %v8957_v48, %v8958_v31  ;;  %v8960_v44 = vsub.f32 %v7909_v4, %v7913_v14  ;;  %v8964_v14 = vld [vmem:[#allocation70_spill] sm:$0xff]  ;;  %v8972_v31 = vsub.f32 %v7981_v12, %v7985_v16  ;;  %v8976_v16 = vld [vmem:[#allocation31_spill] sm:$0xff] }
 0xaf8   :  { %4753 = vmatmul.msk.f32.gmra.mxu3 %vm4312_vm11, %v4293_v51  ;;  %4770 = vmatmul.msk.f32.gmra.mxu0 %vm4312_vm11, %v4293_v51  ;;  %v4297_v21 = vsub.f32 1.0, %v4296_v29  ;;  %v8962_v29 = vsub.f32 %v7500_v59, %v8961_v20  ;;  %v8965_v40 = vsub.f32 %v7525_v60, %v8964_v14 }
 0xafa   :  { %v4298_v6 = vmul.f32 %v5294_v18, %v4297_v21 }
 0xafc   :  { %v4299_v9 = vadd.f32 %v5294_v18, %v4298_v6 }
 0xafe   :  { %v4303_v23 = vsel %vm4302_vm10, %v5294_v18, %v4299_v9 }
 0xaff   :  { %v4308_v13 = vsel %vm4305_vm12, %v4307_v46, %v4303_v23  ;;  %v8966_v46 = vsub.f32 %v7947_v39, %v7951_v62  ;;  %v8970_v62 = vld [vmem:[#allocation27_spill] sm:$0xff] }
 0xb00   :  { %4754 = vmatmul.msk.f32.gmra.mxu3 %vm4312_vm11, %v4308_v13  ;;  %4771 = vmatmul.msk.f32.gmra.mxu0 %vm4312_vm11, %v4308_v13  ;;  %v8968_v13 = vsub.f32 %v7550_v28, %v8967_v45 }
 0xb05   :  { %v4540_v8 = vpop.f32.mrf.mxu0 }
 0xb06   :  { %v4604_v7 = vmul.f32 %v8956_v50, %v4540_v8  ;;  %v8969_v50 = vsub.f32 %v7964_v27, %v7968_v49  ;;  %v8973_v49 = vld [vmem:[#allocation53_spill] sm:$0xff] }
 0xb08   :  { %4620 = vst [vmem:[%s8393_s11 + $0x8] sm:$0xff] %v4604_v7 }
 0xb0b   :  { %v4382_v1 = vpop.f32.mrf.mxu3 }
 0xb0c   :  { %v4446_v55 = vmul.f32 %v8959_v43, %v4382_v1  ;;  %v8971_v1 = vsub.f32 %v7575_v24, %v8970_v62 }
 0xb0d   :  { %v4543_v18 = vpop.f32.mrf.mxu0 }
 0xb0e   :  { %4462 = vst [vmem:[%s8393_s11] sm:$0xff] %v4446_v55  ;;  %v4605_v57 = vmul.f32 %v8960_v44, %v4543_v18  ;;  %v8974_v55 = vsub.f32 %v7600_v52, %v8973_v49  ;;  %v8975_v44 = vsub.f32 %v7998_v54, %v8002_v17  ;;  %v8979_v17 = vld [vmem:[#allocation17_spill] sm:$0xff] }
 0xb10   :  { %4621 = vst [vmem:[%s8393_s11 + $0x18] sm:$0xff] %v4605_v57 }
 0xb13   :  { %v4385_v32 = vpop.f32.mrf.mxu3 }
 0xb14   :  { %v4447_v51 = vmul.f32 %v8962_v29, %v4385_v32  ;;  %v8977_v32 = vsub.f32 %v7625_v53, %v8976_v16  ;;  %v8978_v29 = vsub.f32 %v8015_v37, %v8019_v36  ;;  %v8982_v36 = vld [vmem:[#allocation16_spill] sm:$0xff] }
 0xb15   :  { %v4546_v21 = vpop.f32.mrf.mxu0  ;;  %v8983_v14 = vsub.f32 %v7675_v2, %v8982_v36 }
 0xb16   :  { %4463 = vst [vmem:[%s8393_s11 + $0x10] sm:$0xff] %v4447_v51  ;;  %v4606_v6 = vmul.f32 %v8963_v42, %v4546_v21  ;;  %v8980_v21 = vsub.f32 %v7650_v58, %v8979_v17 }
 0xb18   :  { %4622 = vst [vmem:[%s8393_s11 + $0x28] sm:$0xff] %v4606_v6  ;;  %v8981_v6 = vsub.f32 %v8032_v33, %v8036_v11  ;;  %v8985_v11 = vld [vmem:[#allocation58_spill] sm:$0xff] }
 0xb1b   :  { %v4388_v4 = vpop.f32.mrf.mxu3 }
 0xb1c   :  { %v4448_v9 = vmul.f32 %v8965_v40, %v4388_v4 }
 0xb1d   :  { %v4549_v59 = vpop.f32.mrf.mxu0 }
 0xb1e   :  { %4464 = vst [vmem:[%s8393_s11 + $0x20] sm:$0xff] %v4448_v9  ;;  %v4607_v23 = vmul.f32 %v8966_v46, %v4549_v59  ;;  %v8984_v9 = vsub.f32 %v8052_v38, %v8056_v26  ;;  %v8986_v46 = vsub.f32 %v7700_v35, %v8985_v11  ;;  %v8988_v26 = vld [vmem:[#allocation33_spill] sm:$0xff] }
 0xb20   :  { %4623 = vst [vmem:[%s8393_s11 + $0x38] sm:$0xff] %v4607_v23 }
 0xb23   :  { %v4391_v34 = vpop.f32.mrf.mxu3 }
 0xb24   :  { %v4449_v8 = vmul.f32 %v8968_v13, %v4391_v34  ;;  %v8987_v34 = vsub.f32 %v8072_v19, %v8076_v0  ;;  %v8989_v13 = vld [vmem:[#allocation19_spill] sm:$0xff] }
 0xb25   :  { %v4552_v60 = vpop.f32.mrf.mxu0  ;;  %v8992_v0 = vld [vmem:[#allocation71_spill] sm:$0xff] }
 0xb26   :  { %4465 = vst [vmem:[%s8393_s11 + $0x30] sm:$0xff] %v4449_v8  ;;  %v4608_v7 = vmul.f32 %v8969_v50, %v4552_v60  ;;  %v8990_v8 = vsub.f32 %v8988_v26, %v8989_v13  ;;  %v8991_v50 = vsub.f32 %v8088_v56, %v8092_v61  ;;  %v8996_v61 = vld [vmem:[#allocation73_spill] sm:$0xff] }
 0xb28   :  { %4624 = vst [vmem:[%s8393_s11 + $0x48] sm:$0xff] %v4608_v7 }
 0xb2b   :  { %v4394_v39 = vpop.f32.mrf.mxu3 }
 0xb2c   :  { %v4450_v48 = vmul.f32 %v8971_v1, %v4394_v39  ;;  %v8993_v39 = vld [vmem:[#allocation8_spill] sm:$0xff] }
 0xb2d   :  { %v4555_v28 = vpop.f32.mrf.mxu0  ;;  %v8994_v62 = vsub.f32 %v8992_v0, %v8993_v39 }
 0xb2e   :  { %4466 = vst [vmem:[%s8393_s11 + $0x40] sm:$0xff] %v4450_v48  ;;  %v4609_v43 = vmul.f32 %v8972_v31, %v4555_v28  ;;  %v8995_v28 = vsub.f32 %v8104_v25, %v8108_v47  ;;  %v8999_v47 = vld [vmem:[#allocation72_spill] sm:$0xff] }
 0xb30   :  { %4625 = vst [vmem:[%s8393_s11 + $0x58] sm:$0xff] %v4609_v43  ;;  %v8997_v43 = vld [vmem:[#allocation35_spill] sm:$0xff] }
 0xb33   :  { %v4397_v27 = vpop.f32.mrf.mxu3 }
 0xb34   :  { %v4451_v18 = vmul.f32 %v8974_v55, %v4397_v27  ;;  %v8998_v27 = vsub.f32 %v8996_v61, %v8997_v43 }
 0xb35   :  { %v4558_v24 = vpop.f32.mrf.mxu0 }
 0xb36   :  { %4467 = vst [vmem:[%s8393_s11 + $0x50] sm:$0xff] %v4451_v18  ;;  %v4610_v57 = vmul.f32 %v8975_v44, %v4558_v24  ;;  %v9000_v24 = vld [vmem:[#allocation59_spill] sm:$0xff] }
 0xb37   :  { %v9001_v44 = vsub.f32 %v8999_v47, %v9000_v24 }
 0xb38   :  { %4626 = vst [vmem:[%s8393_s11 + $0x68] sm:$0xff] %v4610_v57 }
 0xb3b   :  { %v4400_v12 = vpop.f32.mrf.mxu3 }
 0xb3c   :  { %v4452_v20 = vmul.f32 %v8977_v32, %v4400_v12 }
 0xb3d   :  { %v4561_v52 = vpop.f32.mrf.mxu0 }
 0xb3e   :  { %4468 = vst [vmem:[%s8393_s11 + $0x60] sm:$0xff] %v4452_v20  ;;  %v4611_v51 = vmul.f32 %v8978_v29, %v4561_v52  ;;  %v9005_v29 = vsub.f32 %v8150_v10, %v8154_v30 }
 0xb40   :  { %4627 = vst [vmem:[%s8393_s11 + $0x78] sm:$0xff] %v4611_v51 }
 0xb43   :  { %v4403_v54 = vpop.f32.mrf.mxu3 }
 0xb44   :  { %v4453_v42 = vmul.f32 %v8980_v21, %v4403_v54 }
 0xb45   :  { %v4564_v53 = vpop.f32.mrf.mxu0 }
 0xb46   :  { %4469 = vst [vmem:[%s8393_s11 + $0x70] sm:$0xff] %v4453_v42  ;;  %v4612_v4 = vmul.f32 %v8981_v6, %v4564_v53 }
 0xb48   :  { %4628 = vst [vmem:[%s8393_s11 + $0x88] sm:$0xff] %v4612_v4 }
 0xb4b   :  { %v4406_v37 = vpop.f32.mrf.mxu3 }
 0xb4c   :  { %v4454_v40 = vmul.f32 %v8983_v14, %v4406_v37 }
 0xb4d   :  { %v4567_v58 = vpop.f32.mrf.mxu0 }
 0xb4e   :  { %4470 = vst [vmem:[%s8393_s11 + $0x80] sm:$0xff] %v4454_v40  ;;  %v4613_v59 = vmul.f32 %v8984_v9, %v4567_v58 }
 0xb50   :  { %4629 = vst [vmem:[%s8393_s11 + $0x98] sm:$0xff] %v4613_v59 }
 0xb53   :  { %v4409_v33 = vpop.f32.mrf.mxu3 }
 0xb54   :  { %v4455_v23 = vmul.f32 %v8986_v46, %v4409_v33 }
 0xb55   :  { %v4570_v2 = vpop.f32.mrf.mxu0 }
 0xb56   :  { %4471 = vst [vmem:[%s8393_s11 + $0x90] sm:$0xff] %v4455_v23  ;;  %v4614_v45 = vmul.f32 %v8987_v34, %v4570_v2 }
 0xb58   :  { %4630 = vst [vmem:[%s8393_s11 + $0xa8] sm:$0xff] %v4614_v45 }
 0xb5b   :  { %v4412_v38 = vpop.f32.mrf.mxu3 }
 0xb5c   :  { %v4456_v60 = vmul.f32 %v8990_v8, %v4412_v38 }
 0xb5d   :  { %v4573_v35 = vpop.f32.mrf.mxu0 }
 0xb5e   :  { %4472 = vst [vmem:[%s8393_s11 + $0xa0] sm:$0xff] %v4456_v60  ;;  %v4615_v7 = vmul.f32 %v8991_v50, %v4573_v35 }
 0xb60   :  { %4631 = vst [vmem:[%s8393_s11 + $0xb8] sm:$0xff] %v4615_v7 }
 0xb63   :  { %v4415_v19 = vpop.f32.mrf.mxu3 }
 0xb64   :  { %v4457_v1 = vmul.f32 %v8994_v62, %v4415_v19 }
 0xb65   :  { %v4576_v48 = vpop.f32.mrf.mxu0 }
 0xb66   :  { %4473 = vst [vmem:[%s8393_s11 + $0xb0] sm:$0xff] %v4457_v1  ;;  %v4616_v31 = vmul.f32 %v8995_v28, %v4576_v48 }
 0xb68   :  { %4632 = vst [vmem:[%s8393_s11 + $0xc8] sm:$0xff] %v4616_v31 }
 0xb6b   :  { %v4418_v56 = vpop.f32.mrf.mxu3 }
 0xb6c   :  { %v4458_v49 = vmul.f32 %v8998_v27, %v4418_v56 }
 0xb6d   :  { %v4579_v55 = vpop.f32.mrf.mxu0 }
 0xb6e   :  { %4474 = vst [vmem:[%s8393_s11 + $0xc0] sm:$0xff] %v4458_v49  ;;  %v4617_v18 = vmul.f32 %v4601_v15, %v4579_v55  ;;  %v9003_v15 = vld [vmem:[#allocation74_spill] sm:$0xff] }
 0xb6f   :  { %v9004_v32 = vsub.f32 %v9002_v41, %v9003_v15 }
 0xb70   :  { %4633 = vst [vmem:[%s8393_s11 + $0xd8] sm:$0xff] %v4617_v18 }
 0xb73   :  { %v4421_v25 = vpop.f32.mrf.mxu3 }
 0xb74   :  { %v4459_v57 = vmul.f32 %v9001_v44, %v4421_v25 }
 0xb75   :  { %v4582_v12 = vpop.f32.mrf.mxu0 }
 0xb76   :  { %4475 = vst [vmem:[%s8393_s11 + $0xd0] sm:$0xff] %v4459_v57  ;;  %v4618_v16 = vmul.f32 %v4602_v5, %v4582_v12  ;;  %v9007_v5 = vld [vmem:[#allocation54_spill] sm:$0xff] }
 0xb77   :  { %v9008_v54 = vsub.f32 %v9006_v63, %v9007_v5 }
 0xb78   :  { %4634 = vst [vmem:[%s8393_s11 + $0xe8] sm:$0xff] %v4618_v16 }
 0xb7b   :  { %v4424_v3 = vpop.f32.mrf.mxu3 }
 0xb7c   :  { %v4460_v20 = vmul.f32 %v9004_v32, %v4424_v3 }
 0xb7d   :  { %v4585_v52 = vpop.f32.mrf.mxu0 }
 0xb7e   :  { %4476 = vst [vmem:[%s8393_s11 + $0xe0] sm:$0xff] %v4460_v20  ;;  %v4619_v51 = vmul.f32 %v9005_v29, %v4585_v52 }
 0xb80   :  { %4635 = vst [vmem:[%s8393_s11 + $0xf8] sm:$0xff] %v4619_v51 }
 0xb83   :  { %v4427_v22 = vpop.f32.mrf.mxu3 }
 0xb84   :  { %v4461_v17 = vmul.f32 %v9008_v54, %v4427_v22 }
 0xb86   :  { %4477 = vst [vmem:[%s8393_s11 + $0xf0] sm:$0xff] %v4461_v17 }
 0xb87   :  { %4640 = vsyncpa [#allocation3], 1 }
 0xb88   :  { %4641 = vsyncpa [#allocation5], 1 }

</bundles_post_ra>
